<compile_context>
chip_gen: v7x
topology: tpu7x:2x2x1
jax: 0.10.0
libtpu: 0.0.40
codegen_flags: <defaults>
</compile_context>

<pallas_src>
import jax
import jax.numpy as jnp
from jax import lax
from jax.experimental import pallas as pl
from jax.experimental.pallas import tpu as pltpu


# --------------------------------------------------------------------------- #
# Kernel
# --------------------------------------------------------------------------- #
def _conv3x3_im2col(h, w_ref):
    """3x3 / stride 1 / pad 1 conv of a B-sample tile as one K=9*C matmul.

    h:     (B, H, W, C) float32 activation (C already lane-padded to 128*k).
    w_ref: (9*C, Cout) bfloat16 weights, K ordered (dy, dx, cin).
    """
    B, H, W, C = h.shape
    Cout = w_ref.shape[1]

    # Cast ONCE to bf16; every shift/pad buffer below stays bf16.
    hb = h.astype(jnp.bfloat16)

    # Zero-pad along H (major dim, cheap) and build the two W-shifted copies
    # with explicit zero fill (sublane-axis copies).
    zrow = jnp.zeros((B, 1, W, C), jnp.bfloat16)
    hp = jnp.concatenate([zrow, hb, zrow], axis=1)                 # (B, H+2, W, C)
    zcol = jnp.zeros((B, H + 2, 1, C), jnp.bfloat16)
    left = jnp.concatenate([zcol, hp[:, :, :W - 1, :]], axis=2)    # value at x-1
    right = jnp.concatenate([hp[:, :, 1:, :], zcol], axis=2)       # value at x+1

    shifted = (left, hp, right)

    # im2col: 9 taps concatenated along the (128-aligned) lane axis, dy-major.
    taps = [shifted[dx][:, dy:dy + H] for dy in range(3) for dx in range(3)]
    cols = jnp.concatenate(taps, axis=-1).reshape(B * H * W, 9 * C)   # bf16

    out = jnp.dot(cols, w_ref[...], preferred_element_type=jnp.float32)
    return out.reshape(B, H, W, Cout)


def _irse_kernel(x_ref, bn0_s_ref, bn0_b_ref, w1_ref, bn1_s_ref, bn1_b_ref,
                 alpha_ref, w2_ref, bn2_s_ref, bn2_b_ref, fc1_ref,
                 se_alpha_ref, fc2_ref, o_ref):
    B, H, W, C = x_ref.shape

    x = x_ref[...].astype(jnp.float32)                             # (B, H, W, C)

    # ---- bn0 (folded scale/shift) ----
    h = (x * bn0_s_ref[...].reshape(1, 1, 1, C)
         + bn0_b_ref[...].reshape(1, 1, 1, C))

    # ---- conv1 -> bn1 -> PReLU ----
    h = _conv3x3_im2col(h, w1_ref)
    h = (h * bn1_s_ref[...].reshape(1, 1, 1, C)
         + bn1_b_ref[...].reshape(1, 1, 1, C))
    alpha = alpha_ref[...].reshape(1, 1, 1, C)
    h = jnp.where(h >= 0, h, h * alpha)

    # ---- conv2 -> bn2 ----
    h = _conv3x3_im2col(h, w2_ref)
    h = (h * bn2_s_ref[...].reshape(1, 1, 1, C)
         + bn2_b_ref[...].reshape(1, 1, 1, C))

    # ---- SE: global avg pool -> fc1 -> PReLU -> fc2 -> sigmoid -> scale ----
    y = jnp.mean(h.reshape(B, H * W, C), axis=1)                   # (B, C) f32
    y = jnp.dot(y.astype(jnp.bfloat16), fc1_ref[...],
                preferred_element_type=jnp.float32)                # (B, Cred)
    y = jnp.where(y >= 0, y, y * se_alpha_ref[...])
    y = jnp.dot(y.astype(jnp.bfloat16), fc2_ref[...],
                preferred_element_type=jnp.float32)                # (B, C)
    # Numerically stable sigmoid (no inf intermediate for large |y|).
    z = jnp.exp(-jnp.abs(y))
    gate = jnp.where(y >= 0, 1.0 / (1.0 + z), z / (1.0 + z))
    h = h * gate.reshape(B, 1, 1, C)

    # ---- residual add + PReLU (same alpha, as in the PyTorch module) ----
    h = h + x
    h = jnp.where(h >= 0, h, h * alpha)

    o_ref[...] = h.astype(o_ref.dtype)


# --------------------------------------------------------------------------- #
# Wrapper helpers
# --------------------------------------------------------------------------- #
def _fold_bn(gamma, beta, mean, var, eps=1e-5):
    s = gamma / jnp.sqrt(var + eps)
    return s, beta - mean * s


def _pad_to(a, axis, size):
    extra = size - a.shape[axis]
    if extra == 0:
        return a
    widths = [(0, 0)] * a.ndim
    widths[axis] = (0, extra)
    return jnp.pad(a, widths)


def _round_up(n, m):
    return ((n + m - 1) // m) * m


def _vmem_capacity_bytes():
    """Generation-aware VMEM capacity (v5e/v6e: 128 MiB, v7x: 64 MiB per TC)."""
    try:
        info = pltpu.get_tpu_info()
        cap = getattr(info, "vmem_capacity_bytes", None)
        if cap:
            return int(cap)
    except Exception:
        pass
    return 64 * 1024 * 1024      # conservative fallback (v7x per-core)


def _choose_btile(N, H, W, Cp, Crp, vmem_cap):
    """Samples per grid step: fill the MXU (M >= ~512 rows) within VMEM budget."""
    rows = H * W
    bt = max(1, min(8, -(-512 // rows)))        # ceil(512 / rows), capped at 8
    bt = min(bt, max(N, 1))
    weight_bytes = 2 * (2 * 9 * Cp * Cp + 2 * Cp * Crp) * 2   # bf16, double-buf
    per_sample = ((2 * H * W * Cp * 4) * 2          # in/out f32 blocks, dbl-buf
                  + 3 * (H + 2) * W * Cp * 2        # hp/left/right bf16
                  + H * W * 9 * Cp * 2              # im2col cols bf16
                  + 2 * H * W * Cp * 4)             # f32 working activations
    budget = int(0.5 * vmem_cap)
    while bt > 1 and weight_bytes + bt * per_sample > budget:
        bt -= 1
    return bt


# --------------------------------------------------------------------------- #
# Wrapper
# --------------------------------------------------------------------------- #
@jax.jit
def irse_block(x_nchw, params):
    """IRSEBlock forward (stride=1, downsample=None, use_se=True). NCHW in/out."""
    N, C, H, W = x_nchw.shape
    Cred = params["fc1"].shape[0]
    Cp = _round_up(C, 128)           # lane-dense channel padding
    Crp = _round_up(Cred, 128)       # lane-dense SE bottleneck

    vmem_cap = _vmem_capacity_bytes()
    bt = _choose_btile(N, H, W, Cp, Crp, vmem_cap)
    n_pad = _round_up(N, bt)

    # NCHW -> NHWC, zero-pad channels to Cp and batch to a multiple of bt.
    x = jnp.transpose(x_nchw, (0, 2, 3, 1)).astype(jnp.float32)
    x = _pad_to(x, 3, Cp)
    x = _pad_to(x, 0, n_pad)

    def bn_pair(p):
        s, b = _fold_bn(*p)
        return (_pad_to(s, 0, Cp).reshape(1, Cp),
                _pad_to(b, 0, Cp).reshape(1, Cp))

    bn0_s, bn0_b = bn_pair(params["bn0"])
    bn1_s, bn1_b = bn_pair(params["bn1"])
    bn2_s, bn2_b = bn_pair(params["bn2"])

    def conv_w(w):   # (Cout, Cin, 3, 3) -> (9*Cp, Cp) bf16, K ordered (dy, dx, cin)
        w = jnp.transpose(w, (2, 3, 1, 0))           # (3, 3, Cin, Cout)
        w = _pad_to(_pad_to(w, 2, Cp), 3, Cp)        # (3, 3, Cp, Cp)
        return w.reshape(9 * Cp, Cp).astype(jnp.bfloat16)

    w1 = conv_w(params["w1"])
    w2 = conv_w(params["w2"])

    alpha = _pad_to(params["prelu"], 0, Cp).reshape(1, Cp)
    se_alpha = params["se_prelu"].reshape(1, 1)
    fc1 = _pad_to(_pad_to(jnp.transpose(params["fc1"]), 0, Cp), 1, Crp
                  ).astype(jnp.bfloat16)             # (Cp, Crp)
    fc2 = _pad_to(_pad_to(jnp.transpose(params["fc2"]), 0, Crp), 1, Cp
                  ).astype(jnp.bfloat16)             # (Crp, Cp)

    args = (x, bn0_s, bn0_b, w1, bn1_s, bn1_b, alpha, w2, bn2_s, bn2_b,
            fc1, se_alpha, fc2)

    def full(a):     # small parameter array: whole thing, constant block index
        nd = a.ndim
        return pl.BlockSpec(a.shape, lambda n: (0,) * nd)

    in_specs = [pl.BlockSpec((bt, H, W, Cp), lambda n: (n, 0, 0, 0))]
    in_specs += [full(a) for a in args[1:]]
    out_specs = pl.BlockSpec((bt, H, W, Cp), lambda n: (n, 0, 0, 0))

    # Per-step VMEM high-water estimate and generation-aware limit.
    blk = bt * H * W * Cp * 4
    weight_bytes = (w1.size + w2.size + fc1.size + fc2.size) * 2
    im2col_bytes = bt * H * W * 9 * Cp * 2
    shift_bytes = 3 * bt * (H + 2) * W * Cp * 2
    est = 4 * blk + weight_bytes + 2 * (im2col_bytes + shift_bytes) + 4 * blk
    vmem_limit = int(min(max(2 * est, 32 * 1024 * 1024), int(0.75 * vmem_cap)))
    vmem_limit = max(vmem_limit, 16 * 1024 * 1024)

    cost = pl.CostEstimate(
        flops=int(n_pad * (2 * 2 * H * W * 9 * Cp * Cp + 2 * 2 * Cp * Crp)),
        transcendentals=int(n_pad * Cp),
        bytes_accessed=int(2 * n_pad * H * W * Cp * 4 + weight_bytes),
    )

    out = pl.pallas_call(
        _irse_kernel,
        out_shape=jax.ShapeDtypeStruct((n_pad, H, W, Cp), jnp.float32),
        grid=(n_pad // bt,),
        in_specs=in_specs,
        out_specs=out_specs,
        compiler_params=pltpu.CompilerParams(
            dimension_semantics=("parallel",),
            vmem_limit_bytes=vmem_limit),
        cost_estimate=cost,
    )(*args)

    out = out[:N, :, :, :C]                            # drop batch/channel pad
    return jnp.transpose(out, (0, 3, 1, 2))            # NHWC -> NCHW


# --------------------------------------------------------------------------- #
# Pure-JAX reference (PyTorch forward, eval-mode BN)
# --------------------------------------------------------------------------- #
def _reference(x, params, mm_dtype=jnp.float32):
    """mm_dtype rounds matmul/conv operands (bf16 mirrors the kernel's MXU
    path: bf16 operands, f32 accumulation)."""
    def rnd(t):
        return t.astype(mm_dtype).astype(jnp.float32)

    def bn(t, gamma, beta, mean, var, eps=1e-5):
        s = gamma / jnp.sqrt(var + eps)
        b = beta - mean * s
        return t * s[None, :, None, None] + b[None, :, None, None]

    def prelu(t, a):
        return jnp.where(t >= 0, t, t * a[None, :, None, None])

    def conv3x3(t, w):
        return lax.conv_general_dilated(rnd(t), rnd(w), (1, 1), ((1, 1), (1, 1)),
                                        dimension_numbers=("NCHW", "OIHW", "NCHW"))

    out = bn(x, *params["bn0"])
    out = conv3x3(out, params["w1"])
    out = bn(out, *params["bn1"])
    out = prelu(out, params["prelu"])
    out = conv3x3(out, params["w2"])
    out = bn(out, *params["bn2"])
    y = jnp.mean(out, axis=(2, 3))
    y = rnd(y) @ rnd(params["fc1"]).T
    y = jnp.where(y >= 0, y, y * params["se_prelu"][0])
    y = rnd(y) @ rnd(params["fc2"]).T
    y = jax.nn.sigmoid(y)
    out = out * y[:, :, None, None]
    out = out + x
    out = prelu(out, params["prelu"])
    return out


# --------------------------------------------------------------------------- #
# Test
# --------------------------------------------------------------------------- #
if __name__ == "__main__":
    key = jax.random.PRNGKey(0)
    # channels must be >= reduction(16) so the SE bottleneck is non-empty
    N, C, H, W = 2, 32, 16, 16
    Cred = C // 16
    ks = jax.random.split(key, 8)

    def bn_params(k):
        k1, k2, k3, k4 = jax.random.split(k, 4)
        gamma = 1.0 + 0.1 * jax.random.normal(k1, (C,), jnp.float32)
        beta = 0.1 * jax.random.normal(k2, (C,), jnp.float32)
        mean = 0.1 * jax.random.normal(k3, (C,), jnp.float32)
        var = 0.5 + jax.random.uniform(k4, (C,), jnp.float32)
        return gamma, beta, mean, var

    params = {
        "bn0": bn_params(ks[0]),
        "w1": 0.1 * jax.random.normal(ks[1], (C, C, 3, 3), jnp.float32),
        "bn1": bn_params(ks[2]),
        "prelu": jnp.full((C,), 0.25, jnp.float32),        # nn.PReLU(C) default
        "w2": 0.1 * jax.random.normal(ks[3], (C, C, 3, 3), jnp.float32),
        "bn2": bn_params(ks[4]),
        "fc1": 0.2 * jax.random.normal(ks[5], (Cred, C), jnp.float32),
        "se_prelu": jnp.full((1,), 0.25, jnp.float32),     # nn.PReLU() default
        "fc2": 0.2 * jax.random.normal(ks[6], (C, Cred), jnp.float32),
    }

    x = jax.random.normal(ks[7], (N, C, H, W), jnp.float32)

    out = jax.block_until_ready(irse_block(x, params))
    assert out.shape == (N, C, H, W)

    # Reference with matmul operands rounded to bf16 — same per-element math as
    # the kernel's bf16-operand / f32-accumulate MXU path.
    ref = jax.block_until_ready(_reference(x, params, mm_dtype=jnp.bfloat16))
    err = float(jnp.max(jnp.abs(out - ref)))
    assert jnp.allclose(out, ref, rtol=1e-2, atol=1e-2), err
    print("KERNEL_OK")
</pallas_src>

<mosaic_0001>
module attributes {stable_mosaic.version = 11 : i64} {
  func.func @_irse_kernel(%arg0: i32, %arg1: memref<2x16x16x128xf32, #tpu.memory_space<vmem>>, %arg2: memref<1x128xf32, #tpu.memory_space<vmem>>, %arg3: memref<1x128xf32, #tpu.memory_space<vmem>>, %arg4: memref<1152x128xbf16, #tpu.memory_space<vmem>>, %arg5: memref<1x128xf32, #tpu.memory_space<vmem>>, %arg6: memref<1x128xf32, #tpu.memory_space<vmem>>, %arg7: memref<1x128xf32, #tpu.memory_space<vmem>>, %arg8: memref<1152x128xbf16, #tpu.memory_space<vmem>>, %arg9: memref<1x128xf32, #tpu.memory_space<vmem>>, %arg10: memref<1x128xf32, #tpu.memory_space<vmem>>, %arg11: memref<128x128xbf16, #tpu.memory_space<vmem>>, %arg12: memref<1x1xf32, #tpu.memory_space<vmem>>, %arg13: memref<128x128xbf16, #tpu.memory_space<vmem>>, %arg14: memref<2x16x16x128xf32, #tpu.memory_space<vmem>>) attributes {dimension_semantics = [#tpu.dimension_semantics<parallel>], iteration_bounds = array<i64: 1>, scalar_prefetch = 0 : i64, scratch_operands = 0 : i64, tpu.core_type = #tpu.core_type<tc>, window_params = [{transform_indices = @transform_0, window_bounds = array<i64: 2, 16, 16, 128>}, {pipeline_mode = #tpu.pipeline_mode<synchronous>, transform_indices = @transform_1, window_bounds = array<i64: 1, 128>}, {pipeline_mode = #tpu.pipeline_mode<synchronous>, transform_indices = @transform_2, window_bounds = array<i64: 1, 128>}, {pipeline_mode = #tpu.pipeline_mode<synchronous>, transform_indices = @transform_3, window_bounds = array<i64: 1152, 128>}, {pipeline_mode = #tpu.pipeline_mode<synchronous>, transform_indices = @transform_4, window_bounds = array<i64: 1, 128>}, {pipeline_mode = #tpu.pipeline_mode<synchronous>, transform_indices = @transform_5, window_bounds = array<i64: 1, 128>}, {pipeline_mode = #tpu.pipeline_mode<synchronous>, transform_indices = @transform_6, window_bounds = array<i64: 1, 128>}, {pipeline_mode = #tpu.pipeline_mode<synchronous>, transform_indices = @transform_7, window_bounds = array<i64: 1152, 128>}, {pipeline_mode = #tpu.pipeline_mode<synchronous>, transform_indices = @transform_8, window_bounds = array<i64: 1, 128>}, {pipeline_mode = #tpu.pipeline_mode<synchronous>, transform_indices = @transform_9, window_bounds = array<i64: 1, 128>}, {pipeline_mode = #tpu.pipeline_mode<synchronous>, transform_indices = @transform_10, window_bounds = array<i64: 128, 128>}, {pipeline_mode = #tpu.pipeline_mode<synchronous>, transform_indices = @transform_11, window_bounds = array<i64: 1, 1>}, {pipeline_mode = #tpu.pipeline_mode<synchronous>, transform_indices = @transform_12, window_bounds = array<i64: 128, 128>}, {transform_indices = @transform_13, window_bounds = array<i64: 2, 16, 16, 128>}]} {
    %c0 = arith.constant 0 : index
    %c0_0 = arith.constant 0 : index
    %c0_1 = arith.constant 0 : index
    %c0_2 = arith.constant 0 : index
    %0 = vector.load %arg1[%c0, %c0_0, %c0_1, %c0_2] : memref<2x16x16x128xf32, #tpu.memory_space<vmem>>, vector<2x16x16x128xf32>
    %c0_3 = arith.constant 0 : index
    %c0_4 = arith.constant 0 : index
    %1 = vector.load %arg2[%c0_3, %c0_4] : memref<1x128xf32, #tpu.memory_space<vmem>>, vector<1x128xf32>
    %2 = vector.shape_cast %1 : vector<1x128xf32> to vector<1x1x1x128xf32>
    %3 = vector.broadcast %2 : vector<1x1x1x128xf32> to vector<2x16x16x128xf32>
    %4 = arith.mulf %0, %3 : vector<2x16x16x128xf32>
    %c0_5 = arith.constant 0 : index
    %c0_6 = arith.constant 0 : index
    %5 = vector.load %arg3[%c0_5, %c0_6] : memref<1x128xf32, #tpu.memory_space<vmem>>, vector<1x128xf32>
    %6 = vector.shape_cast %5 : vector<1x128xf32> to vector<1x1x1x128xf32>
    %7 = vector.broadcast %6 : vector<1x1x1x128xf32> to vector<2x16x16x128xf32>
    %8 = arith.addf %4, %7 : vector<2x16x16x128xf32>
    %9 = arith.truncf %8 : vector<2x16x16x128xf32> to vector<2x16x16x128xbf16>
    %cst = arith.constant 0.000000e+00 : bf16
    %10 = vector.broadcast %cst : bf16 to vector<2x1x16x128xbf16>
    %11 = tpu.concatenate %10, %9, %10 in 1 : vector<2x1x16x128xbf16>, vector<2x16x16x128xbf16>, vector<2x1x16x128xbf16> -> vector<2x18x16x128xbf16>
    %cst_7 = arith.constant 0.000000e+00 : bf16
    %12 = vector.broadcast %cst_7 : bf16 to vector<2x18x1x128xbf16>
    %13 = vector.extract_strided_slice %11 {offsets = [0, 0, 0, 0], sizes = [2, 18, 15, 128], strides = [1, 1, 1, 1]} : vector<2x18x16x128xbf16> to vector<2x18x15x128xbf16>
    %14 = tpu.concatenate %12, %13 in 2 : vector<2x18x1x128xbf16>, vector<2x18x15x128xbf16> -> vector<2x18x16x128xbf16>
    %15 = vector.extract_strided_slice %11 {offsets = [0, 0, 1, 0], sizes = [2, 18, 15, 128], strides = [1, 1, 1, 1]} : vector<2x18x16x128xbf16> to vector<2x18x15x128xbf16>
    %16 = tpu.concatenate %15, %12 in 2 : vector<2x18x15x128xbf16>, vector<2x18x1x128xbf16> -> vector<2x18x16x128xbf16>
    %17 = vector.extract_strided_slice %14 {offsets = [0, 0, 0, 0], sizes = [2, 16, 16, 128], strides = [1, 1, 1, 1]} : vector<2x18x16x128xbf16> to vector<2x16x16x128xbf16>
    %18 = vector.extract_strided_slice %11 {offsets = [0, 0, 0, 0], sizes = [2, 16, 16, 128], strides = [1, 1, 1, 1]} : vector<2x18x16x128xbf16> to vector<2x16x16x128xbf16>
    %19 = vector.extract_strided_slice %16 {offsets = [0, 0, 0, 0], sizes = [2, 16, 16, 128], strides = [1, 1, 1, 1]} : vector<2x18x16x128xbf16> to vector<2x16x16x128xbf16>
    %20 = vector.extract_strided_slice %14 {offsets = [0, 1, 0, 0], sizes = [2, 16, 16, 128], strides = [1, 1, 1, 1]} : vector<2x18x16x128xbf16> to vector<2x16x16x128xbf16>
    %21 = vector.extract_strided_slice %11 {offsets = [0, 1, 0, 0], sizes = [2, 16, 16, 128], strides = [1, 1, 1, 1]} : vector<2x18x16x128xbf16> to vector<2x16x16x128xbf16>
    %22 = vector.extract_strided_slice %16 {offsets = [0, 1, 0, 0], sizes = [2, 16, 16, 128], strides = [1, 1, 1, 1]} : vector<2x18x16x128xbf16> to vector<2x16x16x128xbf16>
    %23 = vector.extract_strided_slice %14 {offsets = [0, 2, 0, 0], sizes = [2, 16, 16, 128], strides = [1, 1, 1, 1]} : vector<2x18x16x128xbf16> to vector<2x16x16x128xbf16>
    %24 = vector.extract_strided_slice %11 {offsets = [0, 2, 0, 0], sizes = [2, 16, 16, 128], strides = [1, 1, 1, 1]} : vector<2x18x16x128xbf16> to vector<2x16x16x128xbf16>
    %25 = vector.extract_strided_slice %16 {offsets = [0, 2, 0, 0], sizes = [2, 16, 16, 128], strides = [1, 1, 1, 1]} : vector<2x18x16x128xbf16> to vector<2x16x16x128xbf16>
    %26 = tpu.concatenate %17, %18, %19, %20, %21, %22, %23, %24, %25 in 3 : vector<2x16x16x128xbf16>, vector<2x16x16x128xbf16>, vector<2x16x16x128xbf16>, vector<2x16x16x128xbf16>, vector<2x16x16x128xbf16>, vector<2x16x16x128xbf16>, vector<2x16x16x128xbf16>, vector<2x16x16x128xbf16>, vector<2x16x16x128xbf16> -> vector<2x16x16x1152xbf16>
    %27 = vector.shape_cast %26 : vector<2x16x16x1152xbf16> to vector<512x1152xbf16>
    %c0_8 = arith.constant 0 : index
    %c0_9 = arith.constant 0 : index
    %28 = vector.load %arg4[%c0_8, %c0_9] : memref<1152x128xbf16, #tpu.memory_space<vmem>>, vector<1152x128xbf16>
    %cst_10 = arith.constant dense<0.000000e+00> : vector<512x128xf32>
    %29 = tpu.matmul %27, %28, %cst_10 {dimension_numbers = #tpu.dot_dimension_numbers<[1], [0], [0], [1], [0, 0, 1, 1], [], []>} : vector<512x1152xbf16>, vector<1152x128xbf16>, vector<512x128xf32> -> vector<512x128xf32>
    %30 = vector.shape_cast %29 : vector<512x128xf32> to vector<2x16x16x128xf32>
    %c0_11 = arith.constant 0 : index
    %c0_12 = arith.constant 0 : index
    %31 = vector.load %arg5[%c0_11, %c0_12] : memref<1x128xf32, #tpu.memory_space<vmem>>, vector<1x128xf32>
    %32 = vector.shape_cast %31 : vector<1x128xf32> to vector<1x1x1x128xf32>
    %33 = vector.broadcast %32 : vector<1x1x1x128xf32> to vector<2x16x16x128xf32>
    %34 = arith.mulf %30, %33 : vector<2x16x16x128xf32>
    %c0_13 = arith.constant 0 : index
    %c0_14 = arith.constant 0 : index
    %35 = vector.load %arg6[%c0_13, %c0_14] : memref<1x128xf32, #tpu.memory_space<vmem>>, vector<1x128xf32>
    %36 = vector.shape_cast %35 : vector<1x128xf32> to vector<1x1x1x128xf32>
    %37 = vector.broadcast %36 : vector<1x1x1x128xf32> to vector<2x16x16x128xf32>
    %38 = arith.addf %34, %37 : vector<2x16x16x128xf32>
    %c0_15 = arith.constant 0 : index
    %c0_16 = arith.constant 0 : index
    %39 = vector.load %arg7[%c0_15, %c0_16] : memref<1x128xf32, #tpu.memory_space<vmem>>, vector<1x128xf32>
    %40 = vector.shape_cast %39 : vector<1x128xf32> to vector<1x1x1x128xf32>
    %cst_17 = arith.constant 0.000000e+00 : f32
    %41 = vector.broadcast %cst_17 : f32 to vector<2x16x16x128xf32>
    %42 = arith.cmpf oge, %38, %41 : vector<2x16x16x128xf32>
    %43 = vector.broadcast %40 : vector<1x1x1x128xf32> to vector<2x16x16x128xf32>
    %44 = arith.mulf %38, %43 : vector<2x16x16x128xf32>
    %45 = arith.select %42, %38, %44 : vector<2x16x16x128xi1>, vector<2x16x16x128xf32>
    %46 = arith.truncf %45 : vector<2x16x16x128xf32> to vector<2x16x16x128xbf16>
    %cst_18 = arith.constant 0.000000e+00 : bf16
    %47 = vector.broadcast %cst_18 : bf16 to vector<2x1x16x128xbf16>
    %48 = tpu.concatenate %47, %46, %47 in 1 : vector<2x1x16x128xbf16>, vector<2x16x16x128xbf16>, vector<2x1x16x128xbf16> -> vector<2x18x16x128xbf16>
    %cst_19 = arith.constant 0.000000e+00 : bf16
    %49 = vector.broadcast %cst_19 : bf16 to vector<2x18x1x128xbf16>
    %50 = vector.extract_strided_slice %48 {offsets = [0, 0, 0, 0], sizes = [2, 18, 15, 128], strides = [1, 1, 1, 1]} : vector<2x18x16x128xbf16> to vector<2x18x15x128xbf16>
    %51 = tpu.concatenate %49, %50 in 2 : vector<2x18x1x128xbf16>, vector<2x18x15x128xbf16> -> vector<2x18x16x128xbf16>
    %52 = vector.extract_strided_slice %48 {offsets = [0, 0, 1, 0], sizes = [2, 18, 15, 128], strides = [1, 1, 1, 1]} : vector<2x18x16x128xbf16> to vector<2x18x15x128xbf16>
    %53 = tpu.concatenate %52, %49 in 2 : vector<2x18x15x128xbf16>, vector<2x18x1x128xbf16> -> vector<2x18x16x128xbf16>
    %54 = vector.extract_strided_slice %51 {offsets = [0, 0, 0, 0], sizes = [2, 16, 16, 128], strides = [1, 1, 1, 1]} : vector<2x18x16x128xbf16> to vector<2x16x16x128xbf16>
    %55 = vector.extract_strided_slice %48 {offsets = [0, 0, 0, 0], sizes = [2, 16, 16, 128], strides = [1, 1, 1, 1]} : vector<2x18x16x128xbf16> to vector<2x16x16x128xbf16>
    %56 = vector.extract_strided_slice %53 {offsets = [0, 0, 0, 0], sizes = [2, 16, 16, 128], strides = [1, 1, 1, 1]} : vector<2x18x16x128xbf16> to vector<2x16x16x128xbf16>
    %57 = vector.extract_strided_slice %51 {offsets = [0, 1, 0, 0], sizes = [2, 16, 16, 128], strides = [1, 1, 1, 1]} : vector<2x18x16x128xbf16> to vector<2x16x16x128xbf16>
    %58 = vector.extract_strided_slice %48 {offsets = [0, 1, 0, 0], sizes = [2, 16, 16, 128], strides = [1, 1, 1, 1]} : vector<2x18x16x128xbf16> to vector<2x16x16x128xbf16>
    %59 = vector.extract_strided_slice %53 {offsets = [0, 1, 0, 0], sizes = [2, 16, 16, 128], strides = [1, 1, 1, 1]} : vector<2x18x16x128xbf16> to vector<2x16x16x128xbf16>
    %60 = vector.extract_strided_slice %51 {offsets = [0, 2, 0, 0], sizes = [2, 16, 16, 128], strides = [1, 1, 1, 1]} : vector<2x18x16x128xbf16> to vector<2x16x16x128xbf16>
    %61 = vector.extract_strided_slice %48 {offsets = [0, 2, 0, 0], sizes = [2, 16, 16, 128], strides = [1, 1, 1, 1]} : vector<2x18x16x128xbf16> to vector<2x16x16x128xbf16>
    %62 = vector.extract_strided_slice %53 {offsets = [0, 2, 0, 0], sizes = [2, 16, 16, 128], strides = [1, 1, 1, 1]} : vector<2x18x16x128xbf16> to vector<2x16x16x128xbf16>
    %63 = tpu.concatenate %54, %55, %56, %57, %58, %59, %60, %61, %62 in 3 : vector<2x16x16x128xbf16>, vector<2x16x16x128xbf16>, vector<2x16x16x128xbf16>, vector<2x16x16x128xbf16>, vector<2x16x16x128xbf16>, vector<2x16x16x128xbf16>, vector<2x16x16x128xbf16>, vector<2x16x16x128xbf16>, vector<2x16x16x128xbf16> -> vector<2x16x16x1152xbf16>
    %64 = vector.shape_cast %63 : vector<2x16x16x1152xbf16> to vector<512x1152xbf16>
    %c0_20 = arith.constant 0 : index
    %c0_21 = arith.constant 0 : index
    %65 = vector.load %arg8[%c0_20, %c0_21] : memref<1152x128xbf16, #tpu.memory_space<vmem>>, vector<1152x128xbf16>
    %cst_22 = arith.constant dense<0.000000e+00> : vector<512x128xf32>
    %66 = tpu.matmul %64, %65, %cst_22 {dimension_numbers = #tpu.dot_dimension_numbers<[1], [0], [0], [1], [0, 0, 1, 1], [], []>} : vector<512x1152xbf16>, vector<1152x128xbf16>, vector<512x128xf32> -> vector<512x128xf32>
    %67 = vector.shape_cast %66 : vector<512x128xf32> to vector<2x16x16x128xf32>
    %c0_23 = arith.constant 0 : index
    %c0_24 = arith.constant 0 : index
    %68 = vector.load %arg9[%c0_23, %c0_24] : memref<1x128xf32, #tpu.memory_space<vmem>>, vector<1x128xf32>
    %69 = vector.shape_cast %68 : vector<1x128xf32> to vector<1x1x1x128xf32>
    %70 = vector.broadcast %69 : vector<1x1x1x128xf32> to vector<2x16x16x128xf32>
    %71 = arith.mulf %67, %70 : vector<2x16x16x128xf32>
    %c0_25 = arith.constant 0 : index
    %c0_26 = arith.constant 0 : index
    %72 = vector.load %arg10[%c0_25, %c0_26] : memref<1x128xf32, #tpu.memory_space<vmem>>, vector<1x128xf32>
    %73 = vector.shape_cast %72 : vector<1x128xf32> to vector<1x1x1x128xf32>
    %74 = vector.broadcast %73 : vector<1x1x1x128xf32> to vector<2x16x16x128xf32>
    %75 = arith.addf %71, %74 : vector<2x16x16x128xf32>
    %76 = vector.shape_cast %75 : vector<2x16x16x128xf32> to vector<2x256x128xf32>
    %cst_27 = arith.constant dense<0.000000e+00> : vector<2x128xf32>
    %77 = vector.multi_reduction <add>, %76, %cst_27 [1] : vector<2x256x128xf32> to vector<2x128xf32>
    %cst_28 = arith.constant 2.560000e+02 : f32
    %78 = vector.broadcast %cst_28 : f32 to vector<2x128xf32>
    %79 = arith.divf %77, %78 : vector<2x128xf32>
    %80 = arith.truncf %79 : vector<2x128xf32> to vector<2x128xbf16>
    %c0_29 = arith.constant 0 : index
    %c0_30 = arith.constant 0 : index
    %81 = vector.load %arg11[%c0_29, %c0_30] : memref<128x128xbf16, #tpu.memory_space<vmem>>, vector<128x128xbf16>
    %cst_31 = arith.constant dense<0.000000e+00> : vector<2x128xf32>
    %82 = tpu.matmul %80, %81, %cst_31 {dimension_numbers = #tpu.dot_dimension_numbers<[1], [0], [0], [1], [0, 0, 1, 1], [], []>} : vector<2x128xbf16>, vector<128x128xbf16>, vector<2x128xf32> -> vector<2x128xf32>
    %cst_32 = arith.constant 0.000000e+00 : f32
    %83 = vector.broadcast %cst_32 : f32 to vector<2x128xf32>
    %84 = arith.cmpf oge, %82, %83 : vector<2x128xf32>
    %c0_33 = arith.constant 0 : index
    %c0_34 = arith.constant 0 : index
    %85 = vector.load %arg12[%c0_33, %c0_34] : memref<1x1xf32, #tpu.memory_space<vmem>>, vector<1x1xf32>
    %86 = vector.broadcast %85 : vector<1x1xf32> to vector<2x128xf32>
    %87 = arith.mulf %82, %86 : vector<2x128xf32>
    %88 = arith.select %84, %82, %87 : vector<2x128xi1>, vector<2x128xf32>
    %89 = arith.truncf %88 : vector<2x128xf32> to vector<2x128xbf16>
    %c0_35 = arith.constant 0 : index
    %c0_36 = arith.constant 0 : index
    %90 = vector.load %arg13[%c0_35, %c0_36] : memref<128x128xbf16, #tpu.memory_space<vmem>>, vector<128x128xbf16>
    %cst_37 = arith.constant dense<0.000000e+00> : vector<2x128xf32>
    %91 = tpu.matmul %89, %90, %cst_37 {dimension_numbers = #tpu.dot_dimension_numbers<[1], [0], [0], [1], [0, 0, 1, 1], [], []>} : vector<2x128xbf16>, vector<128x128xbf16>, vector<2x128xf32> -> vector<2x128xf32>
    %92 = math.absf %91 : vector<2x128xf32>
    %cst_38 = arith.constant 0.000000e+00 : f32
    %93 = vector.broadcast %cst_38 : f32 to vector<2x128xf32>
    %94 = arith.subf %93, %92 : vector<2x128xf32>
    %95 = math.exp %94 : vector<2x128xf32>
    %cst_39 = arith.constant 0.000000e+00 : f32
    %96 = vector.broadcast %cst_39 : f32 to vector<2x128xf32>
    %97 = arith.cmpf oge, %91, %96 : vector<2x128xf32>
    %cst_40 = arith.constant 1.000000e+00 : f32
    %98 = vector.broadcast %cst_40 : f32 to vector<2x128xf32>
    %99 = arith.addf %98, %95 : vector<2x128xf32>
    %cst_41 = arith.constant 1.000000e+00 : f32
    %100 = vector.broadcast %cst_41 : f32 to vector<2x128xf32>
    %101 = arith.divf %100, %99 : vector<2x128xf32>
    %cst_42 = arith.constant 1.000000e+00 : f32
    %102 = vector.broadcast %cst_42 : f32 to vector<2x128xf32>
    %103 = arith.addf %102, %95 : vector<2x128xf32>
    %104 = arith.divf %95, %103 : vector<2x128xf32>
    %105 = arith.select %97, %101, %104 : vector<2x128xi1>, vector<2x128xf32>
    %106 = vector.shape_cast %105 : vector<2x128xf32> to vector<2x1x1x128xf32>
    %107 = vector.broadcast %106 : vector<2x1x1x128xf32> to vector<2x16x16x128xf32>
    %108 = arith.mulf %75, %107 : vector<2x16x16x128xf32>
    %109 = arith.addf %108, %0 : vector<2x16x16x128xf32>
    %cst_43 = arith.constant 0.000000e+00 : f32
    %110 = vector.broadcast %cst_43 : f32 to vector<2x16x16x128xf32>
    %111 = arith.cmpf oge, %109, %110 : vector<2x16x16x128xf32>
    %112 = vector.broadcast %40 : vector<1x1x1x128xf32> to vector<2x16x16x128xf32>
    %113 = arith.mulf %109, %112 : vector<2x16x16x128xf32>
    %114 = arith.select %111, %109, %113 : vector<2x16x16x128xi1>, vector<2x16x16x128xf32>
    %c0_44 = arith.constant 0 : index
    %c0_45 = arith.constant 0 : index
    %c0_46 = arith.constant 0 : index
    %c0_47 = arith.constant 0 : index
    %115 = vector.load %arg14[%c0_44, %c0_45, %c0_46, %c0_47] : memref<2x16x16x128xf32, #tpu.memory_space<vmem>>, vector<2x16x16x128xf32>
    tpu.vector_store %arg14[%c0_44, %c0_45, %c0_46, %c0_47], %114 {strides = array<i32>} : memref<2x16x16x128xf32, #tpu.memory_space<vmem>>, vector<2x16x16x128xf32>,
    return
  }
  func.func @transform_0(%arg0: i32) -> (i32, i32, i32, i32) {
    %c0_i32 = arith.constant 0 : i32
    %c0_i32_0 = arith.constant 0 : i32
    %c0_i32_1 = arith.constant 0 : i32
    %c0_i32_2 = arith.constant 0 : i32
    return %arg0, %c0_i32, %c0_i32_0, %c0_i32_1 : i32, i32, i32, i32
  }
  func.func @transform_1(%arg0: i32) -> (i32, i32) {
    %c0_i32 = arith.constant 0 : i32
    %c0_i32_0 = arith.constant 0 : i32
    %c0_i32_1 = arith.constant 0 : i32
    return %c0_i32, %c0_i32_0 : i32, i32
  }
  func.func @transform_2(%arg0: i32) -> (i32, i32) {
    %c0_i32 = arith.constant 0 : i32
    %c0_i32_0 = arith.constant 0 : i32
    %c0_i32_1 = arith.constant 0 : i32
    return %c0_i32, %c0_i32_0 : i32, i32
  }
  func.func @transform_3(%arg0: i32) -> (i32, i32) {
    %c0_i32 = arith.constant 0 : i32
    %c0_i32_0 = arith.constant 0 : i32
    %c0_i32_1 = arith.constant 0 : i32
    return %c0_i32, %c0_i32_0 : i32, i32
  }
  func.func @transform_4(%arg0: i32) -> (i32, i32) {
    %c0_i32 = arith.constant 0 : i32
    %c0_i32_0 = arith.constant 0 : i32
    %c0_i32_1 = arith.constant 0 : i32
    return %c0_i32, %c0_i32_0 : i32, i32
  }
  func.func @transform_5(%arg0: i32) -> (i32, i32) {
    %c0_i32 = arith.constant 0 : i32
    %c0_i32_0 = arith.constant 0 : i32
    %c0_i32_1 = arith.constant 0 : i32
    return %c0_i32, %c0_i32_0 : i32, i32
  }
  func.func @transform_6(%arg0: i32) -> (i32, i32) {
    %c0_i32 = arith.constant 0 : i32
    %c0_i32_0 = arith.constant 0 : i32
    %c0_i32_1 = arith.constant 0 : i32
    return %c0_i32, %c0_i32_0 : i32, i32
  }
  func.func @transform_7(%arg0: i32) -> (i32, i32) {
    %c0_i32 = arith.constant 0 : i32
    %c0_i32_0 = arith.constant 0 : i32
    %c0_i32_1 = arith.constant 0 : i32
    return %c0_i32, %c0_i32_0 : i32, i32
  }
  func.func @transform_8(%arg0: i32) -> (i32, i32) {
    %c0_i32 = arith.constant 0 : i32
    %c0_i32_0 = arith.constant 0 : i32
    %c0_i32_1 = arith.constant 0 : i32
    return %c0_i32, %c0_i32_0 : i32, i32
  }
  func.func @transform_9(%arg0: i32) -> (i32, i32) {
    %c0_i32 = arith.constant 0 : i32
    %c0_i32_0 = arith.constant 0 : i32
    %c0_i32_1 = arith.constant 0 : i32
    return %c0_i32, %c0_i32_0 : i32, i32
  }
  func.func @transform_10(%arg0: i32) -> (i32, i32) {
    %c0_i32 = arith.constant 0 : i32
    %c0_i32_0 = arith.constant 0 : i32
    %c0_i32_1 = arith.constant 0 : i32
    return %c0_i32, %c0_i32_0 : i32, i32
  }
  func.func @transform_11(%arg0: i32) -> (i32, i32) {
    %c0_i32 = arith.constant 0 : i32
    %c0_i32_0 = arith.constant 0 : i32
    %c0_i32_1 = arith.constant 0 : i32
    return %c0_i32, %c0_i32_0 : i32, i32
  }
  func.func @transform_12(%arg0: i32) -> (i32, i32) {
    %c0_i32 = arith.constant 0 : i32
    %c0_i32_0 = arith.constant 0 : i32
    %c0_i32_1 = arith.constant 0 : i32
    return %c0_i32, %c0_i32_0 : i32, i32
  }
  func.func @transform_13(%arg0: i32) -> (i32, i32, i32, i32) {
    %c0_i32 = arith.constant 0 : i32
    %c0_i32_0 = arith.constant 0 : i32
    %c0_i32_1 = arith.constant 0 : i32
    %c0_i32_2 = arith.constant 0 : i32
    return %arg0, %c0_i32, %c0_i32_0, %c0_i32_1 : i32, i32, i32, i32
  }
}

</mosaic_0001>

<bundles_post_ra>
// kernel: irse_block.1
= control target key start
LH: loop header
LB: loop body
LE: loop exit
PB: predicated region body
PF: predicated region fallthrough
CT: control target
= control target key end

     0   :  { %v13074_v0 = vmov 0   ;;  %vm549_vm0 = vcmask 1040384   ;;  %vm550_vm1 = vsmask.f32 256  ;;  %vm684_vm3 = vcmask 1047552   ;;  %s13018_s3 = inlined_call_operand.vmem [shape: bf16[1152,128], index: 3, kind: input, shape index: {}]   ;;  %s13019_s0 = inlined_call_operand.vmem [shape: f32[2,16,16,128], index: 0, kind: input, shape index: {}]   ;;  %s13020_s1 = inlined_call_operand.vmem [shape: f32[1,128], index: 1, kind: input, shape index: {}]   ;;  %s13021_s2 = inlined_call_operand.vmem [shape: f32[1,128], index: 2, kind: input, shape index: {}]   ;;  %s13022_s7 = inlined_call_operand.vmem [shape: bf16[1152,128], index: 7, kind: input, shape index: {}]   ;;  %s13023_s4 = inlined_call_operand.vmem [shape: f32[1,128], index: 4, kind: input, shape index: {}]   ;;  %s13024_s5 = inlined_call_operand.vmem [shape: f32[1,128], index: 5, kind: input, shape index: {}]   ;;  %s13025_s6 = inlined_call_operand.vmem [shape: f32[1,128], index: 6, kind: input, shape index: {}]   ;;  %s13026_s10 = inlined_call_operand.vmem [shape: bf16[128,128], index: 10, kind: input, shape index: {}]   ;;  %s13027_s8 = inlined_call_operand.vmem [shape: f32[1,128], index: 8, kind: input, shape index: {}]   ;;  %s13028_s9 = inlined_call_operand.vmem [shape: f32[1,128], index: 9, kind: input, shape index: {}]   ;;  %s13029_s11 = inlined_call_operand.<no memory space> [shape: f32[1,1], index: 11, kind: input, shape index: {}]   ;;  %s13030_s12 = inlined_call_operand.vmem [shape: bf16[128,128], index: 12, kind: input, shape index: {}]   ;;  %s13031_s13 = inlined_call_operand.vmem [shape: f32[2,16,16,128], index: 13, kind: output, shape index: {}]  }
   0x1   :  { %1296 = vmatprep.subr.bf16.mxu0 %v13074_v0  ;;  %v7672_v1 = vld [vmem:[%s13018_s3] sm:$0xff]   ;;  %1328 = vmatprep.mubr.bf16.mxu0 %v13074_v0  ;;  %v7673_v2 = vld [vmem:[%s13018_s3 + $0x8] sm:$0xff]   ;;  %v7674_v3 = vld [vmem:[%s13018_s3 + $0x10] sm:$0xff]   ;;  %v288_v34 = vrot.slane %v13074_v0, 7  ;;  %vm685_vm4 = vsmask.f32 7424 }
   0x2   :  { %7671 = vset.pattern.permute.xlu0 %v13074_v0  ;;  %1297 = vmatpush1.bf16.msra.mxu0 %v7672_v1  ;;  %v7675_v4 = vld [vmem:[%s13018_s3 + $0x18] sm:$0xff]   ;;  %v7676_v5 = vld [vmem:[%s13018_s3 + $0x20] sm:$0xff]   ;;  %v7677_v6 = vld [vmem:[%s13018_s3 + $0x28] sm:$0xff]  }
   0x3   :  { %1298 = vmatprep.subr.bf16.mxu0 %v13074_v0  ;;  %v7678_v7 = vld [vmem:[%s13018_s3 + $0x30] sm:$0xff]   ;;  %v7679_v8 = vld [vmem:[%s13018_s3 + $0x38] sm:$0xff]   ;;  %v7680_v9 = vld [vmem:[%s13018_s3 + $0x40] sm:$0xff]  }
   0x4   :  { %v7681_v10 = vld [vmem:[%s13018_s3 + $0x48] sm:$0xff]   ;;  %v7682_v11 = vld [vmem:[%s13018_s3 + $0x50] sm:$0xff]   ;;  %v47_v12 = vld [vmem:[%s13019_s0] sm:$0xff] }
   0x5   :  { %v48_v13 = vld [vmem:[%s13019_s0 + $0x8] sm:$0xff]  ;;  %v8035_v14 = vld [vmem:[%s13020_s1] ss:$0 sm:$0xff]  ;;  %v7683_v15 = vld [vmem:[%s13018_s3 + $0x58] sm:$0xff]  }
   0x6   :  { %1299 = vmatpush1.bf16.msra.mxu0 %v7673_v2  ;;  %v118_v16 = vmul.f32 %v8035_v14, %v47_v12  ;;  %v119_v17 = vmul.f32 %v8035_v14, %v48_v13  ;;  %v8046_v18 = vld [vmem:[%s13021_s2] ss:$0 sm:$0xff]  ;;  %v49_v20 = vld [vmem:[%s13019_s0 + $0x10] sm:$0xff]  ;;  %v50_v23 = vld [vmem:[%s13019_s0 + $0x18] sm:$0xff] }
   0x7   :  { %1300 = vmatprep.subr.bf16.mxu0 %v13074_v0  ;;  %v7684_v19 = vld [vmem:[%s13018_s3 + $0x60] sm:$0xff]   ;;  %v7685_v24 = vld [vmem:[%s13018_s3 + $0x68] sm:$0xff]   ;;  %v120_v25 = vmul.f32 %v8035_v14, %v49_v20  ;;  %v121_v26 = vmul.f32 %v8035_v14, %v50_v23  ;;  %v7686_v28 = vld [vmem:[%s13018_s3 + $0x70] sm:$0xff]  }
   0x8   :  { %v189_v21 = vadd.f32 %v8046_v18, %v118_v16  ;;  %v190_v22 = vadd.f32 %v8046_v18, %v119_v17  ;;  %v7687_v32 = vld [vmem:[%s13018_s3 + $0x78] sm:$0xff]   ;;  %v51_v33 = vld [vmem:[%s13019_s0 + $0x20] sm:$0xff]  ;;  %v52_v35 = vld [vmem:[%s13019_s0 + $0x28] sm:$0xff] }
   0x9   :  { %v191_v29 = vadd.f32 %v8046_v18, %v120_v25  ;;  %v192_v30 = vadd.f32 %v8046_v18, %v121_v26  ;;  %vm8085_vm2 = vmand %vm549_vm0, %vm550_vm1  ;;  %v122_v40 = vmul.f32 %v8035_v14, %v51_v33  ;;  %v123_v41 = vmul.f32 %v8035_v14, %v52_v35  ;;  %v7688_v43 = vld [vmem:[%s13018_s3 + $0x80] sm:$0xff]   ;;  %v7689_v48 = vld [vmem:[%s13018_s3 + $0x88] sm:$0xff]  }
   0xa   :  { %1301 = vmatpush1.bf16.msra.mxu0 %v7674_v3  ;;  %v8066_v27 = vpack.c.bf16 %v190_v22, %v189_v21  ;;  %v8099_v42 = vsel %vm8085_vm2, 0, %v288_v34  ;;  %v53_v50 = vld [vmem:[%s13019_s0 + $0x30] sm:$0xff]  ;;  %v54_v51 = vld [vmem:[%s13019_s0 + $0x38] sm:$0xff]  ;;  %v55_v1 = vld [vmem:[%s13019_s0 + $0x40] sm:$0xff] }
   0xb   :  { %1302 = vmatprep.subr.bf16.mxu0 %v13074_v0  ;;  %v8089_v37 = vpack.c.bf16 %v192_v30, %v191_v29  ;;  %13317 = vst [vmem:[#allocation4_spill] sm:$0xff] %v8099_v42  ;;  %v193_v46 = vadd.f32 %v8046_v18, %v122_v40  ;;  %v194_v47 = vadd.f32 %v8046_v18, %v123_v41  ;;  %v7690_v55 = vld [vmem:[%s13018_s3 + $0x90] sm:$0xff]   ;;  %v7691_v62 = vld [vmem:[%s13018_s3 + $0x98] sm:$0xff]   ;;  %v56_v2 = vld [vmem:[%s13019_s0 + $0x48] sm:$0xff] }
   0xc   :  { %v13071_v31 = vshrl.u32 %v8066_v27, 16  ;;  %v13072_v39 = vshll.u32 %v8066_v27, 16  ;;  %v124_v56 = vmul.f32 %v8035_v14, %v53_v50  ;;  %v125_v57 = vmul.f32 %v8035_v14, %v54_v51  ;;  %v57_v13 = vld [vmem:[%s13019_s0 + $0x50] sm:$0xff]  ;;  %v7693_v16 = vld [vmem:[%s13018_s3 + $0xa8] sm:$0xff]   ;;  %v59_v30 = vld [vmem:[%s13019_s0 + $0x60] sm:$0xff] }
   0xd   :  { %13316 = vst [vmem:[#allocation3_spill] sm:$0xff] %v8089_v37  ;;  %v300_v44 = vshrl.u32 %v8089_v37, 16  ;;  %v303_v49 = vshll.u32 %v8089_v37, 16  ;;  %v8129_v54 = vpack.c.bf16 %v194_v47, %v193_v46  ;;  %v128_v17 = vmul.f32 %v8035_v14, %v57_v13  ;;  %v60_v33 = vld [vmem:[%s13019_s0 + $0x68] sm:$0xff]  ;;  %v61_v51 = vld [vmem:[%s13019_s0 + $0x70] sm:$0xff]  ;;  %vm8576_vm5 = vmand %vm684_vm3, %vm685_vm4 }
   0xe   :  { %1303 = vmatpush1.bf16.msra.mxu0 %v7675_v4  ;;  %v295_v38 = vrot.slane %v13071_v31, 7  ;;  %v195_v60 = vadd.f32 %v8046_v18, %v124_v56  ;;  %v196_v61 = vadd.f32 %v8046_v18, %v125_v57  ;;  %v130_v35 = vmul.f32 %v8035_v14, %v59_v30  ;;  %v66_v30 = vld [vmem:[%s13019_s0 + $0x98] sm:$0xff]  ;;  %v7801_v36 = vld [vmem:[%s13022_s7 + $0x188] sm:$0xff]  }
   0xf   :  { %1304 = vmatprep.subr.bf16.mxu0 %v13074_v0  ;;  %v302_v53 = vrot.slane %v300_v44, 7  ;;  %v13066_v59 = vshrl.u32 %v8129_v54, 16  ;;  %v13069_v63 = vshll.u32 %v8129_v54, 16  ;;  %v132_v57 = vmul.f32 %v8035_v14, %v61_v51 }
  0x10   :  { %v298_v45 = vor.u32 %v13072_v39, %v295_v38 }
  0x11   :  { %v305_v58 = vor.u32 %v303_v49, %v302_v53  ;;  %v309_v4 = vrot.slane %v13066_v59, 7  ;;  %v7697_v53 = vld [vmem:[%s13018_s3 + $0xc8] sm:$0xff]  }
  0x12   :  { %1305 = vmatpush1.bf16.msra.mxu0 %v7676_v5  ;;  %v8125_v52 = vsel %vm8085_vm2, 0, %v298_v45  ;;  %v7692_v5 = vld [vmem:[%s13018_s3 + $0xa0] sm:$0xff]  }
  0x13   :  { %1306 = vmatprep.subr.bf16.mxu0 %v13074_v0  ;;  %v8157_v3 = vsel %vm8085_vm2, 0, %v305_v58  ;;  %v7696_v45 = vld [vmem:[%s13018_s3 + $0xc0] sm:$0xff]  }
  0x14   :  { %13318 = vst [vmem:[#allocation5_spill] sm:$0xff] %v8157_v3 }
  0x16   :  { %1307 = vmatpush1.bf16.msra.mxu0 %v7677_v6  ;;  %v8164_v6 = vpack.c.bf16 %v196_v61, %v195_v60 }
  0x17   :  { %1308 = vmatprep.subr.bf16.mxu0 %v13074_v0 }
  0x18   :  { %v13064_v22 = vshll.u32 %v8164_v6, 16 }
  0x1a   :  { %1309 = vmatpush1.bf16.msra.mxu0 %v7678_v7  ;;  %v126_v7 = vmul.f32 %v8035_v14, %v55_v1  ;;  %v7698_v1 = vld [vmem:[%s13018_s3 + $0xd0] sm:$0xff]  }
  0x1b   :  { %1310 = vmatprep.subr.bf16.mxu0 %v13074_v0 }
  0x1e   :  { %1311 = vmatpush1.bf16.msra.mxu0 %v7679_v8  ;;  %v127_v8 = vmul.f32 %v8035_v14, %v56_v2 }
  0x1f   :  { %1312 = vmatprep.subr.bf16.mxu0 %v13074_v0 }
  0x20   :  { %v198_v12 = vadd.f32 %v8046_v18, %v127_v8  ;;  %v63_v8 = vld [vmem:[%s13019_s0 + $0x80] sm:$0xff] }
  0x22   :  { %1313 = vmatpush1.bf16.msra.mxu0 %v7680_v9  ;;  %v312_v9 = vor.u32 %v13069_v63, %v309_v4 }
  0x23   :  { %1314 = vmatprep.subr.bf16.mxu0 %v13074_v0 }
  0x24   :  { %v8190_v20 = vsel %vm8085_vm2, 0, %v312_v9  ;;  %v64_v9 = vld [vmem:[%s13019_s0 + $0x88] sm:$0xff] }
  0x25   :  { %13319 = vst [vmem:[#allocation6_spill] sm:$0xff] %v8190_v20 }
  0x26   :  { %1315 = vmatpush1.bf16.msra.mxu0 %v7681_v10  ;;  %v13063_v10 = vshrl.u32 %v8164_v6, 16 }
  0x27   :  { %1316 = vmatprep.subr.bf16.mxu0 %v13074_v0 }
  0x28   :  { %v316_v21 = vrot.slane %v13063_v10, 7 }
  0x2a   :  { %1317 = vmatpush1.bf16.msra.mxu0 %v7682_v11  ;;  %v197_v11 = vadd.f32 %v8046_v18, %v126_v7  ;;  %v319_v25 = vor.u32 %v13064_v22, %v316_v21 }
  0x2b   :  { %1318 = vmatprep.subr.bf16.mxu0 %v13074_v0 }
  0x2c   :  { %v8195_v23 = vpack.c.bf16 %v198_v12, %v197_v11  ;;  %v8222_v38 = vsel %vm8085_vm2, 0, %v319_v25  ;;  %v134_v11 = vmul.f32 %v8035_v14, %v63_v8  ;;  %v135_v12 = vmul.f32 %v8035_v14, %v64_v9  ;;  %v7700_v9 = vld [vmem:[%s13018_s3 + $0xe0] sm:$0xff]  }
  0x2d   :  { %13320 = vst [vmem:[#allocation7_spill] sm:$0xff] %v8222_v38 }
  0x2e   :  { %1319 = vmatpush1.bf16.msra.mxu0 %v7683_v15  ;;  %v58_v15 = vld [vmem:[%s13019_s0 + $0x58] sm:$0xff]  ;;  %v13058_v26 = vshrl.u32 %v8195_v23, 16  ;;  %v13061_v34 = vshll.u32 %v8195_v23, 16  ;;  %v205_v25 = vadd.f32 %v8046_v18, %v134_v11 }
  0x2f   :  { %1320 = vmatprep.subr.bf16.mxu0 %v13074_v0 }
  0x30   :  { %v323_v40 = vrot.slane %v13058_v26, 7 }
  0x32   :  { %1321 = vmatpush1.bf16.msra.mxu0 %v7684_v19  ;;  %v129_v19 = vmul.f32 %v8035_v14, %v58_v15  ;;  %v326_v46 = vor.u32 %v13061_v34, %v323_v40 }
  0x33   :  { %1322 = vmatprep.subr.bf16.mxu0 %v13074_v0 }
  0x34   :  { %v200_v29 = vadd.f32 %v8046_v18, %v129_v19  ;;  %v8254_v58 = vsel %vm8085_vm2, 0, %v326_v46  ;;  %v7699_v19 = vld [vmem:[%s13018_s3 + $0xd8] sm:$0xff]  }
  0x35   :  { %13321 = vst [vmem:[#allocation8_spill] sm:$0xff] %v8254_v58 }
  0x36   :  { %1323 = vmatpush1.bf16.msra.mxu0 %v7685_v24  ;;  %v7694_v24 = vld [vmem:[%s13018_s3 + $0xb0] sm:$0xff]  }
  0x37   :  { %1324 = vmatprep.subr.bf16.mxu0 %v13074_v0 }
  0x3a   :  { %1325 = vmatpush1.bf16.msra.mxu0 %v7686_v28  ;;  %v199_v28 = vadd.f32 %v8046_v18, %v128_v17 }
  0x3b   :  { %1326 = vmatprep.subr.bf16.mxu0 %v13074_v0 }
  0x3c   :  { %v8226_v41 = vpack.c.bf16 %v200_v29, %v199_v28  ;;  %v206_v28 = vadd.f32 %v8046_v18, %v135_v12  ;;  %v65_v29 = vld [vmem:[%s13019_s0 + $0x90] sm:$0xff] }
  0x3e   :  { %1327 = vmatpush1.bf16.msra.mxu0 %v7687_v32  ;;  %v7695_v32 = vld [vmem:[%s13018_s3 + $0xb8] sm:$0xff]   ;;  %v13054_v47 = vshrl.u32 %v8226_v41, 16  ;;  %v13056_v56 = vshll.u32 %v8226_v41, 16 }
  0x3f   :  { %1585 = vmatprep.subr.bf16.mxu0 %v13074_v0 }
  0x40   :  { %v330_v60 = vrot.slane %v13054_v47, 7 }
  0x41   :  { %1329 = vmatmul.mubr.bf16.vlgmr.msra.gmra.mrb[0].mxu0 %v8099_v42 }
  0x42   :  { %1586 = vmatpush1.bf16.msra.mxu0 %v7688_v43  ;;  %1336 = vmatprep.mubr.bf16.mxu0 %v8066_v27  ;;  %v131_v43 = vmul.f32 %v8035_v14, %v60_v33  ;;  %v333_v2 = vor.u32 %v13056_v56, %v330_v60  ;;  %v137_v33 = vmul.f32 %v8035_v14, %v66_v30 }
  0x43   :  { %1587 = vmatprep.subr.bf16.mxu0 %v13074_v0 }
  0x44   :  { %v202_v50 = vadd.f32 %v8046_v18, %v131_v43  ;;  %v8283_v13 = vsel %vm8085_vm2, 0, %v333_v2  ;;  %v208_v51 = vadd.f32 %v8046_v18, %v137_v33 }
  0x45   :  { %13322 = vst [vmem:[#allocation9_spill] sm:$0xff] %v8283_v13 }
  0x46   :  { %1588 = vmatpush1.bf16.msra.mxu0 %v7689_v48  ;;  %v201_v48 = vadd.f32 %v8046_v18, %v130_v35 }
  0x47   :  { %1589 = vmatprep.subr.bf16.mxu0 %v13074_v0 }
  0x48   :  { %v8258_v61 = vpack.c.bf16 %v202_v50, %v201_v48 }
  0x49   :  { %1337 = vmatmul.mubr.bf16.gmra.mrb[4].mxu0 %v8125_v52 }
  0x4a   :  { %1344 = vmatprep.mubr.bf16.mxu0 %v8089_v37  ;;  %1590 = vmatpush1.bf16.msra.mxu0 %v7690_v55  ;;  %v62_v55 = vld [vmem:[%s13019_s0 + $0x78] sm:$0xff]  ;;  %v13050_v4 = vshrl.u32 %v8258_v61, 16  ;;  %v8768_v37 = vld [vmem:[%s13021_s2] ss:$0 sm:$0xff] }
  0x4b   :  { %1591 = vmatprep.subr.bf16.mxu0 %v13074_v0 }
  0x4c   :  { %v337_v15 = vrot.slane %v13050_v4, 7 }
  0x4e   :  { %1592 = vmatpush1.bf16.msra.mxu0 %v7691_v62  ;;  %v133_v62 = vmul.f32 %v8035_v14, %v62_v55  ;;  %v68_v55 = vld [vmem:[%s13019_s0 + $0xa8] sm:$0xff] }
  0x4f   :  { %1593 = vmatprep.subr.bf16.mxu0 %v13074_v0  ;;  %v139_v60 = vmul.f32 %v8035_v14, %v68_v55 }
  0x50   :  { %v204_v7 = vadd.f32 %v8046_v18, %v133_v62 }
  0x51   :  { %1345 = vmatmul.mubr.bf16.gmra.mrb[8].mxu0 %v8157_v3  ;;  %v210_v8 = vadd.f32 %v8046_v18, %v139_v60 }
  0x52   :  { %1352 = vmatprep.mubr.bf16.mxu0 %v8129_v54  ;;  %1594 = vmatpush1.bf16.msra.mxu0 %v7692_v5  ;;  %v203_v5 = vadd.f32 %v8046_v18, %v132_v57 }
  0x53   :  { %1595 = vmatprep.subr.bf16.mxu0 %v13074_v0 }
  0x54   :  { %v8288_v17 = vpack.c.bf16 %v204_v7, %v203_v5 }
  0x56   :  { %1596 = vmatpush1.bf16.msra.mxu0 %v7693_v16  ;;  %v13053_v16 = vshll.u32 %v8258_v61, 16  ;;  %v13048_v43 = vshll.u32 %v8288_v17, 16 }
  0x57   :  { %1597 = vmatprep.subr.bf16.mxu0 %v13074_v0 }
  0x58   :  { %v340_v21 = vor.u32 %v13053_v16, %v337_v15  ;;  %v69_v15 = vld [vmem:[%s13019_s0 + $0xb0] sm:$0xff] }
  0x59   :  { %1353 = vmatmul.mubr.bf16.gmra.mrb[12].mxu0 %v8190_v20  ;;  %v140_v30 = vmul.f32 %v8035_v14, %v69_v15 }
  0x5a   :  { %1360 = vmatprep.mubr.bf16.mxu0 %v8164_v6  ;;  %1598 = vmatpush1.bf16.msra.mxu0 %v7694_v24  ;;  %v13047_v24 = vshrl.u32 %v8288_v17, 16  ;;  %v8311_v35 = vsel %vm8085_vm2, 0, %v340_v21 }
  0x5b   :  { %1599 = vmatprep.subr.bf16.mxu0 %v13074_v0  ;;  %13323 = vst [vmem:[#allocation10_spill] sm:$0xff] %v8311_v35 }
  0x5c   :  { %v344_v40 = vrot.slane %v13047_v24, 7 }
  0x5e   :  { %1600 = vmatpush1.bf16.msra.mxu0 %v7695_v32  ;;  %v136_v32 = vmul.f32 %v8035_v14, %v65_v29  ;;  %v347_v46 = vor.u32 %v13048_v43, %v344_v40 }
  0x5f   :  { %1601 = vmatprep.subr.bf16.mxu0 %v13074_v0 }
  0x60   :  { %v207_v50 = vadd.f32 %v8046_v18, %v136_v32  ;;  %v8335_v62 = vsel %vm8085_vm2, 0, %v347_v46  ;;  %v211_v46 = vadd.f32 %v8046_v18, %v140_v30  ;;  %v73_v30 = vld [vmem:[%s13019_s0 + $0xd0] sm:$0xff] }
  0x61   :  { %1361 = vmatmul.mubr.bf16.gmra.mrb[16].mxu0 %v8222_v38  ;;  %13324 = vst [vmem:[#allocation11_spill] sm:$0xff] %v8335_v62 }
  0x62   :  { %1368 = vmatprep.mubr.bf16.mxu0 %v8195_v23  ;;  %1602 = vmatpush1.bf16.msra.mxu0 %v7696_v45  ;;  %v8316_v45 = vpack.c.bf16 %v206_v28, %v205_v25  ;;  %v8340_v5 = vpack.c.bf16 %v208_v51, %v207_v50  ;;  %v71_v51 = vld [vmem:[%s13019_s0 + $0xc0] sm:$0xff] }
  0x63   :  { %1603 = vmatprep.subr.bf16.mxu0 %v13074_v0 }
  0x64   :  { %v13044_v48 = vshrl.u32 %v8316_v45, 16  ;;  %v13045_v2 = vshll.u32 %v8316_v45, 16  ;;  %13325 = vst [vmem:[#allocation12_spill] sm:$0xff] %v8340_v5  ;;  %v13040_v12 = vshrl.u32 %v8340_v5, 16  ;;  %v13042_v21 = vshll.u32 %v8340_v5, 16 }
  0x66   :  { %1604 = vmatpush1.bf16.msra.mxu0 %v7697_v53  ;;  %v67_v53 = vld [vmem:[%s13019_s0 + $0xa0] sm:$0xff]  ;;  %v358_v29 = vrot.slane %v13040_v12, 7 }
  0x67   :  { %1605 = vmatprep.subr.bf16.mxu0 %v13074_v0  ;;  %v138_v57 = vmul.f32 %v8035_v14, %v67_v53  ;;  %v72_v53 = vld [vmem:[%s13019_s0 + $0xc8] sm:$0xff] }
  0x68   :  { %v361_v33 = vor.u32 %v13042_v21, %v358_v29 }
  0x69   :  { %1369 = vmatmul.mubr.bf16.gmra.mrb[20].mxu0 %v8254_v58  ;;  %v209_v7 = vadd.f32 %v8046_v18, %v138_v57  ;;  %v142_v57 = vmul.f32 %v8035_v14, %v71_v51 }
  0x6a   :  { %1376 = vmatprep.mubr.bf16.mxu0 %v8226_v41  ;;  %1606 = vmatpush1.bf16.msra.mxu0 %v7698_v1  ;;  %v351_v1 = vrot.slane %v13044_v48, 7  ;;  %v8387_v60 = vsel %vm8085_vm2, 0, %v361_v33  ;;  %v144_v33 = vmul.f32 %v8035_v14, %v73_v30  ;;  %v75_v30 = vld [vmem:[%s13019_s0 + $0xe0] sm:$0xff] }
  0x6b   :  { %1607 = vmatprep.subr.bf16.mxu0 %v13074_v0  ;;  %v8360_v25 = vpack.c.bf16 %v210_v8, %v209_v7  ;;  %13328 = vst [vmem:[#allocation15_spill] sm:$0xff] %v8387_v60  ;;  %v143_v8 = vmul.f32 %v8035_v14, %v72_v53 }
  0x6c   :  { %v354_v11 = vor.u32 %v13045_v2, %v351_v1 }
  0x6d   :  { %13326 = vst [vmem:[#allocation13_spill] sm:$0xff] %v8360_v25  ;;  %v13035_v40 = vshrl.u32 %v8360_v25, 16  ;;  %v13036_v55 = vshll.u32 %v8360_v25, 16  ;;  %v214_v29 = vadd.f32 %v8046_v18, %v143_v8 }
  0x6e   :  { %1608 = vmatpush1.bf16.msra.mxu0 %v7699_v19  ;;  %v70_v19 = vld [vmem:[%s13019_s0 + $0xb8] sm:$0xff]  ;;  %v8364_v28 = vsel %vm8085_vm2, 0, %v354_v11 }
  0x6f   :  { %1609 = vmatprep.subr.bf16.mxu0 %v13074_v0  ;;  %13327 = vst [vmem:[#allocation14_spill] sm:$0xff] %v8364_v28  ;;  %v141_v32 = vmul.f32 %v8035_v14, %v70_v19  ;;  %v365_v1 = vrot.slane %v13035_v40, 7  ;;  %v213_v19 = vadd.f32 %v8046_v18, %v142_v57 }
  0x71   :  { %1377 = vmatmul.mubr.bf16.gmra.mrb[24].mxu0 %v8283_v13  ;;  %v212_v50 = vadd.f32 %v8046_v18, %v141_v32  ;;  %v368_v11 = vor.u32 %v13036_v55, %v365_v1  ;;  %v74_v32 = vld [vmem:[%s13019_s0 + $0xd8] sm:$0xff]  ;;  %v8420_v57 = vpack.c.bf16 %v214_v29, %v213_v19  ;;  %v76_v19 = vld [vmem:[%s13019_s0 + $0xe8] sm:$0xff]  ;;  %v146_v29 = vmul.f32 %v8035_v14, %v75_v30 }
  0x72   :  { %1384 = vmatprep.mubr.bf16.mxu0 %v8258_v61  ;;  %1610 = vmatpush1.bf16.msra.mxu0 %v7700_v9  ;;  %v7701_v9 = vld [vmem:[%s13018_s3 + $0xe8] sm:$0xff]  }
  0x73   :  { %1611 = vmatprep.subr.bf16.mxu0 %v13074_v0  ;;  %v8391_v7 = vpack.c.bf16 %v212_v50, %v211_v46  ;;  %v145_v46 = vmul.f32 %v8035_v14, %v74_v32  ;;  %v8415_v50 = vsel %vm8085_vm2, 0, %v368_v11  ;;  %v13034_v8 = vshrl.u32 %v8420_v57, 16 }
  0x74   :  { %13329 = vst [vmem:[#allocation16_spill] sm:$0xff] %v8415_v50  ;;  %v147_v32 = vmul.f32 %v8035_v14, %v76_v19  ;;  %v217_v19 = vadd.f32 %v8046_v18, %v146_v29 }
  0x75   :  { %v13032_v15 = vshrl.u32 %v8391_v7, 16  ;;  %v13033_v53 = vshll.u32 %v8391_v7, 16  ;;  %v216_v11 = vadd.f32 %v8046_v18, %v145_v46  ;;  %v13039_v46 = vshll.u32 %v8420_v57, 16 }
  0x76   :  { %1612 = vmatpush1.bf16.msra.mxu0 %v7701_v9  ;;  %v215_v9 = vadd.f32 %v8046_v18, %v144_v33  ;;  %v379_v33 = vrot.slane %v13034_v8, 7  ;;  %v218_v8 = vadd.f32 %v8046_v18, %v147_v32  ;;  %v79_v32 = vld [vmem:[%s13019_s0 + $0x100] sm:$0xff] }
  0x77   :  { %1613 = vmatprep.subr.bf16.mxu0 %v13074_v0  ;;  %v372_v51 = vrot.slane %v13032_v15, 7 }
  0x78   :  { %v8444_v15 = vpack.c.bf16 %v216_v11, %v215_v9  ;;  %v382_v30 = vor.u32 %v13039_v46, %v379_v33  ;;  %v8464_v55 = vpack.c.bf16 %v218_v8, %v217_v19  ;;  %v80_v33 = vld [vmem:[%s13019_s0 + $0x108] sm:$0xff] }
  0x79   :  { %1385 = vmatmul.mubr.bf16.gmra.mrb[28].mxu0 %v8311_v35  ;;  %v375_v1 = vor.u32 %v13033_v53, %v372_v51  ;;  %v7702_v53 = vld [vmem:[%s13018_s3 + $0xf0] sm:$0xff]  }
  0x7a   :  { %1392 = vmatprep.mubr.bf16.mxu0 %v8288_v17  ;;  %1614 = vmatpush1.bf16.msra.mxu0 %v7702_v53  ;;  %v8459_v9 = vsel %vm8085_vm2, 0, %v382_v30  ;;  %v13038_v40 = vshll.u32 %v8444_v15, 16  ;;  %v13041_v29 = vshrl.u32 %v8464_v55, 16  ;;  %v13043_v8 = vshll.u32 %v8464_v55, 16 }
  0x7b   :  { %v8439_v51 = vsel %vm8085_vm2, 0, %v375_v1  ;;  %v13037_v1 = vshrl.u32 %v8444_v15, 16  ;;  %1615 = vmatprep.subr.bf16.mxu0 %v13074_v0  ;;  %13331 = vst [vmem:[#allocation18_spill] sm:$0xff] %v8459_v9 }
  0x7c   :  { %13330 = vst [vmem:[#allocation17_spill] sm:$0xff] %v8439_v51  ;;  %v393_v19 = vrot.slane %v13041_v29, 7 }
  0x7d   :  { %v386_v11 = vrot.slane %v13037_v1, 7  ;;  %v151_v1 = vmul.f32 %v8035_v14, %v80_v33  ;;  %v82_v33 = vld [vmem:[%s13019_s0 + $0x118] sm:$0xff] }
  0x7e   :  { %v396_v46 = vor.u32 %v13043_v8, %v393_v19  ;;  %v153_v21 = vmul.f32 %v8035_v14, %v82_v33 }
  0x7f   :  { %v389_v53 = vor.u32 %v13038_v40, %v386_v11  ;;  %v150_v11 = vmul.f32 %v8035_v14, %v79_v32  ;;  %v7703_v40 = vld [vmem:[%s13018_s3 + $0xf8] sm:$0xff]   ;;  %v222_v12 = vadd.f32 %v8046_v18, %v151_v1  ;;  %v81_v32 = vld [vmem:[%s13019_s0 + $0x110] sm:$0xff] }
  0x80   :  { %1616 = vmatpush1.bf16.msra.mxu0 %v7703_v40  ;;  %v152_v29 = vmul.f32 %v8035_v14, %v81_v32  ;;  %v8506_v19 = vsel %vm8085_vm2, 0, %v396_v46  ;;  %v224_v8 = vadd.f32 %v8046_v18, %v153_v21  ;;  %v83_v32 = vld [vmem:[%s13019_s0 + $0x120] sm:$0xff]  ;;  %v84_v46 = vld [vmem:[%s13019_s0 + $0x128] sm:$0xff] }
  0x81   :  { %1393 = vmatmul.mubr.bf16.gmra.mrb[32].mxu0 %v8335_v62  ;;  %v8480_v30 = vsel %vm8085_vm2, 0, %v389_v53  ;;  %v221_v53 = vadd.f32 %v8046_v18, %v150_v11  ;;  %1874 = vmatprep.subr.bf16.mxu0 %v13074_v0  ;;  %13333 = vst [vmem:[#allocation20_spill] sm:$0xff] %v8506_v19  ;;  %v154_v21 = vmul.f32 %v8035_v14, %v83_v32  ;;  %v86_v32 = vld [vmem:[%s13019_s0 + $0x138] sm:$0xff] }
  0x82   :  { %1400 = vmatprep.mubr.bf16.mxu0 %v8316_v45  ;;  %13332 = vst [vmem:[#allocation19_spill] sm:$0xff] %v8480_v30  ;;  %v223_v11 = vadd.f32 %v8046_v18, %v152_v29  ;;  %v155_v33 = vmul.f32 %v8035_v14, %v84_v46 }
  0x83   :  { %v8508_v1 = vpack.c.bf16 %v222_v12, %v221_v53 }
  0x84   :  { %v8521_v12 = vpack.c.bf16 %v224_v8, %v223_v11  ;;  %v225_v8 = vadd.f32 %v8046_v18, %v154_v21  ;;  %v226_v11 = vadd.f32 %v8046_v18, %v155_v33 }
  0x85   :  { %v13046_v40 = vshrl.u32 %v8508_v1, 16  ;;  %v13049_v29 = vshll.u32 %v8508_v1, 16 }
  0x86   :  { %v13051_v48 = vshrl.u32 %v8521_v12, 16  ;;  %v13052_v24 = vshll.u32 %v8521_v12, 16  ;;  %v8550_v33 = vpack.c.bf16 %v226_v11, %v225_v8  ;;  %v87_v8 = vld [vmem:[%s13019_s0 + $0x140] sm:$0xff]  ;;  %v88_v11 = vld [vmem:[%s13019_s0 + $0x148] sm:$0xff] }
  0x87   :  { %v407_v53 = vrot.slane %v13046_v40, 7  ;;  %v85_v40 = vld [vmem:[%s13019_s0 + $0x130] sm:$0xff]  ;;  %v158_v16 = vmul.f32 %v8035_v14, %v87_v8  ;;  %v159_v47 = vmul.f32 %v8035_v14, %v88_v11  ;;  %v90_v11 = vld [vmem:[%s13019_s0 + $0x158] sm:$0xff] }
  0x88   :  { %v414_v46 = vrot.slane %v13051_v48, 7  ;;  %v156_v43 = vmul.f32 %v8035_v14, %v85_v40  ;;  %v13055_v40 = vshrl.u32 %v8550_v33, 16  ;;  %v89_v8 = vld [vmem:[%s13019_s0 + $0x150] sm:$0xff] }
  0x89   :  { %1401 = vmatmul.mubr.bf16.gmra.mrb[36].mxu0 %v8364_v28  ;;  %v410_v2 = vor.u32 %v13049_v29, %v407_v53  ;;  %v157_v53 = vmul.f32 %v8035_v14, %v86_v32  ;;  %v160_v56 = vmul.f32 %v8035_v14, %v89_v8 }
  0x8a   :  { %1408 = vmatprep.mubr.bf16.mxu0 %v8340_v5  ;;  %v417_v29 = vor.u32 %v13052_v24, %v414_v46  ;;  %v227_v4 = vadd.f32 %v8046_v18, %v156_v43  ;;  %v13057_v46 = vshll.u32 %v8550_v33, 16  ;;  %v421_v24 = vrot.slane %v13055_v40, 7 }
  0x8b   :  { %v8548_v21 = vsel %vm8085_vm2, 0, %v410_v2  ;;  %v228_v48 = vadd.f32 %v8046_v18, %v157_v53  ;;  %v589_v2 = vrot.slane %v303_v49, 1  ;;  %v231_v26 = vadd.f32 %v8046_v18, %v160_v56 }
  0x8c   :  { %v8571_v32 = vsel %vm8085_vm2, 0, %v417_v29  ;;  %v229_v29 = vadd.f32 %v8046_v18, %v158_v16 }
  0x8d   :  { %v590_v43 = vor.u32 %v589_v2, %v300_v44  ;;  %13334 = vst [vmem:[#allocation21_spill] sm:$0xff] %v8571_v32  ;;  %v8574_v53 = vpack.c.bf16 %v228_v48, %v227_v4  ;;  %v424_v48 = vor.u32 %v13057_v46, %v421_v24  ;;  %v230_v2 = vadd.f32 %v8046_v18, %v159_v47 }
  0x8e   :  { %v161_v24 = vmul.f32 %v8035_v14, %v90_v11 }
  0x8f   :  { %v8586_v44 = vsel %vm8576_vm5, %v590_v43, 0  ;;  %v13059_v4 = vshrl.u32 %v8574_v53, 16  ;;  %v13060_v40 = vshll.u32 %v8574_v53, 16  ;;  %v8609_v47 = vsel %vm8085_vm2, 0, %v424_v48  ;;  %v91_v48 = vld [vmem:[%s13019_s0 + $0x160] sm:$0xff] }
  0x90   :  { %6715 = vmatprep.mubr.bf16.mxu1 %v8586_v44  ;;  %13337 = vst [vmem:[#allocation22_spill] sm:$0xff] %v8609_v47  ;;  %v8611_v16 = vpack.c.bf16 %v230_v2, %v229_v29  ;;  %v92_v29 = vld [vmem:[%s13019_s0 + $0x168] sm:$0xff] }
  0x91   :  { %1409 = vmatmul.mubr.bf16.gmra.mrb[40].mxu0 %v8387_v60  ;;  %v428_v43 = vrot.slane %v13059_v4, 7  ;;  %v232_v4 = vadd.f32 %v8046_v18, %v161_v24  ;;  %v162_v24 = vmul.f32 %v8035_v14, %v91_v48  ;;  %v94_v48 = vld [vmem:[%s13019_s0 + $0x178] sm:$0xff] }
  0x92   :  { %1416 = vmatprep.mubr.bf16.mxu0 %v8360_v25  ;;  %v13062_v8 = vshrl.u32 %v8611_v16, 16 }
  0x93   :  { %v431_v46 = vor.u32 %v13060_v40, %v428_v43  ;;  %v8630_v11 = vpack.c.bf16 %v232_v4, %v231_v26  ;;  %v13065_v43 = vshll.u32 %v8611_v16, 16  ;;  %v163_v40 = vmul.f32 %v8035_v14, %v92_v29 }
  0x94   :  { %v435_v56 = vrot.slane %v13062_v8, 7  ;;  %v233_v26 = vadd.f32 %v8046_v18, %v162_v24  ;;  %v93_v8 = vld [vmem:[%s13019_s0 + $0x170] sm:$0xff] }
  0x95   :  { %v8628_v2 = vsel %vm8085_vm2, 0, %v431_v46  ;;  %v13067_v34 = vshrl.u32 %v8630_v11, 16  ;;  %v234_v4 = vadd.f32 %v8046_v18, %v163_v40  ;;  %v13068_v10 = vshll.u32 %v8630_v11, 16 }
  0x96   :  { %13338 = vst [vmem:[#allocation23_spill] sm:$0xff] %v8628_v2  ;;  %v438_v46 = vor.u32 %v13065_v43, %v435_v56  ;;  %v164_v22 = vmul.f32 %v8035_v14, %v93_v8  ;;  %v165_v56 = vmul.f32 %v8035_v14, %v94_v48 }
  0x97   :  { %v442_v29 = vrot.slane %v13067_v34, 7  ;;  %v8659_v24 = vpack.c.bf16 %v234_v4, %v233_v26  ;;  %v96_v26 = vld [vmem:[%s13019_s0 + $0x188] sm:$0xff] }
  0x98   :  { %v8657_v40 = vsel %vm8085_vm2, 0, %v438_v46  ;;  %v235_v59 = vadd.f32 %v8046_v18, %v164_v22  ;;  %v236_v34 = vadd.f32 %v8046_v18, %v165_v56  ;;  %v95_v46 = vld [vmem:[%s13019_s0 + $0x180] sm:$0xff] }
  0x99   :  { %1417 = vmatmul.mubr.bf16.gmra.mrb[44].mxu0 %v8415_v50  ;;  %13339 = vst [vmem:[#allocation24_spill] sm:$0xff] %v8657_v40  ;;  %13340 = vst [vmem:[#allocation25_spill] sm:$0xff] %v8659_v24  ;;  %v445_v43 = vor.u32 %v13068_v10, %v442_v29  ;;  %v13070_v8 = vshrl.u32 %v8659_v24, 16  ;;  %v13073_v29 = vshll.u32 %v8659_v24, 16  ;;  %v166_v56 = vmul.f32 %v8035_v14, %v95_v46  ;;  %v98_v46 = vld [vmem:[%s13019_s0 + $0x198] sm:$0xff] }
  0x9a   :  { %1424 = vmatprep.mubr.bf16.mxu0 %v8391_v7  ;;  %v8678_v48 = vpack.c.bf16 %v236_v34, %v235_v59  ;;  %v167_v10 = vmul.f32 %v8035_v14, %v96_v26 }
  0x9b   :  { %v8676_v4 = vsel %vm8085_vm2, 0, %v445_v43  ;;  %v449_v22 = vrot.slane %v13070_v8, 7  ;;  %v237_v59 = vadd.f32 %v8046_v18, %v166_v56  ;;  %v97_v8 = vld [vmem:[%s13019_s0 + $0x190] sm:$0xff] }
  0x9c   :  { %13341 = vst [vmem:[#allocation26_spill] sm:$0xff] %v8676_v4  ;;  %13342 = vst [vmem:[#allocation27_spill] sm:$0xff] %v8678_v48  ;;  %v13076_v63 = vshrl.u32 %v8678_v48, 16  ;;  %v238_v34 = vadd.f32 %v8046_v18, %v167_v10  ;;  %v13077_v31 = vshll.u32 %v8678_v48, 16  ;;  %v168_v39 = vmul.f32 %v8035_v14, %v97_v8 }
  0x9d   :  { %v452_v43 = vor.u32 %v13073_v29, %v449_v22  ;;  %v169_v22 = vmul.f32 %v8035_v14, %v98_v46 }
  0x9e   :  { %v456_v26 = vrot.slane %v13076_v63, 7  ;;  %v8707_v56 = vpack.c.bf16 %v238_v34, %v237_v59  ;;  %v100_v59 = vld [vmem:[%s13019_s0 + $0x1a8] sm:$0xff] }
  0x9f   :  { %v8705_v10 = vsel %vm8085_vm2, 0, %v452_v43  ;;  %v240_v63 = vadd.f32 %v8046_v18, %v169_v22  ;;  %v99_v43 = vld [vmem:[%s13019_s0 + $0x1a0] sm:$0xff] }
  0xa0   :  { %13343 = vst [vmem:[#allocation28_spill] sm:$0xff] %v8705_v10  ;;  %13344 = vst [vmem:[#allocation29_spill] sm:$0xff] %v8707_v56  ;;  %v459_v29 = vor.u32 %v13077_v31, %v456_v26  ;;  %v13080_v8 = vshrl.u32 %v8707_v56, 16  ;;  %v13081_v26 = vshll.u32 %v8707_v56, 16  ;;  %v170_v22 = vmul.f32 %v8035_v14, %v99_v43 }
  0xa1   :  { %1425 = vmatmul.mubr.bf16.gmra.mrb[48].mxu0 %v8439_v51  ;;  %v171_v31 = vmul.f32 %v8035_v14, %v100_v59  ;;  %v102_v14 = vld [vmem:[%s13019_s0 + $0x1b8] sm:$0xff] }
  0xa2   :  { %1432 = vmatprep.mubr.bf16.mxu0 %v8420_v57  ;;  %v8724_v34 = vsel %vm8085_vm2, 0, %v459_v29 }
  0xa3   :  { %13345 = vst [vmem:[#allocation30_spill] sm:$0xff] %v8724_v34 }
  0xa9   :  { %1433 = vmatmul.mubr.bf16.gmra.mrb[52].mxu0 %v8459_v9 }
  0xaa   :  { %1440 = vmatprep.mubr.bf16.mxu0 %v8444_v15 }
  0xb1   :  { %1441 = vmatmul.mubr.bf16.gmra.mrb[56].mxu0 %v8480_v30 }
  0xb2   :  { %1448 = vmatprep.mubr.bf16.mxu0 %v8464_v55 }
  0xb9   :  { %1449 = vmatmul.mubr.bf16.gmra.mrb[60].mxu0 %v8506_v19 }
  0xba   :  { %1456 = vmatprep.mubr.bf16.mxu0 %v13074_v0  ;;  %v239_v0 = vadd.f32 %v8046_v18, %v168_v39  ;;  %v463_v39 = vrot.slane %v13080_v8, 7  ;;  %v101_v8 = vld [vmem:[%s13019_s0 + $0x1b0] sm:$0xff] }
  0xbc   :  { %v8726_v46 = vpack.c.bf16 %v240_v63, %v239_v0  ;;  %v466_v29 = vor.u32 %v13081_v26, %v463_v39  ;;  %v241_v0 = vadd.f32 %v8046_v18, %v170_v22  ;;  %v242_v63 = vadd.f32 %v8046_v18, %v171_v31  ;;  %v8752_v39 = vld [vmem:[%s13020_s1] ss:$0 sm:$0xff] }
  0xbd   :  { %v172_v18 = vmul.f32 %v8752_v39, %v101_v8  ;;  %v173_v31 = vmul.f32 %v8752_v39, %v102_v14 }
  0xbe   :  { %13346 = vst [vmem:[#allocation31_spill] sm:$0xff] %v8726_v46  ;;  %v13085_v59 = vshll.u32 %v8726_v46, 16  ;;  %v8758_v22 = vsel %vm8085_vm2, 0, %v466_v29  ;;  %v8760_v26 = vpack.c.bf16 %v242_v63, %v241_v0  ;;  %v103_v0 = vld [vmem:[%s13019_s0 + $0x1c0] sm:$0xff]  ;;  %v104_v63 = vld [vmem:[%s13019_s0 + $0x1c8] sm:$0xff] }
  0xbf   :  { %13347 = vst [vmem:[#allocation32_spill] sm:$0xff] %v8758_v22  ;;  %v243_v8 = vadd.f32 %v8768_v37, %v172_v18  ;;  %v244_v14 = vadd.f32 %v8768_v37, %v173_v31 }
  0xc0   :  { %13348 = vst [vmem:[#allocation33_spill] sm:$0xff] %v8760_v26  ;;  %v13092_v29 = vshrl.u32 %v8760_v26, 16  ;;  %v13095_v31 = vshll.u32 %v8760_v26, 16 }
  0xc1   :  { %1457 = vmatmul.mubr.bf16.gmra.mrb[64].mxu0 %v8099_v42  ;;  %v13082_v42 = vshrl.u32 %v8726_v46, 16 }
  0xc2   :  { %1464 = vmatprep.mubr.bf16.mxu0 %v8508_v1  ;;  %v477_v18 = vrot.slane %v13092_v29, 7  ;;  %v105_v29 = vld [vmem:[%s13019_s0 + $0x1d0] sm:$0xff] }
  0xc3   :  { %v470_v43 = vrot.slane %v13082_v42, 7 }
  0xc5   :  { %v473_v42 = vor.u32 %v13085_v59, %v470_v43  ;;  %v8784_v59 = vpack.c.bf16 %v244_v14, %v243_v8 }
  0xc7   :  { %v8782_v43 = vsel %vm8085_vm2, 0, %v473_v42  ;;  %13350 = vst [vmem:[#allocation35_spill] sm:$0xff] %v8784_v59  ;;  %v480_v42 = vor.u32 %v13095_v31, %v477_v18 }
  0xc8   :  { %13349 = vst [vmem:[#allocation34_spill] sm:$0xff] %v8782_v43 }
  0xc9   :  { %1465 = vmatmul.mubr.bf16.gmra.mrb[68].mxu0 %v8548_v21  ;;  %v8809_v18 = vsel %vm8085_vm2, 0, %v480_v42 }
  0xca   :  { %1472 = vmatprep.mubr.bf16.mxu0 %v8521_v12  ;;  %13351 = vst [vmem:[#allocation36_spill] sm:$0xff] %v8809_v18 }
  0xd1   :  { %1473 = vmatmul.mubr.bf16.gmra.mrb[72].mxu0 %v8571_v32 }
  0xd2   :  { %1480 = vmatprep.mubr.bf16.mxu0 %v8550_v33 }
  0xd9   :  { %1481 = vmatmul.mubr.bf16.gmra.mrb[76].mxu0 %v8609_v47 }
  0xda   :  { %1488 = vmatprep.mubr.bf16.mxu0 %v8574_v53 }
  0xe1   :  { %1489 = vmatmul.mubr.bf16.gmra.mrb[80].mxu0 %v8628_v2 }
  0xe2   :  { %1496 = vmatprep.mubr.bf16.mxu0 %v8611_v16 }
  0xe9   :  { %1497 = vmatmul.mubr.bf16.gmra.mrb[84].mxu0 %v8657_v40 }
  0xea   :  { %1504 = vmatprep.mubr.bf16.mxu0 %v8630_v11 }
  0xf1   :  { %1505 = vmatmul.mubr.bf16.gmra.mrb[88].mxu0 %v8676_v4 }
  0xf2   :  { %1512 = vmatprep.mubr.bf16.mxu0 %v8659_v24 }
  0xf9   :  { %1513 = vmatmul.mubr.bf16.gmra.mrb[92].mxu0 %v8705_v10 }
  0xfa   :  { %1520 = vmatprep.mubr.bf16.mxu0 %v8678_v48 }
 0x101   :  { %1521 = vmatmul.mubr.bf16.gmra.mrb[96].mxu0 %v8724_v34 }
 0x102   :  { %1528 = vmatprep.mubr.bf16.mxu0 %v8707_v56  ;;  %v175_v56 = vmul.f32 %v8752_v39, %v104_v63 }
 0x104   :  { %v246_v14 = vadd.f32 %v8768_v37, %v175_v56  ;;  %v176_v56 = vmul.f32 %v8752_v39, %v105_v29  ;;  %v108_v29 = vld [vmem:[%s13019_s0 + $0x1e8] sm:$0xff] }
 0x106   :  { %v247_v48 = vadd.f32 %v8768_v37, %v176_v56 }
 0x109   :  { %1529 = vmatmul.mubr.bf16.gmra.mrb[100].mxu0 %v8758_v22  ;;  %v13098_v22 = vshrl.u32 %v8784_v59, 16 }
 0x10a   :  { %1536 = vmatprep.mubr.bf16.mxu0 %v8726_v46  ;;  %v174_v46 = vmul.f32 %v8752_v39, %v103_v0  ;;  %v106_v0 = vld [vmem:[%s13019_s0 + $0x1d8] sm:$0xff] }
 0x10b   :  { %v484_v63 = vrot.slane %v13098_v22, 7  ;;  %v177_v31 = vmul.f32 %v8752_v39, %v106_v0 }
 0x10c   :  { %v245_v8 = vadd.f32 %v8768_v37, %v174_v46 }
 0x10d   :  { %v248_v42 = vadd.f32 %v8768_v37, %v177_v31 }
 0x10e   :  { %v8811_v46 = vpack.c.bf16 %v246_v14, %v245_v8  ;;  %v107_v8 = vld [vmem:[%s13019_s0 + $0x1e0] sm:$0xff] }
 0x10f   :  { %v8835_v56 = vpack.c.bf16 %v248_v42, %v247_v48  ;;  %v178_v31 = vmul.f32 %v8752_v39, %v107_v8 }
 0x110   :  { %v13112_v22 = vshrl.u32 %v8811_v46, 16  ;;  %v13113_v0 = vshll.u32 %v8811_v46, 16 }
 0x111   :  { %1537 = vmatmul.mubr.bf16.gmra.mrb[104].mxu0 %v8782_v43  ;;  %v13101_v43 = vshll.u32 %v8784_v59, 16  ;;  %v13110_v8 = vshll.u32 %v8835_v56, 16 }
 0x112   :  { %1544 = vmatprep.mubr.bf16.mxu0 %v8760_v26 }
 0x113   :  { %v487_v26 = vor.u32 %v13101_v43, %v484_v63  ;;  %v491_v63 = vrot.slane %v13112_v22, 7  ;;  %v179_v43 = vmul.f32 %v8752_v39, %v108_v29 }
 0x115   :  { %v8830_v14 = vsel %vm8085_vm2, 0, %v487_v26  ;;  %v13108_v26 = vshrl.u32 %v8835_v56, 16  ;;  %v250_v34 = vadd.f32 %v8768_v37, %v179_v43 }
 0x116   :  { %13352 = vst [vmem:[#allocation37_spill] sm:$0xff] %v8830_v14 }
 0x117   :  { %v498_v42 = vrot.slane %v13108_v26, 7 }
 0x119   :  { %1545 = vmatmul.mubr.bf16.gmra.mrb[108].mxu0 %v8809_v18  ;;  %v249_v18 = vadd.f32 %v8768_v37, %v178_v31 }
 0x11a   :  { %1552 = vmatprep.mubr.bf16.mxu0 %v8784_v59  ;;  %v494_v59 = vor.u32 %v13113_v0, %v491_v63  ;;  %v501_v63 = vor.u32 %v13110_v8, %v498_v42  ;;  %v13353_v42 = vmov 0   ;;  %v7704_v8 = vld [vmem:[%s13018_s3 + $0x100] sm:$0xff]   ;;  %v7709_v0 = vld [vmem:[%s13018_s3 + $0x128] sm:$0xff]  }
 0x11b   :  { %v8853_v29 = vpack.c.bf16 %v250_v34, %v249_v18 }
 0x11c   :  { %v8848_v48 = vsel %vm8085_vm2, 0, %v494_v59  ;;  %v8862_v59 = vsel %vm8085_vm2, 0, %v501_v63  ;;  %v585_v63 = vrot.slane %v13353_v42, 1 }
 0x11d   :  { %v13109_v43 = vshrl.u32 %v8853_v29, 16  ;;  %v13111_v26 = vshll.u32 %v8853_v29, 16 }
 0x11f   :  { %v505_v31 = vrot.slane %v13109_v43, 7  ;;  %v8880_v43 = vsel %vm8576_vm5, %v585_v63, 0  ;;  %v7705_v63 = vld [vmem:[%s13018_s3 + $0x108] sm:$0xff]  }
 0x120   :  { %13354 = vst [vmem:[#allocation38_spill] sm:$0xff] %v8880_v43 }
 0x121   :  { %1553 = vmatmul.mubr.bf16.gmra.mrb[112].mxu0 %v8830_v14  ;;  %v508_v34 = vor.u32 %v13111_v26, %v505_v31  ;;  %v13355_v31 = vshll.u32 %v8066_v27, 16 }
 0x122   :  { %1560 = vmatprep.mubr.bf16.mxu0 %v8811_v46 }
 0x123   :  { %v8873_v18 = vsel %vm8085_vm2, 0, %v508_v34  ;;  %v587_v26 = vrot.slane %v13355_v31, 1  ;;  %v13357_v31 = vshll.u32 %v8129_v54, 16 }
 0x129   :  { %1561 = vmatmul.mubr.bf16.gmra.mrb[116].mxu0 %v8848_v48 }
 0x12a   :  { %1568 = vmatprep.mubr.bf16.mxu0 %v8835_v56 }
 0x131   :  { %1569 = vmatmul.mubr.bf16.gmra.mrb[120].mxu0 %v8862_v59 }
 0x132   :  { %1576 = vmatprep.mubr.bf16.mxu0 %v8853_v29 }
 0x139   :  { %1577 = vmatmul.mubr.bf16.gmra.mrb[124].mxu0 %v8873_v18 }
 0x13a   :  { %1617 = vmatprep.mubr.bf16.mxu0 %v8125_v52  ;;  %v13356_v52 = vshrl.u32 %v8066_v27, 16 }
 0x13c   :  { %v588_v34 = vor.u32 %v587_v26, %v13356_v52  ;;  %v7707_v26 = vld [vmem:[%s13018_s3 + $0x118] sm:$0xff]   ;;  %v591_v52 = vrot.slane %v13357_v31, 1  ;;  %v13359_v31 = vshll.u32 %v8164_v6, 16 }
 0x13e   :  { %v8897_v22 = vsel %vm8576_vm5, %v588_v34, 0  ;;  %v7708_v34 = vld [vmem:[%s13018_s3 + $0x120] sm:$0xff]  }
 0x141   :  { %1618 = vmatmul.mubr.bf16.vlgmr.msra.gmra.mrb[0].mxu0 %v8880_v43 }
 0x142   :  { %1875 = vmatpush1.bf16.msra.mxu0 %v7704_v8  ;;  %1625 = vmatprep.mubr.bf16.mxu0 %v8157_v3  ;;  %v7706_v8 = vld [vmem:[%s13018_s3 + $0x110] sm:$0xff]  }
 0x143   :  { %1876 = vmatprep.subr.bf16.mxu0 %v13353_v42 }
 0x146   :  { %1877 = vmatpush1.bf16.msra.mxu0 %v7705_v63  ;;  %v13358_v63 = vshrl.u32 %v8129_v54, 16 }
 0x147   :  { %1878 = vmatprep.subr.bf16.mxu0 %v13353_v42 }
 0x149   :  { %1626 = vmatmul.mubr.bf16.gmra.mrb[4].mxu0 %v8897_v22 }
 0x14a   :  { %1633 = vmatprep.mubr.bf16.mxu0 %v8190_v20  ;;  %1879 = vmatpush1.bf16.msra.mxu0 %v7706_v8  ;;  %v592_v8 = vor.u32 %v591_v52, %v13358_v63  ;;  %v593_v20 = vrot.slane %v13359_v31, 1  ;;  %v13360_v52 = vshrl.u32 %v8164_v6, 16  ;;  %v7711_v63 = vld [vmem:[%s13018_s3 + $0x138] sm:$0xff]  }
 0x14b   :  { %1880 = vmatprep.subr.bf16.mxu0 %v13353_v42 }
 0x14e   :  { %1881 = vmatpush1.bf16.msra.mxu0 %v7707_v26  ;;  %v8925_v26 = vsel %vm8576_vm5, %v592_v8, 0  ;;  %v13361_v8 = vshll.u32 %v8195_v23, 16 }
 0x14f   :  { %1882 = vmatprep.subr.bf16.mxu0 %v13353_v42 }
 0x150   :  { %v595_v31 = vrot.slane %v13361_v8, 1 }
 0x151   :  { %1634 = vmatmul.mubr.bf16.gmra.mrb[8].mxu0 %v8586_v44 }
 0x152   :  { %1641 = vmatprep.mubr.bf16.mxu0 %v8222_v38  ;;  %1883 = vmatpush1.bf16.msra.mxu0 %v7708_v34  ;;  %v7710_v38 = vld [vmem:[%s13018_s3 + $0x130] sm:$0xff]   ;;  %v594_v34 = vor.u32 %v593_v20, %v13360_v52  ;;  %v13362_v20 = vshrl.u32 %v8195_v23, 16  ;;  %v7713_v52 = vld [vmem:[%s13018_s3 + $0x148] sm:$0xff]  }
 0x153   :  { %1884 = vmatprep.subr.bf16.mxu0 %v13353_v42 }
 0x156   :  { %1885 = vmatpush1.bf16.msra.mxu0 %v7709_v0  ;;  %v8943_v0 = vsel %vm8576_vm5, %v594_v34, 0 }
 0x157   :  { %1886 = vmatprep.subr.bf16.mxu0 %v13353_v42 }
 0x159   :  { %1642 = vmatmul.mubr.bf16.gmra.mrb[12].mxu0 %v8925_v26 }
 0x15a   :  { %1649 = vmatprep.mubr.bf16.mxu0 %v8254_v58  ;;  %1887 = vmatpush1.bf16.msra.mxu0 %v7710_v38  ;;  %v7712_v58 = vld [vmem:[%s13018_s3 + $0x140] sm:$0xff]   ;;  %v596_v38 = vor.u32 %v595_v31, %v13362_v20 }
 0x15b   :  { %1888 = vmatprep.subr.bf16.mxu0 %v13353_v42 }
 0x15c   :  { %v8961_v34 = vsel %vm8576_vm5, %v596_v38, 0  ;;  %v13365_v38 = vshll.u32 %v8258_v61, 16 }
 0x15e   :  { %1889 = vmatpush1.bf16.msra.mxu0 %v7711_v63  ;;  %v13363_v63 = vshll.u32 %v8226_v41, 16 }
 0x15f   :  { %1890 = vmatprep.subr.bf16.mxu0 %v13353_v42 }
 0x160   :  { %v597_v8 = vrot.slane %v13363_v63, 1  ;;  %v7715_v63 = vld [vmem:[%s13018_s3 + $0x158] sm:$0xff]  }
 0x161   :  { %1650 = vmatmul.mubr.bf16.gmra.mrb[16].mxu0 %v8943_v0 }
 0x162   :  { %1657 = vmatprep.mubr.bf16.mxu0 %v8283_v13  ;;  %1891 = vmatpush1.bf16.msra.mxu0 %v7712_v58  ;;  %v7714_v13 = vld [vmem:[%s13018_s3 + $0x150] sm:$0xff]   ;;  %v13364_v58 = vshrl.u32 %v8226_v41, 16 }
 0x163   :  { %1892 = vmatprep.subr.bf16.mxu0 %v13353_v42 }
 0x164   :  { %v598_v31 = vor.u32 %v597_v8, %v13364_v58  ;;  %v13366_v8 = vshrl.u32 %v8258_v61, 16 }
 0x166   :  { %1893 = vmatpush1.bf16.msra.mxu0 %v7713_v52  ;;  %v8976_v20 = vsel %vm8576_vm5, %v598_v31, 0  ;;  %v599_v52 = vrot.slane %v13365_v38, 1  ;;  %v13367_v31 = vshll.u32 %v8288_v17, 16 }
 0x167   :  { %1894 = vmatprep.subr.bf16.mxu0 %v13353_v42 }
 0x168   :  { %v601_v38 = vrot.slane %v13367_v31, 1  ;;  %v13370_v31 = vshrl.u32 %v8316_v45, 16 }
 0x169   :  { %1658 = vmatmul.mubr.bf16.gmra.mrb[20].mxu0 %v8961_v34 }
 0x16a   :  { %1665 = vmatprep.mubr.bf16.mxu0 %v8311_v35  ;;  %1895 = vmatpush1.bf16.msra.mxu0 %v7714_v13  ;;  %v600_v13 = vor.u32 %v599_v52, %v13366_v8  ;;  %v13368_v35 = vshrl.u32 %v8288_v17, 16 }
 0x16b   :  { %1896 = vmatprep.subr.bf16.mxu0 %v13353_v42 }
 0x16c   :  { %v8990_v58 = vsel %vm8576_vm5, %v600_v13, 0  ;;  %v7716_v13 = vld [vmem:[%s13018_s3 + $0x160] sm:$0xff]  }
 0x16e   :  { %1897 = vmatpush1.bf16.msra.mxu0 %v7715_v63  ;;  %v13369_v63 = vshll.u32 %v8316_v45, 16 }
 0x16f   :  { %1898 = vmatprep.subr.bf16.mxu0 %v13353_v42 }
 0x170   :  { %v603_v8 = vrot.slane %v13369_v63, 1  ;;  %v13372_v63 = vshrl.u32 %v8340_v5, 16 }
 0x171   :  { %1666 = vmatmul.mubr.bf16.gmra.mrb[24].mxu0 %v8976_v20 }
 0x172   :  { %1673 = vmatprep.mubr.bf16.mxu0 %v8335_v62  ;;  %v602_v62 = vor.u32 %v601_v38, %v13368_v35  ;;  %1899 = vmatpush1.bf16.msra.mxu0 %v7716_v13  ;;  %v13374_v13 = vshll.u32 %v8360_v25, 16 }
 0x173   :  { %1900 = vmatprep.subr.bf16.mxu0 %v13353_v42 }
 0x174   :  { %v9000_v52 = vsel %vm8576_vm5, %v602_v62, 0  ;;  %v13371_v62 = vshll.u32 %v8340_v5, 16 }
 0x176   :  { %v605_v38 = vrot.slane %v13371_v62, 1  ;;  %v13375_v62 = vshrl.u32 %v8360_v25, 16 }
 0x179   :  { %1674 = vmatmul.mubr.bf16.gmra.mrb[28].mxu0 %v8990_v58 }
 0x17a   :  { %1681 = vmatprep.mubr.bf16.mxu0 %v8364_v28  ;;  %v604_v28 = vor.u32 %v603_v8, %v13370_v31  ;;  %v607_v31 = vrot.slane %v13374_v13, 1  ;;  %v13376_v13 = vshll.u32 %v8391_v7, 16 }
 0x17c   :  { %v9014_v35 = vsel %vm8576_vm5, %v604_v28, 0  ;;  %v7717_v28 = vld [vmem:[%s13018_s3 + $0x168] sm:$0xff]  }
 0x17d   :  { %1901 = vmatpush1.bf16.msra.mxu0 %v7717_v28 }
 0x17e   :  { %1902 = vmatprep.subr.bf16.mxu0 %v13353_v42 }
 0x181   :  { %1682 = vmatmul.mubr.bf16.gmra.mrb[32].mxu0 %v9000_v52 }
 0x182   :  { %1689 = vmatprep.mubr.bf16.mxu0 %v8387_v60  ;;  %v606_v60 = vor.u32 %v605_v38, %v13372_v63  ;;  %v78_v38 = vld [vmem:[%s13019_s0 + $0xf8] sm:$0xff] }
 0x183   :  { %v149_v28 = vmul.f32 %v8752_v39, %v78_v38  ;;  %v7718_v38 = vld [vmem:[%s13018_s3 + $0x170] sm:$0xff]  }
 0x184   :  { %v9024_v8 = vsel %vm8576_vm5, %v606_v60, 0  ;;  %v77_v60 = vld [vmem:[%s13019_s0 + $0xf0] sm:$0xff]  ;;  %1903 = vmatpush1.bf16.msra.mxu0 %v7718_v38 }
 0x185   :  { %13373 = vst [vmem:[#allocation39_spill] sm:$0xff] %v9024_v8  ;;  %v220_v5 = vadd.f32 %v8768_v37, %v149_v28  ;;  %1904 = vmatprep.subr.bf16.mxu0 %v13353_v42 }
 0x189   :  { %1690 = vmatmul.mubr.bf16.gmra.mrb[36].mxu0 %v9014_v35 }
 0x18a   :  { %1697 = vmatprep.mubr.bf16.mxu0 %v8415_v50  ;;  %v608_v50 = vor.u32 %v607_v31, %v13375_v62  ;;  %v148_v31 = vmul.f32 %v8752_v39, %v77_v60  ;;  %v13377_v62 = vshrl.u32 %v8391_v7, 16 }
 0x18c   :  { %v9044_v63 = vsel %vm8576_vm5, %v608_v50, 0  ;;  %v219_v25 = vadd.f32 %v8768_v37, %v148_v31 }
 0x191   :  { %1698 = vmatmul.mubr.bf16.gmra.mrb[40].mxu0 %v9024_v8  ;;  %v9062_v8 = vpack.c.bf16 %v220_v5, %v219_v25  ;;  %v13380_v5 = vshll.u32 %v8444_v15, 16 }
 0x192   :  { %1705 = vmatprep.mubr.bf16.mxu0 %v8439_v51  ;;  %v609_v51 = vrot.slane %v13376_v13, 1  ;;  %v13378_v13 = vshll.u32 %v8420_v57, 16 }
 0x193   :  { %v13132_v28 = vshrl.u32 %v9062_v8, 16  ;;  %v613_v25 = vrot.slane %v13380_v5, 1  ;;  %v13382_v5 = vshll.u32 %v8464_v55, 16 }
 0x194   :  { %v610_v3 = vor.u32 %v609_v51, %v13377_v62  ;;  %v611_v60 = vrot.slane %v13378_v13, 1  ;;  %v13379_v51 = vshrl.u32 %v8420_v57, 16  ;;  %v13133_v13 = vshll.u32 %v9062_v8, 16 }
 0x195   :  { %v400_v62 = vrot.slane %v13132_v28, 7 }
 0x196   :  { %v9058_v50 = vsel %vm8576_vm5, %v610_v3, 0  ;;  %v612_v31 = vor.u32 %v611_v60, %v13379_v51  ;;  %v13381_v60 = vshrl.u32 %v8444_v15, 16 }
 0x197   :  { %v403_v51 = vor.u32 %v13133_v13, %v400_v62  ;;  %v13384_v62 = vshrl.u32 %v8464_v55, 16 }
 0x198   :  { %v9075_v3 = vsel %vm8576_vm5, %v612_v31, 0  ;;  %v614_v38 = vor.u32 %v613_v25, %v13381_v60  ;;  %v7719_v25 = vld [vmem:[%s13018_s3 + $0x178] sm:$0xff]  }
 0x199   :  { %1706 = vmatmul.mubr.bf16.gmra.mrb[44].mxu0 %v9044_v63  ;;  %v9096_v28 = vsel %vm8085_vm2, 0, %v403_v51  ;;  %v13385_v51 = vshll.u32 %v8508_v1, 16 }
 0x19a   :  { %1713 = vmatprep.mubr.bf16.mxu0 %v8459_v9  ;;  %v9090_v31 = vsel %vm8576_vm5, %v614_v38, 0  ;;  %13383 = vst [vmem:[#allocation40_spill] sm:$0xff] %v9096_v28  ;;  %1905 = vmatpush1.bf16.msra.mxu0 %v7719_v25 }
 0x19b   :  { %2163 = vmatprep.subr.bf16.mxu0 %v13353_v42 }
 0x1a1   :  { %1714 = vmatmul.mubr.bf16.gmra.mrb[48].mxu0 %v9058_v50 }
 0x1a2   :  { %1721 = vmatprep.mubr.bf16.mxu0 %v8480_v30  ;;  %v615_v30 = vrot.slane %v13382_v5, 1  ;;  %v619_v5 = vrot.slane %v13385_v51, 1 }
 0x1a4   :  { %v616_v60 = vor.u32 %v615_v30, %v13384_v62  ;;  %v13386_v30 = vshrl.u32 %v8508_v1, 16 }
 0x1a6   :  { %v9108_v38 = vsel %vm8576_vm5, %v616_v60, 0  ;;  %v620_v25 = vor.u32 %v619_v5, %v13386_v30  ;;  %v13387_v60 = vshll.u32 %v8521_v12, 16  ;;  %v13389_v5 = vshll.u32 %v8550_v33, 16 }
 0x1a8   :  { %v9120_v62 = vsel %vm8576_vm5, %v620_v25, 0  ;;  %v621_v13 = vrot.slane %v13387_v60, 1  ;;  %v623_v30 = vrot.slane %v13389_v5, 1  ;;  %v13390_v25 = vshrl.u32 %v8550_v33, 16 }
 0x1a9   :  { %1722 = vmatmul.mubr.bf16.gmra.mrb[52].mxu0 %v9075_v3 }
 0x1aa   :  { %1729 = vmatprep.mubr.bf16.mxu0 %v8506_v19  ;;  %v624_v60 = vor.u32 %v623_v30, %v13390_v25  ;;  %v13393_v30 = vshll.u32 %v8611_v16, 16  ;;  %v13401_v19 = vld [vmem:[#allocation27_spill] sm:$0xff] }
 0x1ac   :  { %v627_v25 = vrot.slane %v13393_v30, 1 }
 0x1b1   :  { %1730 = vmatmul.mubr.bf16.gmra.mrb[56].mxu0 %v9090_v31 }
 0x1b2   :  { %1737 = vmatprep.mubr.bf16.mxu0 %v9096_v28 }
 0x1b9   :  { %1738 = vmatmul.mubr.bf16.gmra.mrb[60].mxu0 %v9108_v38 }
 0x1ba   :  { %1745 = vmatprep.mubr.bf16.mxu0 %v8548_v21  ;;  %v13388_v21 = vshrl.u32 %v8521_v12, 16 }
 0x1bc   :  { %v622_v51 = vor.u32 %v621_v13, %v13388_v21  ;;  %v13391_v13 = vshll.u32 %v8574_v53, 16 }
 0x1be   :  { %v625_v21 = vrot.slane %v13391_v13, 1 }
 0x1c1   :  { %1746 = vmatmul.mubr.bf16.gmra.mrb[64].mxu0 %v8880_v43  ;;  %v13406_v43 = vld [vmem:[#allocation29_spill] sm:$0xff] }
 0x1c2   :  { %1753 = vmatprep.mubr.bf16.mxu0 %v8571_v32  ;;  %v9130_v32 = vsel %vm8576_vm5, %v622_v51, 0  ;;  %v13392_v51 = vshrl.u32 %v8574_v53, 16 }
 0x1c4   :  { %v626_v5 = vor.u32 %v625_v21, %v13392_v51  ;;  %v13395_v21 = vshll.u32 %v8630_v11, 16 }
 0x1c6   :  { %v629_v51 = vrot.slane %v13395_v21, 1  ;;  %v13399_v21 = vshrl.u32 %v8659_v24, 16 }
 0x1c9   :  { %1754 = vmatmul.mubr.bf16.gmra.mrb[68].mxu0 %v9120_v62 }
 0x1ca   :  { %1761 = vmatprep.mubr.bf16.mxu0 %v8609_v47  ;;  %v9140_v47 = vsel %vm8576_vm5, %v624_v60, 0  ;;  %v13394_v60 = vshrl.u32 %v8611_v16, 16 }
 0x1cc   :  { %v628_v13 = vor.u32 %v627_v25, %v13394_v60  ;;  %v13397_v25 = vshll.u32 %v8659_v24, 16 }
 0x1ce   :  { %v631_v60 = vrot.slane %v13397_v25, 1  ;;  %v13404_v25 = vshrl.u32 %v13401_v19, 16 }
 0x1d0   :  { %v632_v28 = vor.u32 %v631_v60, %v13399_v21  ;;  %v13407_v60 = vshll.u32 %v13406_v43, 16 }
 0x1d1   :  { %1762 = vmatmul.mubr.bf16.gmra.mrb[72].mxu0 %v9130_v32 }
 0x1d2   :  { %1769 = vmatprep.mubr.bf16.mxu0 %v8628_v2  ;;  %v9150_v2 = vsel %vm8576_vm5, %v626_v5, 0  ;;  %v13396_v5 = vshrl.u32 %v8630_v11, 16  ;;  %v635_v21 = vrot.slane %v13407_v60, 1 }
 0x1d4   :  { %v630_v30 = vor.u32 %v629_v51, %v13396_v5  ;;  %v13402_v51 = vshll.u32 %v13401_v19, 16  ;;  %v13411_v19 = vld [vmem:[#allocation31_spill] sm:$0xff] }
 0x1d5   :  { %v13414_v60 = vshrl.u32 %v13411_v19, 16 }
 0x1d6   :  { %v633_v5 = vrot.slane %v13402_v51, 1  ;;  %v13409_v51 = vshrl.u32 %v13406_v43, 16  ;;  %v13416_v43 = vld [vmem:[#allocation33_spill] sm:$0xff] }
 0x1d8   :  { %v634_v9 = vor.u32 %v633_v5, %v13404_v25  ;;  %v636_v24 = vor.u32 %v635_v21, %v13409_v51  ;;  %v13412_v5 = vshll.u32 %v13411_v19, 16  ;;  %v13417_v21 = vshll.u32 %v13416_v43, 16 }
 0x1d9   :  { %1770 = vmatmul.mubr.bf16.gmra.mrb[76].mxu0 %v9140_v47 }
 0x1da   :  { %1777 = vmatprep.mubr.bf16.mxu0 %v8657_v40  ;;  %v9160_v40 = vsel %vm8576_vm5, %v628_v13, 0  ;;  %v13398_v13 = vld [vmem:[#allocation30_spill] sm:$0xff]  ;;  %v637_v25 = vrot.slane %v13412_v5, 1  ;;  %v639_v51 = vrot.slane %v13417_v21, 1 }
 0x1e1   :  { %1778 = vmatmul.mubr.bf16.gmra.mrb[80].mxu0 %v9150_v2 }
 0x1e2   :  { %1785 = vmatprep.mubr.bf16.mxu0 %v8676_v4  ;;  %v9170_v4 = vsel %vm8576_vm5, %v630_v30, 0  ;;  %v13403_v30 = vld [vmem:[#allocation32_spill] sm:$0xff] }
 0x1e9   :  { %1786 = vmatmul.mubr.bf16.gmra.mrb[84].mxu0 %v9160_v40 }
 0x1ea   :  { %1793 = vmatprep.mubr.bf16.mxu0 %v8705_v10  ;;  %v9180_v10 = vsel %vm8576_vm5, %v632_v28, 0  ;;  %v13408_v28 = vld [vmem:[#allocation34_spill] sm:$0xff] }
 0x1eb   :  { %13400 = vst [vmem:[#allocation41_spill] sm:$0xff] %v9180_v10 }
 0x1f1   :  { %1794 = vmatmul.mubr.bf16.gmra.mrb[88].mxu0 %v9170_v4 }
 0x1f2   :  { %1801 = vmatprep.mubr.bf16.mxu0 %v13398_v13  ;;  %v9190_v13 = vsel %vm8576_vm5, %v634_v9, 0  ;;  %v13413_v9 = vld [vmem:[#allocation36_spill] sm:$0xff] }
 0x1f3   :  { %13405 = vst [vmem:[#allocation42_spill] sm:$0xff] %v9190_v13 }
 0x1f9   :  { %1802 = vmatmul.mubr.bf16.gmra.mrb[92].mxu0 %v9180_v10  ;;  %v638_v10 = vor.u32 %v637_v25, %v13414_v60  ;;  %v110_v25 = vld [vmem:[%s13019_s0 + $0x1f8] sm:$0xff]  ;;  %v13419_v60 = vld [vmem:[#allocation35_spill] sm:$0xff] }
 0x1fa   :  { %1809 = vmatprep.mubr.bf16.mxu0 %v13403_v30  ;;  %v9200_v30 = vsel %vm8576_vm5, %v636_v24, 0  ;;  %v13418_v24 = vshrl.u32 %v13416_v43, 16  ;;  %v13420_v21 = vshll.u32 %v13419_v60, 16  ;;  %v181_v43 = vmul.f32 %v8752_v39, %v110_v25 }
 0x1fb   :  { %13410 = vst [vmem:[#allocation43_spill] sm:$0xff] %v9200_v30 }
 0x1fc   :  { %v640_v5 = vor.u32 %v639_v51, %v13418_v24  ;;  %v641_v19 = vrot.slane %v13420_v21, 1  ;;  %v13421_v51 = vshrl.u32 %v13419_v60, 16  ;;  %v13422_v21 = vshll.u32 %v8811_v46, 16 }
 0x1fe   :  { %v642_v24 = vor.u32 %v641_v19, %v13421_v51  ;;  %v13425_v51 = vshrl.u32 %v8835_v56, 16 }
 0x201   :  { %1810 = vmatmul.mubr.bf16.gmra.mrb[96].mxu0 %v9190_v13 }
 0x202   :  { %1817 = vmatprep.mubr.bf16.mxu0 %v13408_v28  ;;  %v9210_v28 = vsel %vm8576_vm5, %v638_v10, 0  ;;  %v9226_v10 = vsel %vm8576_vm5, %v640_v5, 0  ;;  %v9240_v5 = vsel %vm8576_vm5, %v642_v24, 0 }
 0x203   :  { %13415 = vst [vmem:[#allocation44_spill] sm:$0xff] %v9210_v28 }
 0x209   :  { %1818 = vmatmul.mubr.bf16.gmra.mrb[100].mxu0 %v9200_v30  ;;  %v252_v30 = vadd.f32 %v8768_v37, %v181_v43  ;;  %v13424_v43 = vshll.u32 %v8835_v56, 16 }
 0x20a   :  { %1825 = vmatprep.mubr.bf16.mxu0 %v13413_v9  ;;  %v109_v9 = vld [vmem:[%s13019_s0 + $0x1f0] sm:$0xff] }
 0x20b   :  { %v645_v25 = vrot.slane %v13424_v43, 1 }
 0x20d   :  { %v646_v24 = vor.u32 %v645_v25, %v13425_v51  ;;  %v13428_v25 = vshrl.u32 %v8853_v29, 16 }
 0x211   :  { %1826 = vmatmul.mubr.bf16.gmra.mrb[104].mxu0 %v9210_v28 }
 0x212   :  { %1833 = vmatprep.mubr.bf16.mxu0 %v8830_v14  ;;  %v180_v14 = vmul.f32 %v8752_v39, %v109_v9  ;;  %v643_v9 = vrot.slane %v13422_v21, 1  ;;  %v13423_v39 = vshrl.u32 %v8811_v46, 16 }
 0x214   :  { %v251_v28 = vadd.f32 %v8768_v37, %v180_v14  ;;  %v644_v19 = vor.u32 %v643_v9, %v13423_v39  ;;  %v9268_v9 = vsel %vm8576_vm5, %v646_v24, 0  ;;  %v13426_v39 = vshll.u32 %v8853_v29, 16  ;;  %v7720_v24 = vld [vmem:[%s13018_s3 + $0x180] sm:$0xff]  }
 0x216   :  { %v9244_v13 = vpack.c.bf16 %v252_v30, %v251_v28  ;;  %v9253_v37 = vsel %vm8576_vm5, %v644_v19, 0  ;;  %v647_v19 = vrot.slane %v13426_v39, 1  ;;  %v13429_v39 = vld [vmem:[#allocation3_spill] sm:$0xff] }
 0x218   :  { %v13160_v14 = vshrl.u32 %v9244_v13, 16  ;;  %v13161_v28 = vshll.u32 %v9244_v13, 16  ;;  %v648_v51 = vor.u32 %v647_v19, %v13428_v25  ;;  %v7725_v19 = vld [vmem:[%s13018_s3 + $0x1a8] sm:$0xff]   ;;  %v7726_v25 = vld [vmem:[%s13018_s3 + $0x1b0] sm:$0xff]  }
 0x219   :  { %1834 = vmatmul.mubr.bf16.gmra.mrb[108].mxu0 %v9226_v10 }
 0x21a   :  { %1841 = vmatprep.mubr.bf16.mxu0 %v8848_v48  ;;  %v512_v30 = vrot.slane %v13160_v14, 7  ;;  %v7738_v14 = vld [vmem:[%s13018_s3 + $0x218] sm:$0xff]  }
 0x21c   :  { %v515_v21 = vor.u32 %v13161_v28, %v512_v30  ;;  %v9282_v30 = vsel %vm8576_vm5, %v648_v51, 0  ;;  %v7727_v51 = vld [vmem:[%s13018_s3 + $0x1b8] sm:$0xff]   ;;  %v7739_v28 = vld [vmem:[%s13018_s3 + $0x220] sm:$0xff]  }
 0x21e   :  { %v9274_v43 = vsel %vm8085_vm2, 0, %v515_v21  ;;  %v7721_v21 = vld [vmem:[%s13018_s3 + $0x188] sm:$0xff]  }
 0x21f   :  { %13427 = vst [vmem:[#allocation35_spill] sm:$0xff] %v9274_v43 }
 0x221   :  { %1842 = vmatmul.mubr.bf16.gmra.mrb[112].mxu0 %v9240_v5 }
 0x222   :  { %1849 = vmatprep.mubr.bf16.mxu0 %v8862_v59 }
 0x229   :  { %1850 = vmatmul.mubr.bf16.gmra.mrb[116].mxu0 %v9253_v37 }
 0x22a   :  { %1857 = vmatprep.mubr.bf16.mxu0 %v8873_v18 }
 0x231   :  { %1858 = vmatmul.mubr.bf16.gmra.mrb[120].mxu0 %v9268_v9 }
 0x232   :  { %1865 = vmatprep.mubr.bf16.mxu0 %v9274_v43  ;;  %v7740_v43 = vld [vmem:[%s13018_s3 + $0x1f8] sm:$0xff]  }
 0x239   :  { %1866 = vmatmul.mubr.bf16.gmra.mrb[124].mxu0 %v9282_v30 }
 0x23a   :  { %1906 = vmatprep.mubr.bf16.mxu0 %v8897_v22  ;;  %v7722_v22 = vld [vmem:[%s13018_s3 + $0x190] sm:$0xff]  }
 0x241   :  { %1907 = vmatmul.mubr.bf16.vlgmr.msra.gmra.mrb[0].mxu0 %v8066_v27  ;;  %v7723_v27 = vld [vmem:[%s13018_s3 + $0x198] sm:$0xff]  }
 0x242   :  { %2164 = vmatpush1.bf16.msra.mxu0 %v7720_v24  ;;  %1914 = vmatprep.mubr.bf16.mxu0 %v8586_v44  ;;  %v7724_v44 = vld [vmem:[%s13018_s3 + $0x1a0] sm:$0xff]  }
 0x243   :  { %2165 = vmatprep.subr.bf16.mxu0 %v13353_v42  ;;  %v7728_v24 = vld [vmem:[%s13018_s3 + $0x1c0] sm:$0xff]  }
 0x246   :  { %2166 = vmatpush1.bf16.msra.mxu0 %v7721_v21  ;;  %v7729_v21 = vld [vmem:[%s13018_s3 + $0x1c8] sm:$0xff]  }
 0x247   :  { %2167 = vmatprep.subr.bf16.mxu0 %v13353_v42 }
 0x249   :  { %1915 = vmatmul.mubr.bf16.gmra.mrb[4].mxu0 %v13429_v39 }
 0x24a   :  { %1922 = vmatprep.mubr.bf16.mxu0 %v8925_v26  ;;  %2168 = vmatpush1.bf16.msra.mxu0 %v7722_v22  ;;  %v7730_v22 = vld [vmem:[%s13018_s3 + $0x1d0] sm:$0xff]  }
 0x24b   :  { %2169 = vmatprep.subr.bf16.mxu0 %v13353_v42 }
 0x24e   :  { %2170 = vmatpush1.bf16.msra.mxu0 %v7723_v27  ;;  %v7731_v27 = vld [vmem:[%s13018_s3 + $0x1d8] sm:$0xff]  }
 0x24f   :  { %2171 = vmatprep.subr.bf16.mxu0 %v13353_v42 }
 0x251   :  { %1923 = vmatmul.mubr.bf16.gmra.mrb[8].mxu0 %v8129_v54 }
 0x252   :  { %1930 = vmatprep.mubr.bf16.mxu0 %v8943_v0  ;;  %2172 = vmatpush1.bf16.msra.mxu0 %v7724_v44  ;;  %v7732_v44 = vld [vmem:[%s13018_s3 + $0x1e0] sm:$0xff]  }
 0x253   :  { %2173 = vmatprep.subr.bf16.mxu0 %v13353_v42 }
 0x256   :  { %2174 = vmatpush1.bf16.msra.mxu0 %v7725_v19  ;;  %v13430_v19 = vld [vmem:[#allocation39_spill] sm:$0xff] }
 0x257   :  { %2175 = vmatprep.subr.bf16.mxu0 %v13353_v42 }
 0x259   :  { %1931 = vmatmul.mubr.bf16.gmra.mrb[12].mxu0 %v8164_v6 }
 0x25a   :  { %1938 = vmatprep.mubr.bf16.mxu0 %v8961_v34  ;;  %2176 = vmatpush1.bf16.msra.mxu0 %v7726_v25  ;;  %v13431_v25 = vld [vmem:[#allocation12_spill] sm:$0xff] }
 0x25b   :  { %2177 = vmatprep.subr.bf16.mxu0 %v13353_v42 }
 0x25e   :  { %2178 = vmatpush1.bf16.msra.mxu0 %v7727_v51  ;;  %v13432_v51 = vld [vmem:[#allocation13_spill] sm:$0xff] }
 0x25f   :  { %2179 = vmatprep.subr.bf16.mxu0 %v13353_v42 }
 0x261   :  { %1939 = vmatmul.mubr.bf16.gmra.mrb[16].mxu0 %v8195_v23 }
 0x262   :  { %1946 = vmatprep.mubr.bf16.mxu0 %v8976_v20  ;;  %2180 = vmatpush1.bf16.msra.mxu0 %v7728_v24  ;;  %v7733_v24 = vld [vmem:[%s13018_s3 + $0x1e8] sm:$0xff]  }
 0x263   :  { %2181 = vmatprep.subr.bf16.mxu0 %v13353_v42 }
 0x266   :  { %2182 = vmatpush1.bf16.msra.mxu0 %v7729_v21  ;;  %v7734_v21 = vld [vmem:[%s13018_s3 + $0x200] sm:$0xff]  }
 0x267   :  { %2183 = vmatprep.subr.bf16.mxu0 %v13353_v42  ;;  %6699 = vmatprep.subr.bf16.mxu1 %v7734_v21 }
 0x268   :  { %6700 = vmatpush3.bf16.msra.mxu1 %v7734_v21 }
 0x269   :  { %1947 = vmatmul.mubr.bf16.gmra.mrb[20].mxu0 %v8226_v41 }
 0x26a   :  { %1954 = vmatprep.mubr.bf16.mxu0 %v8990_v58  ;;  %2184 = vmatpush1.bf16.msra.mxu0 %v7730_v22  ;;  %v7736_v22 = vld [vmem:[%s13018_s3 + $0x208] sm:$0xff]  }
 0x26b   :  { %2185 = vmatprep.subr.bf16.mxu0 %v13353_v42  ;;  %6701 = vmatprep.subr.bf16.mxu1 %v7736_v22 }
 0x26c   :  { %6702 = vmatpush3.bf16.msra.mxu1 %v7736_v22  ;;  %v13434_v22 = vshrl.u32 %v9062_v8, 16 }
 0x26e   :  { %2186 = vmatpush1.bf16.msra.mxu0 %v7731_v27  ;;  %v7735_v27 = vld [vmem:[%s13018_s3 + $0x1f0] sm:$0xff]  }
 0x26f   :  { %2187 = vmatprep.subr.bf16.mxu0 %v13353_v42 }
 0x271   :  { %1955 = vmatmul.mubr.bf16.gmra.mrb[24].mxu0 %v8258_v61 }
 0x272   :  { %1962 = vmatprep.mubr.bf16.mxu0 %v9000_v52  ;;  %2188 = vmatpush1.bf16.msra.mxu0 %v7732_v44  ;;  %v7737_v44 = vld [vmem:[%s13018_s3 + $0x210] sm:$0xff]  }
 0x273   :  { %2189 = vmatprep.subr.bf16.mxu0 %v13353_v42  ;;  %6703 = vmatprep.subr.bf16.mxu1 %v7737_v44 }
 0x274   :  { %6704 = vmatpush3.bf16.msra.mxu1 %v7737_v44 }
 0x275   :  { %6705 = vmatprep.subr.bf16.mxu1 %v7738_v14 }
 0x276   :  { %2190 = vmatpush1.bf16.msra.mxu0 %v7733_v24  ;;  %v13433_v24 = vshll.u32 %v9062_v8, 16 }
 0x277   :  { %2191 = vmatprep.subr.bf16.mxu0 %v13353_v42 }
 0x278   :  { %v617_v21 = vrot.slane %v13433_v24, 1  ;;  %6706 = vmatpush3.bf16.msra.mxu1 %v7738_v14  ;;  %v7741_v24 = vld [vmem:[%s13018_s3 + $0x228] sm:$0xff]   ;;  %v7742_v14 = vld [vmem:[%s13018_s3 + $0x230] sm:$0xff]  }
 0x279   :  { %1963 = vmatmul.mubr.bf16.gmra.mrb[28].mxu0 %v8288_v17  ;;  %6707 = vmatprep.subr.bf16.mxu1 %v7739_v28 }
 0x27a   :  { %1970 = vmatprep.mubr.bf16.mxu0 %v9014_v35  ;;  %2192 = vmatpush1.bf16.msra.mxu0 %v7735_v27  ;;  %v618_v27 = vor.u32 %v617_v21, %v13434_v22  ;;  %v13453_v21 = vld [vmem:[#allocation11_spill] sm:$0xff]  ;;  %v13454_v22 = vld [vmem:[#allocation14_spill] sm:$0xff] }
 0x27b   :  { %2193 = vmatprep.subr.bf16.mxu0 %v13353_v42 }
 0x27c   :  { %6708 = vmatpush3.bf16.msra.mxu1 %v7739_v28  ;;  %v703_v44 = vsel %vm8576_vm5, %v618_v27, 0  ;;  %v7743_v28 = vld [vmem:[%s13018_s3 + $0x238] sm:$0xff]   ;;  %v13455_v27 = vld [vmem:[#allocation15_spill] sm:$0xff] }
 0x27d   :  { %6709 = vmatprep.subr.bf16.mxu1 %v7741_v24 }
 0x27e   :  { %2194 = vmatpush1.bf16.msra.mxu0 %v7740_v43  ;;  %v13449_v43 = vld [vmem:[#allocation7_spill] sm:$0xff] }
 0x280   :  { %6710 = vmatpush3.bf16.msra.mxu1 %v7741_v24 }
 0x281   :  { %1971 = vmatmul.mubr.bf16.gmra.mrb[32].mxu0 %v8316_v45  ;;  %6711 = vmatprep.subr.bf16.mxu1 %v7742_v14 }
 0x282   :  { %1978 = vmatprep.mubr.bf16.mxu0 %v13430_v19 }
 0x284   :  { %6712 = vmatpush3.bf16.msra.mxu1 %v7742_v14  ;;  %v13457_v14 = vld [vmem:[#allocation17_spill] sm:$0xff] }
 0x285   :  { %6713 = vmatprep.subr.bf16.mxu1 %v7743_v28 }
 0x288   :  { %6714 = vmatpush3.bf16.msra.mxu1 %v7743_v28 }
 0x289   :  { %1979 = vmatmul.mubr.bf16.gmra.mrb[36].mxu0 %v13431_v25  ;;  %4106 = vmatprep.subr.bf16.mxu1 %v13353_v42 }
 0x28a   :  { %1986 = vmatprep.mubr.bf16.mxu0 %v9044_v63 }
 0x28b   :  { %6716 = vmatmul.mubr.bf16.vlgmr.msra.gmra.mrb[0].mxu1 %v8925_v26  ;;  %v13436_v26 = vld [vmem:[#allocation25_spill] sm:$0xff] }
 0x28c   :  { %6719 = vmatprep.mubr.bf16.mxu1 %v8943_v0  ;;  %v13437_v0 = vld [vmem:[#allocation42_spill] sm:$0xff] }
 0x291   :  { %1987 = vmatmul.mubr.bf16.gmra.mrb[40].mxu0 %v13432_v51 }
 0x292   :  { %1994 = vmatprep.mubr.bf16.mxu0 %v9058_v50 }
 0x293   :  { %6720 = vmatmul.mubr.bf16.gmra.mrb[4].mxu1 %v8961_v34  ;;  %v13438_v34 = vld [vmem:[#allocation38_spill] sm:$0xff] }
 0x294   :  { %6723 = vmatprep.mubr.bf16.mxu1 %v8976_v20  ;;  %v13439_v20 = vld [vmem:[#allocation27_spill] sm:$0xff] }
 0x299   :  { %1995 = vmatmul.mubr.bf16.gmra.mrb[44].mxu0 %v8391_v7 }
 0x29a   :  { %2002 = vmatprep.mubr.bf16.mxu0 %v9075_v3 }
 0x29b   :  { %6724 = vmatmul.mubr.bf16.gmra.mrb[8].mxu1 %v8990_v58  ;;  %v13440_v58 = vld [vmem:[#allocation43_spill] sm:$0xff] }
 0x29c   :  { %6727 = vmatprep.mubr.bf16.mxu1 %v9000_v52  ;;  %v13441_v52 = vld [vmem:[#allocation29_spill] sm:$0xff] }
 0x2a1   :  { %2003 = vmatmul.mubr.bf16.gmra.mrb[48].mxu0 %v8420_v57 }
 0x2a2   :  { %2010 = vmatprep.mubr.bf16.mxu0 %v9090_v31 }
 0x2a3   :  { %6728 = vmatmul.mubr.bf16.gmra.mrb[12].mxu1 %v9014_v35  ;;  %v13442_v35 = vld [vmem:[#allocation44_spill] sm:$0xff] }
 0x2a4   :  { %6731 = vmatprep.mubr.bf16.mxu1 %v13430_v19  ;;  %v13452_v19 = vld [vmem:[#allocation10_spill] sm:$0xff] }
 0x2a9   :  { %2011 = vmatmul.mubr.bf16.gmra.mrb[52].mxu0 %v8444_v15 }
 0x2aa   :  { %2018 = vmatprep.mubr.bf16.mxu0 %v9108_v38 }
 0x2ab   :  { %6732 = vmatmul.mubr.bf16.gmra.mrb[16].mxu1 %v9044_v63  ;;  %v13443_v63 = vld [vmem:[#allocation31_spill] sm:$0xff] }
 0x2ac   :  { %6735 = vmatprep.mubr.bf16.mxu1 %v9058_v50 }
 0x2b1   :  { %2019 = vmatmul.mubr.bf16.gmra.mrb[56].mxu0 %v8464_v55 }
 0x2b2   :  { %2026 = vmatprep.mubr.bf16.mxu0 %v703_v44 }
 0x2b3   :  { %6736 = vmatmul.mubr.bf16.gmra.mrb[20].mxu1 %v9075_v3 }
 0x2b4   :  { %6739 = vmatprep.mubr.bf16.mxu1 %v9090_v31  ;;  %v7745_v31 = vld [vmem:[%s13022_s7 + $0x8] sm:$0xff]  }
 0x2b9   :  { %2027 = vmatmul.mubr.bf16.gmra.mrb[60].mxu0 %v9062_v8 }
 0x2ba   :  { %2034 = vmatprep.mubr.bf16.mxu0 %v9120_v62  ;;  %v7747_v62 = vld [vmem:[%s13022_s7 + $0x18] sm:$0xff]  }
 0x2bb   :  { %6740 = vmatmul.mubr.bf16.gmra.mrb[24].mxu1 %v9108_v38  ;;  %v7746_v38 = vld [vmem:[%s13022_s7 + $0x10] sm:$0xff]  }
 0x2bc   :  { %6743 = vmatprep.mubr.bf16.mxu1 %v703_v44  ;;  %v13456_v44 = vld [vmem:[#allocation16_spill] sm:$0xff] }
 0x2c1   :  { %2035 = vmatmul.mubr.bf16.gmra.mrb[64].mxu0 %v8508_v1  ;;  %v13435_v1 = vld [vmem:[#allocation41_spill] sm:$0xff] }
 0x2c2   :  { %2042 = vmatprep.mubr.bf16.mxu0 %v9130_v32 }
 0x2c3   :  { %6744 = vmatmul.mubr.bf16.gmra.mrb[28].mxu1 %v13438_v34 }
 0x2c4   :  { %6747 = vmatprep.mubr.bf16.mxu1 %v9130_v32  ;;  %v13444_v32 = vld [vmem:[#allocation33_spill] sm:$0xff] }
 0x2c9   :  { %2043 = vmatmul.mubr.bf16.gmra.mrb[68].mxu0 %v8521_v12 }
 0x2ca   :  { %2050 = vmatprep.mubr.bf16.mxu0 %v9140_v47 }
 0x2cb   :  { %6748 = vmatmul.mubr.bf16.gmra.mrb[32].mxu1 %v9140_v47  ;;  %v13445_v47 = vshll.u32 %v9244_v13, 16 }
 0x2cc   :  { %6751 = vmatprep.mubr.bf16.mxu1 %v9150_v2 }
 0x2d1   :  { %2051 = vmatmul.mubr.bf16.gmra.mrb[72].mxu0 %v8550_v33 }
 0x2d2   :  { %2058 = vmatprep.mubr.bf16.mxu0 %v9150_v2  ;;  %v649_v2 = vrot.slane %v13445_v47, 1  ;;  %v13459_v47 = vld [vmem:[#allocation19_spill] sm:$0xff] }
 0x2d3   :  { %6752 = vmatmul.mubr.bf16.gmra.mrb[36].mxu1 %v9160_v40 }
 0x2d4   :  { %6755 = vmatprep.mubr.bf16.mxu1 %v9170_v4 }
 0x2d9   :  { %2059 = vmatmul.mubr.bf16.gmra.mrb[76].mxu0 %v8574_v53 }
 0x2da   :  { %2066 = vmatprep.mubr.bf16.mxu0 %v9160_v40  ;;  %v7744_v40 = vld [vmem:[%s13022_s7] sm:$0xff]  }
 0x2db   :  { %6756 = vmatmul.mubr.bf16.gmra.mrb[40].mxu1 %v13435_v1 }
 0x2dc   :  { %6759 = vmatprep.mubr.bf16.mxu1 %v13437_v0  ;;  %4107 = vmatpush1.bf16.msra.mxu1 %v7744_v40 }
 0x2dd   :  { %4108 = vmatprep.subr.bf16.mxu1 %v13353_v42 }
 0x2e0   :  { %4109 = vmatpush1.bf16.msra.mxu1 %v7745_v31  ;;  %v13461_v31 = vld [vmem:[#allocation20_spill] sm:$0xff] }
 0x2e1   :  { %2067 = vmatmul.mubr.bf16.gmra.mrb[80].mxu0 %v8611_v16  ;;  %4110 = vmatprep.subr.bf16.mxu1 %v13353_v42 }
 0x2e2   :  { %2074 = vmatprep.mubr.bf16.mxu0 %v9170_v4  ;;  %v13446_v4 = vshrl.u32 %v9244_v13, 16 }
 0x2e3   :  { %6760 = vmatmul.mubr.bf16.gmra.mrb[44].mxu1 %v13440_v58 }
 0x2e4   :  { %6763 = vmatprep.mubr.bf16.mxu1 %v13442_v35  ;;  %v650_v50 = vor.u32 %v649_v2, %v13446_v4  ;;  %4111 = vmatpush1.bf16.msra.mxu1 %v7746_v38  ;;  %v13460_v2 = vld [vmem:[#allocation4_spill] sm:$0xff]  ;;  %v7764_v38 = vld [vmem:[%s13022_s7 + $0x218] sm:$0xff]  }
 0x2e5   :  { %4112 = vmatprep.subr.bf16.mxu1 %v13353_v42 }
 0x2e6   :  { %v719_v3 = vsel %vm8576_vm5, %v650_v50, 0  ;;  %v7762_v50 = vld [vmem:[%s13022_s7 + $0x208] sm:$0xff]  }
 0x2e8   :  { %4113 = vmatpush1.bf16.msra.mxu1 %v7747_v62  ;;  %v7765_v62 = vld [vmem:[%s13022_s7 + $0x220] sm:$0xff]  }
 0x2e9   :  { %2075 = vmatmul.mubr.bf16.gmra.mrb[84].mxu0 %v8630_v11  ;;  %4114 = vmatprep.subr.bf16.mxu1 %v13353_v42 }
 0x2ea   :  { %2082 = vmatprep.mubr.bf16.mxu0 %v13435_v1 }
 0x2eb   :  { %6764 = vmatmul.mubr.bf16.gmra.mrb[48].mxu1 %v9226_v10 }
 0x2ec   :  { %6767 = vmatprep.mubr.bf16.mxu1 %v9240_v5 }
 0x2f1   :  { %2083 = vmatmul.mubr.bf16.gmra.mrb[88].mxu0 %v13436_v26 }
 0x2f2   :  { %2090 = vmatprep.mubr.bf16.mxu0 %v13437_v0 }
 0x2f3   :  { %6768 = vmatmul.mubr.bf16.gmra.mrb[52].mxu1 %v9253_v37 }
 0x2f4   :  { %6771 = vmatprep.mubr.bf16.mxu1 %v9268_v9 }
 0x2f9   :  { %2091 = vmatmul.mubr.bf16.gmra.mrb[92].mxu0 %v13439_v20 }
 0x2fa   :  { %2098 = vmatprep.mubr.bf16.mxu0 %v13440_v58  ;;  %v7759_v58 = vld [vmem:[%s13022_s7 + $0x78] sm:$0xff]  }
 0x2fb   :  { %6772 = vmatmul.mubr.bf16.gmra.mrb[56].mxu1 %v9282_v30 }
 0x2fc   :  { %6775 = vmatprep.mubr.bf16.mxu1 %v719_v3 }
 0x301   :  { %2099 = vmatmul.mubr.bf16.gmra.mrb[96].mxu0 %v13441_v52 }
 0x302   :  { %2106 = vmatprep.mubr.bf16.mxu0 %v13442_v35 }
 0x303   :  { %6776 = vmatmul.mubr.bf16.gmra.mrb[60].mxu1 %v13438_v34 }
 0x304   :  { %4138 = vmatprep.mubr.bf16.mxu1 %v13353_v42 }
 0x309   :  { %2107 = vmatmul.mubr.bf16.gmra.mrb[100].mxu0 %v13443_v63 }
 0x30a   :  { %2114 = vmatprep.mubr.bf16.mxu0 %v9226_v10  ;;  %v13447_v10 = vld [vmem:[#allocation5_spill] sm:$0xff] }
 0x311   :  { %2115 = vmatmul.mubr.bf16.gmra.mrb[104].mxu0 %v13444_v32 }
 0x312   :  { %2122 = vmatprep.mubr.bf16.mxu0 %v9240_v5  ;;  %v7748_v5 = vld [vmem:[%s13022_s7 + $0x20] sm:$0xff]  }
 0x313   :  { %4115 = vmatpush1.bf16.msra.mxu1 %v7748_v5  ;;  %v13462_v5 = vld [vmem:[#allocation40_spill] sm:$0xff] }
 0x314   :  { %4116 = vmatprep.subr.bf16.mxu1 %v13353_v42 }
 0x319   :  { %2123 = vmatmul.mubr.bf16.gmra.mrb[108].mxu0 %v13419_v60 }
 0x31a   :  { %2130 = vmatprep.mubr.bf16.mxu0 %v9253_v37  ;;  %v13448_v37 = vld [vmem:[#allocation6_spill] sm:$0xff] }
 0x321   :  { %2131 = vmatmul.mubr.bf16.gmra.mrb[112].mxu0 %v8811_v46 }
 0x322   :  { %2138 = vmatprep.mubr.bf16.mxu0 %v9268_v9  ;;  %v7749_v9 = vld [vmem:[%s13022_s7 + $0x28] sm:$0xff]  }
 0x323   :  { %4117 = vmatpush1.bf16.msra.mxu1 %v7749_v9 }
 0x324   :  { %4118 = vmatprep.subr.bf16.mxu1 %v13353_v42 }
 0x329   :  { %2139 = vmatmul.mubr.bf16.gmra.mrb[116].mxu0 %v8835_v56 }
 0x32a   :  { %2146 = vmatprep.mubr.bf16.mxu0 %v9282_v30  ;;  %v13450_v30 = vld [vmem:[#allocation8_spill] sm:$0xff] }
 0x331   :  { %2147 = vmatmul.mubr.bf16.gmra.mrb[120].mxu0 %v8853_v29 }
 0x332   :  { %2154 = vmatprep.mubr.bf16.mxu0 %v719_v3  ;;  %v7763_v3 = vld [vmem:[%s13022_s7 + $0x210] sm:$0xff]  }
 0x339   :  { %2155 = vmatmul.mubr.bf16.gmra.mrb[124].mxu0 %v9244_v13 }
 0x33a   :  { %2195 = vmatprep.mubr.bf16.mxu0 %v13429_v39  ;;  %v13451_v39 = vld [vmem:[#allocation9_spill] sm:$0xff] }
 0x341   :  { %2196 = vmatmul.mubr.bf16.vlgmr.msra.gmra.mrb[0].mxu0 %v13447_v10 }
 0x342   :  { %2203 = vmatprep.mubr.bf16.mxu0 %v8129_v54  ;;  %v7750_v54 = vld [vmem:[%s13022_s7 + $0x30] sm:$0xff]  }
 0x343   :  { %4119 = vmatpush1.bf16.msra.mxu1 %v7750_v54  ;;  %v7768_v54 = vld [vmem:[%s13022_s7 + $0x230] sm:$0xff]  }
 0x344   :  { %4120 = vmatprep.subr.bf16.mxu1 %v13353_v42 }
 0x349   :  { %2204 = vmatmul.mubr.bf16.gmra.mrb[4].mxu0 %v13448_v37 }
 0x34a   :  { %2211 = vmatprep.mubr.bf16.mxu0 %v8164_v6  ;;  %v7751_v6 = vld [vmem:[%s13022_s7 + $0x38] sm:$0xff]  }
 0x34b   :  { %4121 = vmatpush1.bf16.msra.mxu1 %v7751_v6  ;;  %v7769_v6 = vld [vmem:[%s13022_s7 + $0x238] sm:$0xff]  }
 0x34c   :  { %4122 = vmatprep.subr.bf16.mxu1 %v13353_v42 }
 0x351   :  { %2212 = vmatmul.mubr.bf16.gmra.mrb[8].mxu0 %v13449_v43  ;;  %v7767_v43 = vld [vmem:[%s13022_s7 + $0x228] sm:$0xff]  }
 0x352   :  { %2219 = vmatprep.mubr.bf16.mxu0 %v8195_v23  ;;  %v7752_v23 = vld [vmem:[%s13022_s7 + $0x40] sm:$0xff]  }
 0x353   :  { %4123 = vmatpush1.bf16.msra.mxu1 %v7752_v23  ;;  %v13463_v23 = vld [vmem:[#allocation21_spill] sm:$0xff] }
 0x354   :  { %4124 = vmatprep.subr.bf16.mxu1 %v13353_v42 }
 0x359   :  { %2220 = vmatmul.mubr.bf16.gmra.mrb[12].mxu0 %v13450_v30  ;;  %v7766_v30 = vld [vmem:[%s13022_s7 + $0x88] sm:$0xff]  }
 0x35a   :  { %2227 = vmatprep.mubr.bf16.mxu0 %v8226_v41  ;;  %v7753_v41 = vld [vmem:[%s13022_s7 + $0x48] sm:$0xff]  }
 0x35b   :  { %4125 = vmatpush1.bf16.msra.mxu1 %v7753_v41 }
 0x35c   :  { %4126 = vmatprep.subr.bf16.mxu1 %v13353_v42 }
 0x35e   :  { %v9554_v24 = vpop.f32.mrb[0].mxu1 }
 0x35f   :  { %v9557_v28 = vpop.f32.mrb[1].mxu1 }
 0x360   :  { %v9563_v1 = vpop.f32.mrb[2].mxu1 }
 0x361   :  { %2228 = vmatmul.mubr.bf16.gmra.mrb[16].mxu0 %v13451_v39  ;;  %v9565_v0 = vpop.f32.mrb[3].mxu1 }
 0x362   :  { %2235 = vmatprep.mubr.bf16.mxu0 %v8258_v61  ;;  %v7754_v61 = vld [vmem:[%s13022_s7 + $0x50] sm:$0xff]  }
 0x363   :  { %4127 = vmatpush1.bf16.msra.mxu1 %v7754_v61  ;;  %v13464_v61 = vld [vmem:[#allocation22_spill] sm:$0xff] }
 0x364   :  { %4128 = vmatprep.subr.bf16.mxu1 %v13353_v42 }
 0x366   :  { %v9577_v35 = vpop.f32.mrb[4].mxu1 }
 0x367   :  { %v9581_v40 = vpop.f32.mrb[5].mxu1 }
 0x369   :  { %2236 = vmatmul.mubr.bf16.gmra.mrb[20].mxu0 %v13452_v19 }
 0x36a   :  { %2243 = vmatprep.mubr.bf16.mxu0 %v8288_v17  ;;  %v7755_v17 = vld [vmem:[%s13022_s7 + $0x58] sm:$0xff]  }
 0x36b   :  { %4129 = vmatpush1.bf16.msra.mxu1 %v7755_v17  ;;  %v13465_v17 = vld [vmem:[#allocation23_spill] sm:$0xff] }
 0x36c   :  { %4130 = vmatprep.subr.bf16.mxu1 %v13353_v42 }
 0x371   :  { %2244 = vmatmul.mubr.bf16.gmra.mrb[24].mxu0 %v13453_v21  ;;  %v7770_v21 = vld [vmem:[%s13022_s7 + $0x90] sm:$0xff]  }
 0x372   :  { %2251 = vmatprep.mubr.bf16.mxu0 %v8316_v45  ;;  %v7756_v45 = vld [vmem:[%s13022_s7 + $0x60] sm:$0xff]  }
 0x373   :  { %4131 = vmatpush1.bf16.msra.mxu1 %v7756_v45 }
 0x374   :  { %4132 = vmatprep.subr.bf16.mxu1 %v13353_v42 }
 0x379   :  { %2252 = vmatmul.mubr.bf16.gmra.mrb[28].mxu0 %v13454_v22 }
 0x37a   :  { %2259 = vmatprep.mubr.bf16.mxu0 %v13431_v25  ;;  %v7757_v25 = vld [vmem:[%s13022_s7 + $0x68] sm:$0xff]  }
 0x37b   :  { %4133 = vmatpush1.bf16.msra.mxu1 %v7757_v25 }
 0x37c   :  { %4134 = vmatprep.subr.bf16.mxu1 %v13353_v42 }
 0x381   :  { %2260 = vmatmul.mubr.bf16.gmra.mrb[32].mxu0 %v13455_v27 }
 0x382   :  { %2267 = vmatprep.mubr.bf16.mxu0 %v13432_v51  ;;  %v7758_v51 = vld [vmem:[%s13022_s7 + $0x70] sm:$0xff]  }
 0x383   :  { %4135 = vmatpush1.bf16.msra.mxu1 %v7758_v51 }
 0x384   :  { %4136 = vmatprep.subr.bf16.mxu1 %v13353_v42 }
 0x387   :  { %4137 = vmatpush1.bf16.msra.mxu1 %v7759_v58  ;;  %v7772_v58 = vld [vmem:[%s13022_s7 + $0xa0] sm:$0xff]  }
 0x388   :  { %4395 = vmatprep.subr.bf16.mxu1 %v13353_v42 }
 0x389   :  { %2268 = vmatmul.mubr.bf16.gmra.mrb[36].mxu0 %v13456_v44  ;;  %v7771_v44 = vld [vmem:[%s13022_s7 + $0x98] sm:$0xff]  }
 0x38a   :  { %2275 = vmatprep.mubr.bf16.mxu0 %v8391_v7  ;;  %v13458_v7 = vld [vmem:[#allocation18_spill] sm:$0xff]  ;;  %4139 = vmatmul.mubr.bf16.vlgmr.msra.gmra.mrb[64].mxu1 %v13460_v2 }
 0x391   :  { %2276 = vmatmul.mubr.bf16.gmra.mrb[40].mxu0 %v13457_v14  ;;  %v13467_v14 = vld [vmem:[#allocation26_spill] sm:$0xff] }
 0x392   :  { %2283 = vmatprep.mubr.bf16.mxu0 %v8420_v57  ;;  %v7760_v57 = vld [vmem:[%s13022_s7 + $0x200] sm:$0xff]  }
 0x393   :  { %6779 = vmatprep.subr.bf16.mxu0 %v7760_v57 }
 0x394   :  { %6780 = vmatpush3.bf16.msra.mxu0 %v7760_v57 }
 0x395   :  { %6781 = vmatprep.subr.bf16.mxu0 %v7762_v50 }
 0x398   :  { %6782 = vmatpush3.bf16.msra.mxu0 %v7762_v50 }
 0x399   :  { %2284 = vmatmul.mubr.bf16.gmra.mrb[44].mxu0 %v13458_v7  ;;  %6783 = vmatprep.subr.bf16.mxu0 %v7763_v3 }
 0x39a   :  { %2291 = vmatprep.mubr.bf16.mxu0 %v8444_v15  ;;  %v9584_v15 = vpop.f32.mrb[6].mxu1 }
 0x39b   :  { %v9586_v4 = vpop.f32.mrb[7].mxu1 }
 0x39c   :  { %6784 = vmatpush3.bf16.msra.mxu0 %v7763_v3  ;;  %v9606_v10 = vpop.f32.mrb[8].mxu1 }
 0x39d   :  { %6785 = vmatprep.subr.bf16.mxu0 %v7764_v38 }
 0x3a0   :  { %6786 = vmatpush3.bf16.msra.mxu0 %v7764_v38  ;;  %v13471_v38 = vld [vmem:[#allocation34_spill] sm:$0xff] }
 0x3a1   :  { %2292 = vmatmul.mubr.bf16.gmra.mrb[48].mxu0 %v13459_v47  ;;  %6787 = vmatprep.subr.bf16.mxu0 %v7765_v62  ;;  %v13469_v47 = vld [vmem:[#allocation30_spill] sm:$0xff] }
 0x3a2   :  { %2299 = vmatprep.mubr.bf16.mxu0 %v8464_v55  ;;  %v7761_v55 = vld [vmem:[%s13022_s7 + $0x80] sm:$0xff]  }
 0x3a3   :  { %4396 = vmatpush1.bf16.msra.mxu1 %v7761_v55  ;;  %v7773_v55 = vld [vmem:[%s13022_s7 + $0xa8] sm:$0xff]  }
 0x3a4   :  { %4397 = vmatprep.subr.bf16.mxu1 %v13353_v42  ;;  %6788 = vmatpush3.bf16.msra.mxu0 %v7765_v62 }
 0x3a5   :  { %6789 = vmatprep.subr.bf16.mxu0 %v7767_v43 }
 0x3a7   :  { %4398 = vmatpush1.bf16.msra.mxu1 %v7766_v30  ;;  %v13473_v30 = vld [vmem:[#allocation37_spill] sm:$0xff] }
 0x3a8   :  { %6790 = vmatpush3.bf16.msra.mxu0 %v7767_v43  ;;  %4399 = vmatprep.subr.bf16.mxu1 %v13353_v42  ;;  %v7774_v43 = vld [vmem:[%s13022_s7 + $0xb0] sm:$0xff]  }
 0x3a9   :  { %2300 = vmatmul.mubr.bf16.gmra.mrb[52].mxu0 %v13461_v31  ;;  %6791 = vmatprep.subr.bf16.mxu0 %v7768_v54 }
 0x3aa   :  { %2307 = vmatprep.mubr.bf16.mxu0 %v9062_v8  ;;  %v9609_v8 = vpop.f32.mrb[9].mxu1 }
 0x3ab   :  { %v9612_v37 = vpop.f32.mrb[10].mxu1  ;;  %4400 = vmatpush1.bf16.msra.mxu1 %v7770_v21 }
 0x3ac   :  { %v9614_v9 = vpop.f32.mrb[11].mxu1  ;;  %6792 = vmatpush3.bf16.msra.mxu0 %v7768_v54  ;;  %4401 = vmatprep.subr.bf16.mxu1 %v13353_v42 }
 0x3ad   :  { %6793 = vmatprep.subr.bf16.mxu0 %v7769_v6  ;;  %v9631_v39 = vpop.f32.mrb[12].mxu1 }
 0x3ae   :  { %v9634_v19 = vpop.f32.mrb[13].mxu1 }
 0x3af   :  { %v9637_v41 = vpop.f32.mrb[14].mxu1  ;;  %4402 = vmatpush1.bf16.msra.mxu1 %v7771_v44  ;;  %v9730_v44 = vld [vmem:[%s13024_s5] ss:$0 sm:$0xff] }
 0x3b0   :  { %6794 = vmatpush3.bf16.msra.mxu0 %v7769_v6  ;;  %4403 = vmatprep.subr.bf16.mxu1 %v13353_v42 }
 0x3b1   :  { %2308 = vmatmul.mubr.bf16.gmra.mrb[56].mxu0 %v13462_v5 }
 0x3b2   :  { %2315 = vmatprep.mubr.bf16.mxu0 %v13353_v42 }
 0x3b3   :  { %4404 = vmatpush1.bf16.msra.mxu1 %v7772_v58 }
 0x3b4   :  { %4405 = vmatprep.subr.bf16.mxu1 %v13353_v42 }
 0x3b7   :  { %4406 = vmatpush1.bf16.msra.mxu1 %v7773_v55 }
 0x3b8   :  { %4407 = vmatprep.subr.bf16.mxu1 %v13353_v42 }
 0x3b9   :  { %2316 = vmatmul.mubr.bf16.gmra.mrb[60].mxu0 %v13460_v2 }
 0x3ba   :  { %2323 = vmatprep.mubr.bf16.mxu0 %v8521_v12  ;;  %v9639_v12 = vpop.f32.mrb[15].mxu1 }
 0x3bb   :  { %v9647_v22 = vpop.f32.mrb[16].mxu1  ;;  %4408 = vmatpush1.bf16.msra.mxu1 %v7774_v43 }
 0x3bc   :  { %4409 = vmatprep.subr.bf16.mxu1 %v13353_v42 }
 0x3c1   :  { %2324 = vmatmul.mubr.bf16.gmra.mrb[64].mxu0 %v13463_v23 }
 0x3c2   :  { %2331 = vmatprep.mubr.bf16.mxu0 %v8550_v33  ;;  %v9650_v33 = vpop.f32.mrb[17].mxu1 }
 0x3c3   :  { %v9653_v27 = vpop.f32.mrb[18].mxu1 }
 0x3c4   :  { %v9655_v45 = vpop.f32.mrb[19].mxu1 }
 0x3c5   :  { %v9663_v25 = vpop.f32.mrb[20].mxu1 }
 0x3c9   :  { %2332 = vmatmul.mubr.bf16.gmra.mrb[68].mxu0 %v13464_v61 }
 0x3ca   :  { %2339 = vmatprep.mubr.bf16.mxu0 %v8574_v53  ;;  %v13466_v53 = vld [vmem:[#allocation24_spill] sm:$0xff] }
 0x3d1   :  { %2340 = vmatmul.mubr.bf16.gmra.mrb[72].mxu0 %v13465_v17 }
 0x3d2   :  { %2347 = vmatprep.mubr.bf16.mxu0 %v8611_v16  ;;  %v9666_v16 = vpop.f32.mrb[21].mxu1 }
 0x3d3   :  { %v9669_v51 = vpop.f32.mrb[22].mxu1 }
 0x3d4   :  { %v9671_v7 = vpop.f32.mrb[23].mxu1 }
 0x3d5   :  { %v9679_v57 = vpop.f32.mrb[24].mxu1 }
 0x3d9   :  { %2348 = vmatmul.mubr.bf16.gmra.mrb[76].mxu0 %v13466_v53 }
 0x3da   :  { %2355 = vmatprep.mubr.bf16.mxu0 %v8630_v11  ;;  %v13468_v11 = vld [vmem:[#allocation28_spill] sm:$0xff] }
 0x3e1   :  { %2356 = vmatmul.mubr.bf16.gmra.mrb[80].mxu0 %v13467_v14 }
 0x3e2   :  { %2363 = vmatprep.mubr.bf16.mxu0 %v13436_v26  ;;  %v9682_v26 = vpop.f32.mrb[25].mxu1 }
 0x3e3   :  { %v9685_v50 = vpop.f32.mrb[26].mxu1 }
 0x3e4   :  { %v9687_v3 = vpop.f32.mrb[27].mxu1 }
 0x3e5   :  { %v9695_v31 = vpop.f32.mrb[28].mxu1 }
 0x3e9   :  { %2364 = vmatmul.mubr.bf16.gmra.mrb[84].mxu0 %v13468_v11  ;;  %v9737_v11 = vld [vmem:[%s13025_s6] ss:$0 sm:$0xff] }
 0x3ea   :  { %2371 = vmatprep.mubr.bf16.mxu0 %v13439_v20  ;;  %v13470_v20 = vld [vmem:[#allocation32_spill] sm:$0xff] }
 0x3f1   :  { %2372 = vmatmul.mubr.bf16.gmra.mrb[88].mxu0 %v13469_v47 }
 0x3f2   :  { %2379 = vmatprep.mubr.bf16.mxu0 %v13441_v52  ;;  %v9698_v52 = vpop.f32.mrb[29].mxu1 }
 0x3f3   :  { %v9701_v62 = vpop.f32.mrb[30].mxu1 }
 0x3f4   :  { %v9703_v5 = vpop.f32.mrb[31].mxu1 }
 0x3f5   :  { %v9711_v54 = vpop.f32.mrb[32].mxu1 }
 0x3f9   :  { %2380 = vmatmul.mubr.bf16.gmra.mrb[92].mxu0 %v13470_v20 }
 0x3fa   :  { %2387 = vmatprep.mubr.bf16.mxu0 %v13443_v63  ;;  %v13472_v63 = vld [vmem:[#allocation36_spill] sm:$0xff] }
 0x401   :  { %2388 = vmatmul.mubr.bf16.gmra.mrb[96].mxu0 %v13471_v38 }
 0x402   :  { %2395 = vmatprep.mubr.bf16.mxu0 %v13444_v32  ;;  %v9714_v32 = vpop.f32.mrb[33].mxu1 }
 0x403   :  { %v9717_v6 = vpop.f32.mrb[34].mxu1 }
 0x404   :  { %v9719_v23 = vpop.f32.mrb[35].mxu1 }
 0x409   :  { %2396 = vmatmul.mubr.bf16.gmra.mrb[100].mxu0 %v13472_v63 }
 0x40a   :  { %2403 = vmatprep.mubr.bf16.mxu0 %v13419_v60  ;;  %v9724_v60 = vld [vmem:[%s13023_s4] ss:$0 sm:$0xff] }
 0x411   :  { %2404 = vmatmul.mubr.bf16.gmra.mrb[104].mxu0 %v13473_v30 }
 0x412   :  { %2411 = vmatprep.mubr.bf16.mxu0 %v8811_v46 }
 0x414   :  { %v2197_v21 = vpop.f32.mrb[0].mxu0 }
 0x415   :  { %v2487_v61 = vadd.f32 %v9557_v28, %v2197_v21  ;;  %v2199_v17 = vpop.f32.mrb[1].mxu0  ;;  %v7775_v28 = vld [vmem:[%s13022_s7 + $0xb8] sm:$0xff]  }
 0x416   :  { %v2200_v53 = vpop.f32.mrb[2].mxu0  ;;  %4410 = vmatpush1.bf16.msra.mxu1 %v7775_v28 }
 0x417   :  { %v2748_v46 = vmul.f32 %v9724_v60, %v2487_v61  ;;  %v2490_v14 = vadd.f32 %v9565_v0, %v2200_v53  ;;  %v2202_v58 = vpop.f32.mrb[3].mxu0  ;;  %4411 = vmatprep.subr.bf16.mxu1 %v13353_v42 }
 0x419   :  { %v2819_v47 = vadd.f32 %v9730_v44, %v2748_v46  ;;  %v2749_v55 = vmul.f32 %v9724_v60, %v2490_v14  ;;  %2412 = vmatmul.mubr.bf16.gmra.mrb[108].mxu0 %v8848_v48  ;;  %v9755_v14 = vpop.f32.mrb[36].mxu1 }
 0x41a   :  { %2419 = vmatprep.mubr.bf16.mxu0 %v8835_v56  ;;  %13475 = vst [vmem:[#allocation39_spill] sm:$0xff] %v9755_v14 }
 0x41b   :  { %v2954_v0 = vmul.f32 %v9737_v11, %v2819_v47  ;;  %v2820_v20 = vadd.f32 %v9730_v44, %v2749_v55  ;;  %vm2884_vm6 = vcmp.ge.f32.partialorder %v2819_v47, 0.0 }
 0x41c   :  { %v2205_v38 = vpop.f32.mrb[4].mxu0 }
 0x41d   :  { %vm2885_vm7 = vcmp.ge.f32.partialorder %v2820_v20, 0.0  ;;  %v2955_v43 = vmul.f32 %v9737_v11, %v2820_v20  ;;  %v2495_v63 = vadd.f32 %v9554_v24, %v2205_v38  ;;  %v2207_v30 = vpop.f32.mrb[5].mxu0  ;;  %v3018_v17 = vsel %vm2884_vm6, %v2819_v47, %v2954_v0  ;;  %v9760_v24 = vpop.f32.mrb[37].mxu1 }
 0x41e   :  { %v2208_v21 = vpop.f32.mrb[6].mxu0  ;;  %v9766_v55 = vpop.f32.mrb[38].mxu1 }
 0x41f   :  { %v2750_v48 = vmul.f32 %v9724_v60, %v2495_v63  ;;  %v2498_v56 = vadd.f32 %v9563_v1, %v2208_v21  ;;  %v2210_v61 = vpop.f32.mrb[7].mxu0  ;;  %v3019_v53 = vsel %vm2885_vm7, %v2820_v20, %v2955_v43  ;;  %13476 = vst [vmem:[#allocation12_spill] sm:$0xff] %v9766_v55  ;;  %v9770_v38 = vpop.f32.mrb[39].mxu1 }
 0x420   :  { %v9753_v46 = vpack.c.bf16 %v3019_v53, %v3018_v17  ;;  %13477 = vst [vmem:[#allocation13_spill] sm:$0xff] %v9770_v38 }
 0x421   :  { %v2821_v58 = vadd.f32 %v9730_v44, %v2750_v48  ;;  %v2751_v28 = vmul.f32 %v9724_v60, %v2498_v56  ;;  %2420 = vmatmul.mubr.bf16.gmra.mrb[112].mxu0 %v8862_v59 }
 0x422   :  { %13474 = vst [vmem:[#allocation3_spill] sm:$0xff] %v9753_v46  ;;  %4146 = vmatprep.mubr.bf16.mxu1 %v9753_v46  ;;  %2427 = vmatprep.mubr.bf16.mxu0 %v8853_v29  ;;  %v3115_v1 = vshrl.u32 %v9753_v46, 16  ;;  %v3118_v47 = vshll.u32 %v9753_v46, 16 }
 0x423   :  { %v2956_v0 = vmul.f32 %v9737_v11, %v2821_v58  ;;  %v2822_v20 = vadd.f32 %v9730_v44, %v2751_v28  ;;  %vm2886_vm8 = vcmp.ge.f32.partialorder %v2821_v58, 0.0 }
 0x424   :  { %v2213_v59 = vpop.f32.mrb[8].mxu0  ;;  %v3117_v43 = vrot.slane %v3115_v1, 7  ;;  %v3402_v63 = vrot.slane %v3118_v47, 1 }
 0x425   :  { %vm2887_vm9 = vcmp.ge.f32.partialorder %v2822_v20, 0.0  ;;  %v2957_v30 = vmul.f32 %v9737_v11, %v2822_v20  ;;  %v2503_v29 = vadd.f32 %v9581_v40, %v2213_v59  ;;  %v2215_v21 = vpop.f32.mrb[9].mxu0  ;;  %v3020_v17 = vsel %vm2886_vm8, %v2821_v58, %v2956_v0  ;;  %v7776_v40 = vld [vmem:[%s13022_s7 + $0xc0] sm:$0xff]  }
 0x426   :  { %v2216_v48 = vpop.f32.mrb[10].mxu0  ;;  %v3120_v56 = vor.u32 %v3118_v47, %v3117_v43  ;;  %v9774_v61 = vor.u32 %v3402_v63, %v3115_v1  ;;  %4412 = vmatpush1.bf16.msra.mxu1 %v7776_v40 }
 0x427   :  { %v3021_v53 = vsel %vm2887_vm9, %v2822_v20, %v2957_v30  ;;  %v2752_v28 = vmul.f32 %v9724_v60, %v2503_v29  ;;  %v2506_v46 = vadd.f32 %v9586_v4, %v2216_v48  ;;  %v2218_v55 = vpop.f32.mrb[11].mxu0  ;;  %4413 = vmatprep.subr.bf16.mxu1 %v13353_v42 }
 0x428   :  { %13478 = vst [vmem:[#allocation41_spill] sm:$0xff] %v9774_v61  ;;  %v9778_v14 = vpack.c.bf16 %v3021_v53, %v3020_v17  ;;  %v9782_v38 = vsel %vm8085_vm2, 0, %v3120_v56 }
 0x429   :  { %13480 = vst [vmem:[#allocation42_spill] sm:$0xff] %v9782_v38  ;;  %v2823_v1 = vadd.f32 %v9730_v44, %v2752_v28  ;;  %v2753_v58 = vmul.f32 %v9724_v60, %v2506_v46  ;;  %2428 = vmatmul.mubr.bf16.gmra.mrb[116].mxu0 %v8873_v18  ;;  %4147 = vmatmul.mubr.bf16.gmra.mrb[68].mxu1 %v9782_v38  ;;  %v9808_v28 = vpop.f32.mrb[40].mxu1 }
 0x42a   :  { %13479 = vst [vmem:[#allocation25_spill] sm:$0xff] %v9778_v14  ;;  %4154 = vmatprep.mubr.bf16.mxu1 %v9778_v14  ;;  %2435 = vmatprep.mubr.bf16.mxu0 %v9244_v13  ;;  %v3122_v4 = vshrl.u32 %v9778_v14, 16  ;;  %v3125_v46 = vshll.u32 %v9778_v14, 16 }
 0x42b   :  { %v2958_v47 = vmul.f32 %v9737_v11, %v2823_v1  ;;  %v2824_v55 = vadd.f32 %v9730_v44, %v2753_v58  ;;  %vm2888_vm10 = vcmp.ge.f32.partialorder %v2823_v1, 0.0  ;;  %v13483_v58 = vld [vmem:[#allocation35_spill] sm:$0xff] }
 0x42c   :  { %v2221_v0 = vpop.f32.mrb[12].mxu0  ;;  %v3124_v20 = vrot.slane %v3122_v4, 7 }
 0x42d   :  { %vm2889_vm11 = vcmp.ge.f32.partialorder %v2824_v55, 0.0  ;;  %v2959_v18 = vmul.f32 %v9737_v11, %v2824_v55  ;;  %v2511_v59 = vadd.f32 %v9577_v35, %v2221_v0  ;;  %v2223_v13 = vpop.f32.mrb[13].mxu0  ;;  %v3022_v30 = vsel %vm2888_vm10, %v2823_v1, %v2958_v47  ;;  %v9814_v47 = vpop.f32.mrb[41].mxu1 }
 0x42e   :  { %v2224_v43 = vpop.f32.mrb[14].mxu0  ;;  %v3127_v63 = vor.u32 %v3125_v46, %v3124_v20  ;;  %v3404_v1 = vrot.slane %v3125_v46, 1 }
 0x42f   :  { %v3023_v29 = vsel %vm2889_vm11, %v2824_v55, %v2959_v18  ;;  %v2754_v21 = vmul.f32 %v9724_v60, %v2511_v59  ;;  %v2514_v48 = vadd.f32 %v9584_v15, %v2224_v43  ;;  %v2226_v56 = vpop.f32.mrb[15].mxu0  ;;  %v9819_v55 = vpop.f32.mrb[42].mxu1 }
 0x430   :  { %v9802_v17 = vpack.c.bf16 %v3023_v29, %v3022_v30  ;;  %v9806_v53 = vsel %vm8085_vm2, 0, %v3127_v63  ;;  %v9823_v18 = vpop.f32.mrb[43].mxu1  ;;  %v3405_v29 = vor.u32 %v3404_v1, %v3122_v4 }
 0x431   :  { %13482 = vst [vmem:[#allocation27_spill] sm:$0xff] %v9806_v53  ;;  %v2825_v35 = vadd.f32 %v9730_v44, %v2754_v21  ;;  %v2755_v40 = vmul.f32 %v9724_v60, %v2514_v48  ;;  %2436 = vmatmul.mubr.bf16.gmra.mrb[120].mxu0 %v13483_v58  ;;  %4155 = vmatmul.mubr.bf16.gmra.mrb[72].mxu1 %v9806_v53 }
 0x432   :  { %13481 = vst [vmem:[#allocation38_spill] sm:$0xff] %v9802_v17  ;;  %4162 = vmatprep.mubr.bf16.mxu1 %v9802_v17  ;;  %2443 = vmatprep.mubr.bf16.mxu0 %v13353_v42  ;;  %v3129_v15 = vshrl.u32 %v9802_v17, 16  ;;  %v3132_v46 = vshll.u32 %v9802_v17, 16 }
 0x433   :  { %v2960_v0 = vmul.f32 %v9737_v11, %v2825_v35  ;;  %v2826_v20 = vadd.f32 %v9730_v44, %v2755_v40  ;;  %vm2890_vm12 = vcmp.ge.f32.partialorder %v2825_v35, 0.0 }
 0x434   :  { %v2229_v59 = vpop.f32.mrb[16].mxu0  ;;  %v3131_v13 = vrot.slane %v3129_v15, 7  ;;  %v3406_v38 = vrot.slane %v3132_v46, 1 }
 0x435   :  { %vm2891_vm13 = vcmp.ge.f32.partialorder %v2826_v20, 0.0  ;;  %v2961_v43 = vmul.f32 %v9737_v11, %v2826_v20  ;;  %v2519_v63 = vadd.f32 %v9609_v8, %v2229_v59  ;;  %v2231_v30 = vpop.f32.mrb[17].mxu0  ;;  %v3024_v56 = vsel %vm2890_vm12, %v2825_v35, %v2960_v0  ;;  %v7777_v8 = vld [vmem:[%s13022_s7 + $0xc8] sm:$0xff]  }
 0x436   :  { %v2232_v21 = vpop.f32.mrb[18].mxu0  ;;  %v3134_v48 = vor.u32 %v3132_v46, %v3131_v13  ;;  %4414 = vmatpush1.bf16.msra.mxu1 %v7777_v8  ;;  %v3407_v13 = vor.u32 %v3406_v38, %v3129_v15 }
 0x437   :  { %v3025_v58 = vsel %vm2891_vm13, %v2826_v20, %v2961_v43  ;;  %v2756_v40 = vmul.f32 %v9724_v60, %v2519_v63  ;;  %v2522_v14 = vadd.f32 %v9614_v9, %v2232_v21  ;;  %v2234_v61 = vpop.f32.mrb[19].mxu0  ;;  %v9845_v9 = vsel %vm8576_vm5, %v3405_v29, 0  ;;  %4415 = vmatprep.subr.bf16.mxu1 %v13353_v42 }
 0x438   :  { %v9830_v53 = vpack.c.bf16 %v3025_v58, %v3024_v56  ;;  %v9834_v17 = vsel %vm8085_vm2, 0, %v3134_v48  ;;  %13486 = vst [vmem:[#allocation44_spill] sm:$0xff] %v9845_v9 }
 0x439   :  { %13485 = vst [vmem:[#allocation29_spill] sm:$0xff] %v9834_v17  ;;  %v2827_v4 = vadd.f32 %v9730_v44, %v2756_v40  ;;  %v2757_v35 = vmul.f32 %v9724_v60, %v2522_v14  ;;  %2444 = vmatmul.mubr.bf16.gmra.mrb[124].mxu0 %v13460_v2  ;;  %4163 = vmatmul.mubr.bf16.gmra.mrb[76].mxu1 %v9834_v17 }
 0x43a   :  { %13484 = vst [vmem:[#allocation43_spill] sm:$0xff] %v9830_v53  ;;  %4170 = vmatprep.mubr.bf16.mxu1 %v9830_v53  ;;  %6795 = vmatprep.mubr.bf16.mxu0 %v9845_v9  ;;  %v3136_v61 = vshrl.u32 %v9830_v53, 16  ;;  %v3139_v1 = vshll.u32 %v9830_v53, 16 }
 0x43b   :  { %v2962_v0 = vmul.f32 %v9737_v11, %v2827_v4  ;;  %v2828_v14 = vadd.f32 %v9730_v44, %v2757_v35  ;;  %vm2892_vm14 = vcmp.ge.f32.partialorder %v2827_v4, 0.0 }
 0x43c   :  { %v2237_v20 = vpop.f32.mrb[20].mxu0  ;;  %v3138_v59 = vrot.slane %v3136_v61, 7  ;;  %v3408_v46 = vrot.slane %v3139_v1, 1 }
 0x43d   :  { %vm2893_vm15 = vcmp.ge.f32.partialorder %v2828_v14, 0.0  ;;  %v2963_v43 = vmul.f32 %v9737_v11, %v2828_v14  ;;  %v2527_v63 = vadd.f32 %v9606_v10, %v2237_v20  ;;  %v2239_v30 = vpop.f32.mrb[21].mxu0  ;;  %v3026_v56 = vsel %vm2892_vm14, %v2827_v4, %v2962_v0  ;;  %v9872_v4 = vpop.f32.mrb[44].mxu1 }
 0x43e   :  { %v2240_v29 = vpop.f32.mrb[22].mxu0  ;;  %v3141_v21 = vor.u32 %v3139_v1, %v3138_v59  ;;  %v3409_v48 = vor.u32 %v3408_v46, %v3136_v61  ;;  %v9866_v10 = vsel %vm8576_vm5, %v3407_v13, 0  ;;  %v9878_v0 = vpop.f32.mrb[45].mxu1 }
 0x43f   :  { %v3027_v58 = vsel %vm2893_vm15, %v2828_v14, %v2963_v43  ;;  %v2758_v40 = vmul.f32 %v9724_v60, %v2527_v63  ;;  %v2530_v8 = vadd.f32 %v9612_v37, %v2240_v29  ;;  %v2242_v35 = vpop.f32.mrb[23].mxu0  ;;  %13489 = vst [vmem:[#allocation5_spill] sm:$0xff] %v9866_v10  ;;  %v9884_v59 = vpop.f32.mrb[46].mxu1 }
 0x440   :  { %v9858_v38 = vpack.c.bf16 %v3027_v58, %v3026_v56  ;;  %v9862_v15 = vsel %vm8085_vm2, 0, %v3141_v21  ;;  %v9870_v61 = vsel %vm8576_vm5, %v3409_v48, 0  ;;  %v9888_v43 = vpop.f32.mrb[47].mxu1 }
 0x441   :  { %13488 = vst [vmem:[#allocation33_spill] sm:$0xff] %v9862_v15  ;;  %13490 = vst [vmem:[#allocation6_spill] sm:$0xff] %v9870_v61  ;;  %v2829_v1 = vadd.f32 %v9730_v44, %v2758_v40  ;;  %v2759_v37 = vmul.f32 %v9724_v60, %v2530_v8  ;;  %4171 = vmatmul.mubr.bf16.gmra.mrb[80].mxu1 %v9862_v15  ;;  %6796 = vmatmul.mubr.bf16.vlgmr.msra.gmra.mrb[128].mxu0 %v9866_v10 }
 0x442   :  { %13487 = vst [vmem:[#allocation31_spill] sm:$0xff] %v9858_v38  ;;  %4178 = vmatprep.mubr.bf16.mxu1 %v9858_v38  ;;  %6799 = vmatprep.mubr.bf16.mxu0 %v9870_v61  ;;  %v3143_v14 = vshrl.u32 %v9858_v38, 16  ;;  %v3146_v20 = vshll.u32 %v9858_v38, 16 }
 0x443   :  { %v2964_v13 = vmul.f32 %v9737_v11, %v2829_v1  ;;  %v2830_v46 = vadd.f32 %v9730_v44, %v2759_v37  ;;  %vm2894_vm0 = vcmp.ge.f32.partialorder %v2829_v1, 0.0 }
 0x444   :  { %v2245_v63 = vpop.f32.mrb[24].mxu0  ;;  %v3145_v30 = vrot.slane %v3143_v14, 7  ;;  %v3410_v29 = vrot.slane %v3146_v20, 1 }
 0x445   :  { %vm2895_vm1 = vcmp.ge.f32.partialorder %v2830_v46, 0.0  ;;  %v2965_v21 = vmul.f32 %v9737_v11, %v2830_v46  ;;  %v2535_v48 = vadd.f32 %v9634_v19, %v2245_v63  ;;  %v2247_v56 = vpop.f32.mrb[25].mxu0  ;;  %v3028_v35 = vsel %vm2894_vm0, %v2829_v1, %v2964_v13  ;;  %v7778_v1 = vld [vmem:[%s13022_s7 + $0xd0] sm:$0xff]  }
 0x446   :  { %v2248_v58 = vpop.f32.mrb[26].mxu0  ;;  %v3148_v40 = vor.u32 %v3146_v20, %v3145_v30  ;;  %v3411_v8 = vor.u32 %v3410_v29, %v3143_v14  ;;  %4416 = vmatpush1.bf16.msra.mxu1 %v7778_v1 }
 0x447   :  { %v3029_v38 = vsel %vm2895_vm1, %v2830_v46, %v2965_v21  ;;  %v2760_v53 = vmul.f32 %v9724_v60, %v2535_v48  ;;  %v2538_v37 = vadd.f32 %v9639_v12, %v2248_v58  ;;  %v2250_v61 = vpop.f32.mrb[27].mxu0  ;;  %4417 = vmatprep.subr.bf16.mxu1 %v13353_v42 }
 0x448   :  { %v9894_v10 = vpack.c.bf16 %v3029_v38, %v3028_v35  ;;  %v9898_v15 = vsel %vm8085_vm2, 0, %v3148_v40  ;;  %v9902_v19 = vsel %vm8576_vm5, %v3411_v8, 0 }
 0x449   :  { %13492 = vst [vmem:[#allocation8_spill] sm:$0xff] %v9898_v15  ;;  %13493 = vst [vmem:[#allocation9_spill] sm:$0xff] %v9902_v19  ;;  %v2831_v14 = vadd.f32 %v9730_v44, %v2760_v53  ;;  %v2761_v20 = vmul.f32 %v9724_v60, %v2538_v37  ;;  %4179 = vmatmul.mubr.bf16.gmra.mrb[84].mxu1 %v9898_v15  ;;  %6800 = vmatmul.mubr.bf16.gmra.mrb[132].mxu0 %v9902_v19 }
 0x44a   :  { %13491 = vst [vmem:[#allocation7_spill] sm:$0xff] %v9894_v10  ;;  %4186 = vmatprep.mubr.bf16.mxu1 %v9894_v10  ;;  %v3150_v12 = vshrl.u32 %v9894_v10, 16  ;;  %v3153_v38 = vshll.u32 %v9894_v10, 16 }
 0x44b   :  { %v2966_v61 = vmul.f32 %v9737_v11, %v2831_v14  ;;  %v2832_v13 = vadd.f32 %v9730_v44, %v2761_v20  ;;  %vm2896_vm3 = vcmp.ge.f32.partialorder %v2831_v14, 0.0 }
 0x44c   :  { %v2253_v53 = vpop.f32.mrb[28].mxu0  ;;  %v3152_v46 = vrot.slane %v3150_v12, 7  ;;  %v3412_v63 = vrot.slane %v3153_v38, 1 }
 0x44d   :  { %vm2897_vm4 = vcmp.ge.f32.partialorder %v2832_v13, 0.0  ;;  %v2967_v30 = vmul.f32 %v9737_v11, %v2832_v13  ;;  %v2543_v29 = vadd.f32 %v9631_v39, %v2253_v53  ;;  %v2255_v21 = vpop.f32.mrb[29].mxu0  ;;  %v3030_v40 = vsel %vm2896_vm3, %v2831_v14, %v2966_v61  ;;  %v9931_v53 = vpop.f32.mrb[48].mxu1 }
 0x44e   :  { %v2256_v48 = vpop.f32.mrb[30].mxu0  ;;  %v3155_v56 = vor.u32 %v3153_v38, %v3152_v46  ;;  %v3413_v58 = vor.u32 %v3412_v63, %v3150_v12 }
 0x44f   :  { %v3031_v8 = vsel %vm2897_vm4, %v2832_v13, %v2967_v30  ;;  %v2762_v35 = vmul.f32 %v9724_v60, %v2543_v29  ;;  %v2546_v37 = vadd.f32 %v9637_v41, %v2256_v48  ;;  %v2258_v1 = vpop.f32.mrb[31].mxu0  ;;  %v9937_v41 = vpop.f32.mrb[49].mxu1 }
 0x450   :  { %v9921_v20 = vpack.c.bf16 %v3031_v8, %v3030_v40  ;;  %v9925_v10 = vsel %vm8085_vm2, 0, %v3155_v56  ;;  %v9929_v39 = vsel %vm8576_vm5, %v3413_v58, 0  ;;  %v9942_v13 = vpop.f32.mrb[50].mxu1 }
 0x451   :  { %13495 = vst [vmem:[#allocation11_spill] sm:$0xff] %v9925_v10  ;;  %13496 = vst [vmem:[#allocation14_spill] sm:$0xff] %v9929_v39  ;;  %v2833_v14 = vadd.f32 %v9730_v44, %v2762_v35  ;;  %v2763_v12 = vmul.f32 %v9724_v60, %v2546_v37  ;;  %4187 = vmatmul.mubr.bf16.gmra.mrb[88].mxu1 %v9925_v10  ;;  %6803 = vmatprep.mubr.bf16.mxu0 %v9929_v39  ;;  %v9946_v30 = vpop.f32.mrb[51].mxu1 }
 0x452   :  { %13494 = vst [vmem:[#allocation10_spill] sm:$0xff] %v9921_v20  ;;  %4194 = vmatprep.mubr.bf16.mxu1 %v9921_v20  ;;  %v3157_v38 = vshrl.u32 %v9921_v20, 16  ;;  %v3160_v61 = vshll.u32 %v9921_v20, 16 }
 0x453   :  { %v2968_v46 = vmul.f32 %v9737_v11, %v2833_v14  ;;  %v2834_v63 = vadd.f32 %v9730_v44, %v2763_v12  ;;  %vm2898_vm6 = vcmp.ge.f32.partialorder %v2833_v14, 0.0 }
 0x454   :  { %v2261_v29 = vpop.f32.mrb[32].mxu0  ;;  %v3159_v21 = vrot.slane %v3157_v38, 7  ;;  %v3414_v48 = vrot.slane %v3160_v61, 1 }
 0x455   :  { %vm2899_vm7 = vcmp.ge.f32.partialorder %v2834_v63, 0.0  ;;  %v2969_v56 = vmul.f32 %v9737_v11, %v2834_v63  ;;  %v2551_v58 = vadd.f32 %v9650_v33, %v2261_v29  ;;  %v2263_v40 = vpop.f32.mrb[33].mxu0  ;;  %v3032_v1 = vsel %vm2898_vm6, %v2833_v14, %v2968_v46  ;;  %v7779_v14 = vld [vmem:[%s13022_s7 + $0xd8] sm:$0xff]  }
 0x456   :  { %v2264_v8 = vpop.f32.mrb[34].mxu0  ;;  %v3162_v35 = vor.u32 %v3160_v61, %v3159_v21  ;;  %v3415_v37 = vor.u32 %v3414_v48, %v3157_v38  ;;  %4418 = vmatpush1.bf16.msra.mxu1 %v7779_v14 }
 0x457   :  { %v3033_v20 = vsel %vm2899_vm7, %v2834_v63, %v2969_v56  ;;  %v2764_v39 = vmul.f32 %v9724_v60, %v2551_v58  ;;  %v2554_v12 = vadd.f32 %v9655_v45, %v2264_v8  ;;  %v2266_v19 = vpop.f32.mrb[35].mxu0  ;;  %v9969_v45 = vpop.f32.mrb[52].mxu1  ;;  %4419 = vmatprep.subr.bf16.mxu1 %v13353_v42 }
 0x458   :  { %v9952_v10 = vpack.c.bf16 %v3033_v20, %v3032_v1  ;;  %v9956_v15 = vsel %vm8085_vm2, 0, %v3162_v35  ;;  %v9960_v33 = vsel %vm8576_vm5, %v3415_v37, 0  ;;  %v9974_v46 = vpop.f32.mrb[53].mxu1 }
 0x459   :  { %13498 = vst [vmem:[#allocation16_spill] sm:$0xff] %v9956_v15  ;;  %13499 = vst [vmem:[#allocation17_spill] sm:$0xff] %v9960_v33  ;;  %v2835_v38 = vadd.f32 %v9730_v44, %v2764_v39  ;;  %v2765_v61 = vmul.f32 %v9724_v60, %v2554_v12  ;;  %4195 = vmatmul.mubr.bf16.gmra.mrb[92].mxu1 %v9956_v15  ;;  %6804 = vmatmul.mubr.bf16.gmra.mrb[136].mxu0 %v9960_v33  ;;  %v9978_v29 = vpop.f32.mrb[54].mxu1 }
 0x45a   :  { %13497 = vst [vmem:[#allocation15_spill] sm:$0xff] %v9952_v10  ;;  %4202 = vmatprep.mubr.bf16.mxu1 %v9952_v10  ;;  %v3164_v19 = vshrl.u32 %v9952_v10, 16  ;;  %v3167_v20 = vshll.u32 %v9952_v10, 16  ;;  %v9981_v58 = vpop.f32.mrb[55].mxu1 }
 0x45b   :  { %v2970_v63 = vmul.f32 %v9737_v11, %v2835_v38  ;;  %v2836_v39 = vadd.f32 %v9730_v44, %v2765_v61  ;;  %vm2900_vm8 = vcmp.ge.f32.partialorder %v2835_v38, 0.0 }
 0x45c   :  { %v2269_v21 = vpop.f32.mrb[36].mxu0  ;;  %v3166_v48 = vrot.slane %v3164_v19, 7  ;;  %v3416_v56 = vrot.slane %v3167_v20, 1 }
 0x45d   :  { %vm2901_vm9 = vcmp.ge.f32.partialorder %v2836_v39, 0.0  ;;  %v2971_v40 = vmul.f32 %v9737_v11, %v2836_v39  ;;  %v2559_v8 = vadd.f32 %v9647_v22, %v2269_v21  ;;  %v2271_v35 = vpop.f32.mrb[37].mxu0  ;;  %v3034_v14 = vsel %vm2900_vm8, %v2835_v38, %v2970_v63 }
 0x45e   :  { %v2272_v37 = vpop.f32.mrb[38].mxu0  ;;  %v3169_v1 = vor.u32 %v3167_v20, %v3166_v48  ;;  %v3417_v12 = vor.u32 %v3416_v56, %v3164_v19 }
 0x45f   :  { %v3035_v61 = vsel %vm2901_vm9, %v2836_v39, %v2971_v40  ;;  %v2766_v10 = vmul.f32 %v9724_v60, %v2559_v8  ;;  %v2562_v33 = vadd.f32 %v9653_v27, %v2272_v37  ;;  %v2274_v15 = vpop.f32.mrb[39].mxu0  ;;  %v10001_v27 = vpop.f32.mrb[56].mxu1 }
 0x460   :  { %v9987_v9 = vpack.c.bf16 %v3035_v61, %v3034_v14  ;;  %v9991_v17 = vsel %vm8085_vm2, 0, %v3169_v1  ;;  %v9995_v22 = vsel %vm8576_vm5, %v3417_v12, 0  ;;  %13503 = vst [vmem:[#allocation40_spill] sm:$0xff] %v10001_v27  ;;  %v10006_v63 = vpop.f32.mrb[57].mxu1 }
 0x461   :  { %13501 = vst [vmem:[#allocation19_spill] sm:$0xff] %v9991_v17  ;;  %13502 = vst [vmem:[#allocation20_spill] sm:$0xff] %v9995_v22  ;;  %v2837_v20 = vadd.f32 %v9730_v44, %v2766_v10  ;;  %v2767_v38 = vmul.f32 %v9724_v60, %v2562_v33  ;;  %4203 = vmatmul.mubr.bf16.gmra.mrb[96].mxu1 %v9991_v17  ;;  %6807 = vmatprep.mubr.bf16.mxu0 %v9995_v22  ;;  %v10010_v21 = vpop.f32.mrb[58].mxu1 }
 0x462   :  { %13500 = vst [vmem:[#allocation18_spill] sm:$0xff] %v9987_v9  ;;  %4210 = vmatprep.mubr.bf16.mxu1 %v9987_v9  ;;  %v3171_v15 = vshrl.u32 %v9987_v9, 16  ;;  %v3174_v19 = vshll.u32 %v9987_v9, 16  ;;  %13504 = vst [vmem:[#allocation21_spill] sm:$0xff] %v10010_v21  ;;  %v10012_v40 = vpop.f32.mrb[59].mxu1 }
 0x463   :  { %v2972_v39 = vmul.f32 %v9737_v11, %v2837_v20  ;;  %v2838_v10 = vadd.f32 %v9730_v44, %v2767_v38  ;;  %vm2902_vm10 = vcmp.ge.f32.partialorder %v2837_v20, 0.0 }
 0x464   :  { %v2277_v33 = vpop.f32.mrb[40].mxu0  ;;  %v3173_v48 = vrot.slane %v3171_v15, 7  ;;  %v3418_v56 = vrot.slane %v3174_v19, 1 }
 0x465   :  { %vm2903_vm11 = vcmp.ge.f32.partialorder %v2838_v10, 0.0  ;;  %v2973_v8 = vmul.f32 %v9737_v11, %v2838_v10  ;;  %v2567_v35 = vadd.f32 %v9666_v16, %v2277_v33  ;;  %v2279_v37 = vpop.f32.mrb[41].mxu0  ;;  %v3036_v61 = vsel %vm2902_vm10, %v2837_v20, %v2972_v39  ;;  %v7780_v20 = vld [vmem:[%s13022_s7 + $0xe0] sm:$0xff]  }
 0x466   :  { %v2280_v1 = vpop.f32.mrb[42].mxu0  ;;  %v3176_v12 = vor.u32 %v3174_v19, %v3173_v48  ;;  %v3419_v14 = vor.u32 %v3418_v56, %v3171_v15  ;;  %4420 = vmatpush1.bf16.msra.mxu1 %v7780_v20 }
 0x467   :  { %v3037_v9 = vsel %vm2903_vm11, %v2838_v10, %v2973_v8  ;;  %v2768_v38 = vmul.f32 %v9724_v60, %v2567_v35  ;;  %v2570_v22 = vadd.f32 %v9671_v7, %v2280_v1  ;;  %v2282_v17 = vpop.f32.mrb[43].mxu0  ;;  %v10035_v7 = vpop.f32.mrb[60].mxu1  ;;  %4421 = vmatprep.subr.bf16.mxu1 %v13353_v42 }
 0x468   :  { %v10018_v21 = vpack.c.bf16 %v3037_v9, %v3036_v61  ;;  %v10022_v27 = vsel %vm8085_vm2, 0, %v3176_v12  ;;  %v10026_v16 = vsel %vm8576_vm5, %v3419_v14, 0  ;;  %13508 = vst [vmem:[#allocation26_spill] sm:$0xff] %v10035_v7  ;;  %v10040_v39 = vpop.f32.mrb[61].mxu1 }
 0x469   :  { %13506 = vst [vmem:[#allocation23_spill] sm:$0xff] %v10022_v27  ;;  %13507 = vst [vmem:[#allocation24_spill] sm:$0xff] %v10026_v16  ;;  %v2839_v15 = vadd.f32 %v9730_v44, %v2768_v38  ;;  %v2769_v19 = vmul.f32 %v9724_v60, %v2570_v22  ;;  %4211 = vmatmul.mubr.bf16.gmra.mrb[100].mxu1 %v10022_v27  ;;  %6808 = vmatmul.mubr.bf16.gmra.mrb[140].mxu0 %v10026_v16  ;;  %v10044_v22 = vpop.f32.mrb[62].mxu1 }
 0x46a   :  { %13505 = vst [vmem:[#allocation22_spill] sm:$0xff] %v10018_v21  ;;  %4218 = vmatprep.mubr.bf16.mxu1 %v10018_v21  ;;  %v3178_v17 = vshrl.u32 %v10018_v21, 16  ;;  %v3181_v9 = vshll.u32 %v10018_v21, 16  ;;  %13509 = vst [vmem:[#allocation28_spill] sm:$0xff] %v10044_v22  ;;  %v10047_v35 = vpop.f32.mrb[63].mxu1 }
 0x46b   :  { %v2974_v10 = vmul.f32 %v9737_v11, %v2839_v15  ;;  %v2840_v33 = vadd.f32 %v9730_v44, %v2769_v19  ;;  %vm2904_vm12 = vcmp.ge.f32.partialorder %v2839_v15, 0.0 }
 0x46c   :  { %v2285_v48 = vpop.f32.mrb[44].mxu0  ;;  %v3180_v56 = vrot.slane %v3178_v17, 7  ;;  %v3420_v8 = vrot.slane %v3181_v9, 1 }
 0x46d   :  { %vm2905_vm13 = vcmp.ge.f32.partialorder %v2840_v33, 0.0  ;;  %v2975_v37 = vmul.f32 %v9737_v11, %v2840_v33  ;;  %v2575_v1 = vadd.f32 %v9663_v25, %v2285_v48  ;;  %v2287_v12 = vpop.f32.mrb[45].mxu0  ;;  %v3038_v20 = vsel %vm2904_vm12, %v2839_v15, %v2974_v10 }
 0x46e   :  { %v2288_v14 = vpop.f32.mrb[46].mxu0  ;;  %v3183_v61 = vor.u32 %v3181_v9, %v3180_v56  ;;  %v3421_v38 = vor.u32 %v3420_v8, %v3178_v17 }
 0x46f   :  { %v3039_v19 = vsel %vm2905_vm13, %v2840_v33, %v2975_v37  ;;  %v2770_v21 = vmul.f32 %v9724_v60, %v2575_v1  ;;  %v2578_v16 = vadd.f32 %v9669_v51, %v2288_v14  ;;  %v2290_v27 = vpop.f32.mrb[47].mxu0 }
 0x470   :  { %v10053_v22 = vpack.c.bf16 %v3039_v19, %v3038_v20  ;;  %v10057_v7 = vsel %vm8085_vm2, 0, %v3183_v61  ;;  %v10061_v25 = vsel %vm8576_vm5, %v3421_v38, 0 }
 0x471   :  { %13511 = vst [vmem:[#allocation32_spill] sm:$0xff] %v10057_v7  ;;  %v2841_v9 = vadd.f32 %v9730_v44, %v2770_v21  ;;  %v2771_v15 = vmul.f32 %v9724_v60, %v2578_v16  ;;  %4219 = vmatmul.mubr.bf16.gmra.mrb[104].mxu1 %v10057_v7  ;;  %6811 = vmatprep.mubr.bf16.mxu0 %v10061_v25 }
 0x472   :  { %13510 = vst [vmem:[#allocation30_spill] sm:$0xff] %v10053_v22  ;;  %4226 = vmatprep.mubr.bf16.mxu1 %v10053_v22  ;;  %v3185_v51 = vshrl.u32 %v10053_v22, 16  ;;  %v3188_v27 = vshll.u32 %v10053_v22, 16 }
 0x473   :  { %v2976_v17 = vmul.f32 %v9737_v11, %v2841_v9  ;;  %v2842_v10 = vadd.f32 %v9730_v44, %v2771_v15  ;;  %vm2906_vm14 = vcmp.ge.f32.partialorder %v2841_v9, 0.0 }
 0x474   :  { %v2293_v33 = vpop.f32.mrb[48].mxu0  ;;  %v3187_v48 = vrot.slane %v3185_v51, 7  ;;  %v3422_v21 = vrot.slane %v3188_v27, 1 }
 0x475   :  { %vm2907_vm15 = vcmp.ge.f32.partialorder %v2842_v10, 0.0  ;;  %v2977_v16 = vmul.f32 %v9737_v11, %v2842_v10  ;;  %v2583_v56 = vadd.f32 %v9682_v26, %v2293_v33  ;;  %v2295_v8 = vpop.f32.mrb[49].mxu0  ;;  %v3040_v14 = vsel %vm2906_vm14, %v2841_v9, %v2976_v17  ;;  %v7781_v9 = vld [vmem:[%s13022_s7 + $0xe8] sm:$0xff]  }
 0x476   :  { %v2296_v37 = vpop.f32.mrb[50].mxu0  ;;  %v3190_v1 = vor.u32 %v3188_v27, %v3187_v48  ;;  %v3423_v12 = vor.u32 %v3422_v21, %v3185_v51  ;;  %4422 = vmatpush1.bf16.msra.mxu1 %v7781_v9 }
 0x477   :  { %v3041_v61 = vsel %vm2907_vm15, %v2842_v10, %v2977_v16  ;;  %v2772_v38 = vmul.f32 %v9724_v60, %v2583_v56  ;;  %v2586_v20 = vadd.f32 %v9687_v3, %v2296_v37  ;;  %v2298_v19 = vpop.f32.mrb[51].mxu0  ;;  %4423 = vmatprep.subr.bf16.mxu1 %v13353_v42 }
 0x478   :  { %v10076_v15 = vpack.c.bf16 %v3041_v61, %v3040_v14  ;;  %v10080_v22 = vsel %vm8085_vm2, 0, %v3190_v1  ;;  %v10084_v26 = vsel %vm8576_vm5, %v3423_v12, 0 }
 0x479   :  { %v2843_v51 = vadd.f32 %v9730_v44, %v2772_v38  ;;  %v2773_v27 = vmul.f32 %v9724_v60, %v2586_v20  ;;  %4227 = vmatmul.mubr.bf16.gmra.mrb[108].mxu1 %v10080_v22  ;;  %6812 = vmatmul.mubr.bf16.gmra.mrb[144].mxu0 %v10084_v26 }
 0x47a   :  { %13512 = vst [vmem:[#allocation34_spill] sm:$0xff] %v10076_v15  ;;  %4234 = vmatprep.mubr.bf16.mxu1 %v10076_v15  ;;  %v3192_v3 = vshrl.u32 %v10076_v15, 16  ;;  %v3195_v17 = vshll.u32 %v10076_v15, 16 }
 0x47b   :  { %v2978_v10 = vmul.f32 %v9737_v11, %v2843_v51  ;;  %v2844_v33 = vadd.f32 %v9730_v44, %v2773_v27  ;;  %vm2908_vm0 = vcmp.ge.f32.partialorder %v2843_v51, 0.0 }
 0x47c   :  { %v2301_v48 = vpop.f32.mrb[52].mxu0  ;;  %v3194_v21 = vrot.slane %v3192_v3, 7  ;;  %v3424_v16 = vrot.slane %v3195_v17, 1 }
 0x47d   :  { %vm2909_vm1 = vcmp.ge.f32.partialorder %v2844_v33, 0.0  ;;  %v2979_v56 = vmul.f32 %v9737_v11, %v2844_v33  ;;  %v2591_v8 = vadd.f32 %v9679_v57, %v2301_v48  ;;  %v2303_v37 = vpop.f32.mrb[53].mxu0  ;;  %v3042_v61 = vsel %vm2908_vm0, %v2843_v51, %v2978_v10 }
 0x47e   :  { %v2304_v1 = vpop.f32.mrb[54].mxu0  ;;  %v3197_v12 = vor.u32 %v3195_v17, %v3194_v21  ;;  %v3425_v14 = vor.u32 %v3424_v16, %v3192_v3 }
 0x47f   :  { %v3043_v38 = vsel %vm2909_vm1, %v2844_v33, %v2979_v56  ;;  %v2774_v20 = vmul.f32 %v9724_v60, %v2591_v8  ;;  %v2594_v19 = vadd.f32 %v9685_v50, %v2304_v1  ;;  %v2306_v9 = vpop.f32.mrb[55].mxu0 }
 0x480   :  { %v10103_v27 = vpack.c.bf16 %v3043_v38, %v3042_v61  ;;  %v10107_v15 = vsel %vm8085_vm2, 0, %v3197_v12  ;;  %v10111_v57 = vsel %vm8576_vm5, %v3425_v14, 0 }
 0x481   :  { %v2845_v17 = vadd.f32 %v9730_v44, %v2774_v20  ;;  %v2775_v51 = vmul.f32 %v9724_v60, %v2594_v19  ;;  %4235 = vmatmul.mubr.bf16.gmra.mrb[112].mxu1 %v10107_v15  ;;  %6815 = vmatprep.mubr.bf16.mxu0 %v10111_v57 }
 0x482   :  { %13513 = vst [vmem:[#allocation36_spill] sm:$0xff] %v10103_v27  ;;  %4242 = vmatprep.mubr.bf16.mxu1 %v10103_v27  ;;  %v3199_v50 = vshrl.u32 %v10103_v27, 16  ;;  %v3202_v3 = vshll.u32 %v10103_v27, 16 }
 0x483   :  { %v2980_v10 = vmul.f32 %v9737_v11, %v2845_v17  ;;  %v2846_v33 = vadd.f32 %v9730_v44, %v2775_v51  ;;  %vm2910_vm3 = vcmp.ge.f32.partialorder %v2845_v17, 0.0 }
 0x484   :  { %v2309_v48 = vpop.f32.mrb[56].mxu0  ;;  %v3201_v21 = vrot.slane %v3199_v50, 7  ;;  %v3426_v16 = vrot.slane %v3202_v3, 1 }
 0x485   :  { %vm2911_vm4 = vcmp.ge.f32.partialorder %v2846_v33, 0.0  ;;  %v2981_v56 = vmul.f32 %v9737_v11, %v2846_v33  ;;  %v2599_v8 = vadd.f32 %v9698_v52, %v2309_v48  ;;  %v2311_v37 = vpop.f32.mrb[57].mxu0  ;;  %v3044_v61 = vsel %vm2910_vm3, %v2845_v17, %v2980_v10  ;;  %v7782_v17 = vld [vmem:[%s13022_s7 + $0xf0] sm:$0xff]  }
 0x486   :  { %v2312_v1 = vpop.f32.mrb[58].mxu0  ;;  %v3204_v12 = vor.u32 %v3202_v3, %v3201_v21  ;;  %v3427_v14 = vor.u32 %v3426_v16, %v3199_v50  ;;  %4424 = vmatpush1.bf16.msra.mxu1 %v7782_v17 }
 0x487   :  { %v3045_v38 = vsel %vm2911_vm4, %v2846_v33, %v2981_v56  ;;  %v2776_v20 = vmul.f32 %v9724_v60, %v2599_v8  ;;  %v2602_v19 = vadd.f32 %v9703_v5, %v2312_v1  ;;  %v2314_v9 = vpop.f32.mrb[59].mxu0  ;;  %4425 = vmatprep.subr.bf16.mxu1 %v13353_v42 }
 0x488   :  { %v10126_v51 = vpack.c.bf16 %v3045_v38, %v3044_v61  ;;  %v10130_v27 = vsel %vm8085_vm2, 0, %v3204_v12  ;;  %v10134_v52 = vsel %vm8576_vm5, %v3427_v14, 0 }
 0x489   :  { %v2847_v50 = vadd.f32 %v9730_v44, %v2776_v20  ;;  %v2777_v3 = vmul.f32 %v9724_v60, %v2602_v19  ;;  %4243 = vmatmul.mubr.bf16.gmra.mrb[116].mxu1 %v10130_v27  ;;  %6816 = vmatmul.mubr.bf16.gmra.mrb[148].mxu0 %v10134_v52 }
 0x48a   :  { %13514 = vst [vmem:[#allocation37_spill] sm:$0xff] %v10126_v51  ;;  %4250 = vmatprep.mubr.bf16.mxu1 %v10126_v51  ;;  %v3206_v5 = vshrl.u32 %v10126_v51, 16  ;;  %v3209_v10 = vshll.u32 %v10126_v51, 16 }
 0x48b   :  { %v2982_v33 = vmul.f32 %v9737_v11, %v2847_v50  ;;  %v2848_v48 = vadd.f32 %v9730_v44, %v2777_v3  ;;  %vm2912_vm6 = vcmp.ge.f32.partialorder %v2847_v50, 0.0 }
 0x48c   :  { %v2317_v21 = vpop.f32.mrb[60].mxu0  ;;  %v3208_v16 = vrot.slane %v3206_v5, 7  ;;  %v3428_v56 = vrot.slane %v3209_v10, 1 }
 0x48d   :  { %vm2913_vm7 = vcmp.ge.f32.partialorder %v2848_v48, 0.0  ;;  %v2983_v8 = vmul.f32 %v9737_v11, %v2848_v48  ;;  %v2607_v37 = vadd.f32 %v9695_v31, %v2317_v21  ;;  %v2319_v1 = vpop.f32.mrb[61].mxu0  ;;  %v3046_v38 = vsel %vm2912_vm6, %v2847_v50, %v2982_v33 }
 0x48e   :  { %v2320_v12 = vpop.f32.mrb[62].mxu0  ;;  %v3211_v14 = vor.u32 %v3209_v10, %v3208_v16  ;;  %v3429_v61 = vor.u32 %v3428_v56, %v3206_v5 }
 0x48f   :  { %v3047_v20 = vsel %vm2913_vm7, %v2848_v48, %v2983_v8  ;;  %v2778_v19 = vmul.f32 %v9724_v60, %v2607_v37  ;;  %v2610_v9 = vadd.f32 %v9701_v62, %v2320_v12  ;;  %v2322_v17 = vpop.f32.mrb[63].mxu0 }
 0x490   :  { %v10153_v3 = vpack.c.bf16 %v3047_v20, %v3046_v38  ;;  %v10157_v51 = vsel %vm8085_vm2, 0, %v3211_v14  ;;  %v10161_v31 = vsel %vm8576_vm5, %v3429_v61, 0 }
 0x491   :  { %v2849_v10 = vadd.f32 %v9730_v44, %v2778_v19  ;;  %v2779_v50 = vmul.f32 %v9724_v60, %v2610_v9  ;;  %4251 = vmatmul.mubr.bf16.gmra.mrb[120].mxu1 %v10157_v51  ;;  %6819 = vmatprep.mubr.bf16.mxu0 %v10161_v31 }
 0x492   :  { %13515 = vst [vmem:[#allocation35_spill] sm:$0xff] %v10153_v3  ;;  %4258 = vmatprep.mubr.bf16.mxu1 %v10153_v3  ;;  %v3213_v62 = vshrl.u32 %v10153_v3, 16  ;;  %v3216_v5 = vshll.u32 %v10153_v3, 16 }
 0x493   :  { %v2984_v33 = vmul.f32 %v9737_v11, %v2849_v10  ;;  %v2850_v48 = vadd.f32 %v9730_v44, %v2779_v50  ;;  %vm2914_vm8 = vcmp.ge.f32.partialorder %v2849_v10, 0.0 }
 0x494   :  { %v2325_v21 = vpop.f32.mrb[64].mxu0  ;;  %v3215_v16 = vrot.slane %v3213_v62, 7  ;;  %v3430_v56 = vrot.slane %v3216_v5, 1 }
 0x495   :  { %vm2915_vm9 = vcmp.ge.f32.partialorder %v2850_v48, 0.0  ;;  %v2985_v8 = vmul.f32 %v9737_v11, %v2850_v48  ;;  %v2615_v37 = vadd.f32 %v9714_v32, %v2325_v21  ;;  %v2327_v1 = vpop.f32.mrb[65].mxu0  ;;  %v3048_v38 = vsel %vm2914_vm8, %v2849_v10, %v2984_v33  ;;  %v7783_v10 = vld [vmem:[%s13022_s7 + $0xf8] sm:$0xff]  }
 0x496   :  { %v2328_v12 = vpop.f32.mrb[66].mxu0  ;;  %v3218_v14 = vor.u32 %v3216_v5, %v3215_v16  ;;  %v3431_v61 = vor.u32 %v3430_v56, %v3213_v62  ;;  %4426 = vmatpush1.bf16.msra.mxu1 %v7783_v10 }
 0x497   :  { %v3049_v20 = vsel %vm2915_vm9, %v2850_v48, %v2985_v8  ;;  %v2780_v19 = vmul.f32 %v9724_v60, %v2615_v37  ;;  %v2618_v9 = vadd.f32 %v9719_v23, %v2328_v12  ;;  %v2330_v17 = vpop.f32.mrb[67].mxu0  ;;  %4684 = vmatprep.subr.bf16.mxu1 %v13353_v42  ;;  %v10202_v8 = vld [vmem:[%s13025_s6] ss:$0 sm:$0xff] }
 0x498   :  { %v10176_v50 = vpack.c.bf16 %v3049_v20, %v3048_v38  ;;  %v10180_v3 = vsel %vm8085_vm2, 0, %v3218_v14  ;;  %v10184_v32 = vsel %vm8576_vm5, %v3431_v61, 0  ;;  %v10211_v61 = vld [vmem:[%s13023_s4] ss:$0 sm:$0xff] }
 0x499   :  { %v2851_v62 = vadd.f32 %v9730_v44, %v2780_v19  ;;  %v2781_v5 = vmul.f32 %v9724_v60, %v2618_v9  ;;  %4259 = vmatmul.mubr.bf16.gmra.mrb[124].mxu1 %v10180_v3  ;;  %6820 = vmatmul.mubr.bf16.gmra.mrb[152].mxu0 %v10184_v32 }
 0x49a   :  { %13516 = vst [vmem:[#allocation45_spill] sm:$0xff] %v10176_v50  ;;  %4266 = vmatprep.mubr.bf16.mxu1 %v13353_v42  ;;  %v3220_v23 = vshrl.u32 %v10176_v50, 16  ;;  %v3223_v33 = vshll.u32 %v10176_v50, 16 }
 0x49b   :  { %v2986_v48 = vmul.f32 %v9737_v11, %v2851_v62  ;;  %v2852_v21 = vadd.f32 %v9730_v44, %v2781_v5  ;;  %vm2916_vm10 = vcmp.ge.f32.partialorder %v2851_v62, 0.0  ;;  %v10225_v5 = vld [vmem:[%s13024_s5] ss:$0 sm:$0xff] }
 0x49c   :  { %v2333_v16 = vpop.f32.mrb[68].mxu0  ;;  %v3432_v60 = vrot.slane %v3223_v33, 1  ;;  %v3222_v56 = vrot.slane %v3220_v23, 7 }
 0x49d   :  { %vm2917_vm11 = vcmp.ge.f32.partialorder %v2852_v21, 0.0  ;;  %v2987_v37 = vmul.f32 %v10202_v8, %v2852_v21  ;;  %v2623_v1 = vadd.f32 %v9711_v54, %v2333_v16  ;;  %v2335_v12 = vpop.f32.mrb[69].mxu0  ;;  %v3050_v9 = vsel %vm2916_vm10, %v2851_v62, %v2986_v48 }
 0x49e   :  { %v2336_v11 = vpop.f32.mrb[70].mxu0  ;;  %v3433_v14 = vor.u32 %v3432_v60, %v3220_v23  ;;  %v10206_v44 = vor.u32 %v3223_v33, %v3222_v56 }
 0x49f   :  { %v2782_v38 = vmul.f32 %v10211_v61, %v2623_v1  ;;  %v2626_v20 = vadd.f32 %v9717_v6, %v2336_v11  ;;  %v2338_v19 = vpop.f32.mrb[71].mxu0  ;;  %v3051_v17 = vsel %vm2917_vm11, %v2852_v21, %v2987_v37 }
 0x4a0   :  { %v10218_v54 = vsel %vm8576_vm5, %v3433_v14, 0  ;;  %v10220_v10 = vpack.c.bf16 %v3051_v17, %v3050_v9  ;;  %v13520_v17 = vld [vmem:[#allocation13_spill] sm:$0xff] }
 0x4a1   :  { %13517 = vst [vmem:[#allocation46_spill] sm:$0xff] %v10218_v54  ;;  %v2853_v23 = vadd.f32 %v10225_v5, %v2782_v38  ;;  %v2783_v33 = vmul.f32 %v10211_v61, %v2626_v20  ;;  %4267 = vmatmul.mubr.bf16.gmra.mrb[128].mxu1 %v13460_v2  ;;  %6823 = vmatprep.mubr.bf16.mxu0 %v10218_v54 }
 0x4a2   :  { %13518 = vst [vmem:[#allocation47_spill] sm:$0xff] %v10220_v10  ;;  %4274 = vmatprep.mubr.bf16.mxu1 %v10220_v10  ;;  %v3227_v6 = vshrl.u32 %v10220_v10, 16  ;;  %v3230_v62 = vshll.u32 %v10220_v10, 16  ;;  %6824 = vmatmul.mubr.bf16.gmra.mrb[156].mxu0 %v13438_v34 }
 0x4a3   :  { %v2988_v48 = vmul.f32 %v10202_v8, %v2853_v23  ;;  %v2854_v21 = vadd.f32 %v10225_v5, %v2783_v33  ;;  %vm2918_vm12 = vcmp.ge.f32.partialorder %v2853_v23, 0.0 }
 0x4a4   :  { %v2341_v16 = vpop.f32.mrb[72].mxu0  ;;  %v3229_v60 = vrot.slane %v3227_v6, 7  ;;  %v3434_v56 = vrot.slane %v3230_v62, 1 }
 0x4a5   :  { %vm2919_vm13 = vcmp.ge.f32.partialorder %v2854_v21, 0.0  ;;  %v2989_v37 = vmul.f32 %v10202_v8, %v2854_v21  ;;  %v2631_v1 = vadd.f32 %v9760_v24, %v2341_v16  ;;  %v2343_v12 = vpop.f32.mrb[73].mxu0  ;;  %v3052_v20 = vsel %vm2918_vm12, %v2853_v23, %v2988_v48 }
 0x4a6   :  { %v2344_v11 = vpop.f32.mrb[74].mxu0  ;;  %v3232_v14 = vor.u32 %v3230_v62, %v3229_v60  ;;  %v10239_v38 = vor.u32 %v3434_v56, %v3227_v6 }
 0x4a7   :  { %v3053_v19 = vsel %vm2919_vm13, %v2854_v21, %v2989_v37  ;;  %v2784_v9 = vmul.f32 %v10211_v61, %v2631_v1  ;;  %v2634_v33 = vadd.f32 %v13520_v17, %v2344_v11  ;;  %v2346_v2 = vpop.f32.mrb[75].mxu0  ;;  %v13522_v37 = vld [vmem:[#allocation39_spill] sm:$0xff] }
 0x4a8   :  { %13519 = vst [vmem:[#allocation48_spill] sm:$0xff] %v10239_v38  ;;  %v10243_v10 = vpack.c.bf16 %v3053_v19, %v3052_v20  ;;  %v10247_v50 = vsel %vm8085_vm2, 0, %v3232_v14 }
 0x4a9   :  { %v2855_v24 = vadd.f32 %v10225_v5, %v2784_v9  ;;  %v2785_v16 = vmul.f32 %v10211_v61, %v2634_v33  ;;  %4275 = vmatmul.mubr.bf16.gmra.mrb[132].mxu1 %v10247_v50  ;;  %v13523_v33 = vld [vmem:[#allocation12_spill] sm:$0xff] }
 0x4aa   :  { %13521 = vst [vmem:[#allocation13_spill] sm:$0xff] %v10243_v10  ;;  %4282 = vmatprep.mubr.bf16.mxu1 %v10243_v10  ;;  %v3234_v23 = vshrl.u32 %v10243_v10, 16  ;;  %v3237_v6 = vshll.u32 %v10243_v10, 16 }
 0x4ab   :  { %v2990_v2 = vmul.f32 %v10202_v8, %v2855_v24  ;;  %v2856_v62 = vadd.f32 %v10225_v5, %v2785_v16  ;;  %vm2920_vm14 = vcmp.ge.f32.partialorder %v2855_v24, 0.0 }
 0x4ac   :  { %v2349_v48 = vpop.f32.mrb[76].mxu0  ;;  %v3236_v21 = vrot.slane %v3234_v23, 7  ;;  %v3436_v60 = vrot.slane %v3237_v6, 1 }
 0x4ad   :  { %vm2921_vm15 = vcmp.ge.f32.partialorder %v2856_v62, 0.0  ;;  %v2991_v56 = vmul.f32 %v10202_v8, %v2856_v62  ;;  %v2639_v1 = vadd.f32 %v13522_v37, %v2349_v48  ;;  %v2351_v12 = vpop.f32.mrb[77].mxu0  ;;  %v3054_v19 = vsel %vm2920_vm14, %v2855_v24, %v2990_v2 }
 0x4ae   :  { %v2352_v11 = vpop.f32.mrb[78].mxu0  ;;  %v3239_v14 = vor.u32 %v3237_v6, %v3236_v21  ;;  %v3437_v20 = vor.u32 %v3436_v60, %v3234_v23 }
 0x4af   :  { %v3055_v9 = vsel %vm2921_vm15, %v2856_v62, %v2991_v56  ;;  %v2786_v17 = vmul.f32 %v10211_v61, %v2639_v1  ;;  %v2642_v10 = vadd.f32 %v13523_v33, %v2352_v11  ;;  %v2354_v16 = vpop.f32.mrb[79].mxu0 }
 0x4b0   :  { %v10261_v54 = vpack.c.bf16 %v3055_v9, %v3054_v19  ;;  %v10265_v38 = vsel %vm8085_vm2, 0, %v3239_v14  ;;  %v10269_v48 = vsel %vm8576_vm5, %v3437_v20, 0 }
 0x4b1   :  { %v2857_v6 = vadd.f32 %v10225_v5, %v2786_v17  ;;  %v2787_v24 = vmul.f32 %v10211_v61, %v2642_v10  ;;  %4283 = vmatmul.mubr.bf16.gmra.mrb[136].mxu1 %v10265_v38  ;;  %6827 = vmatprep.mubr.bf16.mxu0 %v10269_v48 }
 0x4b2   :  { %13524 = vst [vmem:[#allocation39_spill] sm:$0xff] %v10261_v54  ;;  %4290 = vmatprep.mubr.bf16.mxu1 %v10261_v54  ;;  %v3241_v23 = vshrl.u32 %v10261_v54, 16  ;;  %v3244_v2 = vshll.u32 %v10261_v54, 16 }
 0x4b3   :  { %v2992_v62 = vmul.f32 %v10202_v8, %v2857_v6  ;;  %v2858_v21 = vadd.f32 %v10225_v5, %v2787_v24  ;;  %vm2922_vm0 = vcmp.ge.f32.partialorder %v2857_v6, 0.0 }
 0x4b4   :  { %v2357_v60 = vpop.f32.mrb[80].mxu0  ;;  %v3243_v56 = vrot.slane %v3241_v23, 7  ;;  %v3438_v37 = vrot.slane %v3244_v2, 1 }
 0x4b5   :  { %vm2923_vm1 = vcmp.ge.f32.partialorder %v2858_v21, 0.0  ;;  %v2993_v10 = vmul.f32 %v10202_v8, %v2858_v21  ;;  %v2647_v1 = vadd.f32 %v9814_v47, %v2357_v60  ;;  %v2359_v12 = vpop.f32.mrb[81].mxu0  ;;  %v3056_v19 = vsel %vm2922_vm0, %v2857_v6, %v2992_v62 }
 0x4b6   :  { %v2360_v11 = vpop.f32.mrb[82].mxu0  ;;  %v3246_v14 = vor.u32 %v3244_v2, %v3243_v56  ;;  %v3439_v20 = vor.u32 %v3438_v37, %v3241_v23 }
 0x4b7   :  { %v3057_v9 = vsel %vm2923_vm1, %v2858_v21, %v2993_v10  ;;  %v2788_v17 = vmul.f32 %v10211_v61, %v2647_v1  ;;  %v2650_v33 = vadd.f32 %v9823_v18, %v2360_v11  ;;  %v2362_v16 = vpop.f32.mrb[83].mxu0 }
 0x4b8   :  { %v10284_v24 = vpack.c.bf16 %v3057_v9, %v3056_v19  ;;  %v10288_v54 = vsel %vm8085_vm2, 0, %v3246_v14  ;;  %v10292_v47 = vsel %vm8576_vm5, %v3439_v20, 0 }
 0x4b9   :  { %v2859_v2 = vadd.f32 %v10225_v5, %v2788_v17  ;;  %v2789_v6 = vmul.f32 %v10211_v61, %v2650_v33  ;;  %4291 = vmatmul.mubr.bf16.gmra.mrb[140].mxu1 %v10288_v54  ;;  %6828 = vmatmul.mubr.bf16.gmra.mrb[160].mxu0 %v10292_v47 }
 0x4ba   :  { %13525 = vst [vmem:[#allocation12_spill] sm:$0xff] %v10284_v24  ;;  %4298 = vmatprep.mubr.bf16.mxu1 %v10284_v24  ;;  %v3248_v18 = vshrl.u32 %v10284_v24, 16  ;;  %v3251_v23 = vshll.u32 %v10284_v24, 16 }
 0x4bb   :  { %v2994_v62 = vmul.f32 %v10202_v8, %v2859_v2  ;;  %v2860_v21 = vadd.f32 %v10225_v5, %v2789_v6  ;;  %vm2924_vm3 = vcmp.ge.f32.partialorder %v2859_v2, 0.0 }
 0x4bc   :  { %v2365_v60 = vpop.f32.mrb[84].mxu0  ;;  %v3250_v56 = vrot.slane %v3248_v18, 7  ;;  %v3440_v37 = vrot.slane %v3251_v23, 1 }
 0x4bd   :  { %vm2925_vm4 = vcmp.ge.f32.partialorder %v2860_v21, 0.0  ;;  %v2995_v10 = vmul.f32 %v10202_v8, %v2860_v21  ;;  %v2655_v1 = vadd.f32 %v9808_v28, %v2365_v60  ;;  %v2367_v12 = vpop.f32.mrb[85].mxu0  ;;  %v3058_v19 = vsel %vm2924_vm3, %v2859_v2, %v2994_v62 }
 0x4be   :  { %v2368_v11 = vpop.f32.mrb[86].mxu0  ;;  %v3253_v14 = vor.u32 %v3251_v23, %v3250_v56  ;;  %v3441_v20 = vor.u32 %v3440_v37, %v3248_v18 }
 0x4bf   :  { %v3059_v9 = vsel %vm2925_vm4, %v2860_v21, %v2995_v10  ;;  %v2790_v17 = vmul.f32 %v10211_v61, %v2655_v1  ;;  %v2658_v33 = vadd.f32 %v9819_v55, %v2368_v11  ;;  %v2370_v16 = vpop.f32.mrb[87].mxu0 }
 0x4c0   :  { %v10307_v6 = vpack.c.bf16 %v3059_v9, %v3058_v19  ;;  %v10311_v24 = vsel %vm8085_vm2, 0, %v3253_v14  ;;  %v10315_v28 = vsel %vm8576_vm5, %v3441_v20, 0 }
 0x4c1   :  { %v2861_v23 = vadd.f32 %v10225_v5, %v2790_v17  ;;  %v2791_v2 = vmul.f32 %v10211_v61, %v2658_v33  ;;  %4299 = vmatmul.mubr.bf16.gmra.mrb[144].mxu1 %v10311_v24  ;;  %6831 = vmatprep.mubr.bf16.mxu0 %v10315_v28 }
 0x4c2   :  { %13526 = vst [vmem:[#allocation49_spill] sm:$0xff] %v10307_v6  ;;  %4306 = vmatprep.mubr.bf16.mxu1 %v10307_v6  ;;  %v3255_v55 = vshrl.u32 %v10307_v6, 16  ;;  %v3258_v18 = vshll.u32 %v10307_v6, 16 }
 0x4c3   :  { %v2996_v62 = vmul.f32 %v10202_v8, %v2861_v23  ;;  %v2862_v21 = vadd.f32 %v10225_v5, %v2791_v2  ;;  %vm2926_vm6 = vcmp.ge.f32.partialorder %v2861_v23, 0.0 }
 0x4c4   :  { %v2373_v60 = vpop.f32.mrb[88].mxu0  ;;  %v3257_v56 = vrot.slane %v3255_v55, 7  ;;  %v3442_v37 = vrot.slane %v3258_v18, 1 }
 0x4c5   :  { %vm2927_vm7 = vcmp.ge.f32.partialorder %v2862_v21, 0.0  ;;  %v2997_v10 = vmul.f32 %v10202_v8, %v2862_v21  ;;  %v2663_v1 = vadd.f32 %v9878_v0, %v2373_v60  ;;  %v2375_v12 = vpop.f32.mrb[89].mxu0  ;;  %v3060_v19 = vsel %vm2926_vm6, %v2861_v23, %v2996_v62 }
 0x4c6   :  { %v2376_v11 = vpop.f32.mrb[90].mxu0  ;;  %v3260_v14 = vor.u32 %v3258_v18, %v3257_v56  ;;  %v3443_v20 = vor.u32 %v3442_v37, %v3255_v55 }
 0x4c7   :  { %v3061_v9 = vsel %vm2927_vm7, %v2862_v21, %v2997_v10  ;;  %v2792_v17 = vmul.f32 %v10211_v61, %v2663_v1  ;;  %v2666_v33 = vadd.f32 %v9888_v43, %v2376_v11  ;;  %v2378_v16 = vpop.f32.mrb[91].mxu0 }
 0x4c8   :  { %v10330_v2 = vpack.c.bf16 %v3061_v9, %v3060_v19  ;;  %v10334_v6 = vsel %vm8085_vm2, 0, %v3260_v14  ;;  %v10338_v0 = vsel %vm8576_vm5, %v3443_v20, 0 }
 0x4c9   :  { %v2863_v18 = vadd.f32 %v10225_v5, %v2792_v17  ;;  %v2793_v23 = vmul.f32 %v10211_v61, %v2666_v33  ;;  %4307 = vmatmul.mubr.bf16.gmra.mrb[148].mxu1 %v10334_v6  ;;  %6832 = vmatmul.mubr.bf16.gmra.mrb[164].mxu0 %v10338_v0 }
 0x4ca   :  { %13527 = vst [vmem:[#allocation50_spill] sm:$0xff] %v10330_v2  ;;  %4314 = vmatprep.mubr.bf16.mxu1 %v10330_v2  ;;  %v3262_v43 = vshrl.u32 %v10330_v2, 16  ;;  %v3265_v55 = vshll.u32 %v10330_v2, 16 }
 0x4cb   :  { %v2998_v62 = vmul.f32 %v10202_v8, %v2863_v18  ;;  %v2864_v21 = vadd.f32 %v10225_v5, %v2793_v23  ;;  %vm2928_vm8 = vcmp.ge.f32.partialorder %v2863_v18, 0.0 }
 0x4cc   :  { %v2381_v60 = vpop.f32.mrb[92].mxu0  ;;  %v3264_v56 = vrot.slane %v3262_v43, 7  ;;  %v3444_v37 = vrot.slane %v3265_v55, 1 }
 0x4cd   :  { %vm2929_vm9 = vcmp.ge.f32.partialorder %v2864_v21, 0.0  ;;  %v2999_v10 = vmul.f32 %v10202_v8, %v2864_v21  ;;  %v2671_v1 = vadd.f32 %v9872_v4, %v2381_v60  ;;  %v2383_v12 = vpop.f32.mrb[93].mxu0  ;;  %v3062_v19 = vsel %vm2928_vm8, %v2863_v18, %v2998_v62 }
 0x4ce   :  { %v2384_v11 = vpop.f32.mrb[94].mxu0  ;;  %v3267_v14 = vor.u32 %v3265_v55, %v3264_v56  ;;  %v3445_v20 = vor.u32 %v3444_v37, %v3262_v43 }
 0x4cf   :  { %v3063_v9 = vsel %vm2929_vm9, %v2864_v21, %v2999_v10  ;;  %v2794_v17 = vmul.f32 %v10211_v61, %v2671_v1  ;;  %v2674_v33 = vadd.f32 %v9884_v59, %v2384_v11  ;;  %v2386_v16 = vpop.f32.mrb[95].mxu0 }
 0x4d0   :  { %v10353_v23 = vpack.c.bf16 %v3063_v9, %v3062_v19  ;;  %v10357_v2 = vsel %vm8085_vm2, 0, %v3267_v14  ;;  %v10361_v4 = vsel %vm8576_vm5, %v3445_v20, 0 }
 0x4d1   :  { %v2865_v55 = vadd.f32 %v10225_v5, %v2794_v17  ;;  %v2795_v18 = vmul.f32 %v10211_v61, %v2674_v33  ;;  %4315 = vmatmul.mubr.bf16.gmra.mrb[152].mxu1 %v10357_v2  ;;  %6835 = vmatprep.mubr.bf16.mxu0 %v10361_v4 }
 0x4d2   :  { %13528 = vst [vmem:[#allocation51_spill] sm:$0xff] %v10353_v23  ;;  %4322 = vmatprep.mubr.bf16.mxu1 %v10353_v23  ;;  %v3269_v59 = vshrl.u32 %v10353_v23, 16  ;;  %v3272_v43 = vshll.u32 %v10353_v23, 16 }
 0x4d3   :  { %v3000_v62 = vmul.f32 %v10202_v8, %v2865_v55  ;;  %v2866_v21 = vadd.f32 %v10225_v5, %v2795_v18  ;;  %vm2930_vm10 = vcmp.ge.f32.partialorder %v2865_v55, 0.0 }
 0x4d4   :  { %v2389_v60 = vpop.f32.mrb[96].mxu0  ;;  %v3271_v56 = vrot.slane %v3269_v59, 7  ;;  %v3446_v37 = vrot.slane %v3272_v43, 1 }
 0x4d5   :  { %vm2931_vm11 = vcmp.ge.f32.partialorder %v2866_v21, 0.0  ;;  %v3001_v10 = vmul.f32 %v10202_v8, %v2866_v21  ;;  %v2679_v1 = vadd.f32 %v9937_v41, %v2389_v60  ;;  %v2391_v12 = vpop.f32.mrb[97].mxu0  ;;  %v3064_v19 = vsel %vm2930_vm10, %v2865_v55, %v3000_v62 }
 0x4d6   :  { %v2392_v11 = vpop.f32.mrb[98].mxu0  ;;  %v3274_v14 = vor.u32 %v3272_v43, %v3271_v56  ;;  %v3447_v20 = vor.u32 %v3446_v37, %v3269_v59 }
 0x4d7   :  { %v3065_v9 = vsel %vm2931_vm11, %v2866_v21, %v3001_v10  ;;  %v2796_v17 = vmul.f32 %v10211_v61, %v2679_v1  ;;  %v2682_v33 = vadd.f32 %v9946_v30, %v2392_v11  ;;  %v2394_v16 = vpop.f32.mrb[99].mxu0 }
 0x4d8   :  { %v10376_v18 = vpack.c.bf16 %v3065_v9, %v3064_v19  ;;  %v10380_v23 = vsel %vm8085_vm2, 0, %v3274_v14  ;;  %v10384_v41 = vsel %vm8576_vm5, %v3447_v20, 0 }
 0x4d9   :  { %v2867_v43 = vadd.f32 %v10225_v5, %v2796_v17  ;;  %v2797_v55 = vmul.f32 %v10211_v61, %v2682_v33  ;;  %4323 = vmatmul.mubr.bf16.gmra.mrb[156].mxu1 %v10380_v23  ;;  %6836 = vmatmul.mubr.bf16.gmra.mrb[168].mxu0 %v10384_v41 }
 0x4da   :  { %13529 = vst [vmem:[#allocation52_spill] sm:$0xff] %v10376_v18  ;;  %4330 = vmatprep.mubr.bf16.mxu1 %v10376_v18  ;;  %v3276_v30 = vshrl.u32 %v10376_v18, 16  ;;  %v3279_v59 = vshll.u32 %v10376_v18, 16 }
 0x4db   :  { %v3002_v62 = vmul.f32 %v10202_v8, %v2867_v43  ;;  %v2868_v21 = vadd.f32 %v10225_v5, %v2797_v55  ;;  %vm2932_vm12 = vcmp.ge.f32.partialorder %v2867_v43, 0.0 }
 0x4dc   :  { %v2397_v60 = vpop.f32.mrb[100].mxu0  ;;  %v3278_v56 = vrot.slane %v3276_v30, 7  ;;  %v3448_v37 = vrot.slane %v3279_v59, 1 }
 0x4dd   :  { %vm2933_vm13 = vcmp.ge.f32.partialorder %v2868_v21, 0.0  ;;  %v3003_v10 = vmul.f32 %v10202_v8, %v2868_v21  ;;  %v2687_v1 = vadd.f32 %v9931_v53, %v2397_v60  ;;  %v2399_v12 = vpop.f32.mrb[101].mxu0  ;;  %v3066_v19 = vsel %vm2932_vm12, %v2867_v43, %v3002_v62 }
 0x4de   :  { %v2400_v11 = vpop.f32.mrb[102].mxu0  ;;  %v3281_v14 = vor.u32 %v3279_v59, %v3278_v56  ;;  %v3449_v20 = vor.u32 %v3448_v37, %v3276_v30 }
 0x4df   :  { %v3067_v9 = vsel %vm2933_vm13, %v2868_v21, %v3003_v10  ;;  %v2798_v17 = vmul.f32 %v10211_v61, %v2687_v1  ;;  %v2690_v33 = vadd.f32 %v9942_v13, %v2400_v11  ;;  %v2402_v16 = vpop.f32.mrb[103].mxu0 }
 0x4e0   :  { %v10399_v55 = vpack.c.bf16 %v3067_v9, %v3066_v19  ;;  %v10403_v18 = vsel %vm8085_vm2, 0, %v3281_v14  ;;  %v10407_v53 = vsel %vm8576_vm5, %v3449_v20, 0 }
 0x4e1   :  { %v2869_v59 = vadd.f32 %v10225_v5, %v2798_v17  ;;  %v2799_v43 = vmul.f32 %v10211_v61, %v2690_v33  ;;  %4331 = vmatmul.mubr.bf16.gmra.mrb[160].mxu1 %v10403_v18  ;;  %6839 = vmatprep.mubr.bf16.mxu0 %v10407_v53 }
 0x4e2   :  { %13530 = vst [vmem:[#allocation53_spill] sm:$0xff] %v10399_v55  ;;  %4338 = vmatprep.mubr.bf16.mxu1 %v10399_v55  ;;  %v3283_v13 = vshrl.u32 %v10399_v55, 16  ;;  %v3286_v30 = vshll.u32 %v10399_v55, 16 }
 0x4e3   :  { %v3004_v62 = vmul.f32 %v10202_v8, %v2869_v59  ;;  %v2870_v21 = vadd.f32 %v10225_v5, %v2799_v43  ;;  %vm2934_vm14 = vcmp.ge.f32.partialorder %v2869_v59, 0.0 }
 0x4e4   :  { %v2405_v60 = vpop.f32.mrb[104].mxu0  ;;  %v3285_v56 = vrot.slane %v3283_v13, 7  ;;  %v3450_v37 = vrot.slane %v3286_v30, 1 }
 0x4e5   :  { %vm2935_vm15 = vcmp.ge.f32.partialorder %v2870_v21, 0.0  ;;  %v3005_v10 = vmul.f32 %v10202_v8, %v2870_v21  ;;  %v2695_v1 = vadd.f32 %v9974_v46, %v2405_v60  ;;  %v2407_v12 = vpop.f32.mrb[105].mxu0  ;;  %v3068_v19 = vsel %vm2934_vm14, %v2869_v59, %v3004_v62 }
 0x4e6   :  { %v2408_v11 = vpop.f32.mrb[106].mxu0  ;;  %v3288_v14 = vor.u32 %v3286_v30, %v3285_v56  ;;  %v3451_v20 = vor.u32 %v3450_v37, %v3283_v13 }
 0x4e7   :  { %v3069_v9 = vsel %vm2935_vm15, %v2870_v21, %v3005_v10  ;;  %v2800_v17 = vmul.f32 %v10211_v61, %v2695_v1  ;;  %v2698_v33 = vadd.f32 %v9981_v58, %v2408_v11  ;;  %v2410_v16 = vpop.f32.mrb[107].mxu0 }
 0x4e8   :  { %v10422_v43 = vpack.c.bf16 %v3069_v9, %v3068_v19  ;;  %v10426_v55 = vsel %vm8085_vm2, 0, %v3288_v14  ;;  %v10430_v46 = vsel %vm8576_vm5, %v3451_v20, 0 }
 0x4e9   :  { %v2871_v30 = vadd.f32 %v10225_v5, %v2800_v17  ;;  %v2801_v59 = vmul.f32 %v10211_v61, %v2698_v33  ;;  %4339 = vmatmul.mubr.bf16.gmra.mrb[164].mxu1 %v10426_v55  ;;  %6840 = vmatmul.mubr.bf16.gmra.mrb[172].mxu0 %v10430_v46 }
 0x4ea   :  { %13531 = vst [vmem:[#allocation54_spill] sm:$0xff] %v10422_v43  ;;  %4346 = vmatprep.mubr.bf16.mxu1 %v10422_v43  ;;  %v3290_v58 = vshrl.u32 %v10422_v43, 16  ;;  %v3293_v13 = vshll.u32 %v10422_v43, 16 }
 0x4eb   :  { %v3006_v62 = vmul.f32 %v10202_v8, %v2871_v30  ;;  %v2872_v21 = vadd.f32 %v10225_v5, %v2801_v59  ;;  %vm2936_vm0 = vcmp.ge.f32.partialorder %v2871_v30, 0.0 }
 0x4ec   :  { %v2413_v60 = vpop.f32.mrb[108].mxu0  ;;  %v3292_v56 = vrot.slane %v3290_v58, 7  ;;  %v3452_v37 = vrot.slane %v3293_v13, 1 }
 0x4ed   :  { %vm2937_vm1 = vcmp.ge.f32.partialorder %v2872_v21, 0.0  ;;  %v3007_v10 = vmul.f32 %v10202_v8, %v2872_v21  ;;  %v2703_v1 = vadd.f32 %v9969_v45, %v2413_v60  ;;  %v2415_v12 = vpop.f32.mrb[109].mxu0  ;;  %v3070_v19 = vsel %vm2936_vm0, %v2871_v30, %v3006_v62 }
 0x4ee   :  { %v2416_v11 = vpop.f32.mrb[110].mxu0  ;;  %v3295_v14 = vor.u32 %v3293_v13, %v3292_v56  ;;  %v3453_v20 = vor.u32 %v3452_v37, %v3290_v58 }
 0x4ef   :  { %v3071_v9 = vsel %vm2937_vm1, %v2872_v21, %v3007_v10  ;;  %v2802_v17 = vmul.f32 %v10211_v61, %v2703_v1  ;;  %v2706_v33 = vadd.f32 %v9978_v29, %v2416_v11  ;;  %v2418_v16 = vpop.f32.mrb[111].mxu0 }
 0x4f0   :  { %v10445_v59 = vpack.c.bf16 %v3071_v9, %v3070_v19  ;;  %v10449_v43 = vsel %vm8085_vm2, 0, %v3295_v14  ;;  %v10453_v45 = vsel %vm8576_vm5, %v3453_v20, 0 }
 0x4f1   :  { %13533 = vst [vmem:[#allocation56_spill] sm:$0xff] %v10453_v45  ;;  %v2873_v13 = vadd.f32 %v10225_v5, %v2802_v17  ;;  %v2803_v30 = vmul.f32 %v10211_v61, %v2706_v33  ;;  %4347 = vmatmul.mubr.bf16.gmra.mrb[168].mxu1 %v10449_v43  ;;  %6843 = vmatprep.mubr.bf16.mxu0 %v10453_v45 }
 0x4f2   :  { %13532 = vst [vmem:[#allocation55_spill] sm:$0xff] %v10445_v59  ;;  %4354 = vmatprep.mubr.bf16.mxu1 %v10445_v59  ;;  %v3297_v29 = vshrl.u32 %v10445_v59, 16  ;;  %v3300_v58 = vshll.u32 %v10445_v59, 16 }
 0x4f3   :  { %v3008_v62 = vmul.f32 %v10202_v8, %v2873_v13  ;;  %v2874_v21 = vadd.f32 %v10225_v5, %v2803_v30  ;;  %vm2938_vm3 = vcmp.ge.f32.partialorder %v2873_v13, 0.0 }
 0x4f4   :  { %v2421_v60 = vpop.f32.mrb[112].mxu0  ;;  %v3299_v56 = vrot.slane %v3297_v29, 7  ;;  %v3454_v37 = vrot.slane %v3300_v58, 1 }
 0x4f5   :  { %vm2939_vm4 = vcmp.ge.f32.partialorder %v2874_v21, 0.0  ;;  %v3009_v10 = vmul.f32 %v10202_v8, %v2874_v21  ;;  %v2711_v1 = vadd.f32 %v10006_v63, %v2421_v60  ;;  %v2423_v12 = vpop.f32.mrb[113].mxu0  ;;  %v3072_v19 = vsel %vm2938_vm3, %v2873_v13, %v3008_v62 }
 0x4f6   :  { %v2424_v11 = vpop.f32.mrb[114].mxu0  ;;  %v3302_v14 = vor.u32 %v3300_v58, %v3299_v56  ;;  %v3455_v20 = vor.u32 %v3454_v37, %v3297_v29 }
 0x4f7   :  { %v3073_v9 = vsel %vm2939_vm4, %v2874_v21, %v3009_v10  ;;  %v2804_v17 = vmul.f32 %v10211_v61, %v2711_v1  ;;  %v2714_v33 = vadd.f32 %v10012_v40, %v2424_v11  ;;  %v2426_v16 = vpop.f32.mrb[115].mxu0  ;;  %v13536_v1 = vld [vmem:[#allocation40_spill] sm:$0xff] }
 0x4f8   :  { %v10468_v30 = vpack.c.bf16 %v3073_v9, %v3072_v19  ;;  %v10472_v59 = vsel %vm8085_vm2, 0, %v3302_v14  ;;  %v10476_v63 = vsel %vm8576_vm5, %v3455_v20, 0  ;;  %v13537_v16 = vld [vmem:[#allocation21_spill] sm:$0xff] }
 0x4f9   :  { %13535 = vst [vmem:[#allocation58_spill] sm:$0xff] %v10476_v63  ;;  %v2875_v58 = vadd.f32 %v10225_v5, %v2804_v17  ;;  %v2805_v13 = vmul.f32 %v10211_v61, %v2714_v33  ;;  %4355 = vmatmul.mubr.bf16.gmra.mrb[172].mxu1 %v10472_v59  ;;  %6844 = vmatmul.mubr.bf16.gmra.mrb[176].mxu0 %v10476_v63 }
 0x4fa   :  { %13534 = vst [vmem:[#allocation57_spill] sm:$0xff] %v10468_v30  ;;  %4362 = vmatprep.mubr.bf16.mxu1 %v10468_v30  ;;  %v3304_v40 = vshrl.u32 %v10468_v30, 16  ;;  %v3307_v29 = vshll.u32 %v10468_v30, 16 }
 0x4fb   :  { %v3010_v62 = vmul.f32 %v10202_v8, %v2875_v58  ;;  %v2876_v21 = vadd.f32 %v10225_v5, %v2805_v13  ;;  %vm2940_vm6 = vcmp.ge.f32.partialorder %v2875_v58, 0.0 }
 0x4fc   :  { %v2429_v60 = vpop.f32.mrb[116].mxu0  ;;  %v3306_v56 = vrot.slane %v3304_v40, 7  ;;  %v3456_v37 = vrot.slane %v3307_v29, 1 }
 0x4fd   :  { %vm2941_vm7 = vcmp.ge.f32.partialorder %v2876_v21, 0.0  ;;  %v3011_v10 = vmul.f32 %v10202_v8, %v2876_v21  ;;  %v2719_v12 = vadd.f32 %v13536_v1, %v2429_v60  ;;  %v2431_v11 = vpop.f32.mrb[117].mxu0  ;;  %v3074_v9 = vsel %vm2940_vm6, %v2875_v58, %v3010_v62 }
 0x4fe   :  { %v2432_v14 = vpop.f32.mrb[118].mxu0  ;;  %v3309_v20 = vor.u32 %v3307_v29, %v3306_v56  ;;  %v3457_v19 = vor.u32 %v3456_v37, %v3304_v40 }
 0x4ff   :  { %v3075_v17 = vsel %vm2941_vm7, %v2876_v21, %v3011_v10  ;;  %v2806_v33 = vmul.f32 %v10211_v61, %v2719_v12  ;;  %v2722_v30 = vadd.f32 %v13537_v16, %v2432_v14  ;;  %v2434_v13 = vpop.f32.mrb[119].mxu0 }
 0x500   :  { %v10491_v63 = vpack.c.bf16 %v3075_v17, %v3074_v9  ;;  %v10495_v45 = vsel %vm8085_vm2, 0, %v3309_v20  ;;  %v10499_v60 = vsel %vm8576_vm5, %v3457_v19, 0 }
 0x501   :  { %13539 = vst [vmem:[#allocation21_spill] sm:$0xff] %v10499_v60  ;;  %v2877_v29 = vadd.f32 %v10225_v5, %v2806_v33  ;;  %v2807_v58 = vmul.f32 %v10211_v61, %v2722_v30  ;;  %4363 = vmatmul.mubr.bf16.gmra.mrb[176].mxu1 %v10495_v45  ;;  %6847 = vmatprep.mubr.bf16.mxu0 %v10499_v60 }
 0x502   :  { %13538 = vst [vmem:[#allocation40_spill] sm:$0xff] %v10491_v63  ;;  %4370 = vmatprep.mubr.bf16.mxu1 %v10491_v63  ;;  %v3311_v40 = vshrl.u32 %v10491_v63, 16  ;;  %v3314_v62 = vshll.u32 %v10491_v63, 16 }
 0x503   :  { %v3012_v21 = vmul.f32 %v10202_v8, %v2877_v29  ;;  %v2878_v56 = vadd.f32 %v10225_v5, %v2807_v58  ;;  %vm2942_vm8 = vcmp.ge.f32.partialorder %v2877_v29, 0.0 }
 0x504   :  { %v2437_v37 = vpop.f32.mrb[120].mxu0  ;;  %v3313_v10 = vrot.slane %v3311_v40, 7  ;;  %v3458_v1 = vrot.slane %v3314_v62, 1 }
 0x505   :  { %vm2943_vm9 = vcmp.ge.f32.partialorder %v2878_v56, 0.0  ;;  %v3013_v30 = vmul.f32 %v10202_v8, %v2878_v56  ;;  %v2727_v12 = vadd.f32 %v10040_v39, %v2437_v37  ;;  %v2439_v11 = vpop.f32.mrb[121].mxu0  ;;  %v3076_v9 = vsel %vm2942_vm8, %v2877_v29, %v3012_v21 }
 0x506   :  { %v2440_v14 = vpop.f32.mrb[122].mxu0  ;;  %v3316_v20 = vor.u32 %v3314_v62, %v3313_v10  ;;  %v3459_v19 = vor.u32 %v3458_v1, %v3311_v40 }
 0x507   :  { %v3077_v17 = vsel %vm2943_vm9, %v2878_v56, %v3013_v30  ;;  %v2808_v33 = vmul.f32 %v10211_v61, %v2727_v12  ;;  %v2730_v16 = vadd.f32 %v10047_v35, %v2440_v14  ;;  %v2442_v13 = vpop.f32.mrb[123].mxu0  ;;  %v13542_v12 = vld [vmem:[#allocation26_spill] sm:$0xff] }
 0x508   :  { %v10514_v58 = vpack.c.bf16 %v3077_v17, %v3076_v9  ;;  %v10518_v63 = vsel %vm8085_vm2, 0, %v3316_v20  ;;  %v10522_v39 = vsel %vm8576_vm5, %v3459_v19, 0  ;;  %v13543_v13 = vld [vmem:[#allocation28_spill] sm:$0xff] }
 0x509   :  { %13541 = vst [vmem:[#allocation60_spill] sm:$0xff] %v10522_v39  ;;  %v2879_v62 = vadd.f32 %v10225_v5, %v2808_v33  ;;  %v2809_v29 = vmul.f32 %v10211_v61, %v2730_v16  ;;  %4371 = vmatmul.mubr.bf16.gmra.mrb[180].mxu1 %v10518_v63  ;;  %6848 = vmatmul.mubr.bf16.gmra.mrb[180].mxu0 %v10522_v39 }
 0x50a   :  { %13540 = vst [vmem:[#allocation59_spill] sm:$0xff] %v10514_v58  ;;  %4378 = vmatprep.mubr.bf16.mxu1 %v10514_v58  ;;  %v3318_v35 = vshrl.u32 %v10514_v58, 16  ;;  %v3321_v40 = vshll.u32 %v10514_v58, 16 }
 0x50b   :  { %v3014_v21 = vmul.f32 %v10202_v8, %v2879_v62  ;;  %v2880_v56 = vadd.f32 %v10225_v5, %v2809_v29  ;;  %vm2944_vm10 = vcmp.ge.f32.partialorder %v2879_v62, 0.0 }
 0x50c   :  { %v2445_v37 = vpop.f32.mrb[124].mxu0  ;;  %v3320_v10 = vrot.slane %v3318_v35, 7  ;;  %v3460_v1 = vrot.slane %v3321_v40, 1 }
 0x50d   :  { %vm2945_vm11 = vcmp.ge.f32.partialorder %v2880_v56, 0.0  ;;  %v3015_v30 = vmul.f32 %v10202_v8, %v2880_v56  ;;  %v2735_v11 = vadd.f32 %v13542_v12, %v2445_v37  ;;  %v2447_v14 = vpop.f32.mrb[125].mxu0  ;;  %v3078_v17 = vsel %vm2944_vm10, %v2879_v62, %v3014_v21 }
 0x50e   :  { %v2448_v20 = vpop.f32.mrb[126].mxu0  ;;  %v3323_v19 = vor.u32 %v3321_v40, %v3320_v10  ;;  %v3461_v9 = vor.u32 %v3460_v1, %v3318_v35 }
 0x50f   :  { %v3079_v33 = vsel %vm2945_vm11, %v2880_v56, %v3015_v30  ;;  %v2810_v16 = vmul.f32 %v10211_v61, %v2735_v11  ;;  %v2738_v58 = vadd.f32 %v13543_v13, %v2448_v20  ;;  %v2450_v29 = vpop.f32.mrb[127].mxu0 }
 0x510   :  { %v10537_v39 = vpack.c.bf16 %v3079_v33, %v3078_v17  ;;  %v10541_v60 = vsel %vm8085_vm2, 0, %v3323_v19  ;;  %v10545_v37 = vsel %vm8576_vm5, %v3461_v9, 0 }
 0x511   :  { %v2881_v40 = vadd.f32 %v10225_v5, %v2810_v16  ;;  %v2811_v62 = vmul.f32 %v10211_v61, %v2738_v58  ;;  %4379 = vmatmul.mubr.bf16.gmra.mrb[184].mxu1 %v10541_v60  ;;  %6851 = vmatprep.mubr.bf16.mxu0 %v10545_v37 }
 0x512   :  { %4386 = vmatprep.mubr.bf16.mxu1 %v10537_v39  ;;  %v3325_v35 = vshrl.u32 %v10537_v39, 16  ;;  %v3328_v21 = vshll.u32 %v10537_v39, 16 }
 0x513   :  { %v3016_v56 = vmul.f32 %v10202_v8, %v2881_v40  ;;  %v2882_v10 = vadd.f32 %v10225_v5, %v2811_v62  ;;  %vm2946_vm12 = vcmp.ge.f32.partialorder %v2881_v40, 0.0 }
 0x514   :  { %v10556_v1 = vpop.f32.mrb[128].mxu0  ;;  %v3327_v30 = vrot.slane %v3325_v35, 7  ;;  %v3462_v12 = vrot.slane %v3328_v21, 1 }
 0x515   :  { %13544 = vst [vmem:[#allocation26_spill] sm:$0xff] %v10556_v1  ;;  %vm2947_vm13 = vcmp.ge.f32.partialorder %v2882_v10, 0.0  ;;  %v3017_v61 = vmul.f32 %v10202_v8, %v2882_v10  ;;  %v10559_v58 = vpop.f32.mrb[129].mxu0  ;;  %v3080_v19 = vsel %vm2946_vm12, %v2881_v40, %v3016_v56  ;;  %v13548_v8 = vld [vmem:[#allocation42_spill] sm:$0xff] }
 0x516   :  { %13545 = vst [vmem:[#allocation28_spill] sm:$0xff] %v10559_v58  ;;  %v10561_v11 = vpop.f32.mrb[130].mxu0  ;;  %v3330_v14 = vor.u32 %v3328_v21, %v3327_v30  ;;  %v3463_v20 = vor.u32 %v3462_v12, %v3325_v35  ;;  %v7784_v30 = vld [vmem:[%s13022_s7 + $0x100] sm:$0xff]  }
 0x517   :  { %13546 = vst [vmem:[#allocation61_spill] sm:$0xff] %v10561_v11  ;;  %v3081_v9 = vsel %vm2947_vm13, %v2882_v10, %v3017_v61  ;;  %v10563_v17 = vpop.f32.mrb[131].mxu0  ;;  %v13569_v11 = vld [vmem:[#allocation11_spill] sm:$0xff] }
 0x518   :  { %13547 = vst [vmem:[#allocation62_spill] sm:$0xff] %v10563_v17  ;;  %v10565_v33 = vpack.c.bf16 %v3081_v9, %v3080_v19  ;;  %v10569_v5 = vsel %vm8085_vm2, 0, %v3330_v14  ;;  %v10573_v16 = vsel %vm8576_vm5, %v3463_v20, 0  ;;  %v13553_v20 = vld [vmem:[#allocation27_spill] sm:$0xff]  ;;  %v7786_v9 = vld [vmem:[%s13022_s7 + $0x110] sm:$0xff]   ;;  %v13576_v17 = vld [vmem:[#allocation14_spill] sm:$0xff] }
 0x519   :  { %4387 = vmatmul.mubr.bf16.gmra.mrb[188].mxu1 %v10569_v5  ;;  %6852 = vmatmul.mubr.bf16.gmra.mrb[184].mxu0 %v10573_v16  ;;  %v7785_v19 = vld [vmem:[%s13022_s7 + $0x108] sm:$0xff]  }
 0x51a   :  { %4427 = vmatprep.mubr.bf16.mxu1 %v13548_v8  ;;  %v3332_v13 = vshrl.u32 %v10565_v33, 16  ;;  %v3335_v29 = vshll.u32 %v10565_v33, 16  ;;  %v13554_v8 = vld [vmem:[#allocation41_spill] sm:$0xff]  ;;  %v13577_v58 = vld [vmem:[#allocation19_spill] sm:$0xff] }
 0x51c   :  { %v10580_v40 = vpop.f32.mrb[132].mxu0  ;;  %v3464_v62 = vrot.slane %v3335_v29, 1  ;;  %v3334_v35 = vrot.slane %v3332_v13, 7 }
 0x51d   :  { %13549 = vst [vmem:[#allocation42_spill] sm:$0xff] %v10580_v40  ;;  %v10582_v21 = vpop.f32.mrb[133].mxu0 }
 0x51e   :  { %13550 = vst [vmem:[#allocation63_spill] sm:$0xff] %v10582_v21  ;;  %v10584_v56 = vpop.f32.mrb[134].mxu0  ;;  %v3465_v10 = vor.u32 %v3464_v62, %v3332_v13  ;;  %v10589_v12 = vor.u32 %v3335_v29, %v3334_v35  ;;  %v10612_v13 = vsel %vm8576_vm5, %v13554_v8, 0  ;;  %v13555_v29 = vld [vmem:[#allocation29_spill] sm:$0xff] }
 0x51f   :  { %13551 = vst [vmem:[#allocation64_spill] sm:$0xff] %v10584_v56  ;;  %v10591_v61 = vpop.f32.mrb[135].mxu0  ;;  %v7787_v62 = vld [vmem:[%s13022_s7 + $0x118] sm:$0xff]  }
 0x520   :  { %13552 = vst [vmem:[#allocation65_spill] sm:$0xff] %v10591_v61  ;;  %v10595_v14 = vsel %vm8576_vm5, %v3465_v10, 0  ;;  %v13561_v56 = vld [vmem:[#allocation33_spill] sm:$0xff]  ;;  %v7792_v61 = vld [vmem:[%s13022_s7 + $0x140] sm:$0xff]  }
 0x521   :  { %4428 = vmatmul.mubr.bf16.vlgmr.msra.gmra.mrb[64].mxu1 %v13438_v34  ;;  %6855 = vmatprep.mubr.bf16.mxu0 %v10595_v14 }
 0x522   :  { %4435 = vmatprep.mubr.bf16.mxu1 %v13553_v20  ;;  %4685 = vmatpush1.bf16.msra.mxu1 %v7784_v30 }
 0x523   :  { %4686 = vmatprep.subr.bf16.mxu1 %v13353_v42  ;;  %6856 = vmatmul.mubr.bf16.gmra.mrb[188].mxu0 %v13438_v34 }
 0x526   :  { %4687 = vmatpush1.bf16.msra.mxu1 %v7785_v19  ;;  %v7788_v19 = vld [vmem:[%s13022_s7 + $0x120] sm:$0xff]  }
 0x527   :  { %4688 = vmatprep.subr.bf16.mxu1 %v13353_v42 }
 0x529   :  { %4436 = vmatmul.mubr.bf16.gmra.mrb[68].mxu1 %v10612_v13 }
 0x52a   :  { %4443 = vmatprep.mubr.bf16.mxu1 %v13555_v29  ;;  %4689 = vmatpush1.bf16.msra.mxu1 %v7786_v9  ;;  %v13560_v9 = vld [vmem:[#allocation44_spill] sm:$0xff] }
 0x52b   :  { %4690 = vmatprep.subr.bf16.mxu1 %v13353_v42 }
 0x52c   :  { %v10620_v35 = vpop.f32.mrb[136].mxu0 }
 0x52d   :  { %13556 = vst [vmem:[#allocation27_spill] sm:$0xff] %v10620_v35  ;;  %v10622_v10 = vpop.f32.mrb[137].mxu0  ;;  %v7789_v35 = vld [vmem:[%s13022_s7 + $0x128] sm:$0xff]  }
 0x52e   :  { %13557 = vst [vmem:[#allocation41_spill] sm:$0xff] %v10622_v10  ;;  %v10624_v30 = vpop.f32.mrb[138].mxu0  ;;  %4691 = vmatpush1.bf16.msra.mxu1 %v7787_v62  ;;  %v7790_v62 = vld [vmem:[%s13022_s7 + $0x130] sm:$0xff]  }
 0x52f   :  { %13558 = vst [vmem:[#allocation29_spill] sm:$0xff] %v10624_v30  ;;  %v10629_v8 = vpop.f32.mrb[139].mxu0  ;;  %4692 = vmatprep.subr.bf16.mxu1 %v13353_v42  ;;  %v13562_v30 = vld [vmem:[#allocation5_spill] sm:$0xff] }
 0x530   :  { %13559 = vst [vmem:[#allocation66_spill] sm:$0xff] %v10629_v8  ;;  %v13563_v8 = vld [vmem:[#allocation8_spill] sm:$0xff] }
 0x531   :  { %4444 = vmatmul.mubr.bf16.gmra.mrb[72].mxu1 %v13560_v9 }
 0x532   :  { %4451 = vmatprep.mubr.bf16.mxu1 %v13561_v56  ;;  %4693 = vmatpush1.bf16.msra.mxu1 %v7788_v19  ;;  %v7791_v19 = vld [vmem:[%s13022_s7 + $0x138] sm:$0xff]  }
 0x533   :  { %4694 = vmatprep.subr.bf16.mxu1 %v13353_v42 }
 0x536   :  { %4695 = vmatpush1.bf16.msra.mxu1 %v7789_v35 }
 0x537   :  { %4696 = vmatprep.subr.bf16.mxu1 %v13353_v42 }
 0x539   :  { %4452 = vmatmul.mubr.bf16.gmra.mrb[76].mxu1 %v13562_v30 }
 0x53a   :  { %4459 = vmatprep.mubr.bf16.mxu1 %v13563_v8  ;;  %4697 = vmatpush1.bf16.msra.mxu1 %v7790_v62  ;;  %v13568_v62 = vld [vmem:[#allocation6_spill] sm:$0xff] }
 0x53b   :  { %4698 = vmatprep.subr.bf16.mxu1 %v13353_v42 }
 0x53c   :  { %v10648_v10 = vpop.f32.mrb[140].mxu0 }
 0x53d   :  { %13564 = vst [vmem:[#allocation44_spill] sm:$0xff] %v10648_v10  ;;  %v10650_v35 = vpop.f32.mrb[141].mxu0  ;;  %v7793_v10 = vld [vmem:[%s13022_s7 + $0x148] sm:$0xff]  }
 0x53e   :  { %13565 = vst [vmem:[#allocation33_spill] sm:$0xff] %v10650_v35  ;;  %v10652_v40 = vpop.f32.mrb[142].mxu0  ;;  %4699 = vmatpush1.bf16.msra.mxu1 %v7791_v19  ;;  %v7794_v19 = vld [vmem:[%s13022_s7 + $0x150] sm:$0xff]  }
 0x53f   :  { %13566 = vst [vmem:[#allocation5_spill] sm:$0xff] %v10652_v40  ;;  %v10657_v21 = vpop.f32.mrb[143].mxu0  ;;  %4700 = vmatprep.subr.bf16.mxu1 %v13353_v42  ;;  %v13570_v40 = vld [vmem:[#allocation9_spill] sm:$0xff] }
 0x540   :  { %13567 = vst [vmem:[#allocation8_spill] sm:$0xff] %v10657_v21  ;;  %v13571_v21 = vld [vmem:[#allocation16_spill] sm:$0xff] }
 0x541   :  { %4460 = vmatmul.mubr.bf16.gmra.mrb[80].mxu1 %v13568_v62 }
 0x542   :  { %4467 = vmatprep.mubr.bf16.mxu1 %v13569_v11  ;;  %4701 = vmatpush1.bf16.msra.mxu1 %v7792_v61  ;;  %v7795_v11 = vld [vmem:[%s13022_s7 + $0x158] sm:$0xff]  }
 0x543   :  { %4702 = vmatprep.subr.bf16.mxu1 %v13353_v42 }
 0x546   :  { %4703 = vmatpush1.bf16.msra.mxu1 %v7793_v10 }
 0x547   :  { %4704 = vmatprep.subr.bf16.mxu1 %v13353_v42 }
 0x549   :  { %4468 = vmatmul.mubr.bf16.gmra.mrb[84].mxu1 %v13570_v40 }
 0x54a   :  { %4475 = vmatprep.mubr.bf16.mxu1 %v13571_v21  ;;  %4705 = vmatpush1.bf16.msra.mxu1 %v7794_v19  ;;  %v13578_v19 = vld [vmem:[#allocation17_spill] sm:$0xff] }
 0x54b   :  { %4706 = vmatprep.subr.bf16.mxu1 %v13353_v42 }
 0x54c   :  { %v10673_v61 = vpop.f32.mrb[144].mxu0 }
 0x54d   :  { %13572 = vst [vmem:[#allocation6_spill] sm:$0xff] %v10673_v61  ;;  %v10675_v35 = vpop.f32.mrb[145].mxu0  ;;  %v13579_v61 = vld [vmem:[#allocation23_spill] sm:$0xff] }
 0x54e   :  { %13573 = vst [vmem:[#allocation9_spill] sm:$0xff] %v10675_v35  ;;  %v10677_v1 = vpop.f32.mrb[146].mxu0  ;;  %4707 = vmatpush1.bf16.msra.mxu1 %v7795_v11  ;;  %v7796_v11 = vld [vmem:[%s13022_s7 + $0x160] sm:$0xff]  }
 0x54f   :  { %13574 = vst [vmem:[#allocation67_spill] sm:$0xff] %v10677_v1  ;;  %v10679_v10 = vpop.f32.mrb[147].mxu0  ;;  %4708 = vmatprep.subr.bf16.mxu1 %v13353_v42 }
 0x550   :  { %13575 = vst [vmem:[#allocation68_spill] sm:$0xff] %v10679_v10 }
 0x551   :  { %4476 = vmatmul.mubr.bf16.gmra.mrb[88].mxu1 %v13576_v17 }
 0x552   :  { %4483 = vmatprep.mubr.bf16.mxu1 %v13577_v58  ;;  %v13584_v58 = vld [vmem:[#allocation20_spill] sm:$0xff]  ;;  %4709 = vmatpush1.bf16.msra.mxu1 %v7796_v11 }
 0x553   :  { %4710 = vmatprep.subr.bf16.mxu1 %v13353_v42  ;;  %v7797_v11 = vld [vmem:[%s13022_s7 + $0x168] sm:$0xff]  }
 0x556   :  { %4711 = vmatpush1.bf16.msra.mxu1 %v7797_v11  ;;  %v7798_v11 = vld [vmem:[%s13022_s7 + $0x170] sm:$0xff]  }
 0x557   :  { %4712 = vmatprep.subr.bf16.mxu1 %v13353_v42 }
 0x559   :  { %4484 = vmatmul.mubr.bf16.gmra.mrb[92].mxu1 %v13578_v19 }
 0x55a   :  { %4491 = vmatprep.mubr.bf16.mxu1 %v13579_v61  ;;  %v13585_v61 = vld [vmem:[#allocation24_spill] sm:$0xff]  ;;  %4713 = vmatpush1.bf16.msra.mxu1 %v7798_v11  ;;  %v10749_v11 = vsel %vm8085_vm2, 0, %v10206_v44 }
 0x55b   :  { %4714 = vmatprep.subr.bf16.mxu1 %v13353_v42 }
 0x55c   :  { %v10689_v35 = vpop.f32.mrb[148].mxu0 }
 0x55d   :  { %13580 = vst [vmem:[#allocation14_spill] sm:$0xff] %v10689_v35  ;;  %v10691_v1 = vpop.f32.mrb[149].mxu0 }
 0x55e   :  { %13581 = vst [vmem:[#allocation17_spill] sm:$0xff] %v10691_v1  ;;  %v10693_v10 = vpop.f32.mrb[150].mxu0 }
 0x55f   :  { %13582 = vst [vmem:[#allocation69_spill] sm:$0xff] %v10693_v10  ;;  %v10695_v21 = vpop.f32.mrb[151].mxu0 }
 0x560   :  { %13583 = vst [vmem:[#allocation70_spill] sm:$0xff] %v10695_v21 }
 0x561   :  { %4492 = vmatmul.mubr.bf16.gmra.mrb[96].mxu1 %v13584_v58 }
 0x562   :  { %4499 = vmatprep.mubr.bf16.mxu1 %v10057_v7 }
 0x569   :  { %4500 = vmatmul.mubr.bf16.gmra.mrb[100].mxu1 %v13585_v61 }
 0x56a   :  { %4507 = vmatprep.mubr.bf16.mxu1 %v10080_v22 }
 0x56c   :  { %v10705_v35 = vpop.f32.mrb[152].mxu0 }
 0x56d   :  { %13586 = vst [vmem:[#allocation20_spill] sm:$0xff] %v10705_v35  ;;  %v10707_v10 = vpop.f32.mrb[153].mxu0 }
 0x56e   :  { %13587 = vst [vmem:[#allocation24_spill] sm:$0xff] %v10707_v10  ;;  %v10709_v21 = vpop.f32.mrb[154].mxu0 }
 0x56f   :  { %13588 = vst [vmem:[#allocation71_spill] sm:$0xff] %v10709_v21  ;;  %v10711_v1 = vpop.f32.mrb[155].mxu0 }
 0x570   :  { %13589 = vst [vmem:[#allocation72_spill] sm:$0xff] %v10711_v1  ;;  %v7799_v1 = vld [vmem:[%s13022_s7 + $0x178] sm:$0xff]  }
 0x571   :  { %4508 = vmatmul.mubr.bf16.gmra.mrb[104].mxu1 %v10061_v25 }
 0x572   :  { %4515 = vmatprep.mubr.bf16.mxu1 %v10107_v15  ;;  %4715 = vmatpush1.bf16.msra.mxu1 %v7799_v1 }
 0x573   :  { %4973 = vmatprep.subr.bf16.mxu1 %v13353_v42 }
 0x575   :  { %v10718_v7 = vpop.f32.mrb[156].mxu0 }
 0x576   :  { %13590 = vst [vmem:[#allocation73_spill] sm:$0xff] %v10718_v7  ;;  %v10721_v35 = vpop.f32.mrb[157].mxu0 }
 0x577   :  { %13591 = vst [vmem:[#allocation74_spill] sm:$0xff] %v10721_v35  ;;  %v10723_v10 = vpop.f32.mrb[158].mxu0 }
 0x578   :  { %13592 = vst [vmem:[#allocation75_spill] sm:$0xff] %v10723_v10  ;;  %v10725_v21 = vpop.f32.mrb[159].mxu0 }
 0x579   :  { %13593 = vst [vmem:[#allocation76_spill] sm:$0xff] %v10725_v21  ;;  %4516 = vmatmul.mubr.bf16.gmra.mrb[108].mxu1 %v10084_v26 }
 0x57a   :  { %4523 = vmatprep.mubr.bf16.mxu1 %v10130_v27 }
 0x581   :  { %4524 = vmatmul.mubr.bf16.gmra.mrb[112].mxu1 %v10111_v57 }
 0x582   :  { %4531 = vmatprep.mubr.bf16.mxu1 %v10157_v51 }
 0x589   :  { %4532 = vmatmul.mubr.bf16.gmra.mrb[116].mxu1 %v10134_v52 }
 0x58a   :  { %4539 = vmatprep.mubr.bf16.mxu1 %v10180_v3 }
 0x58c   :  { %v10737_v10 = vpop.f32.mrb[160].mxu0 }
 0x58d   :  { %13594 = vst [vmem:[#allocation77_spill] sm:$0xff] %v10737_v10  ;;  %v10739_v7 = vpop.f32.mrb[161].mxu0 }
 0x58e   :  { %13595 = vst [vmem:[#allocation78_spill] sm:$0xff] %v10739_v7  ;;  %v10741_v21 = vpop.f32.mrb[162].mxu0  ;;  %v13602_v7 = vld [vmem:[#allocation48_spill] sm:$0xff] }
 0x58f   :  { %13596 = vst [vmem:[#allocation79_spill] sm:$0xff] %v10741_v21  ;;  %v10743_v35 = vpop.f32.mrb[163].mxu0  ;;  %v10771_v1 = vsel %vm8576_vm5, %v13602_v7, 0  ;;  %vm5792_vm5 = vcmask 1041409  }
 0x590   :  { %13597 = vst [vmem:[#allocation80_spill] sm:$0xff] %v10743_v35 }
 0x591   :  { %4540 = vmatmul.mubr.bf16.gmra.mrb[120].mxu1 %v10161_v31 }
 0x592   :  { %4547 = vmatprep.mubr.bf16.mxu1 %v10749_v11 }
 0x599   :  { %4548 = vmatmul.mubr.bf16.gmra.mrb[124].mxu1 %v10184_v32 }
 0x59a   :  { %4555 = vmatprep.mubr.bf16.mxu1 %v10247_v50 }
 0x59c   :  { %v10758_v21 = vpop.f32.mrb[164].mxu0 }
 0x59d   :  { %13598 = vst [vmem:[#allocation81_spill] sm:$0xff] %v10758_v21  ;;  %v10760_v10 = vpop.f32.mrb[165].mxu0 }
 0x59e   :  { %13599 = vst [vmem:[#allocation82_spill] sm:$0xff] %v10760_v10  ;;  %v10762_v35 = vpop.f32.mrb[166].mxu0  ;;  %v13626_v10 = vld [vmem:[#allocation60_spill] sm:$0xff] }
 0x59f   :  { %13600 = vst [vmem:[#allocation83_spill] sm:$0xff] %v10762_v35  ;;  %v10764_v44 = vpop.f32.mrb[167].mxu0 }
 0x5a0   :  { %13601 = vst [vmem:[#allocation84_spill] sm:$0xff] %v10764_v44 }
 0x5a1   :  { %4556 = vmatmul.mubr.bf16.gmra.mrb[128].mxu1 %v13438_v34 }
 0x5a2   :  { %4563 = vmatprep.mubr.bf16.mxu1 %v10265_v38 }
 0x5a9   :  { %4564 = vmatmul.mubr.bf16.gmra.mrb[132].mxu1 %v10771_v1 }
 0x5aa   :  { %4571 = vmatprep.mubr.bf16.mxu1 %v10288_v54 }
 0x5ac   :  { %v10775_v50 = vpop.f32.mrb[168].mxu0 }
 0x5ad   :  { %13603 = vst [vmem:[#allocation48_spill] sm:$0xff] %v10775_v50  ;;  %v10777_v21 = vpop.f32.mrb[169].mxu0 }
 0x5ae   :  { %13604 = vst [vmem:[#allocation85_spill] sm:$0xff] %v10777_v21  ;;  %v10779_v35 = vpop.f32.mrb[170].mxu0 }
 0x5af   :  { %13605 = vst [vmem:[#allocation86_spill] sm:$0xff] %v10779_v35  ;;  %v10781_v44 = vpop.f32.mrb[171].mxu0 }
 0x5b0   :  { %13606 = vst [vmem:[#allocation87_spill] sm:$0xff] %v10781_v44 }
 0x5b1   :  { %4572 = vmatmul.mubr.bf16.gmra.mrb[136].mxu1 %v10269_v48 }
 0x5b2   :  { %4579 = vmatprep.mubr.bf16.mxu1 %v10311_v24 }
 0x5b9   :  { %4580 = vmatmul.mubr.bf16.gmra.mrb[140].mxu1 %v10292_v47 }
 0x5ba   :  { %4587 = vmatprep.mubr.bf16.mxu1 %v10334_v6 }
 0x5bc   :  { %v10787_v49 = vpop.f32.mrb[172].mxu0 }
 0x5bd   :  { %13607 = vst [vmem:[#allocation88_spill] sm:$0xff] %v10787_v49  ;;  %v10789_v34 = vpop.f32.mrb[173].mxu0 }
 0x5be   :  { %13608 = vst [vmem:[#allocation89_spill] sm:$0xff] %v10789_v34  ;;  %v10791_v7 = vpop.f32.mrb[174].mxu0 }
 0x5bf   :  { %13609 = vst [vmem:[#allocation90_spill] sm:$0xff] %v10791_v7  ;;  %v10793_v50 = vpop.f32.mrb[175].mxu0 }
 0x5c0   :  { %13610 = vst [vmem:[#allocation91_spill] sm:$0xff] %v10793_v50 }
 0x5c1   :  { %4588 = vmatmul.mubr.bf16.gmra.mrb[144].mxu1 %v10315_v28 }
 0x5c2   :  { %4595 = vmatprep.mubr.bf16.mxu1 %v10357_v2 }
 0x5c9   :  { %4596 = vmatmul.mubr.bf16.gmra.mrb[148].mxu1 %v10338_v0 }
 0x5ca   :  { %4603 = vmatprep.mubr.bf16.mxu1 %v10380_v23 }
 0x5cc   :  { %v10799_v35 = vpop.f32.mrb[176].mxu0 }
 0x5cd   :  { %13611 = vst [vmem:[#allocation92_spill] sm:$0xff] %v10799_v35  ;;  %v10801_v44 = vpop.f32.mrb[177].mxu0 }
 0x5ce   :  { %13612 = vst [vmem:[#allocation93_spill] sm:$0xff] %v10801_v44  ;;  %v10803_v21 = vpop.f32.mrb[178].mxu0 }
 0x5cf   :  { %13613 = vst [vmem:[#allocation94_spill] sm:$0xff] %v10803_v21  ;;  %v10805_v49 = vpop.f32.mrb[179].mxu0 }
 0x5d0   :  { %13614 = vst [vmem:[#allocation95_spill] sm:$0xff] %v10805_v49 }
 0x5d1   :  { %4604 = vmatmul.mubr.bf16.gmra.mrb[152].mxu1 %v10361_v4 }
 0x5d2   :  { %4611 = vmatprep.mubr.bf16.mxu1 %v10403_v18 }
 0x5d9   :  { %4612 = vmatmul.mubr.bf16.gmra.mrb[156].mxu1 %v10384_v41 }
 0x5da   :  { %4619 = vmatprep.mubr.bf16.mxu1 %v10426_v55 }
 0x5dc   :  { %v10811_v7 = vpop.f32.mrb[180].mxu0 }
 0x5dd   :  { %13615 = vst [vmem:[#allocation96_spill] sm:$0xff] %v10811_v7  ;;  %v10813_v50 = vpop.f32.mrb[181].mxu0 }
 0x5de   :  { %13616 = vst [vmem:[#allocation97_spill] sm:$0xff] %v10813_v50  ;;  %v10815_v34 = vpop.f32.mrb[182].mxu0  ;;  %v13623_v50 = vld [vmem:[#allocation56_spill] sm:$0xff] }
 0x5df   :  { %13617 = vst [vmem:[#allocation98_spill] sm:$0xff] %v10815_v34  ;;  %v10817_v35 = vpop.f32.mrb[183].mxu0  ;;  %v13624_v34 = vld [vmem:[#allocation58_spill] sm:$0xff] }
 0x5e0   :  { %13618 = vst [vmem:[#allocation99_spill] sm:$0xff] %v10817_v35  ;;  %v13625_v35 = vld [vmem:[#allocation21_spill] sm:$0xff] }
 0x5e1   :  { %4620 = vmatmul.mubr.bf16.gmra.mrb[160].mxu1 %v10407_v53 }
 0x5e2   :  { %4627 = vmatprep.mubr.bf16.mxu1 %v10449_v43 }
 0x5e9   :  { %4628 = vmatmul.mubr.bf16.gmra.mrb[164].mxu1 %v10430_v46 }
 0x5ea   :  { %4635 = vmatprep.mubr.bf16.mxu1 %v10472_v59 }
 0x5ec   :  { %v10823_v21 = vpop.f32.mrb[184].mxu0 }
 0x5ed   :  { %13619 = vst [vmem:[#allocation100_spill] sm:$0xff] %v10823_v21  ;;  %v10825_v49 = vpop.f32.mrb[185].mxu0  ;;  %v7800_v21 = vld [vmem:[%s13022_s7 + $0x180] sm:$0xff]  }
 0x5ee   :  { %13620 = vst [vmem:[#allocation101_spill] sm:$0xff] %v10825_v49  ;;  %v10827_v44 = vpop.f32.mrb[186].mxu0  ;;  %v13645_v49 = vld [vmem:[#allocation13_spill] sm:$0xff] }
 0x5ef   :  { %13621 = vst [vmem:[#allocation102_spill] sm:$0xff] %v10827_v44  ;;  %v10829_v7 = vpop.f32.mrb[187].mxu0  ;;  %v10843_v44 = vsel %vm8085_vm2, 0, %v10589_v12  ;;  %v7802_v12 = vld [vmem:[%s13022_s7 + $0x190] sm:$0xff]   ;;  %vm7908_vm2 = vmmov 0  }
 0x5f0   :  { %13622 = vst [vmem:[#allocation103_spill] sm:$0xff] %v10829_v7  ;;  %v13627_v7 = vld [vmem:[#allocation3_spill] sm:$0xff] }
 0x5f1   :  { %4636 = vmatmul.mubr.bf16.gmra.mrb[168].mxu1 %v13623_v50 }
 0x5f2   :  { %4643 = vmatprep.mubr.bf16.mxu1 %v10495_v45 }
 0x5f9   :  { %4644 = vmatmul.mubr.bf16.gmra.mrb[172].mxu1 %v13624_v34 }
 0x5fa   :  { %4651 = vmatprep.mubr.bf16.mxu1 %v10518_v63 }
 0x601   :  { %4652 = vmatmul.mubr.bf16.gmra.mrb[176].mxu1 %v13625_v35 }
 0x602   :  { %4659 = vmatprep.mubr.bf16.mxu1 %v10541_v60 }
 0x609   :  { %4660 = vmatmul.mubr.bf16.gmra.mrb[180].mxu1 %v13626_v10 }
 0x60a   :  { %4667 = vmatprep.mubr.bf16.mxu1 %v10569_v5 }
 0x611   :  { %4668 = vmatmul.mubr.bf16.gmra.mrb[184].mxu1 %v10545_v37 }
 0x612   :  { %4675 = vmatprep.mubr.bf16.mxu1 %v10843_v44 }
 0x619   :  { %4676 = vmatmul.mubr.bf16.gmra.mrb[188].mxu1 %v10573_v16 }
 0x61a   :  { %4716 = vmatprep.mubr.bf16.mxu1 %v10612_v13  ;;  %v13628_v13 = vld [vmem:[#allocation25_spill] sm:$0xff] }
 0x621   :  { %4717 = vmatmul.mubr.bf16.vlgmr.msra.gmra.mrb[64].mxu1 %v13627_v7  ;;  %v13629_v7 = vld [vmem:[#allocation38_spill] sm:$0xff] }
 0x622   :  { %4724 = vmatprep.mubr.bf16.mxu1 %v13560_v9  ;;  %4974 = vmatpush1.bf16.msra.mxu1 %v7800_v21  ;;  %v7803_v21 = vld [vmem:[%s13022_s7 + $0x198] sm:$0xff]   ;;  %v7804_v9 = vld [vmem:[%s13022_s7 + $0x1a0] sm:$0xff]  }
 0x623   :  { %4975 = vmatprep.subr.bf16.mxu1 %v13353_v42 }
 0x626   :  { %4976 = vmatpush1.bf16.msra.mxu1 %v7801_v36  ;;  %v7806_v36 = vld [vmem:[%s13022_s7 + $0x1b0] sm:$0xff]  }
 0x627   :  { %4977 = vmatprep.subr.bf16.mxu1 %v13353_v42 }
 0x629   :  { %4725 = vmatmul.mubr.bf16.gmra.mrb[68].mxu1 %v13628_v13 }
 0x62a   :  { %4732 = vmatprep.mubr.bf16.mxu1 %v13562_v30  ;;  %4978 = vmatpush1.bf16.msra.mxu1 %v7802_v12  ;;  %v7805_v30 = vld [vmem:[%s13022_s7 + $0x1a8] sm:$0xff]  }
 0x62b   :  { %4979 = vmatprep.subr.bf16.mxu1 %v13353_v42  ;;  %v13630_v12 = vld [vmem:[#allocation43_spill] sm:$0xff] }
 0x62e   :  { %4980 = vmatpush1.bf16.msra.mxu1 %v7803_v21  ;;  %v7808_v21 = vld [vmem:[%s13022_s7 + $0x1c0] sm:$0xff]  }
 0x62f   :  { %4981 = vmatprep.subr.bf16.mxu1 %v13353_v42 }
 0x631   :  { %4733 = vmatmul.mubr.bf16.gmra.mrb[72].mxu1 %v13629_v7 }
 0x632   :  { %4740 = vmatprep.mubr.bf16.mxu1 %v13568_v62  ;;  %4982 = vmatpush1.bf16.msra.mxu1 %v7804_v9  ;;  %v7807_v62 = vld [vmem:[%s13022_s7 + $0x1b8] sm:$0xff]   ;;  %v13631_v9 = vld [vmem:[#allocation31_spill] sm:$0xff] }
 0x633   :  { %4983 = vmatprep.subr.bf16.mxu1 %v13353_v42 }
 0x636   :  { %4984 = vmatpush1.bf16.msra.mxu1 %v7805_v30  ;;  %v7810_v30 = vld [vmem:[%s13022_s7 + $0x1d0] sm:$0xff]  }
 0x637   :  { %4985 = vmatprep.subr.bf16.mxu1 %v13353_v42 }
 0x639   :  { %4741 = vmatmul.mubr.bf16.gmra.mrb[76].mxu1 %v13630_v12 }
 0x63a   :  { %4748 = vmatprep.mubr.bf16.mxu1 %v13570_v40  ;;  %4986 = vmatpush1.bf16.msra.mxu1 %v7806_v36  ;;  %v7809_v40 = vld [vmem:[%s13022_s7 + $0x1c8] sm:$0xff]  }
 0x63b   :  { %4987 = vmatprep.subr.bf16.mxu1 %v13353_v42  ;;  %v13632_v36 = vld [vmem:[#allocation7_spill] sm:$0xff] }
 0x63e   :  { %4988 = vmatpush1.bf16.msra.mxu1 %v7807_v62  ;;  %v7811_v62 = vld [vmem:[%s13022_s7 + $0x1d8] sm:$0xff]  }
 0x63f   :  { %4989 = vmatprep.subr.bf16.mxu1 %v13353_v42 }
 0x641   :  { %4749 = vmatmul.mubr.bf16.gmra.mrb[80].mxu1 %v13631_v9 }
 0x642   :  { %4756 = vmatprep.mubr.bf16.mxu1 %v13576_v17  ;;  %4990 = vmatpush1.bf16.msra.mxu1 %v7808_v21  ;;  %v13633_v17 = vld [vmem:[#allocation10_spill] sm:$0xff]  ;;  %v13634_v21 = vld [vmem:[#allocation15_spill] sm:$0xff] }
 0x643   :  { %4991 = vmatprep.subr.bf16.mxu1 %v13353_v42 }
 0x646   :  { %4992 = vmatpush1.bf16.msra.mxu1 %v7809_v40  ;;  %v13635_v40 = vld [vmem:[#allocation18_spill] sm:$0xff] }
 0x647   :  { %4993 = vmatprep.subr.bf16.mxu1 %v13353_v42 }
 0x649   :  { %4757 = vmatmul.mubr.bf16.gmra.mrb[84].mxu1 %v13632_v36 }
 0x64a   :  { %4764 = vmatprep.mubr.bf16.mxu1 %v13578_v19  ;;  %4994 = vmatpush1.bf16.msra.mxu1 %v7810_v30  ;;  %v7812_v19 = vld [vmem:[%s13022_s7 + $0x1e0] sm:$0xff]  }
 0x64b   :  { %4995 = vmatprep.subr.bf16.mxu1 %v13353_v42  ;;  %v13637_v30 = vld [vmem:[#allocation30_spill] sm:$0xff] }
 0x64e   :  { %4996 = vmatpush1.bf16.msra.mxu1 %v7811_v62  ;;  %v13639_v62 = vld [vmem:[#allocation36_spill] sm:$0xff] }
 0x64f   :  { %4997 = vmatprep.subr.bf16.mxu1 %v13353_v42 }
 0x651   :  { %4765 = vmatmul.mubr.bf16.gmra.mrb[88].mxu1 %v13633_v17 }
 0x652   :  { %4772 = vmatprep.mubr.bf16.mxu1 %v13584_v58  ;;  %4998 = vmatpush1.bf16.msra.mxu1 %v7812_v19  ;;  %v13636_v58 = vld [vmem:[#allocation22_spill] sm:$0xff]  ;;  %v13641_v19 = vld [vmem:[#allocation35_spill] sm:$0xff] }
 0x653   :  { %4999 = vmatprep.subr.bf16.mxu1 %v13353_v42 }
 0x659   :  { %4773 = vmatmul.mubr.bf16.gmra.mrb[92].mxu1 %v13634_v21 }
 0x65a   :  { %4780 = vmatprep.mubr.bf16.mxu1 %v13585_v61  ;;  %v7813_v61 = vld [vmem:[%s13022_s7 + $0x1e8] sm:$0xff]  }
 0x65b   :  { %5000 = vmatpush1.bf16.msra.mxu1 %v7813_v61  ;;  %v13642_v61 = vld [vmem:[#allocation46_spill] sm:$0xff] }
 0x65c   :  { %5001 = vmatprep.subr.bf16.mxu1 %v13353_v42 }
 0x661   :  { %4781 = vmatmul.mubr.bf16.gmra.mrb[96].mxu1 %v13635_v40 }
 0x662   :  { %4788 = vmatprep.mubr.bf16.mxu1 %v10061_v25  ;;  %v13638_v25 = vld [vmem:[#allocation34_spill] sm:$0xff] }
 0x669   :  { %4789 = vmatmul.mubr.bf16.gmra.mrb[100].mxu1 %v13636_v58 }
 0x66a   :  { %4796 = vmatprep.mubr.bf16.mxu1 %v10084_v26  ;;  %v7814_v26 = vld [vmem:[%s13022_s7 + $0x1f0] sm:$0xff]  }
 0x66b   :  { %5002 = vmatpush1.bf16.msra.mxu1 %v7814_v26  ;;  %v13644_v26 = vld [vmem:[#allocation47_spill] sm:$0xff] }
 0x66c   :  { %5003 = vmatprep.subr.bf16.mxu1 %v13353_v42 }
 0x671   :  { %4797 = vmatmul.mubr.bf16.gmra.mrb[104].mxu1 %v13637_v30 }
 0x672   :  { %4804 = vmatprep.mubr.bf16.mxu1 %v10111_v57  ;;  %v13640_v57 = vld [vmem:[#allocation37_spill] sm:$0xff] }
 0x679   :  { %4805 = vmatmul.mubr.bf16.gmra.mrb[108].mxu1 %v13638_v25 }
 0x67a   :  { %4812 = vmatprep.mubr.bf16.mxu1 %v10134_v52  ;;  %v7815_v52 = vld [vmem:[%s13022_s7 + $0x1f8] sm:$0xff]  }
 0x67b   :  { %5004 = vmatpush1.bf16.msra.mxu1 %v7815_v52  ;;  %v13648_v52 = vld [vmem:[#allocation49_spill] sm:$0xff] }
 0x681   :  { %4813 = vmatmul.mubr.bf16.gmra.mrb[112].mxu1 %v13639_v62 }
 0x682   :  { %4820 = vmatprep.mubr.bf16.mxu1 %v10161_v31  ;;  %v13643_v31 = vld [vmem:[#allocation45_spill] sm:$0xff] }
 0x689   :  { %4821 = vmatmul.mubr.bf16.gmra.mrb[116].mxu1 %v13640_v57 }
 0x68a   :  { %4828 = vmatprep.mubr.bf16.mxu1 %v10184_v32  ;;  %v13646_v32 = vld [vmem:[#allocation39_spill] sm:$0xff] }
 0x691   :  { %4829 = vmatmul.mubr.bf16.gmra.mrb[120].mxu1 %v13641_v19 }
 0x692   :  { %4836 = vmatprep.mubr.bf16.mxu1 %v13642_v61  ;;  %v13647_v61 = vld [vmem:[#allocation12_spill] sm:$0xff] }
 0x699   :  { %4837 = vmatmul.mubr.bf16.gmra.mrb[124].mxu1 %v13643_v31 }
 0x69a   :  { %4844 = vmatprep.mubr.bf16.mxu1 %v10771_v1  ;;  %v13649_v1 = vld [vmem:[#allocation50_spill] sm:$0xff] }
 0x6a1   :  { %4845 = vmatmul.mubr.bf16.gmra.mrb[128].mxu1 %v13644_v26  ;;  %v13673_v26 = vld [vmem:[#allocation66_spill] sm:$0xff] }
 0x6a2   :  { %4852 = vmatprep.mubr.bf16.mxu1 %v10269_v48  ;;  %v13650_v48 = vld [vmem:[#allocation51_spill] sm:$0xff] }
 0x6a9   :  { %4853 = vmatmul.mubr.bf16.gmra.mrb[132].mxu1 %v13645_v49 }
 0x6aa   :  { %4860 = vmatprep.mubr.bf16.mxu1 %v10292_v47  ;;  %v13651_v47 = vld [vmem:[#allocation52_spill] sm:$0xff] }
 0x6b1   :  { %4861 = vmatmul.mubr.bf16.gmra.mrb[136].mxu1 %v13646_v32 }
 0x6b2   :  { %4868 = vmatprep.mubr.bf16.mxu1 %v10315_v28  ;;  %v13652_v28 = vld [vmem:[#allocation53_spill] sm:$0xff] }
 0x6b9   :  { %4869 = vmatmul.mubr.bf16.gmra.mrb[140].mxu1 %v13647_v61 }
 0x6ba   :  { %4876 = vmatprep.mubr.bf16.mxu1 %v10338_v0  ;;  %v13653_v0 = vld [vmem:[#allocation54_spill] sm:$0xff] }
 0x6c1   :  { %4877 = vmatmul.mubr.bf16.gmra.mrb[144].mxu1 %v13648_v52 }
 0x6c2   :  { %4884 = vmatprep.mubr.bf16.mxu1 %v10361_v4  ;;  %v13654_v4 = vld [vmem:[#allocation55_spill] sm:$0xff] }
 0x6c9   :  { %4885 = vmatmul.mubr.bf16.gmra.mrb[148].mxu1 %v13649_v1 }
 0x6ca   :  { %4892 = vmatprep.mubr.bf16.mxu1 %v10384_v41  ;;  %v13655_v41 = vld [vmem:[#allocation57_spill] sm:$0xff] }
 0x6d1   :  { %4893 = vmatmul.mubr.bf16.gmra.mrb[152].mxu1 %v13650_v48 }
 0x6d2   :  { %4900 = vmatprep.mubr.bf16.mxu1 %v10407_v53  ;;  %v13656_v53 = vld [vmem:[#allocation40_spill] sm:$0xff] }
 0x6d9   :  { %4901 = vmatmul.mubr.bf16.gmra.mrb[156].mxu1 %v13651_v47 }
 0x6da   :  { %4908 = vmatprep.mubr.bf16.mxu1 %v10430_v46  ;;  %v13657_v46 = vld [vmem:[#allocation59_spill] sm:$0xff] }
 0x6e1   :  { %4909 = vmatmul.mubr.bf16.gmra.mrb[160].mxu1 %v13652_v28 }
 0x6e2   :  { %4916 = vmatprep.mubr.bf16.mxu1 %v13623_v50 }
 0x6e9   :  { %4917 = vmatmul.mubr.bf16.gmra.mrb[164].mxu1 %v13653_v0 }
 0x6ea   :  { %4924 = vmatprep.mubr.bf16.mxu1 %v13624_v34  ;;  %v13668_v34 = vld [vmem:[#allocation63_spill] sm:$0xff] }
 0x6f1   :  { %4925 = vmatmul.mubr.bf16.gmra.mrb[168].mxu1 %v13654_v4 }
 0x6f2   :  { %4932 = vmatprep.mubr.bf16.mxu1 %v13625_v35 }
 0x6f9   :  { %4933 = vmatmul.mubr.bf16.gmra.mrb[172].mxu1 %v13655_v41 }
 0x6fa   :  { %4940 = vmatprep.mubr.bf16.mxu1 %v13626_v10  ;;  %v13667_v10 = vld [vmem:[#allocation61_spill] sm:$0xff] }
 0x701   :  { %4941 = vmatmul.mubr.bf16.gmra.mrb[176].mxu1 %v13656_v53 }
 0x702   :  { %4948 = vmatprep.mubr.bf16.mxu1 %v10545_v37  ;;  %v13658_v37 = vld [vmem:[#allocation11_spill] sm:$0xff] }
 0x709   :  { %4949 = vmatmul.mubr.bf16.gmra.mrb[180].mxu1 %v13657_v46 }
 0x70a   :  { %4956 = vmatprep.mubr.bf16.mxu1 %v10573_v16  ;;  %v13659_v16 = vld [vmem:[#allocation16_spill] sm:$0xff] }
 0x711   :  { %4957 = vmatmul.mubr.bf16.gmra.mrb[184].mxu1 %v10537_v39 }
 0x712   :  { %4964 = vmatprep.mubr.bf16.mxu1 %v10595_v14  ;;  %v13660_v14 = vld [vmem:[#allocation19_spill] sm:$0xff] }
 0x719   :  { %4965 = vmatmul.mubr.bf16.gmra.mrb[188].mxu1 %v10565_v33 }
 0x71a   :  { %5005 = vmatprep.mubr.bf16.mxu1 %v13628_v13 }
 0x721   :  { %5006 = vmatmul.mubr.bf16.vlgmr.msra.gmra.mrb[64].mxu1 %v13553_v20  ;;  %v13661_v20 = vld [vmem:[#allocation23_spill] sm:$0xff] }
 0x722   :  { %5013 = vmatprep.mubr.bf16.mxu1 %v13629_v7 }
 0x729   :  { %5014 = vmatmul.mubr.bf16.gmra.mrb[68].mxu1 %v13555_v29 }
 0x72a   :  { %5021 = vmatprep.mubr.bf16.mxu1 %v13630_v12  ;;  %v13669_v12 = vld [vmem:[#allocation65_spill] sm:$0xff] }
 0x731   :  { %5022 = vmatmul.mubr.bf16.gmra.mrb[72].mxu1 %v13561_v56  ;;  %v13662_v56 = vld [vmem:[#allocation32_spill] sm:$0xff] }
 0x732   :  { %5029 = vmatprep.mubr.bf16.mxu1 %v13631_v9 }
 0x739   :  { %5030 = vmatmul.mubr.bf16.gmra.mrb[76].mxu1 %v13563_v8 }
 0x73a   :  { %5037 = vmatprep.mubr.bf16.mxu1 %v13632_v36 }
 0x741   :  { %5038 = vmatmul.mubr.bf16.gmra.mrb[80].mxu1 %v13658_v37 }
 0x742   :  { %5045 = vmatprep.mubr.bf16.mxu1 %v13633_v17 }
 0x749   :  { %5046 = vmatmul.mubr.bf16.gmra.mrb[84].mxu1 %v13659_v16  ;;  %v13677_v16 = vld [vmem:[#allocation8_spill] sm:$0xff] }
 0x74a   :  { %5053 = vmatprep.mubr.bf16.mxu1 %v13634_v21  ;;  %v13670_v21 = vld [vmem:[#allocation42_spill] sm:$0xff] }
 0x751   :  { %5054 = vmatmul.mubr.bf16.gmra.mrb[88].mxu1 %v13660_v14 }
 0x752   :  { %5061 = vmatprep.mubr.bf16.mxu1 %v13635_v40 }
 0x759   :  { %5062 = vmatmul.mubr.bf16.gmra.mrb[92].mxu1 %v13661_v20 }
 0x75a   :  { %5069 = vmatprep.mubr.bf16.mxu1 %v13636_v58  ;;  %v13671_v58 = vld [vmem:[#allocation64_spill] sm:$0xff] }
 0x761   :  { %5070 = vmatmul.mubr.bf16.gmra.mrb[96].mxu1 %v13662_v56 }
 0x762   :  { %5077 = vmatprep.mubr.bf16.mxu1 %v13637_v30 }
 0x769   :  { %5078 = vmatmul.mubr.bf16.gmra.mrb[100].mxu1 %v10080_v22  ;;  %v13265_v22 = vmov 0.0  }
 0x76a   :  { %5085 = vmatprep.mubr.bf16.mxu1 %v13638_v25  ;;  %6859 = vmatprep.subr.bf16.mxu1 %v13265_v22 }
 0x76b   :  { %6879 = vmatprep.subr.bf16.mxu0 %v13265_v22  ;;  %6895 = vmatprep.mubr.msk.bf16.mxu0 %vm7908_vm2, %v13265_v22 }
 0x771   :  { %5086 = vmatmul.mubr.bf16.gmra.mrb[104].mxu1 %v10107_v15  ;;  %v7816_v15 = vld [vmem:[%s13026_s10] sm:$0xff]  }
 0x772   :  { %5093 = vmatprep.mubr.bf16.mxu1 %v13639_v62  ;;  %6860 = vmatpush3.bf16.msra.mxu1 %v7816_v15  ;;  %v13678_v15 = vld [vmem:[#allocation44_spill] sm:$0xff] }
 0x773   :  { %6861 = vmatprep.subr.bf16.mxu1 %v13265_v22 }
 0x779   :  { %5094 = vmatmul.mubr.bf16.gmra.mrb[108].mxu1 %v10130_v27  ;;  %v13663_v27 = vld [vmem:[#allocation4_spill] sm:$0xff] }
 0x77a   :  { %5101 = vmatprep.mubr.bf16.mxu1 %v13640_v57 }
 0x781   :  { %5102 = vmatmul.mubr.bf16.gmra.mrb[112].mxu1 %v10157_v51  ;;  %v7817_v51 = vld [vmem:[%s13026_s10 + $0x8] sm:$0xff]  }
 0x782   :  { %5109 = vmatprep.mubr.bf16.mxu1 %v13641_v19  ;;  %6862 = vmatpush3.bf16.msra.mxu1 %v7817_v51 }
 0x783   :  { %6863 = vmatprep.subr.bf16.mxu1 %v13265_v22 }
 0x789   :  { %5110 = vmatmul.mubr.bf16.gmra.mrb[116].mxu1 %v10180_v3  ;;  %v7818_v3 = vld [vmem:[%s13026_s10 + $0x10] sm:$0xff]  }
 0x78a   :  { %5117 = vmatprep.mubr.bf16.mxu1 %v13643_v31  ;;  %6864 = vmatpush3.bf16.msra.mxu1 %v7818_v3 }
 0x78b   :  { %6865 = vmatprep.subr.bf16.mxu1 %v13265_v22 }
 0x791   :  { %5118 = vmatmul.mubr.bf16.gmra.mrb[120].mxu1 %v10749_v11 }
 0x792   :  { %5125 = vmatprep.mubr.bf16.mxu1 %v13353_v42 }
 0x799   :  { %5126 = vmatmul.mubr.bf16.gmra.mrb[124].mxu1 %v13663_v27 }
 0x79a   :  { %5133 = vmatprep.mubr.bf16.mxu1 %v13645_v49 }
 0x7a1   :  { %5134 = vmatmul.mubr.bf16.gmra.mrb[128].mxu1 %v10265_v38 }
 0x7a2   :  { %5141 = vmatprep.mubr.bf16.mxu1 %v13646_v32 }
 0x7a9   :  { %5142 = vmatmul.mubr.bf16.gmra.mrb[132].mxu1 %v10288_v54  ;;  %v7819_v54 = vld [vmem:[%s13026_s10 + $0x18] sm:$0xff]  }
 0x7aa   :  { %5149 = vmatprep.mubr.bf16.mxu1 %v13647_v61  ;;  %6866 = vmatpush3.bf16.msra.mxu1 %v7819_v54  ;;  %v13679_v54 = vld [vmem:[#allocation5_spill] sm:$0xff] }
 0x7ab   :  { %6867 = vmatprep.subr.bf16.mxu1 %v13265_v22 }
 0x7b1   :  { %5150 = vmatmul.mubr.bf16.gmra.mrb[136].mxu1 %v10311_v24  ;;  %v13664_v24 = vld [vmem:[#allocation28_spill] sm:$0xff] }
 0x7b2   :  { %5157 = vmatprep.mubr.bf16.mxu1 %v13648_v52 }
 0x7b9   :  { %5158 = vmatmul.mubr.bf16.gmra.mrb[140].mxu1 %v10334_v6 }
 0x7ba   :  { %5165 = vmatprep.mubr.bf16.mxu1 %v13649_v1 }
 0x7c1   :  { %5166 = vmatmul.mubr.bf16.gmra.mrb[144].mxu1 %v10357_v2 }
 0x7c2   :  { %5173 = vmatprep.mubr.bf16.mxu1 %v13650_v48 }
 0x7c9   :  { %5174 = vmatmul.mubr.bf16.gmra.mrb[148].mxu1 %v10380_v23 }
 0x7ca   :  { %5181 = vmatprep.mubr.bf16.mxu1 %v13651_v47  ;;  %v13675_v47 = vld [vmem:[#allocation29_spill] sm:$0xff] }
 0x7d1   :  { %5182 = vmatmul.mubr.bf16.gmra.mrb[152].mxu1 %v10403_v18  ;;  %v13665_v18 = vld [vmem:[#allocation62_spill] sm:$0xff] }
 0x7d2   :  { %5189 = vmatprep.mubr.bf16.mxu1 %v13652_v28 }
 0x7d9   :  { %5190 = vmatmul.mubr.bf16.gmra.mrb[156].mxu1 %v10426_v55 }
 0x7da   :  { %5197 = vmatprep.mubr.bf16.mxu1 %v13653_v0 }
 0x7e1   :  { %5198 = vmatmul.mubr.bf16.gmra.mrb[160].mxu1 %v10449_v43 }
 0x7e2   :  { %5205 = vmatprep.mubr.bf16.mxu1 %v13654_v4 }
 0x7e9   :  { %5206 = vmatmul.mubr.bf16.gmra.mrb[164].mxu1 %v10472_v59 }
 0x7ea   :  { %5213 = vmatprep.mubr.bf16.mxu1 %v13655_v41  ;;  %v13676_v41 = vld [vmem:[#allocation33_spill] sm:$0xff] }
 0x7f1   :  { %5214 = vmatmul.mubr.bf16.gmra.mrb[168].mxu1 %v10495_v45  ;;  %v13666_v45 = vld [vmem:[#allocation26_spill] sm:$0xff] }
 0x7f2   :  { %5221 = vmatprep.mubr.bf16.mxu1 %v13656_v53 }
 0x7f4   :  { %v5007_v38 = vpop.f32.mrb[64].mxu1 }
 0x7f5   :  { %v11047_v6 = vadd.f32 %v13664_v24, %v5007_v38  ;;  %v5009_v2 = vpop.f32.mrb[65].mxu1 }
 0x7f6   :  { %v5010_v23 = vpop.f32.mrb[66].mxu1  ;;  %v7821_v2 = vld [vmem:[%s13026_s10 + $0x28] sm:$0xff]  }
 0x7f7   :  { %v11051_v55 = vadd.f32 %v13665_v18, %v5010_v23  ;;  %v5012_v43 = vpop.f32.mrb[67].mxu1  ;;  %v13680_v18 = vld [vmem:[#allocation9_spill] sm:$0xff] }
 0x7f9   :  { %5222 = vmatmul.mubr.bf16.gmra.mrb[172].mxu1 %v10518_v63 }
 0x7fa   :  { %5229 = vmatprep.mubr.bf16.mxu1 %v13657_v46 }
 0x7fc   :  { %v5015_v59 = vpop.f32.mrb[68].mxu1 }
 0x7fd   :  { %v11056_v29 = vadd.f32 %v13666_v45, %v5015_v59  ;;  %v5017_v8 = vpop.f32.mrb[69].mxu1 }
 0x7fe   :  { %v5018_v35 = vpop.f32.mrb[70].mxu1  ;;  %v13681_v8 = vld [vmem:[#allocation68_spill] sm:$0xff] }
 0x7ff   :  { %v11059_v11 = vadd.f32 %v13667_v10, %v5018_v35  ;;  %v5020_v50 = vpop.f32.mrb[71].mxu1 }
 0x801   :  { %5230 = vmatmul.mubr.bf16.gmra.mrb[176].mxu1 %v10541_v60 }
 0x802   :  { %5237 = vmatprep.mubr.bf16.mxu1 %v10537_v39 }
 0x804   :  { %v5023_v49 = vpop.f32.mrb[72].mxu1 }
 0x805   :  { %v11064_v13 = vadd.f32 %v13668_v34, %v5023_v49  ;;  %v5025_v63 = vpop.f32.mrb[73].mxu1  ;;  %v13682_v49 = vld [vmem:[#allocation6_spill] sm:$0xff] }
 0x806   :  { %v5026_v7 = vpop.f32.mrb[74].mxu1 }
 0x807   :  { %v11067_v9 = vadd.f32 %v13669_v12, %v5026_v7  ;;  %v5028_v36 = vpop.f32.mrb[75].mxu1  ;;  %v13683_v12 = vld [vmem:[#allocation67_spill] sm:$0xff] }
 0x809   :  { %5238 = vmatmul.mubr.bf16.gmra.mrb[180].mxu1 %v10569_v5  ;;  %v7820_v5 = vld [vmem:[%s13026_s10 + $0x20] sm:$0xff]  }
 0x80a   :  { %5245 = vmatprep.mubr.bf16.mxu1 %v10565_v33  ;;  %v13672_v33 = vld [vmem:[#allocation41_spill] sm:$0xff]  ;;  %6868 = vmatpush3.bf16.msra.mxu1 %v7820_v5  ;;  %v13685_v5 = vld [vmem:[#allocation70_spill] sm:$0xff] }
 0x80b   :  { %6869 = vmatprep.subr.bf16.mxu1 %v13265_v22 }
 0x80c   :  { %v5031_v17 = vpop.f32.mrb[76].mxu1 }
 0x80d   :  { %v11072_v40 = vadd.f32 %v13670_v21, %v5031_v17  ;;  %v5033_v60 = vpop.f32.mrb[77].mxu1 }
 0x80e   :  { %v5034_v39 = vpop.f32.mrb[78].mxu1  ;;  %6870 = vmatpush3.bf16.msra.mxu1 %v7821_v2  ;;  %v13684_v60 = vld [vmem:[#allocation17_spill] sm:$0xff]  ;;  %v13691_v2 = vld [vmem:[#allocation71_spill] sm:$0xff] }
 0x80f   :  { %v11075_v30 = vadd.f32 %v13671_v58, %v5034_v39  ;;  %v5036_v25 = vpop.f32.mrb[79].mxu1  ;;  %6871 = vmatprep.subr.bf16.mxu1 %v13265_v22 }
 0x811   :  { %5246 = vmatmul.mubr.bf16.gmra.mrb[184].mxu1 %v10843_v44  ;;  %v13674_v44 = vld [vmem:[#allocation27_spill] sm:$0xff] }
 0x812   :  { %5253 = vmatprep.mubr.bf16.mxu1 %v13353_v42 }
 0x814   :  { %v5039_v62 = vpop.f32.mrb[80].mxu1 }
 0x815   :  { %v11083_v57 = vadd.f32 %v13672_v33, %v5039_v62  ;;  %v5041_v19 = vpop.f32.mrb[81].mxu1 }
 0x816   :  { %v5042_v31 = vpop.f32.mrb[82].mxu1 }
 0x817   :  { %v11087_v32 = vadd.f32 %v13673_v26, %v5042_v31  ;;  %v5044_v61 = vpop.f32.mrb[83].mxu1  ;;  %v13686_v31 = vld [vmem:[#allocation14_spill] sm:$0xff] }
 0x819   :  { %5254 = vmatmul.mubr.bf16.gmra.mrb[188].mxu1 %v13663_v27 }
 0x81a   :  { %6875 = vmatprep.mubr.msk.bf16.mxu1 %vm7908_vm2, %v13265_v22 }
 0x81c   :  { %v5047_v42 = vpop.f32.mrb[84].mxu1 }
 0x81d   :  { %v11091_v52 = vadd.f32 %v13674_v44, %v5047_v42  ;;  %v5049_v1 = vpop.f32.mrb[85].mxu1  ;;  %v13687_v44 = vld [vmem:[#allocation69_spill] sm:$0xff] }
 0x81e   :  { %v5050_v48 = vpop.f32.mrb[86].mxu1 }
 0x81f   :  { %v11094_v28 = vadd.f32 %v13675_v47, %v5050_v48  ;;  %v5052_v0 = vpop.f32.mrb[87].mxu1  ;;  %v7822_v47 = vld [vmem:[%s13026_s10 + $0x30] sm:$0xff]  }
 0x820   :  { %6872 = vmatpush3.bf16.msra.mxu1 %v7822_v47  ;;  %v13696_v47 = vld [vmem:[#allocation78_spill] sm:$0xff] }
 0x821   :  { %6873 = vmatprep.subr.bf16.mxu1 %v13265_v22 }
 0x824   :  { %v5055_v4 = vpop.f32.mrb[88].mxu1 }
 0x825   :  { %v11097_v53 = vadd.f32 %v13676_v41, %v5055_v4  ;;  %v5057_v46 = vpop.f32.mrb[89].mxu1  ;;  %v13688_v4 = vld [vmem:[#allocation24_spill] sm:$0xff] }
 0x826   :  { %v5058_v37 = vpop.f32.mrb[90].mxu1 }
 0x827   :  { %v11100_v14 = vadd.f32 %v13677_v16, %v5058_v37  ;;  %v5060_v20 = vpop.f32.mrb[91].mxu1  ;;  %v13689_v16 = vld [vmem:[#allocation72_spill] sm:$0xff] }
 0x82c   :  { %v5063_v56 = vpop.f32.mrb[92].mxu1 }
 0x82d   :  { %v11103_v27 = vadd.f32 %v13678_v15, %v5063_v56  ;;  %v5065_v51 = vpop.f32.mrb[93].mxu1 }
 0x82e   :  { %v5066_v3 = vpop.f32.mrb[94].mxu1  ;;  %v13690_v51 = vld [vmem:[#allocation20_spill] sm:$0xff] }
 0x82f   :  { %v11106_v38 = vadd.f32 %v13679_v54, %v5066_v3  ;;  %v5068_v24 = vpop.f32.mrb[95].mxu1 }
 0x834   :  { %v5071_v23 = vpop.f32.mrb[96].mxu1 }
 0x835   :  { %v11112_v43 = vadd.f32 %v13680_v18, %v5071_v23  ;;  %v5073_v59 = vpop.f32.mrb[97].mxu1 }
 0x836   :  { %v5074_v45 = vpop.f32.mrb[98].mxu1  ;;  %v11152_v59 = vpop.f32.mrb[188].mxu0 }
 0x837   :  { %v11116_v35 = vadd.f32 %v13681_v8, %v5074_v45  ;;  %v5076_v10 = vpop.f32.mrb[99].mxu1  ;;  %v11154_v8 = vpop.f32.mrb[189].mxu0 }
 0x838   :  { %v13692_v10 = vld [vmem:[#allocation74_spill] sm:$0xff] }
 0x83c   :  { %v5079_v50 = vpop.f32.mrb[100].mxu1 }
 0x83d   :  { %v11119_v34 = vadd.f32 %v13682_v49, %v5079_v50  ;;  %v5081_v63 = vpop.f32.mrb[101].mxu1 }
 0x83e   :  { %v5082_v7 = vpop.f32.mrb[102].mxu1  ;;  %v11159_v63 = vpop.f32.mrb[190].mxu0 }
 0x83f   :  { %v11122_v36 = vadd.f32 %v13683_v12, %v5082_v7  ;;  %v5084_v17 = vpop.f32.mrb[103].mxu1  ;;  %v11161_v12 = vpop.f32.mrb[191].mxu0 }
 0x840   :  { %v13693_v17 = vld [vmem:[#allocation76_spill] sm:$0xff] }
 0x844   :  { %v5087_v21 = vpop.f32.mrb[104].mxu1 }
 0x845   :  { %v11125_v39 = vadd.f32 %v13684_v60, %v5087_v21  ;;  %v5089_v58 = vpop.f32.mrb[105].mxu1 }
 0x846   :  { %v5090_v25 = vpop.f32.mrb[106].mxu1 }
 0x847   :  { %v11128_v62 = vadd.f32 %v13685_v5, %v5090_v25  ;;  %v5092_v33 = vpop.f32.mrb[107].mxu1  ;;  %v13694_v25 = vld [vmem:[#allocation73_spill] sm:$0xff] }
 0x84c   :  { %v5095_v19 = vpop.f32.mrb[108].mxu1 }
 0x84d   :  { %v11131_v26 = vadd.f32 %v13686_v31, %v5095_v19  ;;  %v5097_v61 = vpop.f32.mrb[109].mxu1  ;;  %v13695_v31 = vld [vmem:[#allocation75_spill] sm:$0xff] }
 0x84e   :  { %v5098_v42 = vpop.f32.mrb[110].mxu1 }
 0x84f   :  { %v11134_v1 = vadd.f32 %v13687_v44, %v5098_v42  ;;  %v5100_v48 = vpop.f32.mrb[111].mxu1  ;;  %v7823_v44 = vld [vmem:[%s13026_s10 + $0x38] sm:$0xff]  }
 0x850   :  { %6874 = vmatpush3.bf16.msra.mxu1 %v7823_v44 }
 0x854   :  { %v5103_v0 = vpop.f32.mrb[112].mxu1 }
 0x855   :  { %v11140_v41 = vadd.f32 %v13688_v4, %v5103_v0  ;;  %v5105_v46 = vpop.f32.mrb[113].mxu1 }
 0x856   :  { %v5106_v37 = vpop.f32.mrb[114].mxu1 }
 0x857   :  { %v11144_v20 = vadd.f32 %v13689_v16, %v5106_v37  ;;  %v5108_v56 = vpop.f32.mrb[115].mxu1  ;;  %v13697_v37 = vld [vmem:[#allocation80_spill] sm:$0xff] }
 0x85c   :  { %v5111_v15 = vpop.f32.mrb[116].mxu1 }
 0x85d   :  { %v11147_v3 = vadd.f32 %v13690_v51, %v5111_v15  ;;  %v5113_v54 = vpop.f32.mrb[117].mxu1  ;;  %v13698_v51 = vld [vmem:[#allocation77_spill] sm:$0xff] }
 0x85e   :  { %v5114_v24 = vpop.f32.mrb[118].mxu1 }
 0x85f   :  { %v11150_v23 = vadd.f32 %v13691_v2, %v5114_v24  ;;  %v5116_v18 = vpop.f32.mrb[119].mxu1 }
 0x860   :  { %v11185_v18 = vld [vmem:[%s13027_s8] ss:$0 sm:$0xff] }
 0x864   :  { %v5119_v45 = vpop.f32.mrb[120].mxu1 }
 0x865   :  { %v11157_v50 = vadd.f32 %v13692_v10, %v5119_v45  ;;  %v5121_v49 = vpop.f32.mrb[121].mxu1  ;;  %v13699_v45 = vld [vmem:[#allocation79_spill] sm:$0xff] }
 0x866   :  { %v5122_v7 = vpop.f32.mrb[122].mxu1 }
 0x867   :  { %v11164_v21 = vadd.f32 %v13693_v17, %v5122_v7  ;;  %v5124_v60 = vpop.f32.mrb[123].mxu1  ;;  %v5559_v7 = vmul.f32 %v11185_v18, %v11051_v55  ;;  %v5558_v17 = vmul.f32 %v11185_v18, %v11047_v6 }
 0x868   :  { %v5560_v60 = vmul.f32 %v11185_v18, %v11056_v29  ;;  %v5561_v29 = vmul.f32 %v11185_v18, %v11059_v11 }
 0x86c   :  { %v5127_v58 = vpop.f32.mrb[124].mxu1 }
 0x86d   :  { %v11167_v5 = vadd.f32 %v13694_v25, %v5127_v58  ;;  %v5129_v33 = vpop.f32.mrb[125].mxu1  ;;  %v11199_v58 = vld [vmem:[%s13028_s9] ss:$0 sm:$0xff] }
 0x86e   :  { %v5130_v19 = vpop.f32.mrb[126].mxu1  ;;  %v11202_v25 = vadd.f32 %v11199_v58, %v5559_v7  ;;  %v11208_v55 = vadd.f32 %v11199_v58, %v5558_v17  ;;  %v11211_v6 = vadd.f32 %v11199_v58, %v5560_v60  ;;  %v11226_v11 = vadd.f32 %v11199_v58, %v5561_v29  ;;  %v7824_v7 = vld [vmem:[%s13030_s12] sm:$0xff]   ;;  %v7825_v29 = vld [vmem:[%s13030_s12 + $0x8] sm:$0xff]  }
 0x86f   :  { %v11170_v61 = vadd.f32 %v13695_v31, %v5130_v19  ;;  %v5132_v42 = vpop.f32.mrb[127].mxu1  ;;  %v13700_v19 = vld [vmem:[#allocation82_spill] sm:$0xff]  ;;  %v5564_v60 = vmul.f32 %v11185_v18, %v11072_v40  ;;  %6880 = vmatpush3.bf16.msra.mxu0 %v7824_v7 }
 0x870   :  { %6881 = vmatprep.subr.bf16.mxu0 %v13265_v22 }
 0x871   :  { %v11257_v40 = vadd.f32 %v11199_v58, %v5564_v60 }
 0x873   :  { %6882 = vmatpush3.bf16.msra.mxu0 %v7825_v29  ;;  %v7827_v29 = vld [vmem:[%s13030_s12 + $0x18] sm:$0xff]  }
 0x874   :  { %v5135_v48 = vpop.f32.mrb[128].mxu1  ;;  %6883 = vmatprep.subr.bf16.mxu0 %v13265_v22 }
 0x875   :  { %v11176_v0 = vadd.f32 %v13696_v47, %v5135_v48  ;;  %v5137_v4 = vpop.f32.mrb[129].mxu1  ;;  %v13701_v48 = vld [vmem:[#allocation84_spill] sm:$0xff] }
 0x876   :  { %v5138_v46 = vpop.f32.mrb[130].mxu1 }
 0x877   :  { %v5428_v16 = vadd.f32 %v13697_v37, %v5138_v46  ;;  %v5140_v56 = vpop.f32.mrb[131].mxu1  ;;  %v5693_v46 = vadd.f32 %v11202_v25, %v11208_v55  ;;  %v5562_v37 = vmul.f32 %v11185_v18, %v11064_v13 }
 0x879   :  { %v5694_v56 = vadd.f32 %v5693_v46, %v11211_v6  ;;  %v7826_v46 = vld [vmem:[%s13030_s12 + $0x10] sm:$0xff]  }
 0x87a   :  { %6884 = vmatpush3.bf16.msra.mxu0 %v7826_v46  ;;  %v5568_v46 = vmul.f32 %v11185_v18, %v11091_v52 }
 0x87b   :  { %v5695_v17 = vadd.f32 %v5694_v56, %v11226_v11  ;;  %v5566_v56 = vmul.f32 %v11185_v18, %v11083_v57  ;;  %v5590_v57 = vmul.f32 %v11185_v18, %v11176_v0  ;;  %6885 = vmatprep.subr.bf16.mxu0 %v13265_v22 }
 0x87c   :  { %v5143_v15 = vpop.f32.mrb[132].mxu1 }
 0x87d   :  { %v11180_v54 = vadd.f32 %v13698_v51, %v5143_v15  ;;  %v5145_v24 = vpop.f32.mrb[133].mxu1  ;;  %v11229_v15 = vadd.f32 %v11199_v58, %v5562_v37  ;;  %v5563_v51 = vmul.f32 %v11185_v18, %v11067_v9  ;;  %v13703_v9 = vld [vmem:[#allocation83_spill] sm:$0xff] }
 0x87e   :  { %v5146_v2 = vpop.f32.mrb[134].mxu1  ;;  %6886 = vmatpush3.bf16.msra.mxu0 %v7827_v29 }
 0x87f   :  { %v11188_v10 = vadd.f32 %v13699_v45, %v5146_v2  ;;  %v5148_v49 = vpop.f32.mrb[135].mxu1  ;;  %v13702_v2 = vld [vmem:[#allocation81_spill] sm:$0xff]  ;;  %6887 = vmatprep.subr.bf16.mxu0 %v13265_v22 }
 0x880   :  { %v18_v49 = vstv %s13029_s11 }
 0x881   :  { %19 = vst [vmem:[#allocation2] sm:$0x1] %v18_v49 }
 0x884   :  { %v5151_v33 = vpop.f32.mrb[136].mxu1 }
 0x885   :  { %v11205_v31 = vadd.f32 %v13700_v19, %v5151_v33  ;;  %v5153_v42 = vpop.f32.mrb[137].mxu1 }
 0x886   :  { %v5154_v44 = vpop.f32.mrb[138].mxu1 }
 0x887   :  { %v11216_v47 = vadd.f32 %v13701_v48, %v5154_v44  ;;  %v5156_v4 = vpop.f32.mrb[139].mxu1  ;;  %v5696_v44 = vadd.f32 %v5695_v17, %v11229_v15  ;;  %v11253_v48 = vadd.f32 %v11199_v58, %v5563_v51 }
 0x888   :  { %v5565_v4 = vmul.f32 %v11185_v18, %v11075_v30  ;;  %v6592_v30 = vld [vmem:[#allocation2] ss:$0 sm:$0xff] }
 0x889   :  { %v5697_v37 = vadd.f32 %v5696_v44, %v11253_v48  ;;  %5892 = vperm.xlu0 %7671, %v6592_v30   ;;  %v11287_v44 = vadd.f32 %v11199_v58, %v5566_v56  ;;  %v5593_v56 = vmul.f32 %v11185_v18, %v11188_v10  ;;  %v5594_v30 = vmul.f32 %v11185_v18, %v11205_v31  ;;  %v13707_v10 = vld [vmem:[#allocation48_spill] sm:$0xff] }
 0x88a   :  { %v11274_v17 = vadd.f32 %v11199_v58, %v5565_v4  ;;  %v5567_v4 = vmul.f32 %v11185_v18, %v11087_v32  ;;  %v7828_v32 = vld [vmem:[%s13030_s12 + $0x20] sm:$0xff]   ;;  %v7829_v31 = vld [vmem:[%s13030_s12 + $0x28] sm:$0xff]  }
 0x88b   :  { %v5698_v7 = vadd.f32 %v5697_v37, %v11257_v40  ;;  %v11299_v37 = vadd.f32 %v11199_v58, %v5590_v57  ;;  %v11320_v57 = vadd.f32 %v11199_v58, %v5568_v46  ;;  %v11326_v29 = vadd.f32 %v11199_v58, %v5593_v56  ;;  %6888 = vmatpush3.bf16.msra.mxu0 %v7828_v32 }
 0x88c   :  { %v5159_v24 = vpop.f32.mrb[140].mxu1  ;;  %v5595_v56 = vmul.f32 %v11185_v18, %v11216_v47  ;;  %v5571_v47 = vmul.f32 %v11185_v18, %v11100_v14 }
 0x88d   :  { %v11234_v45 = vadd.f32 %v13702_v2, %v5159_v24  ;;  %v5161_v13 = vpop.f32.mrb[141].mxu1  ;;  %v5591_v24 = vmul.f32 %v11185_v18, %v5428_v16  ;;  %v13704_v2 = vld [vmem:[#allocation85_spill] sm:$0xff]  ;;  %13708 = vst [vmem:[#allocation58_spill] sm:$0xff] %v11326_v29 }
 0x88e   :  { %v5162_v33 = vpop.f32.mrb[142].mxu1 }
 0x88f   :  { %v11246_v19 = vadd.f32 %v13703_v9, %v5162_v33  ;;  %v5164_v42 = vpop.f32.mrb[143].mxu1  ;;  %v5592_v33 = vmul.f32 %v11185_v18, %v11180_v54  ;;  %v13705_v9 = vld [vmem:[#allocation87_spill] sm:$0xff]  ;;  %v11293_v0 = vadd.f32 %v11199_v58, %v5591_v24  ;;  %v5699_v54 = vadd.f32 %v5698_v7, %v11274_v17 }
 0x891   :  { %v5700_v24 = vadd.f32 %v5699_v54, %v11287_v44  ;;  %v5597_v14 = vmul.f32 %v11185_v18, %v11246_v19 }
 0x894   :  { %v5167_v51 = vpop.f32.mrb[144].mxu1 }
 0x895   :  { %v11270_v13 = vadd.f32 %v13704_v2, %v5167_v51  ;;  %v5169_v49 = vpop.f32.mrb[145].mxu1  ;;  %v11302_v51 = vadd.f32 %v11199_v58, %v5592_v33  ;;  %v11311_v2 = vadd.f32 %v11199_v58, %v5567_v4  ;;  %v5569_v33 = vmul.f32 %v11185_v18, %v11094_v28  ;;  %v13709_v4 = vld [vmem:[#allocation86_spill] sm:$0xff] }
 0x896   :  { %v5170_v60 = vpop.f32.mrb[146].mxu1  ;;  %v5730_v49 = vadd.f32 %v11293_v0, %v11299_v37  ;;  %v5570_v28 = vmul.f32 %v11185_v18, %v11097_v53  ;;  %v7830_v53 = vld [vmem:[%s13030_s12 + $0x30] sm:$0xff]  }
 0x897   :  { %v11281_v16 = vadd.f32 %v13705_v9, %v5170_v60  ;;  %v5172_v42 = vpop.f32.mrb[147].mxu1  ;;  %13706 = vst [vmem:[#allocation56_spill] sm:$0xff] %v11302_v51  ;;  %v5701_v46 = vadd.f32 %v5700_v24, %v11311_v2  ;;  %v11345_v32 = vadd.f32 %v11199_v58, %v5569_v33  ;;  %v5596_v24 = vmul.f32 %v11185_v18, %v11234_v45  ;;  %v13712_v45 = vld [vmem:[#allocation89_spill] sm:$0xff] }
 0x898   :  { %v5731_v42 = vadd.f32 %v5730_v49, %v11302_v51  ;;  %v11339_v49 = vadd.f32 %v11199_v58, %v5594_v30  ;;  %v11354_v30 = vadd.f32 %v11199_v58, %v5570_v28  ;;  %v13714_v51 = vld [vmem:[#allocation91_spill] sm:$0xff]  ;;  %v5598_v19 = vmul.f32 %v11185_v18, %v11270_v13 }
 0x89a   :  { %13711 = vst [vmem:[#allocation21_spill] sm:$0xff] %v11339_v49  ;;  %v11397_v13 = vadd.f32 %v11199_v58, %v5598_v19 }
 0x89c   :  { %v5175_v52 = vpop.f32.mrb[148].mxu1  ;;  %13715 = vst [vmem:[#allocation3_spill] sm:$0xff] %v11397_v13 }
 0x89d   :  { %v5465_v7 = vadd.f32 %v13707_v10, %v5175_v52  ;;  %v5177_v60 = vpop.f32.mrb[149].mxu1  ;;  %v13710_v52 = vmov 0.0   ;;  %v5732_v10 = vadd.f32 %v5731_v42, %v11326_v29  ;;  %v11368_v29 = vadd.f32 %v11199_v58, %v5596_v24 }
 0x89e   :  { %v5178_v9 = vpop.f32.mrb[150].mxu1  ;;  %6889 = vmatprep.subr.bf16.mxu0 %v13710_v52 }
 0x89f   :  { %v11329_v54 = vadd.f32 %v13709_v4, %v5178_v9  ;;  %v5180_v22 = vpop.f32.mrb[151].mxu1  ;;  %6890 = vmatpush3.bf16.msra.mxu0 %v7829_v31  ;;  %v5733_v33 = vadd.f32 %v5732_v10, %v11339_v49  ;;  %v11361_v9 = vadd.f32 %v11199_v58, %v5595_v56  ;;  %13713 = vst [vmem:[#allocation60_spill] sm:$0xff] %v11368_v29  ;;  %v7831_v56 = vld [vmem:[%s13030_s12 + $0x38] sm:$0xff]  }
 0x8a0   :  { %v5702_v22 = vadd.f32 %v5701_v46, %v11320_v57  ;;  %6891 = vmatprep.subr.bf16.mxu0 %v13710_v52  ;;  %v5572_v46 = vmul.f32 %v11185_v18, %v11103_v27 }
 0x8a1   :  { %v5734_v27 = vadd.f32 %v5733_v33, %v11361_v9 }
 0x8a2   :  { %v5703_v31 = vadd.f32 %v5702_v22, %v11345_v32 }
 0x8a3   :  { %6892 = vmatpush3.bf16.msra.mxu0 %v7830_v53  ;;  %v5735_v24 = vadd.f32 %v5734_v27, %v11368_v29  ;;  %v11391_v53 = vadd.f32 %v11199_v58, %v5597_v14 }
 0x8a4   :  { %v5183_v60 = vpop.f32.mrb[152].mxu1  ;;  %v5704_v22 = vadd.f32 %v5703_v31, %v11354_v30  ;;  %6893 = vmatprep.subr.bf16.mxu0 %v13710_v52  ;;  %v5574_v52 = vmul.f32 %v11185_v18, %v11112_v43  ;;  %v5600_v43 = vmul.f32 %v11185_v18, %v5465_v7 }
 0x8a5   :  { %v5473_v42 = vadd.f32 %v13712_v45, %v5183_v60  ;;  %v5185_v4 = vpop.f32.mrb[153].mxu1  ;;  %v11378_v60 = vadd.f32 %v11199_v58, %v5571_v47  ;;  %v5599_v45 = vmul.f32 %v11185_v18, %v11281_v16  ;;  %v5575_v16 = vmul.f32 %v11185_v18, %v11116_v35 }
 0x8a6   :  { %v5186_v28 = vpop.f32.mrb[154].mxu1  ;;  %v13716_v4 = vld [vmem:[#allocation88_spill] sm:$0xff]  ;;  %v11410_v29 = vadd.f32 %v11199_v58, %v5574_v52  ;;  %v11422_v7 = vadd.f32 %v11199_v58, %v5600_v43  ;;  %v5601_v52 = vmul.f32 %v11185_v18, %v11329_v54  ;;  %v5577_v43 = vmul.f32 %v11185_v18, %v11122_v36 }
 0x8a7   :  { %v5476_v10 = vadd.f32 %v13714_v51, %v5186_v28  ;;  %v5188_v49 = vpop.f32.mrb[155].mxu1  ;;  %v11385_v51 = vadd.f32 %v11199_v58, %v5572_v46  ;;  %6894 = vmatpush3.bf16.msra.mxu0 %v7831_v56  ;;  %v5705_v47 = vadd.f32 %v5704_v22, %v11378_v60  ;;  %v5736_v56 = vadd.f32 %v5735_v24, %v11391_v53  ;;  %v13717_v22 = vld [vmem:[#allocation90_spill] sm:$0xff] }
 0x8a8   :  { %v5573_v49 = vmul.f32 %v11185_v18, %v11106_v38  ;;  %v5576_v24 = vmul.f32 %v11185_v18, %v11119_v34  ;;  %13718 = vst [vmem:[#allocation25_spill] sm:$0xff] %v11422_v7  ;;  %v11428_v35 = vadd.f32 %v11199_v58, %v5575_v16  ;;  %v11440_v16 = vadd.f32 %v11199_v58, %v5601_v52 }
 0x8a9   :  { %v5706_v46 = vadd.f32 %v5705_v47, %v11385_v51  ;;  %v11416_v47 = vadd.f32 %v11199_v58, %v5599_v45 }
 0x8aa   :  { %v11404_v28 = vadd.f32 %v11199_v58, %v5573_v49  ;;  %v11434_v34 = vadd.f32 %v11199_v58, %v5576_v24  ;;  %13720 = vst [vmem:[#allocation38_spill] sm:$0xff] %v11440_v16 }
 0x8ac   :  { %v5191_v33 = vpop.f32.mrb[156].mxu1  ;;  %v5707_v49 = vadd.f32 %v5706_v46, %v11404_v28  ;;  %v13719_v46 = vld [vmem:[#allocation93_spill] sm:$0xff] }
 0x8ad   :  { %v5481_v38 = vadd.f32 %v13716_v4, %v5191_v33  ;;  %v5193_v31 = vpop.f32.mrb[157].mxu1  ;;  %v5737_v33 = vadd.f32 %v5736_v56, %v11397_v13 }
 0x8ae   :  { %v5194_v14 = vpop.f32.mrb[158].mxu1  ;;  %v5708_v4 = vadd.f32 %v5707_v49, %v11410_v29  ;;  %v13721_v49 = vld [vmem:[#allocation95_spill] sm:$0xff] }
 0x8af   :  { %v5484_v27 = vadd.f32 %v13717_v22, %v5194_v14  ;;  %v5196_v19 = vpop.f32.mrb[159].mxu1  ;;  %v5738_v45 = vadd.f32 %v5737_v33, %v11416_v47  ;;  %v5602_v14 = vmul.f32 %v11185_v18, %v5473_v42 }
 0x8b0   :  { %v5709_v42 = vadd.f32 %v5708_v4, %v11428_v35 }
 0x8b1   :  { %v5739_v19 = vadd.f32 %v5738_v45, %v11422_v7  ;;  %v11447_v24 = vadd.f32 %v11199_v58, %v5602_v14  ;;  %v11452_v45 = vadd.f32 %v11199_v58, %v5577_v43 }
 0x8b2   :  { %v5710_v36 = vadd.f32 %v5709_v42, %v11434_v34 }
 0x8b3   :  { %13722 = vst [vmem:[#allocation43_spill] sm:$0xff] %v11447_v24  ;;  %v5740_v52 = vadd.f32 %v5739_v19, %v11440_v16  ;;  %v13726_v16 = vld [vmem:[#allocation94_spill] sm:$0xff] }
 0x8b4   :  { %v5199_v31 = vpop.f32.mrb[160].mxu1  ;;  %v5711_v42 = vadd.f32 %v5710_v36, %v11452_v45 }
 0x8b5   :  { %v5489_v56 = vadd.f32 %v13719_v46, %v5199_v31  ;;  %v5201_v22 = vpop.f32.mrb[161].mxu1  ;;  %v5578_v31 = vmul.f32 %v11185_v18, %v11125_v39  ;;  %v5603_v46 = vmul.f32 %v11185_v18, %v5476_v10  ;;  %v5579_v39 = vmul.f32 %v11185_v18, %v11128_v62 }
 0x8b6   :  { %v5202_v54 = vpop.f32.mrb[162].mxu1  ;;  %v5604_v22 = vmul.f32 %v11185_v18, %v5481_v38  ;;  %v5741_v14 = vadd.f32 %v5740_v52, %v11447_v24  ;;  %v5580_v38 = vmul.f32 %v11185_v18, %v11131_v26  ;;  %v5605_v62 = vmul.f32 %v11185_v18, %v5484_v27 }
 0x8b7   :  { %v5492_v13 = vadd.f32 %v13721_v49, %v5202_v54  ;;  %v5204_v33 = vpop.f32.mrb[163].mxu1  ;;  %v11457_v54 = vadd.f32 %v11199_v58, %v5578_v31  ;;  %v11463_v10 = vadd.f32 %v11199_v58, %v5603_v46  ;;  %v13724_v49 = vld [vmem:[#allocation92_spill] sm:$0xff]  ;;  %v11476_v24 = vadd.f32 %v11199_v58, %v5579_v39 }
 0x8b8   :  { %v11470_v31 = vadd.f32 %v11199_v58, %v5604_v22  ;;  %v5606_v36 = vmul.f32 %v11185_v18, %v5489_v56  ;;  %v11481_v26 = vadd.f32 %v11199_v58, %v5580_v38  ;;  %v5581_v22 = vmul.f32 %v11185_v18, %v11134_v1 }
 0x8b9   :  { %13723 = vst [vmem:[#allocation31_spill] sm:$0xff] %v11463_v10  ;;  %v5712_v46 = vadd.f32 %v5711_v42, %v11457_v54  ;;  %v5582_v39 = vmul.f32 %v11185_v18, %v11140_v41  ;;  %v5607_v56 = vmul.f32 %v11185_v18, %v5492_v13  ;;  %v13728_v42 = vld [vmem:[#allocation97_spill] sm:$0xff]  ;;  %v13729_v41 = vld [vmem:[#allocation99_spill] sm:$0xff]  ;;  %v5583_v13 = vmul.f32 %v11185_v18, %v11144_v20 }
 0x8ba   :  { %13725 = vst [vmem:[#allocation7_spill] sm:$0xff] %v11470_v31 }
 0x8bc   :  { %v5207_v4 = vpop.f32.mrb[164].mxu1 }
 0x8bd   :  { %v5497_v33 = vadd.f32 %v13724_v49, %v5207_v4  ;;  %v5209_v43 = vpop.f32.mrb[165].mxu1  ;;  %v5742_v4 = vadd.f32 %v5741_v14, %v11463_v10  ;;  %v5713_v49 = vadd.f32 %v5712_v46, %v11476_v24  ;;  %v11493_v14 = vadd.f32 %v11199_v58, %v5606_v36 }
 0x8be   :  { %v5210_v19 = vpop.f32.mrb[166].mxu1  ;;  %v11505_v36 = vadd.f32 %v11199_v58, %v5582_v39 }
 0x8bf   :  { %v5500_v7 = vadd.f32 %v13726_v16, %v5210_v19  ;;  %v5212_v52 = vpop.f32.mrb[167].mxu1  ;;  %v5743_v27 = vadd.f32 %v5742_v4, %v11470_v31  ;;  %v11487_v16 = vadd.f32 %v11199_v58, %v5605_v62  ;;  %13727 = vst [vmem:[#allocation10_spill] sm:$0xff] %v11493_v14  ;;  %v5714_v1 = vadd.f32 %v5713_v49, %v11481_v26 }
 0x8c0   :  { %v11499_v52 = vadd.f32 %v11199_v58, %v5581_v22  ;;  %v5608_v4 = vmul.f32 %v11185_v18, %v5497_v33  ;;  %v11511_v49 = vadd.f32 %v11199_v58, %v5607_v56 }
 0x8c1   :  { %v5744_v46 = vadd.f32 %v5743_v27, %v11487_v16  ;;  %v5584_v27 = vmul.f32 %v11185_v18, %v11147_v3 }
 0x8c2   :  { %v5715_v22 = vadd.f32 %v5714_v1, %v11499_v52  ;;  %v11517_v33 = vadd.f32 %v11199_v58, %v5608_v4  ;;  %v5585_v4 = vmul.f32 %v11185_v18, %v11150_v23 }
 0x8c3   :  { %v11528_v3 = vadd.f32 %v11199_v58, %v5584_v27 }
 0x8c4   :  { %v5215_v43 = vpop.f32.mrb[168].mxu1  ;;  %13730 = vst [vmem:[#allocation15_spill] sm:$0xff] %v11517_v33  ;;  %v5716_v39 = vadd.f32 %v5715_v22, %v11505_v36  ;;  %v13733_v22 = vld [vmem:[#allocation98_spill] sm:$0xff] }
 0x8c5   :  { %v5505_v38 = vadd.f32 %v13728_v42, %v5215_v43  ;;  %v5217_v19 = vpop.f32.mrb[169].mxu1  ;;  %v5745_v43 = vadd.f32 %v5744_v46, %v11493_v14  ;;  %v11522_v42 = vadd.f32 %v11199_v58, %v5583_v13 }
 0x8c6   :  { %v5218_v62 = vpop.f32.mrb[170].mxu1 }
 0x8c7   :  { %v5508_v31 = vadd.f32 %v13729_v41, %v5218_v62  ;;  %v5220_v10 = vpop.f32.mrb[171].mxu1  ;;  %v5746_v19 = vadd.f32 %v5745_v43, %v11511_v49  ;;  %v5610_v56 = vmul.f32 %v11185_v18, %v5505_v38  ;;  %v13731_v62 = vld [vmem:[#allocation96_spill] sm:$0xff]  ;;  %v5717_v38 = vadd.f32 %v5716_v39, %v11522_v42 }
 0x8c8   :  { %v5609_v10 = vmul.f32 %v11185_v18, %v5500_v7 }
 0x8c9   :  { %v5747_v41 = vadd.f32 %v5746_v19, %v11517_v33  ;;  %v11541_v27 = vadd.f32 %v11199_v58, %v5610_v56  ;;  %v5718_v23 = vadd.f32 %v5717_v38, %v11528_v3  ;;  %v11546_v19 = vadd.f32 %v11199_v58, %v5585_v4 }
 0x8ca   :  { %v11534_v13 = vadd.f32 %v11199_v58, %v5609_v10 }
 0x8cb   :  { %13734 = vst [vmem:[#allocation22_spill] sm:$0xff] %v11541_v27  ;;  %v5719_v38 = vadd.f32 %v5718_v23, %v11546_v19 }
 0x8cc   :  { %v5223_v20 = vpop.f32.mrb[172].mxu1  ;;  %13732 = vst [vmem:[#allocation18_spill] sm:$0xff] %v11534_v13  ;;  %v5748_v10 = vadd.f32 %v5747_v41, %v11534_v13  ;;  %v13738_v13 = vld [vmem:[#allocation103_spill] sm:$0xff] }
 0x8cd   :  { %v5513_v1 = vadd.f32 %v13731_v62, %v5223_v20  ;;  %v5225_v46 = vpop.f32.mrb[173].mxu1  ;;  %v5586_v20 = vmul.f32 %v11185_v18, %v11157_v50  ;;  %v5611_v62 = vmul.f32 %v11185_v18, %v5508_v31  ;;  %v5587_v50 = vmul.f32 %v11185_v18, %v11164_v21 }
 0x8ce   :  { %v5226_v7 = vpop.f32.mrb[174].mxu1  ;;  %v5749_v56 = vadd.f32 %v5748_v10, %v11541_v27 }
 0x8cf   :  { %v5516_v14 = vadd.f32 %v13733_v22, %v5226_v7  ;;  %v5228_v43 = vpop.f32.mrb[175].mxu1  ;;  %v5612_v46 = vmul.f32 %v11185_v18, %v5513_v1  ;;  %v11551_v7 = vadd.f32 %v11199_v58, %v5586_v20  ;;  %v11557_v31 = vadd.f32 %v11199_v58, %v5611_v62  ;;  %v13736_v22 = vld [vmem:[#allocation101_spill] sm:$0xff] }
 0x8d0   :  { %v5588_v1 = vmul.f32 %v11185_v18, %v11167_v5  ;;  %v11570_v27 = vadd.f32 %v11199_v58, %v5587_v50 }
 0x8d1   :  { %13735 = vst [vmem:[#allocation30_spill] sm:$0xff] %v11557_v31  ;;  %v11564_v20 = vadd.f32 %v11199_v58, %v5612_v46  ;;  %v5613_v21 = vmul.f32 %v11185_v18, %v5516_v14  ;;  %v5720_v62 = vadd.f32 %v5719_v38, %v11551_v7  ;;  %v5589_v46 = vmul.f32 %v11185_v18, %v11170_v61 }
 0x8d2   :  { %v11575_v5 = vadd.f32 %v11199_v58, %v5588_v1 }
 0x8d3   :  { %13737 = vst [vmem:[#allocation34_spill] sm:$0xff] %v11564_v20  ;;  %v11591_v61 = vadd.f32 %v11199_v58, %v5589_v46 }
 0x8d4   :  { %v5231_v39 = vpop.f32.mrb[176].mxu1 }
 0x8d5   :  { %v5521_v43 = vadd.f32 %v13736_v22, %v5231_v39  ;;  %v5233_v4 = vpop.f32.mrb[177].mxu1  ;;  %v5750_v39 = vadd.f32 %v5749_v56, %v11557_v31  ;;  %v5721_v22 = vadd.f32 %v5720_v62, %v11570_v27  ;;  %v13740_v62 = vld [vmem:[#allocation102_spill] sm:$0xff] }
 0x8d6   :  { %v5234_v41 = vpop.f32.mrb[178].mxu1 }
 0x8d7   :  { %v5524_v33 = vadd.f32 %v13738_v13, %v5234_v41  ;;  %v5236_v10 = vpop.f32.mrb[179].mxu1  ;;  %v5614_v23 = vmul.f32 %v11185_v18, %v5521_v43  ;;  %v5751_v14 = vadd.f32 %v5750_v39, %v11564_v20  ;;  %v11581_v13 = vadd.f32 %v11199_v58, %v5613_v21  ;;  %v13739_v43 = vld [vmem:[#allocation100_spill] sm:$0xff] }
 0x8d8   :  { %v5722_v41 = vadd.f32 %v5721_v22, %v11575_v5 }
 0x8d9   :  { %v11585_v50 = vadd.f32 %v11199_v58, %v5614_v23  ;;  %v5615_v56 = vmul.f32 %v11185_v18, %v5524_v33  ;;  %v5752_v21 = vadd.f32 %v5751_v14, %v11581_v13 }
 0x8db   :  { %v5753_v23 = vadd.f32 %v5752_v21, %v11585_v50  ;;  %v11598_v33 = vadd.f32 %v11199_v58, %v5615_v56 }
 0x8dc   :  { %v5239_v4 = vpop.f32.mrb[180].mxu1 }
 0x8dd   :  { %v5529_v38 = vadd.f32 %v13739_v43, %v5239_v4  ;;  %v5241_v1 = vpop.f32.mrb[181].mxu1  ;;  %13741 = vst [vmem:[#allocation36_spill] sm:$0xff] %v11598_v33  ;;  %v5723_v4 = vadd.f32 %v5722_v41, %v11591_v61  ;;  %v5754_v14 = vadd.f32 %v5753_v23, %v11598_v33 }
 0x8de   :  { %v5242_v10 = vpop.f32.mrb[182].mxu1 }
 0x8df   :  { %v5616_v39 = vmul.f32 %v11185_v18, %v5529_v38  ;;  %v5532_v20 = vadd.f32 %v13740_v62, %v5242_v10  ;;  %v5244_v31 = vpop.f32.mrb[183].mxu1  ;;  %v5724_v10 = vrot.slane %v5723_v4, 4 }
 0x8e1   :  { %v11602_v22 = vadd.f32 %v11199_v58, %v5616_v39  ;;  %v5617_v46 = vmul.f32 %v11185_v18, %v5532_v20  ;;  %v5725_v33 = vadd.f32 %v5724_v10, %v5723_v4 }
 0x8e3   :  { %13742 = vst [vmem:[#allocation37_spill] sm:$0xff] %v11602_v22  ;;  %v5755_v21 = vadd.f32 %v5754_v14, %v11602_v22  ;;  %v11609_v56 = vadd.f32 %v11199_v58, %v5617_v46 }
 0x8e4   :  { %v5247_v43 = vpop.f32.mrb[184].mxu1 }
 0x8e5   :  { %v5537_v38 = vadd.f32 %v11154_v8, %v5247_v43  ;;  %v5249_v1 = vpop.f32.mrb[185].mxu1  ;;  %13743 = vst [vmem:[#allocation35_spill] sm:$0xff] %v11609_v56  ;;  %v5756_v8 = vadd.f32 %v5755_v21, %v11609_v56 }
 0x8e6   :  { %v5250_v31 = vpop.f32.mrb[186].mxu1 }
 0x8e7   :  { %v5618_v41 = vmul.f32 %v11185_v18, %v5537_v38  ;;  %v5540_v39 = vadd.f32 %v11161_v12, %v5250_v31  ;;  %v5252_v62 = vpop.f32.mrb[187].mxu1  ;;  %v5726_v12 = vrot.slane %v5725_v33, 2 }
 0x8e9   :  { %v11614_v20 = vadd.f32 %v11199_v58, %v5618_v41  ;;  %v5619_v23 = vmul.f32 %v11185_v18, %v5540_v39  ;;  %v5727_v39 = vadd.f32 %v5726_v12, %v5725_v33 }
 0x8eb   :  { %13744 = vst [vmem:[#allocation46_spill] sm:$0xff] %v11614_v20  ;;  %v5757_v1 = vadd.f32 %v5756_v8, %v11614_v20  ;;  %v11620_v14 = vadd.f32 %v11199_v58, %v5619_v23 }
 0x8ec   :  { %v5255_v43 = vpop.f32.mrb[188].mxu1 }
 0x8ed   :  { %13745 = vst [vmem:[#allocation45_spill] sm:$0xff] %v11620_v14  ;;  %v5545_v46 = vadd.f32 %v11152_v59, %v5255_v43  ;;  %v5257_v38 = vpop.f32.mrb[189].mxu1  ;;  %v5758_v4 = vadd.f32 %v5757_v1, %v11620_v14  ;;  %v5728_v43 = vrot.slane %v5727_v39, 1 }
 0x8ee   :  { %v5258_v22 = vpop.f32.mrb[190].mxu1 }
 0x8ef   :  { %v5620_v31 = vmul.f32 %v11185_v18, %v5545_v46  ;;  %v5548_v41 = vadd.f32 %v11159_v63, %v5258_v22  ;;  %v5260_v62 = vpop.f32.mrb[191].mxu1  ;;  %v5729_v63 = vadd.f32 %v5728_v43, %v5727_v39 }
 0x8f1   :  { %v11627_v10 = vadd.f32 %v11199_v58, %v5620_v31  ;;  %v5621_v21 = vmul.f32 %v11185_v18, %v5548_v41  ;;  %v5768_v1 = vmul.f32 0.00390625, %v5729_v63 }
 0x8f3   :  { %v5759_v23 = vadd.f32 %v5758_v4, %v11627_v10  ;;  %v11632_v59 = vadd.f32 %v11199_v58, %v5621_v21  ;;  %v5770_v20 = vpack.c.bf16 %v5768_v1, %v5768_v1 }
 0x8f5   :  { %v5760_v8 = vadd.f32 %v5759_v23, %v11632_v59  ;;  %v5790_v33 = vunpack.c.l.b16 %v5770_v20 }
 0x8f7   :  { %v5761_v46 = vrot.slane %v5760_v8, 4 }
 0x8f9   :  { %v5762_v38 = vadd.f32 %v5761_v46, %v5760_v8 }
 0x8fb   :  { %v5763_v22 = vrot.slane %v5762_v38, 2 }
 0x8fd   :  { %v5764_v62 = vadd.f32 %v5763_v22, %v5762_v38 }
 0x8ff   :  { %v5765_v14 = vrot.slane %v5764_v62, 1 }
 0x901   :  { %v5766_v31 = vadd.f32 %v5765_v14, %v5764_v62 }
 0x903   :  { %v5769_v56 = vmul.f32 0.00390625, %v5766_v31 }
 0x905   :  { %v5771_v18 = vpack.c.bf16 %v5769_v56, %v5769_v56 }
 0x907   :  { %v5791_v12 = vunpack.c.l.b16 %v5771_v18 }
 0x908   :  { %v5893_v4 = vpop.permute.xlu0 %5892 }
 0x909   :  { %v5793_v41 = vsel %vm5792_vm5, %v5791_v12, %v5790_v33  ;;  %v7909_v33 = vmov 1966171168  }
 0x90a   :  { %v5794_v58 = vpack.c.b16 %v5793_v41, %v5793_v41  ;;  %v6014_v12 = vunpack.c.l.s4 %v7909_v33  ;;  %v6016_v41 = vlaneseq }
 0x90c   :  { %6876 = vmatmul.mubr.bf16.vlgmr.msra.gmra.mrb[192].mxu1 %v5794_v58 }
 0x9df   :  { %v5878_v21 = vpop.f32.mrb[192].mxu1 }
 0x9e0   :  { %vm5884_vm14 = vcmp.ge.f32.partialorder %v5878_v21, 0.0  ;;  %v5895_v23 = vmul.f32 %v5893_v4, %v5878_v21  ;;  %v6877_v8 = vpop.f32.mrb[193].mxu1  ;;  %v6015_v4 = vunpack.c.0.s8 %v6014_v12 }
 0x9e1   :  { %v5881_v39 = vpop.f32.mrb[194].mxu1 }
 0x9e2   :  { %v5896_v43 = vsel %vm5884_vm14, %v5878_v21, %v5895_v23  ;;  %v6878_v46 = vpop.f32.mrb[195].mxu1  ;;  %v6017_v21 = vshrl.u32 %v6016_v41, 7 }
 0x9e3   :  { %v5897_v38 = vpack.c.bf16 %v5896_v43, %v5896_v43 }
 0x9e4   :  { %v6018_v8 = vsub.s32 %v6015_v4, %v6017_v21 }
 0x9e5   :  { %6896 = vmatmul.mubr.bf16.vlgmr.msra.gmra.mrb[192].mxu0 %v5897_v38 }
 0xab8   :  { %v5996_v14 = vpop.f32.mrb[192].mxu0 }
 0xab9   :  { %v6002_v63 = vand.u32 2147483647, %v5996_v14  ;;  %v6897_v22 = vpop.f32.mrb[193].mxu0  ;;  %vm6006_vm15 = vcmp.ge.f32.partialorder %v5996_v14, 0.0 }
 0xaba   :  { %v5999_v56 = vpop.f32.mrb[194].mxu0 }
 0xabb   :  { %v6003_v62 = vsub.f32 0.0, %v6002_v63  ;;  %v6898_v20 = vpop.f32.mrb[195].mxu0  ;;  %v6037_v63 = vsub.s32 0, %v6017_v21  ;;  %v13750_v21 = vld [vmem:[#allocation3_spill] sm:$0xff] }
 0xabd   :  { %v6004_v1 = vmul.f32 1.442695, %v6003_v62 }
 0xabf   :  { %7832 = vpow2.f32 %v6004_v1 }
 0xac9   :  { %v7833_v31 = vpop.eup %7832 }
 0xaca   :  { %v6007_v18 = vadd.f32 1.0, %v7833_v31 }
 0xacc   :  { %7834 = vrcp.f32 %v6007_v18 }
 0xad6   :  { %v7835_v58 = vpop.eup %7834 }
 0xad7   :  { %v6010_v23 = vmul.f32 %v7835_v58, %v7833_v31 }
 0xad9   :  { %v6011_v39 = vsel %vm6006_vm15, %v7835_v58, %v6010_v23  ;;  %v13749_v58 = vld [vmem:[#allocation60_spill] sm:$0xff] }
 0xada   :  { %v6019_v43 = vrot.slane %v6011_v39, %v6018_v8  ;;  %v13751_v39 = vld [vmem:[#allocation25_spill] sm:$0xff] }
 0xadc   :  { %v6020_v46 = vcombine.high %v6019_v43, %v6019_v43  ;;  %v6027_v38 = vrot.slane %v6019_v43, %v6018_v8  ;;  %v13752_v43 = vld [vmem:[#allocation38_spill] sm:$0xff] }
 0xade   :  { %v6034_v22 = vrot.slane %v6020_v46, %v6018_v8  ;;  %v6038_v56 = vrot.slane %v6027_v38, %v6037_v63  ;;  %v13753_v38 = vld [vmem:[#allocation43_spill] sm:$0xff] }
 0xae0   :  { %v11635_v62 = vrot.slane %v6034_v22, %v6037_v63  ;;  %v11638_v20 = vmul.f32 %v6038_v56, %v11208_v55  ;;  %v11641_v1 = vmul.f32 %v6038_v56, %v11202_v25  ;;  %v11644_v18 = vmul.f32 %v6038_v56, %v11211_v6  ;;  %v13754_v63 = vld [vmem:[#allocation31_spill] sm:$0xff] }
 0xae1   :  { %v11647_v14 = vmul.f32 %v6038_v56, %v11226_v11  ;;  %v11650_v31 = vmul.f32 %v6038_v56, %v11229_v15  ;;  %v11653_v33 = vmul.f32 %v6038_v56, %v11253_v48  ;;  %v11656_v12 = vmul.f32 %v6038_v56, %v11257_v40 }
 0xae2   :  { %v11659_v55 = vmul.f32 %v6038_v56, %v11274_v17  ;;  %v11662_v25 = vmul.f32 %v6038_v56, %v11287_v44  ;;  %v11665_v6 = vmul.f32 %v6038_v56, %v11311_v2  ;;  %v11668_v11 = vmul.f32 %v6038_v56, %v11320_v57 }
 0xae3   :  { %v11671_v15 = vmul.f32 %v6038_v56, %v11345_v32  ;;  %v11674_v48 = vmul.f32 %v6038_v56, %v11354_v30  ;;  %v11677_v40 = vmul.f32 %v6038_v56, %v11378_v60  ;;  %v11680_v17 = vmul.f32 %v6038_v56, %v11385_v51 }
 0xae4   :  { %v11683_v44 = vmul.f32 %v6038_v56, %v11404_v28  ;;  %v11686_v2 = vmul.f32 %v6038_v56, %v11410_v29  ;;  %v11689_v57 = vmul.f32 %v6038_v56, %v11428_v35  ;;  %v11692_v32 = vmul.f32 %v6038_v56, %v11434_v34 }
 0xae5   :  { %v11695_v30 = vmul.f32 %v6038_v56, %v11452_v45  ;;  %v11698_v60 = vmul.f32 %v6038_v56, %v11457_v54  ;;  %v11701_v51 = vmul.f32 %v6038_v56, %v11476_v24  ;;  %v11704_v28 = vmul.f32 %v6038_v56, %v11481_v26 }
 0xae6   :  { %v11707_v29 = vmul.f32 %v6038_v56, %v11499_v52  ;;  %v11710_v35 = vmul.f32 %v6038_v56, %v11505_v36  ;;  %v11713_v34 = vmul.f32 %v6038_v56, %v11522_v42  ;;  %v11716_v45 = vmul.f32 %v6038_v56, %v11528_v3 }
 0xae7   :  { %v11719_v54 = vmul.f32 %v6038_v56, %v11546_v19  ;;  %v11722_v24 = vmul.f32 %v6038_v56, %v11551_v7  ;;  %v11725_v26 = vmul.f32 %v6038_v56, %v11570_v27  ;;  %v11728_v52 = vmul.f32 %v6038_v56, %v11575_v5  ;;  %v13746_v19 = vld [vmem:[#allocation56_spill] sm:$0xff]  ;;  %v13747_v27 = vld [vmem:[#allocation58_spill] sm:$0xff]  ;;  %v13748_v5 = vld [vmem:[#allocation21_spill] sm:$0xff] }
 0xae8   :  { %v11731_v36 = vmul.f32 %v6038_v56, %v11591_v61  ;;  %v11735_v42 = vmul.f32 %v11635_v62, %v11299_v37  ;;  %v11739_v3 = vmul.f32 %v11635_v62, %v11293_v0  ;;  %v11743_v7 = vmul.f32 %v11635_v62, %v13746_v19  ;;  %v13755_v56 = vld [vmem:[#allocation7_spill] sm:$0xff] }
 0xae9   :  { %v11747_v41 = vmul.f32 %v11635_v62, %v13747_v27  ;;  %v11751_v61 = vmul.f32 %v11635_v62, %v13748_v5  ;;  %v11755_v37 = vmul.f32 %v11635_v62, %v11361_v9  ;;  %v11759_v0 = vmul.f32 %v11635_v62, %v13749_v58  ;;  %v13756_v27 = vld [vmem:[#allocation10_spill] sm:$0xff] }
 0xaea   :  { %v11763_v4 = vmul.f32 %v11635_v62, %v11391_v53  ;;  %v11767_v23 = vmul.f32 %v11635_v62, %v13750_v21  ;;  %v11771_v8 = vmul.f32 %v11635_v62, %v11416_v47  ;;  %v11775_v9 = vmul.f32 %v11635_v62, %v13751_v39  ;;  %v13758_v21 = vld [vmem:[#allocation15_spill] sm:$0xff] }
 0xaeb   :  { %v11779_v46 = vmul.f32 %v11635_v62, %v13752_v43  ;;  %v11783_v53 = vmul.f32 %v11635_v62, %v13753_v38  ;;  %v11787_v22 = vmul.f32 %v11635_v62, %v13754_v63  ;;  %v11791_v47 = vmul.f32 %v11635_v62, %v13755_v56  ;;  %v13759_v43 = vld [vmem:[#allocation18_spill] sm:$0xff] }
 0xaec   :  { %v11795_v19 = vmul.f32 %v11635_v62, %v11487_v16  ;;  %v11799_v5 = vmul.f32 %v11635_v62, %v13756_v27  ;;  %v11803_v58 = vmul.f32 %v11635_v62, %v11511_v49  ;;  %v11807_v39 = vmul.f32 %v11635_v62, %v13758_v21  ;;  %v13761_v63 = vld [vmem:[#allocation22_spill] sm:$0xff] }
 0xaed   :  { %v11811_v38 = vmul.f32 %v11635_v62, %v13759_v43  ;;  %v11815_v16 = vmul.f32 %v11635_v62, %v13761_v63  ;;  %v13763_v56 = vld [vmem:[#allocation30_spill] sm:$0xff]  ;;  %v11827_v21 = vmul.f32 %v11635_v62, %v11581_v13  ;;  %v11831_v43 = vmul.f32 %v11635_v62, %v11585_v50 }
 0xaee   :  { %13757 = vst [vmem:[#allocation47_spill] sm:$0xff] %v11799_v5  ;;  %v11819_v27 = vmul.f32 %v11635_v62, %v13763_v56  ;;  %v13765_v5 = vld [vmem:[#allocation34_spill] sm:$0xff] }
 0xaef   :  { %13760 = vst [vmem:[#allocation13_spill] sm:$0xff] %v11811_v38  ;;  %13762 = vst [vmem:[#allocation39_spill] sm:$0xff] %v11815_v16  ;;  %v11823_v49 = vmul.f32 %v11635_v62, %v13765_v5  ;;  %v13768_v38 = vld [vmem:[#allocation36_spill] sm:$0xff]  ;;  %v13769_v16 = vld [vmem:[#allocation37_spill] sm:$0xff] }
 0xaf0   :  { %13764 = vst [vmem:[#allocation12_spill] sm:$0xff] %v11819_v27  ;;  %13767 = vst [vmem:[#allocation50_spill] sm:$0xff] %v11827_v21  ;;  %v11835_v63 = vmul.f32 %v11635_v62, %v13768_v38  ;;  %v11839_v56 = vmul.f32 %v11635_v62, %v13769_v16  ;;  %v13770_v27 = vld [vmem:[#allocation35_spill] sm:$0xff]  ;;  %v13773_v21 = vld [vmem:[#allocation45_spill] sm:$0xff]  ;;  %v11855_v38 = vmul.f32 %v11635_v62, %v11627_v10 }
 0xaf1   :  { %13766 = vst [vmem:[#allocation49_spill] sm:$0xff] %v11823_v49  ;;  %v11843_v5 = vmul.f32 %v11635_v62, %v13770_v27  ;;  %v13772_v49 = vld [vmem:[#allocation46_spill] sm:$0xff]  ;;  %v11851_v50 = vmul.f32 %v11635_v62, %v13773_v21  ;;  %v11859_v16 = vmul.f32 %v11635_v62, %v11632_v59  ;;  %v7843_v10 = vld [vmem:[%s13019_s0 + $0x10] sm:$0xff] }
 0xaf2   :  { %v11847_v13 = vmul.f32 %v11635_v62, %v13772_v49  ;;  %v7841_v27 = vld [vmem:[%s13019_s0] sm:$0xff]  ;;  %v7842_v49 = vld [vmem:[%s13019_s0 + $0x8] sm:$0xff]  ;;  %v11877_v59 = vadd.f32 %v7843_v10, %v11644_v18  ;;  %v7844_v62 = vld [vmem:[%s13019_s0 + $0x18] sm:$0xff] }
 0xaf3   :  { %13771 = vst [vmem:[#allocation51_spill] sm:$0xff] %v11843_v5  ;;  %v11865_v5 = vadd.f32 %v7841_v27, %v11638_v20  ;;  %v11871_v21 = vadd.f32 %v7842_v49, %v11641_v1  ;;  %v11883_v20 = vadd.f32 %v7844_v62, %v11647_v14  ;;  %v7845_v27 = vld [vmem:[%s13019_s0 + $0x20] sm:$0xff]  ;;  %v7846_v49 = vld [vmem:[%s13019_s0 + $0x28] sm:$0xff]  ;;  %v7847_v10 = vld [vmem:[%s13019_s0 + $0x30] sm:$0xff] }
 0xaf4   :  { %v11889_v1 = vadd.f32 %v7845_v27, %v11650_v31  ;;  %v11895_v18 = vadd.f32 %v7846_v49, %v11653_v33  ;;  %v11901_v14 = vadd.f32 %v7847_v10, %v11656_v12  ;;  %v7848_v62 = vld [vmem:[%s13019_s0 + $0x38] sm:$0xff]  ;;  %v7849_v27 = vld [vmem:[%s13019_s0 + $0x40] sm:$0xff]  ;;  %v7850_v49 = vld [vmem:[%s13019_s0 + $0x48] sm:$0xff]  ;;  %vm6175_vm3 = vcmp.ge.f32.partialorder %v11877_v59, 0.0 }
 0xaf5   :  { %v11907_v31 = vadd.f32 %v7848_v62, %v11659_v55  ;;  %v11913_v33 = vadd.f32 %v7849_v27, %v11662_v25  ;;  %v11919_v12 = vadd.f32 %v7850_v49, %v11665_v6  ;;  %v7851_v10 = vld [vmem:[%s13019_s0 + $0x50] sm:$0xff]  ;;  %v7852_v62 = vld [vmem:[%s13019_s0 + $0x58] sm:$0xff]  ;;  %v7853_v27 = vld [vmem:[%s13019_s0 + $0x60] sm:$0xff]  ;;  %vm6173_vm0 = vcmp.ge.f32.partialorder %v11865_v5, 0.0 }
 0xaf6   :  { %v11925_v55 = vadd.f32 %v7851_v10, %v11668_v11  ;;  %v11931_v25 = vadd.f32 %v7852_v62, %v11671_v15  ;;  %v11937_v6 = vadd.f32 %v7853_v27, %v11674_v48  ;;  %v7854_v49 = vld [vmem:[%s13019_s0 + $0x68] sm:$0xff]  ;;  %v7855_v10 = vld [vmem:[%s13019_s0 + $0x70] sm:$0xff]  ;;  %v7856_v62 = vld [vmem:[%s13019_s0 + $0x78] sm:$0xff]  ;;  %vm6174_vm1 = vcmp.ge.f32.partialorder %v11871_v21, 0.0 }
 0xaf7   :  { %v11943_v11 = vadd.f32 %v7854_v49, %v11677_v40  ;;  %v11949_v15 = vadd.f32 %v7855_v10, %v11680_v17  ;;  %v11955_v48 = vadd.f32 %v7856_v62, %v11683_v44  ;;  %v7857_v27 = vld [vmem:[%s13019_s0 + $0x80] sm:$0xff]  ;;  %v7858_v49 = vld [vmem:[%s13019_s0 + $0x88] sm:$0xff]  ;;  %v7859_v10 = vld [vmem:[%s13019_s0 + $0x90] sm:$0xff]  ;;  %vm6176_vm4 = vcmp.ge.f32.partialorder %v11883_v20, 0.0 }
 0xaf8   :  { %v11961_v40 = vadd.f32 %v7857_v27, %v11686_v2  ;;  %v11967_v17 = vadd.f32 %v7858_v49, %v11689_v57  ;;  %v11973_v44 = vadd.f32 %v7859_v10, %v11692_v32  ;;  %v7860_v62 = vld [vmem:[%s13019_s0 + $0x98] sm:$0xff]  ;;  %v7861_v27 = vld [vmem:[%s13019_s0 + $0xa0] sm:$0xff]  ;;  %v7862_v49 = vld [vmem:[%s13019_s0 + $0xa8] sm:$0xff]  ;;  %vm6177_vm6 = vcmp.ge.f32.partialorder %v11889_v1, 0.0 }
 0xaf9   :  { %v11979_v2 = vadd.f32 %v7860_v62, %v11695_v30  ;;  %v11985_v57 = vadd.f32 %v7861_v27, %v11698_v60  ;;  %v11991_v32 = vadd.f32 %v7862_v49, %v11701_v51  ;;  %v7863_v10 = vld [vmem:[%s13019_s0 + $0xb0] sm:$0xff]  ;;  %v7864_v62 = vld [vmem:[%s13019_s0 + $0xb8] sm:$0xff]  ;;  %v7865_v27 = vld [vmem:[%s13019_s0 + $0xc0] sm:$0xff]  ;;  %vm6178_vm7 = vcmp.ge.f32.partialorder %v11895_v18, 0.0 }
 0xafa   :  { %v11997_v30 = vadd.f32 %v7863_v10, %v11704_v28  ;;  %v12003_v60 = vadd.f32 %v7864_v62, %v11707_v29  ;;  %v12009_v51 = vadd.f32 %v7865_v27, %v11710_v35  ;;  %v7866_v49 = vld [vmem:[%s13019_s0 + $0xc8] sm:$0xff]  ;;  %v7867_v10 = vld [vmem:[%s13019_s0 + $0xd0] sm:$0xff]  ;;  %v7868_v62 = vld [vmem:[%s13019_s0 + $0xd8] sm:$0xff]  ;;  %vm6179_vm8 = vcmp.ge.f32.partialorder %v11901_v14, 0.0 }
 0xafb   :  { %v12015_v28 = vadd.f32 %v7866_v49, %v11713_v34  ;;  %v12021_v29 = vadd.f32 %v7867_v10, %v11716_v45  ;;  %v12027_v35 = vadd.f32 %v7868_v62, %v11719_v54  ;;  %v7869_v27 = vld [vmem:[%s13019_s0 + $0xe0] sm:$0xff]  ;;  %v7870_v49 = vld [vmem:[%s13019_s0 + $0xe8] sm:$0xff]  ;;  %v7871_v10 = vld [vmem:[%s13019_s0 + $0xf0] sm:$0xff]  ;;  %vm6180_vm9 = vcmp.ge.f32.partialorder %v11907_v31, 0.0 }
 0xafc   :  { %13774 = vst [vmem:[#allocation52_spill] sm:$0xff] %v11997_v30  ;;  %v12033_v34 = vadd.f32 %v7869_v27, %v11722_v24  ;;  %v12039_v45 = vadd.f32 %v7870_v49, %v11725_v26  ;;  %v12045_v54 = vadd.f32 %v7871_v10, %v11728_v52  ;;  %v7872_v62 = vld [vmem:[%s13019_s0 + $0xf8] sm:$0xff]  ;;  %v7873_v27 = vld [vmem:[%s13019_s0 + $0x100] sm:$0xff]  ;;  %v7874_v49 = vld [vmem:[%s13019_s0 + $0x108] sm:$0xff]  ;;  %vm6181_vm10 = vcmp.ge.f32.partialorder %v11913_v33, 0.0 }
 0xafd   :  { %13775 = vst [vmem:[#allocation53_spill] sm:$0xff] %v12015_v28  ;;  %13776 = vst [vmem:[#allocation54_spill] sm:$0xff] %v12021_v29  ;;  %v12051_v24 = vadd.f32 %v7872_v62, %v11731_v36  ;;  %v12057_v26 = vadd.f32 %v7873_v27, %v11735_v42  ;;  %v12063_v52 = vadd.f32 %v7874_v49, %v11739_v3  ;;  %v7875_v10 = vld [vmem:[%s13019_s0 + $0x110] sm:$0xff]  ;;  %v7876_v62 = vld [vmem:[%s13019_s0 + $0x118] sm:$0xff]  ;;  %vm6182_vm11 = vcmp.ge.f32.partialorder %v11919_v12, 0.0 }
 0xafe   :  { %13777 = vst [vmem:[#allocation55_spill] sm:$0xff] %v12027_v35  ;;  %13778 = vst [vmem:[#allocation57_spill] sm:$0xff] %v12039_v45  ;;  %v12069_v36 = vadd.f32 %v7875_v10, %v11743_v7  ;;  %v12075_v42 = vadd.f32 %v7876_v62, %v11747_v41  ;;  %v7877_v27 = vld [vmem:[%s13019_s0 + $0x120] sm:$0xff]  ;;  %v7878_v49 = vld [vmem:[%s13019_s0 + $0x128] sm:$0xff]  ;;  %vm6183_vm12 = vcmp.ge.f32.partialorder %v11925_v55, 0.0  ;;  %vm6184_vm13 = vcmp.ge.f32.partialorder %v11931_v25, 0.0 }
 0xaff   :  { %13779 = vst [vmem:[#allocation40_spill] sm:$0xff] %v12045_v54  ;;  %v12081_v3 = vadd.f32 %v7877_v27, %v11751_v61  ;;  %v12087_v7 = vadd.f32 %v7878_v49, %v11755_v37  ;;  %v7879_v10 = vld [vmem:[%s13019_s0 + $0x130] sm:$0xff]  ;;  %v7880_v62 = vld [vmem:[%s13019_s0 + $0x138] sm:$0xff]  ;;  %v7881_v27 = vld [vmem:[%s13019_s0 + $0x140] sm:$0xff] }
 0xb00   :  { %13780 = vst [vmem:[#allocation59_spill] sm:$0xff] %v12069_v36  ;;  %v12093_v41 = vadd.f32 %v7879_v10, %v11759_v0  ;;  %v12099_v61 = vadd.f32 %v7880_v62, %v11763_v4  ;;  %v12105_v37 = vadd.f32 %v7881_v27, %v11767_v23  ;;  %v7882_v49 = vld [vmem:[%s13019_s0 + $0x148] sm:$0xff]  ;;  %v7883_v10 = vld [vmem:[%s13019_s0 + $0x150] sm:$0xff]  ;;  %v7884_v62 = vld [vmem:[%s13019_s0 + $0x158] sm:$0xff] }
 0xb01   :  { %v12111_v0 = vadd.f32 %v7882_v49, %v11771_v8  ;;  %v12117_v4 = vadd.f32 %v7883_v10, %v11775_v9  ;;  %v12123_v23 = vadd.f32 %v7884_v62, %v11779_v46  ;;  %v7885_v27 = vld [vmem:[%s13019_s0 + $0x160] sm:$0xff]  ;;  %v7886_v49 = vld [vmem:[%s13019_s0 + $0x168] sm:$0xff]  ;;  %v7887_v10 = vld [vmem:[%s13019_s0 + $0x170] sm:$0xff] }
 0xb02   :  { %v12129_v8 = vadd.f32 %v7885_v27, %v11783_v53  ;;  %v12135_v9 = vadd.f32 %v7886_v49, %v11787_v22  ;;  %v12141_v46 = vadd.f32 %v7887_v10, %v11791_v47  ;;  %v7888_v62 = vld [vmem:[%s13019_s0 + $0x178] sm:$0xff]  ;;  %v7889_v27 = vld [vmem:[%s13019_s0 + $0x180] sm:$0xff]  ;;  %v7891_v10 = vld [vmem:[%s13019_s0 + $0x190] sm:$0xff] }
 0xb03   :  { %13781 = vst [vmem:[#allocation11_spill] sm:$0xff] %v12117_v4  ;;  %13782 = vst [vmem:[#allocation16_spill] sm:$0xff] %v12123_v23  ;;  %v12147_v53 = vadd.f32 %v7888_v62, %v11795_v19  ;;  %v13784_v22 = vld [vmem:[#allocation47_spill] sm:$0xff]  ;;  %v12165_v19 = vadd.f32 %v7891_v10, %v11807_v39  ;;  %v7892_v62 = vld [vmem:[%s13019_s0 + $0x198] sm:$0xff] }
 0xb04   :  { %13783 = vst [vmem:[#allocation19_spill] sm:$0xff] %v12135_v9  ;;  %v12153_v49 = vadd.f32 %v7889_v27, %v13784_v22  ;;  %v7890_v9 = vld [vmem:[%s13019_s0 + $0x188] sm:$0xff]  ;;  %v13788_v27 = vld [vmem:[#allocation13_spill] sm:$0xff] }
 0xb05   :  { %v12159_v47 = vadd.f32 %v7890_v9, %v11803_v58  ;;  %13787 = vst [vmem:[#allocation4_spill] sm:$0xff] %v12165_v19  ;;  %v12171_v22 = vadd.f32 %v7892_v62, %v13788_v27  ;;  %v13790_v58 = vld [vmem:[#allocation39_spill] sm:$0xff]  ;;  %v13792_v39 = vld [vmem:[#allocation12_spill] sm:$0xff]  ;;  %v13793_v62 = vld [vmem:[#allocation49_spill] sm:$0xff]  ;;  %vm6220_vm14 = vcmp.ge.f32.partialorder %v12147_v53, 0.0 }
 0xb06   :  { %13785 = vst [vmem:[#allocation23_spill] sm:$0xff] %v12153_v49  ;;  %v7893_v49 = vld [vmem:[%s13019_s0 + $0x1a0] sm:$0xff]  ;;  %v7895_v19 = vld [vmem:[%s13019_s0 + $0x1b0] sm:$0xff] }
 0xb07   :  { %13786 = vst [vmem:[#allocation32_spill] sm:$0xff] %v12159_v47  ;;  %13789 = vst [vmem:[#allocation28_spill] sm:$0xff] %v12171_v22  ;;  %v12177_v9 = vadd.f32 %v7893_v49, %v13790_v58  ;;  %v7894_v47 = vld [vmem:[%s13019_s0 + $0x1a8] sm:$0xff]  ;;  %v12189_v27 = vadd.f32 %v7895_v19, %v13793_v62  ;;  %v7896_v22 = vld [vmem:[%s13019_s0 + $0x1b8] sm:$0xff] }
 0xb08   :  { %v12183_v10 = vadd.f32 %v7894_v47, %v13792_v39  ;;  %v13794_v49 = vld [vmem:[#allocation50_spill] sm:$0xff]  ;;  %v7898_v39 = vld [vmem:[%s13019_s0 + $0x1c8] sm:$0xff]  ;;  %v7899_v62 = vld [vmem:[%s13019_s0 + $0x1d0] sm:$0xff] }
 0xb09   :  { %13791 = vst [vmem:[#allocation62_spill] sm:$0xff] %v12177_v9  ;;  %v12195_v58 = vadd.f32 %v7896_v22, %v13794_v49  ;;  %v7897_v9 = vld [vmem:[%s13019_s0 + $0x1c0] sm:$0xff]  ;;  %v12207_v19 = vadd.f32 %v7898_v39, %v11835_v63  ;;  %v12213_v22 = vadd.f32 %v7899_v62, %v11839_v56  ;;  %v7900_v49 = vld [vmem:[%s13019_s0 + $0x1d8] sm:$0xff]  ;;  %v7902_v39 = vld [vmem:[%s13019_s0 + $0x1e8] sm:$0xff] }
 0xb0a   :  { %v12201_v47 = vadd.f32 %v7897_v9, %v11831_v43  ;;  %v13796_v43 = vld [vmem:[#allocation51_spill] sm:$0xff]  ;;  %v12231_v56 = vadd.f32 %v7902_v39, %v11851_v50  ;;  %v7903_v62 = vld [vmem:[%s13019_s0 + $0x1f0] sm:$0xff] }
 0xb0b   :  { %v12219_v9 = vadd.f32 %v7900_v49, %v13796_v43  ;;  %v12237_v49 = vadd.f32 %v7903_v62, %v11855_v38  ;;  %v7904_v43 = vld [vmem:[%s13019_s0 + $0x1f8] sm:$0xff] }
 0xb0c   :  { %13795 = vst [vmem:[#allocation26_spill] sm:$0xff] %v12201_v47  ;;  %v7901_v47 = vld [vmem:[%s13019_s0 + $0x1e0] sm:$0xff] }
 0xb0d   :  { %v12225_v63 = vadd.f32 %v7901_v47, %v11847_v13  ;;  %v12243_v13 = vadd.f32 %v7904_v43, %v11859_v16  ;;  %v12248_v47 = vld [vmem:[%s13025_s6] ss:$0 sm:$0xff] }
 0xb0e   :  { %v12252_v50 = vmul.f32 %v12248_v47, %v11865_v5  ;;  %v12256_v38 = vmul.f32 %v12248_v47, %v11871_v21  ;;  %v12260_v39 = vmul.f32 %v12248_v47, %v11877_v59  ;;  %v12264_v16 = vmul.f32 %v12248_v47, %v11883_v20 }
 0xb0f   :  { %v12268_v62 = vmul.f32 %v12248_v47, %v11889_v1  ;;  %v12272_v43 = vmul.f32 %v12248_v47, %v11895_v18 }
 0xb10   :  { %13797 = vst [vmem:[#allocation61_spill] sm:$0xff] %v12252_v50  ;;  %13798 = vst [vmem:[#allocation63_spill] sm:$0xff] %v12256_v38  ;;  %v12276_v50 = vmul.f32 %v12248_v47, %v11901_v14  ;;  %v12280_v38 = vmul.f32 %v12248_v47, %v11907_v31 }
 0xb11   :  { %13799 = vst [vmem:[#allocation65_spill] sm:$0xff] %v12260_v39  ;;  %13800 = vst [vmem:[#allocation42_spill] sm:$0xff] %v12264_v16  ;;  %v12284_v39 = vmul.f32 %v12248_v47, %v11913_v33  ;;  %v12288_v16 = vmul.f32 %v12248_v47, %v11919_v12 }
 0xb12   :  { %13801 = vst [vmem:[#allocation64_spill] sm:$0xff] %v12268_v62  ;;  %13802 = vst [vmem:[#allocation41_spill] sm:$0xff] %v12272_v43  ;;  %v12292_v62 = vmul.f32 %v12248_v47, %v11925_v55  ;;  %v12296_v43 = vmul.f32 %v12248_v47, %v11931_v25 }
 0xb13   :  { %13803 = vst [vmem:[#allocation66_spill] sm:$0xff] %v12276_v50  ;;  %13804 = vst [vmem:[#allocation27_spill] sm:$0xff] %v12280_v38  ;;  %v12300_v50 = vmul.f32 %v12248_v47, %v11937_v6  ;;  %v12304_v38 = vmul.f32 %v12248_v47, %v11943_v11 }
 0xb14   :  { %13805 = vst [vmem:[#allocation29_spill] sm:$0xff] %v12284_v39  ;;  %13806 = vst [vmem:[#allocation33_spill] sm:$0xff] %v12288_v16  ;;  %v12308_v39 = vmul.f32 %v12248_v47, %v11949_v15  ;;  %v12312_v16 = vmul.f32 %v12248_v47, %v11955_v48 }
 0xb15   :  { %13807 = vst [vmem:[#allocation8_spill] sm:$0xff] %v12292_v62  ;;  %13808 = vst [vmem:[#allocation44_spill] sm:$0xff] %v12296_v43  ;;  %v12316_v62 = vmul.f32 %v12248_v47, %v11961_v40  ;;  %v12320_v43 = vmul.f32 %v12248_v47, %v11967_v17 }
 0xb16   :  { %13809 = vst [vmem:[#allocation5_spill] sm:$0xff] %v12300_v50  ;;  %13810 = vst [vmem:[#allocation9_spill] sm:$0xff] %v12312_v16  ;;  %v12324_v50 = vmul.f32 %v12248_v47, %v11973_v44  ;;  %v12331_v16 = vmul.f32 %v12248_v47, %v11979_v2 }
 0xb17   :  { %13811 = vst [vmem:[#allocation68_spill] sm:$0xff] %v12316_v62  ;;  %13812 = vst [vmem:[#allocation6_spill] sm:$0xff] %v12320_v43  ;;  %v12335_v62 = vmul.f32 %v12248_v47, %v11985_v57  ;;  %v12339_v43 = vmul.f32 %v12248_v47, %v11991_v32 }
 0xb18   :  { %13813 = vst [vmem:[#allocation67_spill] sm:$0xff] %v12324_v50  ;;  %13814 = vst [vmem:[#allocation17_spill] sm:$0xff] %v12331_v16  ;;  %v12343_v50 = vmul.f32 %v12248_v47, %v11997_v30  ;;  %v12351_v16 = vmul.f32 %v12248_v47, %v12003_v60 }
 0xb19   :  { %13815 = vst [vmem:[#allocation70_spill] sm:$0xff] %v12335_v62  ;;  %13816 = vst [vmem:[#allocation14_spill] sm:$0xff] %v12339_v43  ;;  %v12355_v62 = vmul.f32 %v12248_v47, %v12009_v51  ;;  %v12359_v43 = vmul.f32 %v12248_v47, %v12015_v28 }
 0xb1a   :  { %13817 = vst [vmem:[#allocation69_spill] sm:$0xff] %v12343_v50  ;;  %13818 = vst [vmem:[#allocation24_spill] sm:$0xff] %v12351_v16  ;;  %v12363_v50 = vmul.f32 %v12248_v47, %v12021_v29  ;;  %v12371_v16 = vmul.f32 %v12248_v47, %v12027_v35 }
 0xb1b   :  { %13819 = vst [vmem:[#allocation72_spill] sm:$0xff] %v12355_v62  ;;  %13820 = vst [vmem:[#allocation20_spill] sm:$0xff] %v12359_v43  ;;  %v12375_v62 = vmul.f32 %v12248_v47, %v12033_v34  ;;  %v12379_v43 = vmul.f32 %v12248_v47, %v12039_v45 }
 0xb1c   :  { %13821 = vst [vmem:[#allocation71_spill] sm:$0xff] %v12363_v50  ;;  %13822 = vst [vmem:[#allocation74_spill] sm:$0xff] %v12371_v16  ;;  %v12383_v50 = vmul.f32 %v12248_v47, %v12045_v54  ;;  %v12391_v16 = vmul.f32 %v12248_v47, %v12051_v24 }
 0xb1d   :  { %13823 = vst [vmem:[#allocation76_spill] sm:$0xff] %v12375_v62  ;;  %13824 = vst [vmem:[#allocation73_spill] sm:$0xff] %v12379_v43  ;;  %v12395_v62 = vmul.f32 %v12248_v47, %v12057_v26  ;;  %v12399_v43 = vmul.f32 %v12248_v47, %v12063_v52 }
 0xb1e   :  { %13825 = vst [vmem:[#allocation75_spill] sm:$0xff] %v12383_v50  ;;  %13826 = vst [vmem:[#allocation78_spill] sm:$0xff] %v12391_v16  ;;  %v12403_v50 = vmul.f32 %v12248_v47, %v12069_v36  ;;  %v12411_v16 = vmul.f32 %v12248_v47, %v12075_v42 }
 0xb1f   :  { %13827 = vst [vmem:[#allocation80_spill] sm:$0xff] %v12395_v62  ;;  %13828 = vst [vmem:[#allocation77_spill] sm:$0xff] %v12399_v43  ;;  %v12415_v62 = vmul.f32 %v12248_v47, %v12081_v3  ;;  %v12419_v43 = vmul.f32 %v12248_v47, %v12087_v7 }
 0xb20   :  { %13829 = vst [vmem:[#allocation79_spill] sm:$0xff] %v12403_v50  ;;  %13830 = vst [vmem:[#allocation82_spill] sm:$0xff] %v12411_v16  ;;  %v12423_v50 = vmul.f32 %v12248_v47, %v12093_v41  ;;  %v12431_v16 = vmul.f32 %v12248_v47, %v12099_v61 }
 0xb21   :  { %13831 = vst [vmem:[#allocation84_spill] sm:$0xff] %v12415_v62  ;;  %13832 = vst [vmem:[#allocation81_spill] sm:$0xff] %v12419_v43  ;;  %v12435_v62 = vmul.f32 %v12248_v47, %v12105_v37  ;;  %v12439_v43 = vmul.f32 %v12248_v47, %v12111_v0 }
 0xb22   :  { %13833 = vst [vmem:[#allocation83_spill] sm:$0xff] %v12423_v50  ;;  %13834 = vst [vmem:[#allocation85_spill] sm:$0xff] %v12431_v16  ;;  %v12443_v50 = vmul.f32 %v12248_v47, %v12117_v4  ;;  %v12451_v16 = vmul.f32 %v12248_v47, %v12123_v23  ;;  %v13867_v4 = vld [vmem:[#allocation63_spill] sm:$0xff]  ;;  %v13868_v23 = vld [vmem:[#allocation65_spill] sm:$0xff] }
 0xb23   :  { %13835 = vst [vmem:[#allocation87_spill] sm:$0xff] %v12435_v62  ;;  %13836 = vst [vmem:[#allocation48_spill] sm:$0xff] %v12439_v43  ;;  %v12455_v62 = vmul.f32 %v12248_v47, %v12129_v8  ;;  %v13840_v43 = vld [vmem:[#allocation19_spill] sm:$0xff] }
 0xb24   :  { %13837 = vst [vmem:[#allocation86_spill] sm:$0xff] %v12443_v50  ;;  %13838 = vst [vmem:[#allocation89_spill] sm:$0xff] %v12451_v16  ;;  %v12459_v30 = vmul.f32 %v12248_v47, %v13840_v43  ;;  %v12463_v50 = vmul.f32 %v12248_v47, %v12141_v46  ;;  %v12471_v16 = vmul.f32 %v12248_v47, %v12147_v53 }
 0xb25   :  { %13839 = vst [vmem:[#allocation91_spill] sm:$0xff] %v12455_v62  ;;  %v13844_v62 = vld [vmem:[#allocation23_spill] sm:$0xff]  ;;  %v6303_v43 = vsel %vm6175_vm3, %v11877_v59, %v13868_v23  ;;  %v13872_v23 = vld [vmem:[#allocation66_spill] sm:$0xff]  ;;  %vm6226_vm3 = vcmp.ge.f32.partialorder %v12183_v10, 0.0 }
 0xb26   :  { %13841 = vst [vmem:[#allocation88_spill] sm:$0xff] %v12459_v30  ;;  %13842 = vst [vmem:[#allocation90_spill] sm:$0xff] %v12463_v50  ;;  %v12475_v29 = vmul.f32 %v12248_v47, %v13844_v62  ;;  %v13846_v30 = vld [vmem:[#allocation32_spill] sm:$0xff]  ;;  %vm6221_vm15 = vcmp.ge.f32.partialorder %v13844_v62, 0.0 }
 0xb27   :  { %13843 = vst [vmem:[#allocation93_spill] sm:$0xff] %v12471_v16  ;;  %v12479_v28 = vmul.f32 %v12248_v47, %v13846_v30  ;;  %v13848_v50 = vld [vmem:[#allocation4_spill] sm:$0xff]  ;;  %vm6222_vm5 = vcmp.ge.f32.partialorder %v13846_v30, 0.0  ;;  %6367 = vst [vmem:[%s13031_s13 + $0x10] sm:$0xff] %v6303_v43 }
 0xb28   :  { %13845 = vst [vmem:[#allocation95_spill] sm:$0xff] %v12475_v29  ;;  %v12483_v35 = vmul.f32 %v12248_v47, %v13848_v50  ;;  %v13850_v16 = vld [vmem:[#allocation28_spill] sm:$0xff]  ;;  %v13852_v29 = vld [vmem:[#allocation62_spill] sm:$0xff]  ;;  %vm6223_vm2 = vcmp.ge.f32.partialorder %v13848_v50, 0.0 }
 0xb29   :  { %13847 = vst [vmem:[#allocation92_spill] sm:$0xff] %v12479_v28  ;;  %v12491_v54 = vmul.f32 %v12248_v47, %v13850_v16  ;;  %v12495_v45 = vmul.f32 %v12248_v47, %v13852_v29  ;;  %v12499_v28 = vmul.f32 %v12248_v47, %v12183_v10  ;;  %v13876_v43 = vld [vmem:[#allocation8_spill] sm:$0xff] }
 0xb2a   :  { %13849 = vst [vmem:[#allocation94_spill] sm:$0xff] %v12483_v35  ;;  %v12503_v35 = vmul.f32 %v12248_v47, %v12189_v27 }
 0xb2b   :  { %13851 = vst [vmem:[#allocation97_spill] sm:$0xff] %v12491_v54  ;;  %13853 = vst [vmem:[#allocation99_spill] sm:$0xff] %v12495_v45  ;;  %v12511_v54 = vmul.f32 %v12248_v47, %v12195_v58  ;;  %v13857_v45 = vld [vmem:[#allocation26_spill] sm:$0xff] }
 0xb2c   :  { %13854 = vst [vmem:[#allocation96_spill] sm:$0xff] %v12499_v28  ;;  %13855 = vst [vmem:[#allocation98_spill] sm:$0xff] %v12503_v35  ;;  %v12515_v36 = vmul.f32 %v12248_v47, %v13857_v45  ;;  %v12519_v28 = vmul.f32 %v12248_v47, %v12207_v19  ;;  %v12523_v35 = vmul.f32 %v12248_v47, %v12213_v22 }
 0xb2d   :  { %13856 = vst [vmem:[#allocation101_spill] sm:$0xff] %v12511_v54  ;;  %v12531_v54 = vmul.f32 %v12248_v47, %v12219_v9 }
 0xb2e   :  { %13858 = vst [vmem:[#allocation103_spill] sm:$0xff] %v12515_v36  ;;  %13859 = vst [vmem:[#allocation100_spill] sm:$0xff] %v12519_v28  ;;  %v12535_v36 = vmul.f32 %v12248_v47, %v12225_v63  ;;  %v12539_v28 = vmul.f32 %v12248_v47, %v12231_v56 }
 0xb2f   :  { %13860 = vst [vmem:[#allocation102_spill] sm:$0xff] %v12523_v35  ;;  %13861 = vst [vmem:[#allocation56_spill] sm:$0xff] %v12531_v54  ;;  %v12543_v35 = vmul.f32 %v12248_v47, %v12237_v49  ;;  %v12551_v54 = vmul.f32 %v12248_v47, %v12243_v13  ;;  %v13869_v47 = vld [vmem:[#allocation42_spill] sm:$0xff] }
 0xb30   :  { %13862 = vst [vmem:[#allocation58_spill] sm:$0xff] %v12535_v36  ;;  %13863 = vst [vmem:[#allocation21_spill] sm:$0xff] %v12539_v28  ;;  %v13866_v36 = vld [vmem:[#allocation61_spill] sm:$0xff] }
 0xb31   :  { %13864 = vst [vmem:[#allocation60_spill] sm:$0xff] %v12543_v35  ;;  %13865 = vst [vmem:[#allocation3_spill] sm:$0xff] %v12551_v54  ;;  %v6301_v28 = vsel %vm6173_vm0, %v11865_v5, %v13866_v36  ;;  %v6302_v35 = vsel %vm6174_vm1, %v11871_v21, %v13867_v4  ;;  %v6304_v5 = vsel %vm6176_vm4, %v11883_v20, %v13869_v47  ;;  %v13870_v36 = vld [vmem:[#allocation64_spill] sm:$0xff]  ;;  %v13871_v4 = vld [vmem:[#allocation41_spill] sm:$0xff]  ;;  %vm6224_vm0 = vcmp.ge.f32.partialorder %v13850_v16, 0.0 }
 0xb32   :  { %v6305_v21 = vsel %vm6177_vm6, %v11889_v1, %v13870_v36  ;;  %v6306_v59 = vsel %vm6178_vm7, %v11895_v18, %v13871_v4  ;;  %v6307_v54 = vsel %vm6179_vm8, %v11901_v14, %v13872_v23  ;;  %6365 = vst [vmem:[%s13031_s13] sm:$0xff] %v6301_v28  ;;  %6366 = vst [vmem:[%s13031_s13 + $0x8] sm:$0xff] %v6302_v35  ;;  %vm6225_vm1 = vcmp.ge.f32.partialorder %v13852_v29, 0.0  ;;  %v13873_v20 = vld [vmem:[#allocation27_spill] sm:$0xff]  ;;  %v13874_v18 = vld [vmem:[#allocation29_spill] sm:$0xff] }
 0xb33   :  { %vm6227_vm4 = vcmp.ge.f32.partialorder %v12189_v27, 0.0  ;;  %v6308_v1 = vsel %vm6180_vm9, %v11907_v31, %v13873_v20  ;;  %v6309_v14 = vsel %vm6181_vm10, %v11913_v33, %v13874_v18  ;;  %v13875_v28 = vld [vmem:[#allocation33_spill] sm:$0xff]  ;;  %v6311_v47 = vsel %vm6183_vm12, %v11925_v55, %v13876_v43  ;;  %6368 = vst [vmem:[%s13031_s13 + $0x18] sm:$0xff] %v6304_v5  ;;  %6369 = vst [vmem:[%s13031_s13 + $0x20] sm:$0xff] %v6305_v21  ;;  %v13877_v31 = vld [vmem:[#allocation44_spill] sm:$0xff] }
 0xb34   :  { %v6310_v35 = vsel %vm6182_vm11, %v11919_v12, %v13875_v28  ;;  %6370 = vst [vmem:[%s13031_s13 + $0x28] sm:$0xff] %v6306_v59  ;;  %6371 = vst [vmem:[%s13031_s13 + $0x30] sm:$0xff] %v6307_v54  ;;  %vm6228_vm6 = vcmp.ge.f32.partialorder %v12195_v58, 0.0  ;;  %vm6229_vm7 = vcmp.ge.f32.partialorder %v13857_v45, 0.0  ;;  %v6312_v33 = vsel %vm6184_vm13, %v11931_v25, %v13877_v31  ;;  %v13878_v12 = vld [vmem:[#allocation5_spill] sm:$0xff]  ;;  %v13888_v36 = vld [vmem:[#allocation67_spill] sm:$0xff] }
 0xb35   :  { %vm13879_vm10 = vcmp.ge.f32.partialorder %v11937_v6, 0.0  ;;  %vm13880_vm11 = vcmp.ge.f32.partialorder %v11943_v11, 0.0  ;;  %vm13881_vm12 = vcmp.ge.f32.partialorder %v11949_v15, 0.0  ;;  %6372 = vst [vmem:[%s13031_s13 + $0x38] sm:$0xff] %v6308_v1  ;;  %6373 = vst [vmem:[%s13031_s13 + $0x40] sm:$0xff] %v6309_v14  ;;  %v13882_v25 = vld [vmem:[#allocation9_spill] sm:$0xff] }
 0xb36   :  { %v6313_v55 = vsel %vm13879_vm10, %v11937_v6, %v13878_v12  ;;  %v6314_v54 = vsel %vm13880_vm11, %v11943_v11, %v12304_v38  ;;  %v6315_v5 = vsel %vm13881_vm12, %v11949_v15, %v12308_v39  ;;  %6374 = vst [vmem:[%s13031_s13 + $0x48] sm:$0xff] %v6310_v35  ;;  %6375 = vst [vmem:[%s13031_s13 + $0x50] sm:$0xff] %v6311_v47  ;;  %vm6233_vm10 = vcmp.ge.f32.partialorder %v12225_v63, 0.0  ;;  %v13884_v11 = vld [vmem:[#allocation68_spill] sm:$0xff]  ;;  %v13886_v38 = vld [vmem:[#allocation6_spill] sm:$0xff] }
 0xb37   :  { %vm13883_vm9 = vcmp.ge.f32.partialorder %v11955_v48, 0.0  ;;  %vm13885_vm8 = vcmp.ge.f32.partialorder %v11961_v40, 0.0  ;;  %vm13887_vm13 = vcmp.ge.f32.partialorder %v11967_v17, 0.0  ;;  %vm13889_vm11 = vcmp.ge.f32.partialorder %v11973_v44, 0.0  ;;  %6376 = vst [vmem:[%s13031_s13 + $0x58] sm:$0xff] %v6312_v33  ;;  %6377 = vst [vmem:[%s13031_s13 + $0x60] sm:$0xff] %v6313_v55 }
 0xb38   :  { %v6316_v6 = vsel %vm13883_vm9, %v11955_v48, %v13882_v25  ;;  %v6317_v15 = vsel %vm13885_vm8, %v11961_v40, %v13884_v11  ;;  %v6318_v39 = vsel %vm13887_vm13, %v11967_v17, %v13886_v38  ;;  %v6319_v21 = vsel %vm13889_vm11, %v11973_v44, %v13888_v36  ;;  %6378 = vst [vmem:[%s13031_s13 + $0x68] sm:$0xff] %v6314_v54  ;;  %v13890_v48 = vld [vmem:[#allocation17_spill] sm:$0xff]  ;;  %v13892_v17 = vld [vmem:[#allocation70_spill] sm:$0xff]  ;;  %v13897_v20 = vld [vmem:[#allocation52_spill] sm:$0xff] }
 0xb39   :  { %6379 = vst [vmem:[%s13031_s13 + $0x70] sm:$0xff] %v6315_v5  ;;  %vm6236_vm8 = vcmp.ge.f32.partialorder %v12243_v13, 0.0  ;;  %vm13891_vm9 = vcmp.ge.f32.partialorder %v11979_v2, 0.0  ;;  %vm13893_vm13 = vcmp.ge.f32.partialorder %v11985_v57, 0.0  ;;  %v13894_v4 = vld [vmem:[#allocation14_spill] sm:$0xff]  ;;  %vm13895_vm11 = vcmp.ge.f32.partialorder %v11991_v32, 0.0 }
 0xb3a   :  { %v6320_v40 = vsel %vm13891_vm9, %v11979_v2, %v13890_v48  ;;  %v6321_v44 = vsel %vm13893_vm13, %v11985_v57, %v13892_v17  ;;  %v6322_v59 = vsel %vm13895_vm11, %v11991_v32, %v13894_v4  ;;  %v13896_v23 = vld [vmem:[#allocation69_spill] sm:$0xff]  ;;  %vm13898_vm12 = vcmp.ge.f32.partialorder %v13897_v20, 0.0  ;;  %6380 = vst [vmem:[%s13031_s13 + $0x78] sm:$0xff] %v6316_v6  ;;  %6381 = vst [vmem:[%s13031_s13 + $0x80] sm:$0xff] %v6317_v15  ;;  %v13899_v2 = vld [vmem:[#allocation24_spill] sm:$0xff] }
 0xb3b   :  { %v6323_v1 = vsel %vm13898_vm12, %v13897_v20, %v13896_v23  ;;  %6382 = vst [vmem:[%s13031_s13 + $0x88] sm:$0xff] %v6318_v39  ;;  %6383 = vst [vmem:[%s13031_s13 + $0x90] sm:$0xff] %v6319_v21  ;;  %vm13900_vm12 = vcmp.ge.f32.partialorder %v12003_v60, 0.0  ;;  %v13901_v32 = vld [vmem:[#allocation72_spill] sm:$0xff]  ;;  %vm13902_vm9 = vcmp.ge.f32.partialorder %v12009_v51, 0.0  ;;  %v13904_v28 = vld [vmem:[#allocation53_spill] sm:$0xff] }
 0xb3c   :  { %v6324_v57 = vsel %vm13900_vm12, %v12003_v60, %v13899_v2  ;;  %v6325_v18 = vsel %vm13902_vm9, %v12009_v51, %v13901_v32  ;;  %v13903_v14 = vld [vmem:[#allocation20_spill] sm:$0xff]  ;;  %vm13905_vm13 = vcmp.ge.f32.partialorder %v13904_v28, 0.0  ;;  %v13906_v43 = vld [vmem:[#allocation71_spill] sm:$0xff]  ;;  %v13907_v47 = vld [vmem:[#allocation54_spill] sm:$0xff]  ;;  %6384 = vst [vmem:[%s13031_s13 + $0x98] sm:$0xff] %v6320_v40  ;;  %vm13913_vm9 = vcmp.ge.f32.partialorder %v12033_v34, 0.0 }
 0xb3d   :  { %v6326_v35 = vsel %vm13905_vm13, %v13904_v28, %v13903_v14  ;;  %vm13908_vm11 = vcmp.ge.f32.partialorder %v13907_v47, 0.0  ;;  %6385 = vst [vmem:[%s13031_s13 + $0xa0] sm:$0xff] %v6321_v44  ;;  %6386 = vst [vmem:[%s13031_s13 + $0xa8] sm:$0xff] %v6322_v59  ;;  %v13909_v60 = vld [vmem:[#allocation74_spill] sm:$0xff]  ;;  %v13910_v51 = vld [vmem:[#allocation55_spill] sm:$0xff] }
 0xb3e   :  { %v6327_v31 = vsel %vm13908_vm11, %v13907_v47, %v13906_v43  ;;  %6387 = vst [vmem:[%s13031_s13 + $0xb0] sm:$0xff] %v6323_v1  ;;  %vm13911_vm12 = vcmp.ge.f32.partialorder %v13910_v51, 0.0  ;;  %v13912_v12 = vld [vmem:[#allocation76_spill] sm:$0xff]  ;;  %v13914_v54 = vld [vmem:[#allocation73_spill] sm:$0xff]  ;;  %v13917_v6 = vld [vmem:[#allocation75_spill] sm:$0xff] }
 0xb3f   :  { %v6328_v33 = vsel %vm13911_vm12, %v13910_v51, %v13909_v60  ;;  %v6329_v55 = vsel %vm13913_vm9, %v12033_v34, %v13912_v12  ;;  %v13915_v5 = vld [vmem:[#allocation57_spill] sm:$0xff]  ;;  %v13918_v11 = vld [vmem:[#allocation40_spill] sm:$0xff]  ;;  %6388 = vst [vmem:[%s13031_s13 + $0xb8] sm:$0xff] %v6324_v57  ;;  %6389 = vst [vmem:[%s13031_s13 + $0xc0] sm:$0xff] %v6325_v18  ;;  %vm13921_vm12 = vcmp.ge.f32.partialorder %v12051_v24, 0.0  ;;  %vm13923_vm9 = vcmp.ge.f32.partialorder %v12057_v26, 0.0 }
 0xb40   :  { %vm13916_vm13 = vcmp.ge.f32.partialorder %v13915_v5, 0.0  ;;  %vm13919_vm11 = vcmp.ge.f32.partialorder %v13918_v11, 0.0  ;;  %6390 = vst [vmem:[%s13031_s13 + $0xc8] sm:$0xff] %v6326_v35  ;;  %6391 = vst [vmem:[%s13031_s13 + $0xd0] sm:$0xff] %v6327_v31  ;;  %v13920_v34 = vld [vmem:[#allocation78_spill] sm:$0xff]  ;;  %v13922_v39 = vld [vmem:[#allocation80_spill] sm:$0xff] }
 0xb41   :  { %v6330_v25 = vsel %vm13916_vm13, %v13915_v5, %v13914_v54  ;;  %v6331_v15 = vsel %vm13919_vm11, %v13918_v11, %v13917_v6  ;;  %v6332_v38 = vsel %vm13921_vm12, %v12051_v24, %v13920_v34  ;;  %v6333_v36 = vsel %vm13923_vm9, %v12057_v26, %v13922_v39  ;;  %v13924_v21 = vld [vmem:[#allocation77_spill] sm:$0xff]  ;;  %v13926_v40 = vld [vmem:[#allocation79_spill] sm:$0xff]  ;;  %6392 = vst [vmem:[%s13031_s13 + $0xd8] sm:$0xff] %v6328_v33  ;;  %v13929_v24 = vld [vmem:[#allocation82_spill] sm:$0xff] }
 0xb42   :  { %vm13925_vm13 = vcmp.ge.f32.partialorder %v12063_v52, 0.0  ;;  %v13927_v17 = vld [vmem:[#allocation59_spill] sm:$0xff]  ;;  %6393 = vst [vmem:[%s13031_s13 + $0xe0] sm:$0xff] %v6329_v55  ;;  %6394 = vst [vmem:[%s13031_s13 + $0xe8] sm:$0xff] %v6330_v25  ;;  %vm13930_vm12 = vcmp.ge.f32.partialorder %v12075_v42, 0.0  ;;  %vm13932_vm9 = vcmp.ge.f32.partialorder %v12081_v3, 0.0 }
 0xb43   :  { %v6334_v48 = vsel %vm13925_vm13, %v12063_v52, %v13924_v21  ;;  %vm13928_vm11 = vcmp.ge.f32.partialorder %v13927_v17, 0.0  ;;  %6395 = vst [vmem:[%s13031_s13 + $0xf0] sm:$0xff] %v6331_v15  ;;  %v6336_v26 = vsel %vm13930_vm12, %v12075_v42, %v13929_v24  ;;  %v13931_v52 = vld [vmem:[#allocation84_spill] sm:$0xff]  ;;  %v13933_v59 = vld [vmem:[#allocation81_spill] sm:$0xff]  ;;  %vm13934_vm13 = vcmp.ge.f32.partialorder %v12087_v7, 0.0  ;;  %v13935_v20 = vld [vmem:[#allocation83_spill] sm:$0xff] }
 0xb44   :  { %v6335_v44 = vsel %vm13928_vm11, %v13927_v17, %v13926_v40  ;;  %v6337_v4 = vsel %vm13932_vm9, %v12081_v3, %v13931_v52  ;;  %v6338_v23 = vsel %vm13934_vm13, %v12087_v7, %v13933_v59  ;;  %vm13936_vm11 = vcmp.ge.f32.partialorder %v12093_v41, 0.0  ;;  %6396 = vst [vmem:[%s13031_s13 + $0xf8] sm:$0xff] %v6332_v38  ;;  %6397 = vst [vmem:[%s13031_s13 + $0x100] sm:$0xff] %v6333_v36  ;;  %v13937_v42 = vld [vmem:[#allocation85_spill] sm:$0xff]  ;;  %v13939_v7 = vld [vmem:[#allocation87_spill] sm:$0xff] }
 0xb45   :  { %v6339_v1 = vsel %vm13936_vm11, %v12093_v41, %v13935_v20  ;;  %6398 = vst [vmem:[%s13031_s13 + $0x108] sm:$0xff] %v6334_v48  ;;  %6399 = vst [vmem:[%s13031_s13 + $0x110] sm:$0xff] %v6335_v44  ;;  %vm13938_vm12 = vcmp.ge.f32.partialorder %v12099_v61, 0.0  ;;  %vm13940_vm9 = vcmp.ge.f32.partialorder %v12105_v37, 0.0  ;;  %v13941_v2 = vld [vmem:[#allocation48_spill] sm:$0xff]  ;;  %vm13942_vm13 = vcmp.ge.f32.partialorder %v12111_v0, 0.0 }
 0xb46   :  { %v6340_v3 = vsel %vm13938_vm12, %v12099_v61, %v13937_v42  ;;  %v6341_v41 = vsel %vm13940_vm9, %v12105_v37, %v13939_v7  ;;  %v6342_v57 = vsel %vm13942_vm13, %v12111_v0, %v13941_v2  ;;  %v13943_v32 = vld [vmem:[#allocation86_spill] sm:$0xff]  ;;  %v13944_v18 = vld [vmem:[#allocation11_spill] sm:$0xff]  ;;  %6400 = vst [vmem:[%s13031_s13 + $0x118] sm:$0xff] %v6336_v26  ;;  %6401 = vst [vmem:[%s13031_s13 + $0x120] sm:$0xff] %v6337_v4  ;;  %vm13950_vm9 = vcmp.ge.f32.partialorder %v12129_v8, 0.0 }
 0xb47   :  { %vm13945_vm11 = vcmp.ge.f32.partialorder %v13944_v18, 0.0  ;;  %6402 = vst [vmem:[%s13031_s13 + $0x128] sm:$0xff] %v6338_v23  ;;  %6403 = vst [vmem:[%s13031_s13 + $0x130] sm:$0xff] %v6339_v1  ;;  %v13946_v61 = vld [vmem:[#allocation89_spill] sm:$0xff]  ;;  %v13947_v37 = vld [vmem:[#allocation16_spill] sm:$0xff] }
 0xb48   :  { %v6343_v14 = vsel %vm13945_vm11, %v13944_v18, %v13943_v32  ;;  %vm13948_vm12 = vcmp.ge.f32.partialorder %v13947_v37, 0.0  ;;  %v13949_v28 = vld [vmem:[#allocation91_spill] sm:$0xff]  ;;  %v13951_v43 = vld [vmem:[#allocation88_spill] sm:$0xff]  ;;  %v13954_v60 = vld [vmem:[#allocation90_spill] sm:$0xff]  ;;  %vm13955_vm11 = vcmp.ge.f32.partialorder %v12141_v46, 0.0  ;;  %6404 = vst [vmem:[%s13031_s13 + $0x138] sm:$0xff] %v6340_v3 }
 0xb49   :  { %v6344_v0 = vsel %vm13948_vm12, %v13947_v37, %v13946_v61  ;;  %v6345_v35 = vsel %vm13950_vm9, %v12129_v8, %v13949_v28  ;;  %v13952_v47 = vld [vmem:[#allocation19_spill] sm:$0xff]  ;;  %v6347_v51 = vsel %vm13955_vm11, %v12141_v46, %v13954_v60  ;;  %6405 = vst [vmem:[%s13031_s13 + $0x140] sm:$0xff] %v6341_v41  ;;  %6406 = vst [vmem:[%s13031_s13 + $0x148] sm:$0xff] %v6342_v57  ;;  %v13956_v8 = vld [vmem:[#allocation93_spill] sm:$0xff] }
 0xb4a   :  { %vm13953_vm13 = vcmp.ge.f32.partialorder %v13952_v47, 0.0  ;;  %6407 = vst [vmem:[%s13031_s13 + $0x150] sm:$0xff] %v6343_v14  ;;  %v6348_v46 = vsel %vm6220_vm14, %v12147_v53, %v13956_v8  ;;  %v13957_v33 = vld [vmem:[#allocation95_spill] sm:$0xff]  ;;  %v13958_v55 = vld [vmem:[#allocation92_spill] sm:$0xff]  ;;  %v13959_v5 = vld [vmem:[#allocation94_spill] sm:$0xff]  ;;  %vm13971_vm14 = vcmp.ge.f32.partialorder %v12219_v9, 0.0 }
 0xb4b   :  { %v6346_v31 = vsel %vm13953_vm13, %v13952_v47, %v13951_v43  ;;  %v6349_v12 = vsel %vm6221_vm15, %v13844_v62, %v13957_v33  ;;  %v6350_v54 = vsel %vm6222_vm5, %v13846_v30, %v13958_v55  ;;  %v6351_v25 = vsel %vm6223_vm2, %v13848_v50, %v13959_v5  ;;  %6408 = vst [vmem:[%s13031_s13 + $0x158] sm:$0xff] %v6344_v0  ;;  %v13960_v30 = vld [vmem:[#allocation97_spill] sm:$0xff]  ;;  %v13961_v50 = vld [vmem:[#allocation99_spill] sm:$0xff]  ;;  %v13962_v6 = vld [vmem:[#allocation96_spill] sm:$0xff] }
 0xb4c   :  { %6409 = vst [vmem:[%s13031_s13 + $0x160] sm:$0xff] %v6345_v35  ;;  %6410 = vst [vmem:[%s13031_s13 + $0x168] sm:$0xff] %v6346_v31  ;;  %v6352_v53 = vsel %vm6224_vm0, %v13850_v16, %v13960_v30  ;;  %v6353_v62 = vsel %vm6225_vm1, %v13852_v29, %v13961_v50  ;;  %v6354_v11 = vsel %vm6226_vm3, %v12183_v10, %v13962_v6  ;;  %v13963_v15 = vld [vmem:[#allocation98_spill] sm:$0xff]  ;;  %v13964_v29 = vld [vmem:[#allocation101_spill] sm:$0xff]  ;;  %vm13967_vm2 = vcmp.ge.f32.partialorder %v12207_v19, 0.0 }
 0xb4d   :  { %6411 = vst [vmem:[%s13031_s13 + $0x170] sm:$0xff] %v6347_v51  ;;  %v6355_v34 = vsel %vm6227_vm4, %v12189_v27, %v13963_v15  ;;  %6412 = vst [vmem:[%s13031_s13 + $0x178] sm:$0xff] %v6348_v46  ;;  %v6356_v10 = vsel %vm6228_vm6, %v12195_v58, %v13964_v29  ;;  %v13965_v27 = vld [vmem:[#allocation103_spill] sm:$0xff]  ;;  %v13966_v38 = vld [vmem:[#allocation100_spill] sm:$0xff]  ;;  %vm13969_vm5 = vcmp.ge.f32.partialorder %v12213_v22, 0.0  ;;  %vm13974_vm15 = vcmp.ge.f32.partialorder %v12231_v56, 0.0 }
 0xb4e   :  { %6413 = vst [vmem:[%s13031_s13 + $0x180] sm:$0xff] %v6349_v12  ;;  %6414 = vst [vmem:[%s13031_s13 + $0x188] sm:$0xff] %v6350_v54  ;;  %v6357_v16 = vsel %vm6229_vm7, %v13857_v45, %v13965_v27  ;;  %v6358_v39 = vsel %vm13967_vm2, %v12207_v19, %v13966_v38  ;;  %v13968_v36 = vld [vmem:[#allocation102_spill] sm:$0xff]  ;;  %v13970_v45 = vld [vmem:[#allocation56_spill] sm:$0xff]  ;;  %vm13976_vm0 = vcmp.ge.f32.partialorder %v12237_v49, 0.0 }
 0xb4f   :  { %6415 = vst [vmem:[%s13031_s13 + $0x190] sm:$0xff] %v6351_v25  ;;  %v6359_v21 = vsel %vm13969_vm5, %v12213_v22, %v13968_v36  ;;  %6416 = vst [vmem:[%s13031_s13 + $0x198] sm:$0xff] %v6352_v53  ;;  %v6360_v58 = vsel %vm13971_vm14, %v12219_v9, %v13970_v45  ;;  %v13972_v19 = vld [vmem:[#allocation58_spill] sm:$0xff]  ;;  %v13973_v48 = vld [vmem:[#allocation21_spill] sm:$0xff] }
 0xb50   :  { %6417 = vst [vmem:[%s13031_s13 + $0x1a0] sm:$0xff] %v6353_v62  ;;  %6418 = vst [vmem:[%s13031_s13 + $0x1a8] sm:$0xff] %v6354_v11  ;;  %v6361_v22 = vsel %vm6233_vm10, %v12225_v63, %v13972_v19  ;;  %v6362_v40 = vsel %vm13974_vm15, %v12231_v56, %v13973_v48  ;;  %v13975_v17 = vld [vmem:[#allocation60_spill] sm:$0xff]  ;;  %v13977_v9 = vld [vmem:[#allocation3_spill] sm:$0xff] }
 0xb51   :  { %6419 = vst [vmem:[%s13031_s13 + $0x1b0] sm:$0xff] %v6355_v34  ;;  %v6363_v44 = vsel %vm13976_vm0, %v12237_v49, %v13975_v17  ;;  %6420 = vst [vmem:[%s13031_s13 + $0x1b8] sm:$0xff] %v6356_v10  ;;  %v6364_v63 = vsel %vm6236_vm8, %v12243_v13, %v13977_v9 }
 0xb52   :  { %6421 = vst [vmem:[%s13031_s13 + $0x1c0] sm:$0xff] %v6357_v16  ;;  %6422 = vst [vmem:[%s13031_s13 + $0x1c8] sm:$0xff] %v6358_v39 }
 0xb53   :  { %6423 = vst [vmem:[%s13031_s13 + $0x1d0] sm:$0xff] %v6359_v21  ;;  %6424 = vst [vmem:[%s13031_s13 + $0x1d8] sm:$0xff] %v6360_v58 }
 0xb54   :  { %6425 = vst [vmem:[%s13031_s13 + $0x1e0] sm:$0xff] %v6361_v22  ;;  %6426 = vst [vmem:[%s13031_s13 + $0x1e8] sm:$0xff] %v6362_v40 }
 0xb55   :  { %6427 = vst [vmem:[%s13031_s13 + $0x1f0] sm:$0xff] %v6363_v44  ;;  %6428 = vst [vmem:[%s13031_s13 + $0x1f8] sm:$0xff] %v6364_v63 }

</bundles_post_ra>
